<compile_context>
chip_gen: v5e
topology: v5e:2x2
jax: 0.10.0
libtpu: 0.0.40
codegen_flags: <defaults>
</compile_context>

<pallas_src>
import functools

import jax
import jax.numpy as jnp
from jax.experimental import pallas as pl
from jax.experimental.pallas import tpu as pltpu


def _round_up(x, m):
    return (x + m - 1) // m * m


# ----------------------------------------------------------------------------
# Pallas kernels
# ----------------------------------------------------------------------------

def _matmul_kernel(a_ref, b_ref, bias_ref, o_ref, acc_ref, *, activation):
    """K-tiled bf16 matmul, f32 accumulator, fused bias+activation epilogue."""
    @pl.when(pl.program_id(2) == 0)
    def _():
        acc_ref[...] = jnp.zeros_like(acc_ref)

    acc_ref[...] += jnp.dot(a_ref[...], b_ref[...],
                            preferred_element_type=jnp.float32)

    # Only touch the output tile (and the scarce vector-store slot) on the last
    # K step; bias/activation fused here to avoid extra HBM round trips.
    @pl.when(pl.program_id(2) == pl.num_programs(2) - 1)
    def _():
        out = acc_ref[...] + bias_ref[...]
        if activation == "relu":
            out = jnp.maximum(out, 0.0)
        elif activation == "leaky_relu":
            out = jnp.where(out >= 0, out, jnp.float32(0.2) * out)
        o_ref[...] = out.astype(o_ref.dtype)


def matmul_bias_act(a, b, bias=None, activation=None, out_dtype=jnp.float32):
    """Pallas MXU matmul with fused bias + activation.  bf16 operands, f32 acc."""
    M, K = a.shape
    K2, N = b.shape
    assert K == K2
    a = a.astype(jnp.bfloat16)
    b = b.astype(jnp.bfloat16)
    if bias is None:
        bias = jnp.zeros((N,), jnp.float32)
    bias = bias.astype(jnp.float32)

    # --- tile / pad selection: pad only ragged dims, padding done in bf16 ---
    Mp = _round_up(M, 16)
    if Mp <= 512:
        tm = Mp
    elif M >= 4096:
        Mp, tm = _round_up(M, 512), 512
    else:
        Mp, tm = _round_up(M, 256), 256

    Np = _round_up(N, 128)
    if Np <= 512:
        tn = Np
    elif Np % 512 == 0:
        tn = 512
    elif Np % 256 == 0:
        tn = 256
    else:
        tn = 128

    Kp = _round_up(K, 128)
    if Kp <= 1024:
        tk = Kp
    elif Kp % 512 == 0:
        tk = 512
    elif Kp % 256 == 0:
        tk = 256
    else:
        tk = 128

    a_p = a if (Mp == M and Kp == K) else jnp.pad(a, ((0, Mp - M), (0, Kp - K)))
    b_p = b if (Kp == K and Np == N) else jnp.pad(b, ((0, Kp - K), (0, Np - N)))
    bias_p = bias[None, :]
    if Np != N:
        bias_p = jnp.pad(bias_p, ((0, 0), (0, Np - N)))

    out = pl.pallas_call(
        functools.partial(_matmul_kernel, activation=activation),
        out_shape=jax.ShapeDtypeStruct((Mp, Np), out_dtype),
        grid_spec=pltpu.PrefetchScalarGridSpec(
            num_scalar_prefetch=0,
            grid=(Mp // tm, Np // tn, Kp // tk),
            in_specs=[pl.BlockSpec((tm, tk), lambda i, j, k: (i, k)),
                      pl.BlockSpec((tk, tn), lambda i, j, k: (k, j)),
                      pl.BlockSpec((1, tn), lambda i, j, k: (0, j))],
            out_specs=pl.BlockSpec((tm, tn), lambda i, j, k: (i, j)),
            scratch_shapes=[pltpu.VMEM((tm, tn), jnp.float32)]),
        compiler_params=pltpu.CompilerParams(
            dimension_semantics=("parallel", "parallel", "arbitrary")),
    )(a_p, b_p, bias_p)
    if Mp != M or Np != N:
        out = out[:M, :N]
    return out


def _l1_sum_kernel(x_ref, r_ref, o_ref):
    @pl.when(pl.program_id(0) == 0)
    def _():
        o_ref[...] = jnp.zeros_like(o_ref)
    o_ref[...] += jnp.sum(jnp.abs(x_ref[...] - r_ref[...]))


def l1_sum(x, r):
    """sum(|x - r|) over all elements, reduced over lane/sublane-dense tiles."""
    x = x.reshape(-1).astype(jnp.float32)
    r = r.reshape(-1).astype(jnp.float32)
    total = x.shape[0]
    tp = _round_up(total, 1024)          # (8,128)-dense
    if tp != total:
        x = jnp.pad(x, (0, tp - total))
        r = jnp.pad(r, (0, tp - total))
    R = tp // 128
    x2 = x.reshape(R, 128)
    r2 = r.reshape(R, 128)
    if R <= 2048:
        tr = R
    else:
        tr = next(t for t in (2048, 1024, 512, 256, 128, 64, 32, 16, 8)
                  if R % t == 0)
    out = pl.pallas_call(
        _l1_sum_kernel,
        out_shape=jax.ShapeDtypeStruct((1, 1), jnp.float32),
        grid=(R // tr,),
        in_specs=[pl.BlockSpec((tr, 128), lambda i: (i, 0)),
                  pl.BlockSpec((tr, 128), lambda i: (i, 0))],
        out_specs=pl.BlockSpec((1, 1), lambda i: (0, 0)),
        compiler_params=pltpu.CompilerParams(
            dimension_semantics=("arbitrary",)),
    )(x2, r2)
    return out[0, 0]


def kl_total(mean, logvar):
    # DiagonalGaussian KL summed over batch+latent.  Tiny tensor: plain XLA —
    # a dedicated pallas_call would cost more in launch overhead than compute.
    return 0.5 * jnp.sum(jnp.square(mean) + jnp.exp(logvar) - 1.0 - logvar)


# ----------------------------------------------------------------------------
# Conv / norm building blocks (im2col glue in JAX, matmul+epilogue in Pallas)
# ----------------------------------------------------------------------------

def conv2d(x_nhwc, w_oihw, bias, stride, pad, activation=None):
    """Conv2d matching PyTorch semantics; hot path = fused Pallas matmul."""
    Cout, Cin, kh, kw = w_oihw.shape
    x = x_nhwc.astype(jnp.bfloat16)                 # build im2col in bf16
    xp = jnp.pad(x, ((0, 0), (pad, pad), (pad, pad), (0, 0)))
    B, Hp, Wp, _ = xp.shape
    Ho = (Hp - kh) // stride + 1
    Wo = (Wp - kw) // stride + 1
    # TODO(synk): im2col is still materialized in HBM (kh*kw x input, bf16);
    # moving the tap gather onto an extra kernel grid axis would remove it.
    cols = []
    for i in range(kh):
        for j in range(kw):
            cols.append(xp[:, i:i + stride * Ho:stride,
                           j:j + stride * Wo:stride, :])
    patches = jnp.concatenate(cols, axis=-1).reshape(B * Ho * Wo, kh * kw * Cin)
    # weight -> (kh, kw, Cin, Cout) flattened to match patch ordering (i, j, c)
    w_mat = jnp.transpose(w_oihw, (2, 3, 1, 0)).reshape(kh * kw * Cin, Cout)
    out = matmul_bias_act(patches, w_mat, bias=bias, activation=activation)
    return out.reshape(B, Ho, Wo, Cout)


def bn_leaky_relu(x, gamma, beta, eps=1e-5, slope=0.2, num_stat_groups=1):
    """Train-mode BatchNorm + LeakyReLU as one fused elementwise pass.
    num_stat_groups>1 computes stats per batch-group so one batched
    discriminator call matches separate per-tensor calls exactly."""
    B = x.shape[0]
    g = num_stat_groups
    xs = x.reshape(g, B // g, *x.shape[1:])
    mean = jnp.mean(xs, axis=(1, 2, 3), keepdims=True)
    var = jnp.var(xs, axis=(1, 2, 3), keepdims=True)
    scale = gamma * jax.lax.rsqrt(var + eps)
    shift = beta - mean * scale
    y = xs * scale + shift
    y = jnp.where(y >= 0, y, slope * y)
    return y.reshape(x.shape)


def adopt_weight(weight, global_step, threshold=0, value=0.0):
    # jnp.where so a traced / jitted global_step works too.
    return jnp.where(jnp.asarray(global_step) < threshold,
                     jnp.float32(value), jnp.float32(weight))


# ----------------------------------------------------------------------------
# NLayerDiscriminator (PatchGAN), deterministic init matching weights_init
# ----------------------------------------------------------------------------

def init_discriminator(key, input_nc=3, ndf=64, n_layers=3):
    keys = iter(jax.random.split(key, 2 * (n_layers + 2)))
    kw = 4

    def conv_p(cin, cout):
        w = 0.02 * jax.random.normal(next(keys), (cout, cin, kw, kw), jnp.float32)
        return {"w": w, "b": jnp.zeros((cout,), jnp.float32)}

    def bn_p(c):
        g = 1.0 + 0.02 * jax.random.normal(next(keys), (c,), jnp.float32)
        return {"gamma": g, "beta": jnp.zeros((c,), jnp.float32)}

    layers = [{"conv": conv_p(input_nc, ndf), "bn": None, "stride": 2}]
    nf_mult_prev = 1
    for n in range(1, n_layers):
        nf_mult = min(2 ** n, 8)
        layers.append({"conv": conv_p(ndf * nf_mult_prev, ndf * nf_mult),
                       "bn": bn_p(ndf * nf_mult), "stride": 2})
        nf_mult_prev = nf_mult
    nf_mult = min(2 ** n_layers, 8)
    layers.append({"conv": conv_p(ndf * nf_mult_prev, ndf * nf_mult),
                   "bn": bn_p(ndf * nf_mult), "stride": 1})
    layers.append({"conv": conv_p(ndf * nf_mult, 1), "bn": None, "stride": 1})
    return layers


def discriminator_forward(layers, x_nhwc, num_stat_groups=1):
    h = x_nhwc
    n = len(layers)
    for idx, layer in enumerate(layers):
        last = idx == n - 1
        has_bn = layer["bn"] is not None
        act = None if (last or has_bn) else "leaky_relu"   # fused in conv epilogue
        h = conv2d(h, layer["conv"]["w"], layer["conv"]["b"],
                   stride=layer["stride"], pad=1, activation=act)
        if has_bn:
            h = bn_leaky_relu(h, layer["bn"]["gamma"], layer["bn"]["beta"],
                              num_stat_groups=num_stat_groups)
    return h  # (B, H', W', 1) patch logits


# ----------------------------------------------------------------------------
# LPIPS (perceptual loss) — structure-preserving surrogate
# ----------------------------------------------------------------------------
# TODO(synk): real LPIPS uses a pretrained VGG16 backbone + learned 1x1 lin
# layers loaded from a checkpoint; here the same scaling/feature-normalize/
# diff^2/lin/spatial-average structure is kept with a small deterministic conv
# feature extractor (all convs still run on the Pallas MXU path).

_LPIPS_SHIFT = jnp.array([-0.030, -0.088, -0.188], jnp.float32)
_LPIPS_SCALE = jnp.array([0.458, 0.448, 0.450], jnp.float32)


def init_lpips(key):
    k1, k2, k3, k4 = jax.random.split(key, 4)
    return {
        "f0w": 0.1 * jax.random.normal(k1, (16, 3, 3, 3), jnp.float32),
        "f0b": jnp.zeros((16,), jnp.float32),
        "f1w": 0.1 * jax.random.normal(k2, (32, 16, 3, 3), jnp.float32),
        "f1b": jnp.zeros((32,), jnp.float32),
        "lin0": jnp.abs(jax.random.normal(k3, (16,), jnp.float32)),
        "lin1": jnp.abs(jax.random.normal(k4, (32,), jnp.float32)),
    }


def _norm_tensor(x, eps=1e-10):
    return x * jax.lax.rsqrt(jnp.sum(x * x, axis=-1, keepdims=True) + eps)


def lpips_forward(params, x_nhwc, y_nhwc):
    B = x_nhwc.shape[0]
    z = jnp.concatenate([x_nhwc, y_nhwc], axis=0)          # one batched pass
    z = (z - _LPIPS_SHIFT) / _LPIPS_SCALE
    h0 = conv2d(z, params["f0w"], params["f0b"], 1, 1, activation="relu")
    h1 = conv2d(h0, params["f1w"], params["f1b"], 2, 1, activation="relu")
    total = jnp.zeros((B,), jnp.float32)
    for h, lin in ((h0, params["lin0"]), (h1, params["lin1"])):
        d = jnp.square(_norm_tensor(h[:B]) - _norm_tensor(h[B:]))   # (B,H,W,C)
        # 1x1 "lin" layer == channel-weighted reduce: VPU, not an N=1 matmul.
        total = total + jnp.mean(jnp.sum(d * lin, axis=-1), axis=(1, 2))
    return total  # (B,) per-sample perceptual distance (== LPIPS (N,1,1,1))


# ----------------------------------------------------------------------------
# LPIPSWithDiscriminator
# ----------------------------------------------------------------------------

class LPIPSWithDiscriminator:
    def __init__(self, disc_start, logvar_init=0.0, kl_weight=1.0,
                 pixelloss_weight=1.0, disc_num_layers=3, disc_in_channels=3,
                 disc_factor=1.0, disc_weight=1.0, perceptual_weight=1.0,
                 disc_conditional=False, disc_loss="hinge", seed=0):
        assert disc_loss in ("hinge", "vanilla")
        k_disc, k_lpips = jax.random.split(jax.random.PRNGKey(seed))
        self.kl_weight = kl_weight
        self.pixel_weight = pixelloss_weight
        self.perceptual_weight = perceptual_weight
        self.logvar = jnp.full((1,), logvar_init, jnp.float32)   # learned scalar
        self.disc_params = init_discriminator(k_disc, input_nc=disc_in_channels,
                                              ndf=64, n_layers=disc_num_layers)
        self.lpips_params = init_lpips(k_lpips)
        self.discriminator_iter_start = disc_start
        self.disc_loss_name = disc_loss
        self.disc_factor = disc_factor
        self.discriminator_weight = disc_weight
        self.disc_conditional = disc_conditional

    def _disc(self, x_nchw, num_stat_groups=1):
        logits = discriminator_forward(
            self.disc_params, jnp.transpose(x_nchw, (0, 2, 3, 1)),
            num_stat_groups=num_stat_groups)
        return jnp.transpose(logits, (0, 3, 1, 2))               # NCHW logits

    def forward(self, inputs, reconstructions, posteriors, optimizer_idx,
                global_step, last_layer=None, cond=None, split="train",
                weights=None):
        B = inputs.shape[0]
        disc_factor = adopt_weight(self.disc_factor, global_step,
                                   threshold=self.discriminator_iter_start)

        if optimizer_idx == 0:
            x = jnp.transpose(inputs, (0, 2, 3, 1)).astype(jnp.float32)
            r = jnp.transpose(reconstructions, (0, 2, 3, 1)).astype(jnp.float32)
            if self.perceptual_weight > 0:
                p_loss = lpips_forward(self.lpips_params, x, r)      # (B,)
            else:
                p_loss = jnp.zeros((B,), jnp.float32)

            # rec = |x-r| + pw*p_loss (bcast over C,H,W); nll = rec*exp(-lv)+lv.
            # Only sum(|x-r|) needs a kernel; the perceptual / logvar terms fold
            # in analytically (keeps the reduction tiles (8,128)-dense).
            numel = inputs.size
            per_sample = numel // B
            lv = self.logvar[0]
            rec_sum = (l1_sum(inputs, reconstructions)
                       + self.perceptual_weight * per_sample * jnp.sum(p_loss))
            nll_sum = rec_sum * jnp.exp(-lv) + numel * lv
            rec_mean = rec_sum / numel
            nll_mean = nll_sum / numel
            # NOTE: mirrors the reference exactly — the `weights` branch is
            # overwritten by torch.sum(nll_loss)/N in the original forward.
            weighted_nll_loss = nll_sum / B

            post_mean, post_logvar = posteriors
            kl_loss = kl_total(post_mean.astype(jnp.float32),
                               post_logvar.astype(jnp.float32)) / B

            assert cond is None and not self.disc_conditional
            logits_fake = self._disc(reconstructions)
            g_loss = -jnp.mean(logits_fake)
            # TODO(synk): adaptive d_weight needs autograd of nll/g_loss wrt the
            # decoder's last layer (not part of this module's inputs); mirror the
            # eval-time exception path (d_weight=0) when it is unavailable.
            d_weight = (jnp.float32(0.0) if last_layer is None
                        else jnp.float32(self.discriminator_weight))
            loss = (weighted_nll_loss + self.kl_weight * kl_loss
                    + d_weight * disc_factor * g_loss)
            log = {f"{split}/total_loss": loss,
                   f"{split}/logvar": lv,
                   f"{split}/kl_loss": kl_loss,
                   f"{split}/nll_loss": nll_mean,
                   f"{split}/rec_loss": rec_mean,
                   f"{split}/d_weight": d_weight,
                   f"{split}/disc_factor": jnp.asarray(disc_factor, jnp.float32),
                   f"{split}/g_loss": g_loss}
            return loss, log

        if optimizer_idx == 1:
            assert cond is None and not self.disc_conditional
            # One batched discriminator pass (2x M in every conv matmul); BN
            # stats are computed per half so numerics match two separate calls.
            both = jnp.concatenate([inputs, reconstructions], axis=0)
            logits = self._disc(both, num_stat_groups=2)
            logits_real, logits_fake = logits[:B], logits[B:]
            if self.disc_loss_name == "hinge":
                d_val = 0.5 * (jnp.mean(jnp.maximum(1.0 - logits_real, 0.0)) +
                               jnp.mean(jnp.maximum(1.0 + logits_fake, 0.0)))
            else:
                d_val = 0.5 * (jnp.mean(jax.nn.softplus(-logits_real)) +
                               jnp.mean(jax.nn.softplus(logits_fake)))
            d_loss = disc_factor * d_val
            log = {f"{split}/disc_loss": d_loss,
                   f"{split}/logits_real": jnp.mean(logits_real),
                   f"{split}/logits_fake": jnp.mean(logits_fake)}
            return d_loss, log


# ----------------------------------------------------------------------------

if __name__ == "__main__":
    key = jax.random.PRNGKey(0)
    k1, k2, k3, k4 = jax.random.split(key, 4)
    B, C, H, W = 2, 3, 32, 32
    inputs = jax.random.uniform(k1, (B, C, H, W), jnp.float32, -1.0, 1.0)
    recons = jax.random.uniform(k2, (B, C, H, W), jnp.float32, -1.0, 1.0)
    zC, zH, zW = 4, 8, 8
    post_mean = 0.1 * jax.random.normal(k3, (B, zC, zH, zW), jnp.float32)
    post_logvar = 0.1 * jax.random.normal(k4, (B, zC, zH, zW), jnp.float32)

    module = LPIPSWithDiscriminator(disc_start=0, disc_in_channels=C)
    fwd = jax.jit(module.forward, static_argnames=("optimizer_idx", "split"))

    g_loss, g_log = fwd(inputs, recons, (post_mean, post_logvar),
                        optimizer_idx=0, global_step=1)
    d_loss, d_log = fwd(inputs, recons, (post_mean, post_logvar),
                        optimizer_idx=1, global_step=1)
    jax.block_until_ready((g_loss, d_loss,
                           jax.tree_util.tree_leaves(g_log),
                           jax.tree_util.tree_leaves(d_log)))
    print("KERNEL_OK")
</pallas_src>

<mosaic_0001>
module attributes {stable_mosaic.version = 11 : i64} {
  func.func @_matmul_kernel(%arg0: i32, %arg1: i32, %arg2: i32, %arg3: memref<512x128xbf16, #tpu.memory_space<vmem>>, %arg4: memref<128x128xbf16, #tpu.memory_space<vmem>>, %arg5: memref<1x128xf32, #tpu.memory_space<vmem>>, %arg6: memref<512x128xf32, #tpu.memory_space<vmem>>, %arg7: memref<512x128xf32, #tpu.memory_space<vmem>>) attributes {dimension_semantics = [#tpu.dimension_semantics<parallel>, #tpu.dimension_semantics<parallel>, #tpu.dimension_semantics<arbitrary>], iteration_bounds = array<i64: 1, 1, 1>, scalar_prefetch = 0 : i64, scratch_operands = 1 : i64, tpu.core_type = #tpu.core_type<tc>, window_params = [{transform_indices = @transform_0, window_bounds = array<i64: 512, 128>}, {transform_indices = @transform_1, window_bounds = array<i64: 128, 128>}, {transform_indices = @transform_2, window_bounds = array<i64: 1, 128>}, {transform_indices = @transform_3, window_bounds = array<i64: 512, 128>}]} {
    %c0_i32 = arith.constant 0 : i32
    %0 = arith.cmpi eq, %arg2, %c0_i32 : i32
    %1 = arith.extui %0 : i1 to i32
    %c0_i32_0 = arith.constant 0 : i32
    %2 = arith.cmpi ne, %1, %c0_i32_0 : i32
    scf.if %2 {
      %cst_10 = arith.constant 0.000000e+00 : f32
      %12 = vector.broadcast %cst_10 : f32 to vector<512x128xf32>
      %c0_11 = arith.constant 0 : index
      %c0_12 = arith.constant 0 : index
      %13 = vector.load %arg7[%c0_11, %c0_12] : memref<512x128xf32, #tpu.memory_space<vmem>>, vector<512x128xf32>
      tpu.vector_store %arg7[%c0_11, %c0_12], %12 {strides = array<i32>} : memref<512x128xf32, #tpu.memory_space<vmem>>, vector<512x128xf32>,
    } else {
    }
    %c0 = arith.constant 0 : index
    %c0_1 = arith.constant 0 : index
    %3 = vector.load %arg7[%c0, %c0_1] : memref<512x128xf32, #tpu.memory_space<vmem>>, vector<512x128xf32>
    %c0_2 = arith.constant 0 : index
    %c0_3 = arith.constant 0 : index
    %4 = vector.load %arg3[%c0_2, %c0_3] : memref<512x128xbf16, #tpu.memory_space<vmem>>, vector<512x128xbf16>
    %c0_4 = arith.constant 0 : index
    %c0_5 = arith.constant 0 : index
    %5 = vector.load %arg4[%c0_4, %c0_5] : memref<128x128xbf16, #tpu.memory_space<vmem>>, vector<128x128xbf16>
    %cst = arith.constant dense<0.000000e+00> : vector<512x128xf32>
    %6 = tpu.matmul %4, %5, %cst {dimension_numbers = #tpu.dot_dimension_numbers<[1], [0], [0], [1], [0, 0, 1, 1], [], []>} : vector<512x128xbf16>, vector<128x128xbf16>, vector<512x128xf32> -> vector<512x128xf32>
    %7 = arith.addf %3, %6 : vector<512x128xf32>
    %c0_6 = arith.constant 0 : index
    %c0_7 = arith.constant 0 : index
    %8 = vector.load %arg7[%c0_6, %c0_7] : memref<512x128xf32, #tpu.memory_space<vmem>>, vector<512x128xf32>
    tpu.vector_store %arg7[%c0_6, %c0_7], %7 {strides = array<i32>} : memref<512x128xf32, #tpu.memory_space<vmem>>, vector<512x128xf32>,
    %c0_i32_8 = arith.constant 0 : i32
    %9 = arith.cmpi eq, %arg2, %c0_i32_8 : i32
    %10 = arith.extui %9 : i1 to i32
    %c0_i32_9 = arith.constant 0 : i32
    %11 = arith.cmpi ne, %10, %c0_i32_9 : i32
    scf.if %11 {
      %c0_10 = arith.constant 0 : index
      %c0_11 = arith.constant 0 : index
      %12 = vector.load %arg7[%c0_10, %c0_11] : memref<512x128xf32, #tpu.memory_space<vmem>>, vector<512x128xf32>
      %c0_12 = arith.constant 0 : index
      %c0_13 = arith.constant 0 : index
      %13 = vector.load %arg5[%c0_12, %c0_13] : memref<1x128xf32, #tpu.memory_space<vmem>>, vector<1x128xf32>
      %14 = vector.broadcast %13 : vector<1x128xf32> to vector<512x128xf32>
      %15 = arith.addf %12, %14 : vector<512x128xf32>
      %cst_14 = arith.constant 0.000000e+00 : f32
      %16 = vector.broadcast %cst_14 : f32 to vector<512x128xf32>
      %17 = arith.cmpf oge, %15, %16 : vector<512x128xf32>
      %cst_15 = arith.constant 2.000000e-01 : f32
      %18 = vector.broadcast %cst_15 : f32 to vector<512x128xf32>
      %19 = arith.mulf %18, %15 : vector<512x128xf32>
      %20 = arith.select %17, %15, %19 : vector<512x128xi1>, vector<512x128xf32>
      %c0_16 = arith.constant 0 : index
      %c0_17 = arith.constant 0 : index
      %21 = vector.load %arg6[%c0_16, %c0_17] : memref<512x128xf32, #tpu.memory_space<vmem>>, vector<512x128xf32>
      tpu.vector_store %arg6[%c0_16, %c0_17], %20 {strides = array<i32>} : memref<512x128xf32, #tpu.memory_space<vmem>>, vector<512x128xf32>,
    } else {
    }
    return
  }
  func.func @transform_0(%arg0: i32, %arg1: i32, %arg2: i32) -> (i32, i32) {
    %c0_i32 = arith.constant 0 : i32
    return %arg0, %arg2 : i32, i32
  }
  func.func @transform_1(%arg0: i32, %arg1: i32, %arg2: i32) -> (i32, i32) {
    %c0_i32 = arith.constant 0 : i32
    return %arg2, %arg1 : i32, i32
  }
  func.func @transform_2(%arg0: i32, %arg1: i32, %arg2: i32) -> (i32, i32) {
    %c0_i32 = arith.constant 0 : i32
    %c0_i32_0 = arith.constant 0 : i32
    return %c0_i32, %arg1 : i32, i32
  }
  func.func @transform_3(%arg0: i32, %arg1: i32, %arg2: i32) -> (i32, i32) {
    %c0_i32 = arith.constant 0 : i32
    return %arg0, %arg1 : i32, i32
  }
}

module attributes {stable_mosaic.version = 11 : i64} {
  func.func @_matmul_kernel(%arg0: i32, %arg1: i32, %arg2: i32, %arg3: memref<128x1024xbf16, #tpu.memory_space<vmem>>, %arg4: memref<1024x128xbf16, #tpu.memory_space<vmem>>, %arg5: memref<1x128xf32, #tpu.memory_space<vmem>>, %arg6: memref<128x128xf32, #tpu.memory_space<vmem>>, %arg7: memref<128x128xf32, #tpu.memory_space<vmem>>) attributes {dimension_semantics = [#tpu.dimension_semantics<parallel>, #tpu.dimension_semantics<parallel>, #tpu.dimension_semantics<arbitrary>], iteration_bounds = array<i64: 1, 1, 1>, scalar_prefetch = 0 : i64, scratch_operands = 1 : i64, tpu.core_type = #tpu.core_type<tc>, window_params = [{transform_indices = @transform_0, window_bounds = array<i64: 128, 1024>}, {transform_indices = @transform_1, window_bounds = array<i64: 1024, 128>}, {transform_indices = @transform_2, window_bounds = array<i64: 1, 128>}, {transform_indices = @transform_3, window_bounds = array<i64: 128, 128>}]} {
    %c0_i32 = arith.constant 0 : i32
    %0 = arith.cmpi eq, %arg2, %c0_i32 : i32
    %1 = arith.extui %0 : i1 to i32
    %c0_i32_0 = arith.constant 0 : i32
    %2 = arith.cmpi ne, %1, %c0_i32_0 : i32
    scf.if %2 {
      %cst_10 = arith.constant 0.000000e+00 : f32
      %12 = vector.broadcast %cst_10 : f32 to vector<128x128xf32>
      %c0_11 = arith.constant 0 : index
      %c0_12 = arith.constant 0 : index
      %13 = vector.load %arg7[%c0_11, %c0_12] : memref<128x128xf32, #tpu.memory_space<vmem>>, vector<128x128xf32>
      tpu.vector_store %arg7[%c0_11, %c0_12], %12 {strides = array<i32>} : memref<128x128xf32, #tpu.memory_space<vmem>>, vector<128x128xf32>,
    } else {
    }
    %c0 = arith.constant 0 : index
    %c0_1 = arith.constant 0 : index
    %3 = vector.load %arg7[%c0, %c0_1] : memref<128x128xf32, #tpu.memory_space<vmem>>, vector<128x128xf32>
    %c0_2 = arith.constant 0 : index
    %c0_3 = arith.constant 0 : index
    %4 = vector.load %arg3[%c0_2, %c0_3] : memref<128x1024xbf16, #tpu.memory_space<vmem>>, vector<128x1024xbf16>
    %c0_4 = arith.constant 0 : index
    %c0_5 = arith.constant 0 : index
    %5 = vector.load %arg4[%c0_4, %c0_5] : memref<1024x128xbf16, #tpu.memory_space<vmem>>, vector<1024x128xbf16>
    %cst = arith.constant dense<0.000000e+00> : vector<128x128xf32>
    %6 = tpu.matmul %4, %5, %cst {dimension_numbers = #tpu.dot_dimension_numbers<[1], [0], [0], [1], [0, 0, 1, 1], [], []>} : vector<128x1024xbf16>, vector<1024x128xbf16>, vector<128x128xf32> -> vector<128x128xf32>
    %7 = arith.addf %3, %6 : vector<128x128xf32>
    %c0_6 = arith.constant 0 : index
    %c0_7 = arith.constant 0 : index
    %8 = vector.load %arg7[%c0_6, %c0_7] : memref<128x128xf32, #tpu.memory_space<vmem>>, vector<128x128xf32>
    tpu.vector_store %arg7[%c0_6, %c0_7], %7 {strides = array<i32>} : memref<128x128xf32, #tpu.memory_space<vmem>>, vector<128x128xf32>,
    %c0_i32_8 = arith.constant 0 : i32
    %9 = arith.cmpi eq, %arg2, %c0_i32_8 : i32
    %10 = arith.extui %9 : i1 to i32
    %c0_i32_9 = arith.constant 0 : i32
    %11 = arith.cmpi ne, %10, %c0_i32_9 : i32
    scf.if %11 {
      %c0_10 = arith.constant 0 : index
      %c0_11 = arith.constant 0 : index
      %12 = vector.load %arg7[%c0_10, %c0_11] : memref<128x128xf32, #tpu.memory_space<vmem>>, vector<128x128xf32>
      %c0_12 = arith.constant 0 : index
      %c0_13 = arith.constant 0 : index
      %13 = vector.load %arg5[%c0_12, %c0_13] : memref<1x128xf32, #tpu.memory_space<vmem>>, vector<1x128xf32>
      %14 = vector.broadcast %13 : vector<1x128xf32> to vector<128x128xf32>
      %15 = arith.addf %12, %14 : vector<128x128xf32>
      %c0_14 = arith.constant 0 : index
      %c0_15 = arith.constant 0 : index
      %16 = vector.load %arg6[%c0_14, %c0_15] : memref<128x128xf32, #tpu.memory_space<vmem>>, vector<128x128xf32>
      tpu.vector_store %arg6[%c0_14, %c0_15], %15 {strides = array<i32>} : memref<128x128xf32, #tpu.memory_space<vmem>>, vector<128x128xf32>,
    } else {
    }
    return
  }
  func.func @transform_0(%arg0: i32, %arg1: i32, %arg2: i32) -> (i32, i32) {
    %c0_i32 = arith.constant 0 : i32
    return %arg0, %arg2 : i32, i32
  }
  func.func @transform_1(%arg0: i32, %arg1: i32, %arg2: i32) -> (i32, i32) {
    %c0_i32 = arith.constant 0 : i32
    return %arg2, %arg1 : i32, i32
  }
  func.func @transform_2(%arg0: i32, %arg1: i32, %arg2: i32) -> (i32, i32) {
    %c0_i32 = arith.constant 0 : i32
    %c0_i32_0 = arith.constant 0 : i32
    return %c0_i32, %arg1 : i32, i32
  }
  func.func @transform_3(%arg0: i32, %arg1: i32, %arg2: i32) -> (i32, i32) {
    %c0_i32 = arith.constant 0 : i32
    return %arg0, %arg1 : i32, i32
  }
}

module attributes {stable_mosaic.version = 11 : i64} {
  func.func @_matmul_kernel(%arg0: i32, %arg1: i32, %arg2: i32, %arg3: memref<32x512xbf16, #tpu.memory_space<vmem>>, %arg4: memref<512x256xbf16, #tpu.memory_space<vmem>>, %arg5: memref<1x256xf32, #tpu.memory_space<vmem>>, %arg6: memref<32x256xf32, #tpu.memory_space<vmem>>, %arg7: memref<32x256xf32, #tpu.memory_space<vmem>>) attributes {dimension_semantics = [#tpu.dimension_semantics<parallel>, #tpu.dimension_semantics<parallel>, #tpu.dimension_semantics<arbitrary>], iteration_bounds = array<i64: 1, 1, 4>, scalar_prefetch = 0 : i64, scratch_operands = 1 : i64, tpu.core_type = #tpu.core_type<tc>, window_params = [{transform_indices = @transform_0, window_bounds = array<i64: 32, 512>}, {transform_indices = @transform_1, window_bounds = array<i64: 512, 256>}, {transform_indices = @transform_2, window_bounds = array<i64: 1, 256>}, {transform_indices = @transform_3, window_bounds = array<i64: 32, 256>}]} {
    %c0_i32 = arith.constant 0 : i32
    %0 = arith.cmpi eq, %arg2, %c0_i32 : i32
    %1 = arith.extui %0 : i1 to i32
    %c0_i32_0 = arith.constant 0 : i32
    %2 = arith.cmpi ne, %1, %c0_i32_0 : i32
    scf.if %2 {
      %cst_9 = arith.constant 0.000000e+00 : f32
      %12 = vector.broadcast %cst_9 : f32 to vector<32x256xf32>
      %c0_10 = arith.constant 0 : index
      %c0_11 = arith.constant 0 : index
      %13 = vector.load %arg7[%c0_10, %c0_11] : memref<32x256xf32, #tpu.memory_space<vmem>>, vector<32x256xf32>
      tpu.vector_store %arg7[%c0_10, %c0_11], %12 {strides = array<i32>} : memref<32x256xf32, #tpu.memory_space<vmem>>, vector<32x256xf32>,
    } else {
    }
    %c0 = arith.constant 0 : index
    %c0_1 = arith.constant 0 : index
    %3 = vector.load %arg7[%c0, %c0_1] : memref<32x256xf32, #tpu.memory_space<vmem>>, vector<32x256xf32>
    %c0_2 = arith.constant 0 : index
    %c0_3 = arith.constant 0 : index
    %4 = vector.load %arg3[%c0_2, %c0_3] : memref<32x512xbf16, #tpu.memory_space<vmem>>, vector<32x512xbf16>
    %c0_4 = arith.constant 0 : index
    %c0_5 = arith.constant 0 : index
    %5 = vector.load %arg4[%c0_4, %c0_5] : memref<512x256xbf16, #tpu.memory_space<vmem>>, vector<512x256xbf16>
    %cst = arith.constant dense<0.000000e+00> : vector<32x256xf32>
    %6 = tpu.matmul %4, %5, %cst {dimension_numbers = #tpu.dot_dimension_numbers<[1], [0], [0], [1], [0, 0, 1, 1], [], []>} : vector<32x512xbf16>, vector<512x256xbf16>, vector<32x256xf32> -> vector<32x256xf32>
    %7 = arith.addf %3, %6 : vector<32x256xf32>
    %c0_6 = arith.constant 0 : index
    %c0_7 = arith.constant 0 : index
    %8 = vector.load %arg7[%c0_6, %c0_7] : memref<32x256xf32, #tpu.memory_space<vmem>>, vector<32x256xf32>
    tpu.vector_store %arg7[%c0_6, %c0_7], %7 {strides = array<i32>} : memref<32x256xf32, #tpu.memory_space<vmem>>, vector<32x256xf32>,
    %c3_i32 = arith.constant 3 : i32
    %9 = arith.cmpi eq, %arg2, %c3_i32 : i32
    %10 = arith.extui %9 : i1 to i32
    %c0_i32_8 = arith.constant 0 : i32
    %11 = arith.cmpi ne, %10, %c0_i32_8 : i32
    scf.if %11 {
      %c0_9 = arith.constant 0 : index
      %c0_10 = arith.constant 0 : index
      %12 = vector.load %arg7[%c0_9, %c0_10] : memref<32x256xf32, #tpu.memory_space<vmem>>, vector<32x256xf32>
      %c0_11 = arith.constant 0 : index
      %c0_12 = arith.constant 0 : index
      %13 = vector.load %arg5[%c0_11, %c0_12] : memref<1x256xf32, #tpu.memory_space<vmem>>, vector<1x256xf32>
      %14 = vector.broadcast %13 : vector<1x256xf32> to vector<32x256xf32>
      %15 = arith.addf %12, %14 : vector<32x256xf32>
      %c0_13 = arith.constant 0 : index
      %c0_14 = arith.constant 0 : index
      %16 = vector.load %arg6[%c0_13, %c0_14] : memref<32x256xf32, #tpu.memory_space<vmem>>, vector<32x256xf32>
      tpu.vector_store %arg6[%c0_13, %c0_14], %15 {strides = array<i32>} : memref<32x256xf32, #tpu.memory_space<vmem>>, vector<32x256xf32>,
    } else {
    }
    return
  }
  func.func @transform_0(%arg0: i32, %arg1: i32, %arg2: i32) -> (i32, i32) {
    %c0_i32 = arith.constant 0 : i32
    return %arg0, %arg2 : i32, i32
  }
  func.func @transform_1(%arg0: i32, %arg1: i32, %arg2: i32) -> (i32, i32) {
    %c0_i32 = arith.constant 0 : i32
    return %arg2, %arg1 : i32, i32
  }
  func.func @transform_2(%arg0: i32, %arg1: i32, %arg2: i32) -> (i32, i32) {
    %c0_i32 = arith.constant 0 : i32
    %c0_i32_0 = arith.constant 0 : i32
    return %c0_i32, %arg1 : i32, i32
  }
  func.func @transform_3(%arg0: i32, %arg1: i32, %arg2: i32) -> (i32, i32) {
    %c0_i32 = arith.constant 0 : i32
    return %arg0, %arg1 : i32, i32
  }
}

module attributes {stable_mosaic.version = 11 : i64} {
  func.func @_matmul_kernel(%arg0: i32, %arg1: i32, %arg2: i32, %arg3: memref<32x512xbf16, #tpu.memory_space<vmem>>, %arg4: memref<512x512xbf16, #tpu.memory_space<vmem>>, %arg5: memref<1x512xf32, #tpu.memory_space<vmem>>, %arg6: memref<32x512xf32, #tpu.memory_space<vmem>>, %arg7: memref<32x512xf32, #tpu.memory_space<vmem>>) attributes {dimension_semantics = [#tpu.dimension_semantics<parallel>, #tpu.dimension_semantics<parallel>, #tpu.dimension_semantics<arbitrary>], iteration_bounds = array<i64: 1, 1, 8>, scalar_prefetch = 0 : i64, scratch_operands = 1 : i64, tpu.core_type = #tpu.core_type<tc>, window_params = [{transform_indices = @transform_0, window_bounds = array<i64: 32, 512>}, {transform_indices = @transform_1, window_bounds = array<i64: 512, 512>}, {transform_indices = @transform_2, window_bounds = array<i64: 1, 512>}, {transform_indices = @transform_3, window_bounds = array<i64: 32, 512>}]} {
    %c0_i32 = arith.constant 0 : i32
    %0 = arith.cmpi eq, %arg2, %c0_i32 : i32
    %1 = arith.extui %0 : i1 to i32
    %c0_i32_0 = arith.constant 0 : i32
    %2 = arith.cmpi ne, %1, %c0_i32_0 : i32
    scf.if %2 {
      %cst_9 = arith.constant 0.000000e+00 : f32
      %12 = vector.broadcast %cst_9 : f32 to vector<32x512xf32>
      %c0_10 = arith.constant 0 : index
      %c0_11 = arith.constant 0 : index
      %13 = vector.load %arg7[%c0_10, %c0_11] : memref<32x512xf32, #tpu.memory_space<vmem>>, vector<32x512xf32>
      tpu.vector_store %arg7[%c0_10, %c0_11], %12 {strides = array<i32>} : memref<32x512xf32, #tpu.memory_space<vmem>>, vector<32x512xf32>,
    } else {
    }
    %c0 = arith.constant 0 : index
    %c0_1 = arith.constant 0 : index
    %3 = vector.load %arg7[%c0, %c0_1] : memref<32x512xf32, #tpu.memory_space<vmem>>, vector<32x512xf32>
    %c0_2 = arith.constant 0 : index
    %c0_3 = arith.constant 0 : index
    %4 = vector.load %arg3[%c0_2, %c0_3] : memref<32x512xbf16, #tpu.memory_space<vmem>>, vector<32x512xbf16>
    %c0_4 = arith.constant 0 : index
    %c0_5 = arith.constant 0 : index
    %5 = vector.load %arg4[%c0_4, %c0_5] : memref<512x512xbf16, #tpu.memory_space<vmem>>, vector<512x512xbf16>
    %cst = arith.constant dense<0.000000e+00> : vector<32x512xf32>
    %6 = tpu.matmul %4, %5, %cst {dimension_numbers = #tpu.dot_dimension_numbers<[1], [0], [0], [1], [0, 0, 1, 1], [], []>} : vector<32x512xbf16>, vector<512x512xbf16>, vector<32x512xf32> -> vector<32x512xf32>
    %7 = arith.addf %3, %6 : vector<32x512xf32>
    %c0_6 = arith.constant 0 : index
    %c0_7 = arith.constant 0 : index
    %8 = vector.load %arg7[%c0_6, %c0_7] : memref<32x512xf32, #tpu.memory_space<vmem>>, vector<32x512xf32>
    tpu.vector_store %arg7[%c0_6, %c0_7], %7 {strides = array<i32>} : memref<32x512xf32, #tpu.memory_space<vmem>>, vector<32x512xf32>,
    %c7_i32 = arith.constant 7 : i32
    %9 = arith.cmpi eq, %arg2, %c7_i32 : i32
    %10 = arith.extui %9 : i1 to i32
    %c0_i32_8 = arith.constant 0 : i32
    %11 = arith.cmpi ne, %10, %c0_i32_8 : i32
    scf.if %11 {
      %c0_9 = arith.constant 0 : index
      %c0_10 = arith.constant 0 : index
      %12 = vector.load %arg7[%c0_9, %c0_10] : memref<32x512xf32, #tpu.memory_space<vmem>>, vector<32x512xf32>
      %c0_11 = arith.constant 0 : index
      %c0_12 = arith.constant 0 : index
      %13 = vector.load %arg5[%c0_11, %c0_12] : memref<1x512xf32, #tpu.memory_space<vmem>>, vector<1x512xf32>
      %14 = vector.broadcast %13 : vector<1x512xf32> to vector<32x512xf32>
      %15 = arith.addf %12, %14 : vector<32x512xf32>
      %c0_13 = arith.constant 0 : index
      %c0_14 = arith.constant 0 : index
      %16 = vector.load %arg6[%c0_13, %c0_14] : memref<32x512xf32, #tpu.memory_space<vmem>>, vector<32x512xf32>
      tpu.vector_store %arg6[%c0_13, %c0_14], %15 {strides = array<i32>} : memref<32x512xf32, #tpu.memory_space<vmem>>, vector<32x512xf32>,
    } else {
    }
    return
  }
  func.func @transform_0(%arg0: i32, %arg1: i32, %arg2: i32) -> (i32, i32) {
    %c0_i32 = arith.constant 0 : i32
    return %arg0, %arg2 : i32, i32
  }
  func.func @transform_1(%arg0: i32, %arg1: i32, %arg2: i32) -> (i32, i32) {
    %c0_i32 = arith.constant 0 : i32
    return %arg2, %arg1 : i32, i32
  }
  func.func @transform_2(%arg0: i32, %arg1: i32, %arg2: i32) -> (i32, i32) {
    %c0_i32 = arith.constant 0 : i32
    %c0_i32_0 = arith.constant 0 : i32
    return %c0_i32, %arg1 : i32, i32
  }
  func.func @transform_3(%arg0: i32, %arg1: i32, %arg2: i32) -> (i32, i32) {
    %c0_i32 = arith.constant 0 : i32
    return %arg0, %arg1 : i32, i32
  }
}

module attributes {stable_mosaic.version = 11 : i64} {
  func.func @_matmul_kernel(%arg0: i32, %arg1: i32, %arg2: i32, %arg3: memref<16x512xbf16, #tpu.memory_space<vmem>>, %arg4: memref<512x128xbf16, #tpu.memory_space<vmem>>, %arg5: memref<1x128xf32, #tpu.memory_space<vmem>>, %arg6: memref<16x128xf32, #tpu.memory_space<vmem>>, %arg7: memref<16x128xf32, #tpu.memory_space<vmem>>) attributes {dimension_semantics = [#tpu.dimension_semantics<parallel>, #tpu.dimension_semantics<parallel>, #tpu.dimension_semantics<arbitrary>], iteration_bounds = array<i64: 1, 1, 16>, scalar_prefetch = 0 : i64, scratch_operands = 1 : i64, tpu.core_type = #tpu.core_type<tc>, window_params = [{transform_indices = @transform_0, window_bounds = array<i64: 16, 512>}, {transform_indices = @transform_1, window_bounds = array<i64: 512, 128>}, {transform_indices = @transform_2, window_bounds = array<i64: 1, 128>}, {transform_indices = @transform_3, window_bounds = array<i64: 16, 128>}]} {
    %c0_i32 = arith.constant 0 : i32
    %0 = arith.cmpi eq, %arg2, %c0_i32 : i32
    %1 = arith.extui %0 : i1 to i32
    %c0_i32_0 = arith.constant 0 : i32
    %2 = arith.cmpi ne, %1, %c0_i32_0 : i32
    scf.if %2 {
      %cst_9 = arith.constant 0.000000e+00 : f32
      %12 = vector.broadcast %cst_9 : f32 to vector<16x128xf32>
      %c0_10 = arith.constant 0 : index
      %c0_11 = arith.constant 0 : index
      %13 = vector.load %arg7[%c0_10, %c0_11] : memref<16x128xf32, #tpu.memory_space<vmem>>, vector<16x128xf32>
      tpu.vector_store %arg7[%c0_10, %c0_11], %12 {strides = array<i32>} : memref<16x128xf32, #tpu.memory_space<vmem>>, vector<16x128xf32>,
    } else {
    }
    %c0 = arith.constant 0 : index
    %c0_1 = arith.constant 0 : index
    %3 = vector.load %arg7[%c0, %c0_1] : memref<16x128xf32, #tpu.memory_space<vmem>>, vector<16x128xf32>
    %c0_2 = arith.constant 0 : index
    %c0_3 = arith.constant 0 : index
    %4 = vector.load %arg3[%c0_2, %c0_3] : memref<16x512xbf16, #tpu.memory_space<vmem>>, vector<16x512xbf16>
    %c0_4 = arith.constant 0 : index
    %c0_5 = arith.constant 0 : index
    %5 = vector.load %arg4[%c0_4, %c0_5] : memref<512x128xbf16, #tpu.memory_space<vmem>>, vector<512x128xbf16>
    %cst = arith.constant dense<0.000000e+00> : vector<16x128xf32>
    %6 = tpu.matmul %4, %5, %cst {dimension_numbers = #tpu.dot_dimension_numbers<[1], [0], [0], [1], [0, 0, 1, 1], [], []>} : vector<16x512xbf16>, vector<512x128xbf16>, vector<16x128xf32> -> vector<16x128xf32>
    %7 = arith.addf %3, %6 : vector<16x128xf32>
    %c0_6 = arith.constant 0 : index
    %c0_7 = arith.constant 0 : index
    %8 = vector.load %arg7[%c0_6, %c0_7] : memref<16x128xf32, #tpu.memory_space<vmem>>, vector<16x128xf32>
    tpu.vector_store %arg7[%c0_6, %c0_7], %7 {strides = array<i32>} : memref<16x128xf32, #tpu.memory_space<vmem>>, vector<16x128xf32>,
    %c15_i32 = arith.constant 15 : i32
    %9 = arith.cmpi eq, %arg2, %c15_i32 : i32
    %10 = arith.extui %9 : i1 to i32
    %c0_i32_8 = arith.constant 0 : i32
    %11 = arith.cmpi ne, %10, %c0_i32_8 : i32
    scf.if %11 {
      %c0_9 = arith.constant 0 : index
      %c0_10 = arith.constant 0 : index
      %12 = vector.load %arg7[%c0_9, %c0_10] : memref<16x128xf32, #tpu.memory_space<vmem>>, vector<16x128xf32>
      %c0_11 = arith.constant 0 : index
      %c0_12 = arith.constant 0 : index
      %13 = vector.load %arg5[%c0_11, %c0_12] : memref<1x128xf32, #tpu.memory_space<vmem>>, vector<1x128xf32>
      %14 = vector.broadcast %13 : vector<1x128xf32> to vector<16x128xf32>
      %15 = arith.addf %12, %14 : vector<16x128xf32>
      %c0_13 = arith.constant 0 : index
      %c0_14 = arith.constant 0 : index
      %16 = vector.load %arg6[%c0_13, %c0_14] : memref<16x128xf32, #tpu.memory_space<vmem>>, vector<16x128xf32>
      tpu.vector_store %arg6[%c0_13, %c0_14], %15 {strides = array<i32>} : memref<16x128xf32, #tpu.memory_space<vmem>>, vector<16x128xf32>,
    } else {
    }
    return
  }
  func.func @transform_0(%arg0: i32, %arg1: i32, %arg2: i32) -> (i32, i32) {
    %c0_i32 = arith.constant 0 : i32
    return %arg0, %arg2 : i32, i32
  }
  func.func @transform_1(%arg0: i32, %arg1: i32, %arg2: i32) -> (i32, i32) {
    %c0_i32 = arith.constant 0 : i32
    return %arg2, %arg1 : i32, i32
  }
  func.func @transform_2(%arg0: i32, %arg1: i32, %arg2: i32) -> (i32, i32) {
    %c0_i32 = arith.constant 0 : i32
    %c0_i32_0 = arith.constant 0 : i32
    return %c0_i32, %arg1 : i32, i32
  }
  func.func @transform_3(%arg0: i32, %arg1: i32, %arg2: i32) -> (i32, i32) {
    %c0_i32 = arith.constant 0 : i32
    return %arg0, %arg1 : i32, i32
  }
}

module attributes {stable_mosaic.version = 11 : i64} {
  func.func @_matmul_kernel(%arg0: i32, %arg1: i32, %arg2: i32, %arg3: memref<512x128xbf16, #tpu.memory_space<vmem>>, %arg4: memref<128x128xbf16, #tpu.memory_space<vmem>>, %arg5: memref<1x128xf32, #tpu.memory_space<vmem>>, %arg6: memref<512x128xf32, #tpu.memory_space<vmem>>, %arg7: memref<512x128xf32, #tpu.memory_space<vmem>>) attributes {dimension_semantics = [#tpu.dimension_semantics<parallel>, #tpu.dimension_semantics<parallel>, #tpu.dimension_semantics<arbitrary>], iteration_bounds = array<i64: 8, 1, 1>, scalar_prefetch = 0 : i64, scratch_operands = 1 : i64, tpu.core_type = #tpu.core_type<tc>, window_params = [{transform_indices = @transform_0, window_bounds = array<i64: 512, 128>}, {transform_indices = @transform_1, window_bounds = array<i64: 128, 128>}, {transform_indices = @transform_2, window_bounds = array<i64: 1, 128>}, {transform_indices = @transform_3, window_bounds = array<i64: 512, 128>}]} {
    %c0_i32 = arith.constant 0 : i32
    %0 = arith.cmpi eq, %arg2, %c0_i32 : i32
    %1 = arith.extui %0 : i1 to i32
    %c0_i32_0 = arith.constant 0 : i32
    %2 = arith.cmpi ne, %1, %c0_i32_0 : i32
    scf.if %2 {
      %cst_10 = arith.constant 0.000000e+00 : f32
      %12 = vector.broadcast %cst_10 : f32 to vector<512x128xf32>
      %c0_11 = arith.constant 0 : index
      %c0_12 = arith.constant 0 : index
      %13 = vector.load %arg7[%c0_11, %c0_12] : memref<512x128xf32, #tpu.memory_space<vmem>>, vector<512x128xf32>
      tpu.vector_store %arg7[%c0_11, %c0_12], %12 {strides = array<i32>} : memref<512x128xf32, #tpu.memory_space<vmem>>, vector<512x128xf32>,
    } else {
    }
    %c0 = arith.constant 0 : index
    %c0_1 = arith.constant 0 : index
    %3 = vector.load %arg7[%c0, %c0_1] : memref<512x128xf32, #tpu.memory_space<vmem>>, vector<512x128xf32>
    %c0_2 = arith.constant 0 : index
    %c0_3 = arith.constant 0 : index
    %4 = vector.load %arg3[%c0_2, %c0_3] : memref<512x128xbf16, #tpu.memory_space<vmem>>, vector<512x128xbf16>
    %c0_4 = arith.constant 0 : index
    %c0_5 = arith.constant 0 : index
    %5 = vector.load %arg4[%c0_4, %c0_5] : memref<128x128xbf16, #tpu.memory_space<vmem>>, vector<128x128xbf16>
    %cst = arith.constant dense<0.000000e+00> : vector<512x128xf32>
    %6 = tpu.matmul %4, %5, %cst {dimension_numbers = #tpu.dot_dimension_numbers<[1], [0], [0], [1], [0, 0, 1, 1], [], []>} : vector<512x128xbf16>, vector<128x128xbf16>, vector<512x128xf32> -> vector<512x128xf32>
    %7 = arith.addf %3, %6 : vector<512x128xf32>
    %c0_6 = arith.constant 0 : index
    %c0_7 = arith.constant 0 : index
    %8 = vector.load %arg7[%c0_6, %c0_7] : memref<512x128xf32, #tpu.memory_space<vmem>>, vector<512x128xf32>
    tpu.vector_store %arg7[%c0_6, %c0_7], %7 {strides = array<i32>} : memref<512x128xf32, #tpu.memory_space<vmem>>, vector<512x128xf32>,
    %c0_i32_8 = arith.constant 0 : i32
    %9 = arith.cmpi eq, %arg2, %c0_i32_8 : i32
    %10 = arith.extui %9 : i1 to i32
    %c0_i32_9 = arith.constant 0 : i32
    %11 = arith.cmpi ne, %10, %c0_i32_9 : i32
    scf.if %11 {
      %c0_10 = arith.constant 0 : index
      %c0_11 = arith.constant 0 : index
      %12 = vector.load %arg7[%c0_10, %c0_11] : memref<512x128xf32, #tpu.memory_space<vmem>>, vector<512x128xf32>
      %c0_12 = arith.constant 0 : index
      %c0_13 = arith.constant 0 : index
      %13 = vector.load %arg5[%c0_12, %c0_13] : memref<1x128xf32, #tpu.memory_space<vmem>>, vector<1x128xf32>
      %14 = vector.broadcast %13 : vector<1x128xf32> to vector<512x128xf32>
      %15 = arith.addf %12, %14 : vector<512x128xf32>
      %cst_14 = arith.constant 0.000000e+00 : f32
      %16 = vector.broadcast %cst_14 : f32 to vector<512x128xf32>
      %17 = arith.maximumf %15, %16 : vector<512x128xf32>
      %c0_15 = arith.constant 0 : index
      %c0_16 = arith.constant 0 : index
      %18 = vector.load %arg6[%c0_15, %c0_16] : memref<512x128xf32, #tpu.memory_space<vmem>>, vector<512x128xf32>
      tpu.vector_store %arg6[%c0_15, %c0_16], %17 {strides = array<i32>} : memref<512x128xf32, #tpu.memory_space<vmem>>, vector<512x128xf32>,
    } else {
    }
    return
  }
  func.func @transform_0(%arg0: i32, %arg1: i32, %arg2: i32) -> (i32, i32) {
    %c0_i32 = arith.constant 0 : i32
    return %arg0, %arg2 : i32, i32
  }
  func.func @transform_1(%arg0: i32, %arg1: i32, %arg2: i32) -> (i32, i32) {
    %c0_i32 = arith.constant 0 : i32
    return %arg2, %arg1 : i32, i32
  }
  func.func @transform_2(%arg0: i32, %arg1: i32, %arg2: i32) -> (i32, i32) {
    %c0_i32 = arith.constant 0 : i32
    %c0_i32_0 = arith.constant 0 : i32
    return %c0_i32, %arg1 : i32, i32
  }
  func.func @transform_3(%arg0: i32, %arg1: i32, %arg2: i32) -> (i32, i32) {
    %c0_i32 = arith.constant 0 : i32
    return %arg0, %arg1 : i32, i32
  }
}

module attributes {stable_mosaic.version = 11 : i64} {
  func.func @_matmul_kernel(%arg0: i32, %arg1: i32, %arg2: i32, %arg3: memref<256x256xbf16, #tpu.memory_space<vmem>>, %arg4: memref<256x128xbf16, #tpu.memory_space<vmem>>, %arg5: memref<1x128xf32, #tpu.memory_space<vmem>>, %arg6: memref<256x128xf32, #tpu.memory_space<vmem>>, %arg7: memref<256x128xf32, #tpu.memory_space<vmem>>) attributes {dimension_semantics = [#tpu.dimension_semantics<parallel>, #tpu.dimension_semantics<parallel>, #tpu.dimension_semantics<arbitrary>], iteration_bounds = array<i64: 4, 1, 1>, scalar_prefetch = 0 : i64, scratch_operands = 1 : i64, tpu.core_type = #tpu.core_type<tc>, window_params = [{transform_indices = @transform_0, window_bounds = array<i64: 256, 256>}, {transform_indices = @transform_1, window_bounds = array<i64: 256, 128>}, {transform_indices = @transform_2, window_bounds = array<i64: 1, 128>}, {transform_indices = @transform_3, window_bounds = array<i64: 256, 128>}]} {
    %c0_i32 = arith.constant 0 : i32
    %0 = arith.cmpi eq, %arg2, %c0_i32 : i32
    %1 = arith.extui %0 : i1 to i32
    %c0_i32_0 = arith.constant 0 : i32
    %2 = arith.cmpi ne, %1, %c0_i32_0 : i32
    scf.if %2 {
      %cst_10 = arith.constant 0.000000e+00 : f32
      %12 = vector.broadcast %cst_10 : f32 to vector<256x128xf32>
      %c0_11 = arith.constant 0 : index
      %c0_12 = arith.constant 0 : index
      %13 = vector.load %arg7[%c0_11, %c0_12] : memref<256x128xf32, #tpu.memory_space<vmem>>, vector<256x128xf32>
      tpu.vector_store %arg7[%c0_11, %c0_12], %12 {strides = array<i32>} : memref<256x128xf32, #tpu.memory_space<vmem>>, vector<256x128xf32>,
    } else {
    }
    %c0 = arith.constant 0 : index
    %c0_1 = arith.constant 0 : index
    %3 = vector.load %arg7[%c0, %c0_1] : memref<256x128xf32, #tpu.memory_space<vmem>>, vector<256x128xf32>
    %c0_2 = arith.constant 0 : index
    %c0_3 = arith.constant 0 : index
    %4 = vector.load %arg3[%c0_2, %c0_3] : memref<256x256xbf16, #tpu.memory_space<vmem>>, vector<256x256xbf16>
    %c0_4 = arith.constant 0 : index
    %c0_5 = arith.constant 0 : index
    %5 = vector.load %arg4[%c0_4, %c0_5] : memref<256x128xbf16, #tpu.memory_space<vmem>>, vector<256x128xbf16>
    %cst = arith.constant dense<0.000000e+00> : vector<256x128xf32>
    %6 = tpu.matmul %4, %5, %cst {dimension_numbers = #tpu.dot_dimension_numbers<[1], [0], [0], [1], [0, 0, 1, 1], [], []>} : vector<256x256xbf16>, vector<256x128xbf16>, vector<256x128xf32> -> vector<256x128xf32>
    %7 = arith.addf %3, %6 : vector<256x128xf32>
    %c0_6 = arith.constant 0 : index
    %c0_7 = arith.constant 0 : index
    %8 = vector.load %arg7[%c0_6, %c0_7] : memref<256x128xf32, #tpu.memory_space<vmem>>, vector<256x128xf32>
    tpu.vector_store %arg7[%c0_6, %c0_7], %7 {strides = array<i32>} : memref<256x128xf32, #tpu.memory_space<vmem>>, vector<256x128xf32>,
    %c0_i32_8 = arith.constant 0 : i32
    %9 = arith.cmpi eq, %arg2, %c0_i32_8 : i32
    %10 = arith.extui %9 : i1 to i32
    %c0_i32_9 = arith.constant 0 : i32
    %11 = arith.cmpi ne, %10, %c0_i32_9 : i32
    scf.if %11 {
      %c0_10 = arith.constant 0 : index
      %c0_11 = arith.constant 0 : index
      %12 = vector.load %arg7[%c0_10, %c0_11] : memref<256x128xf32, #tpu.memory_space<vmem>>, vector<256x128xf32>
      %c0_12 = arith.constant 0 : index
      %c0_13 = arith.constant 0 : index
      %13 = vector.load %arg5[%c0_12, %c0_13] : memref<1x128xf32, #tpu.memory_space<vmem>>, vector<1x128xf32>
      %14 = vector.broadcast %13 : vector<1x128xf32> to vector<256x128xf32>
      %15 = arith.addf %12, %14 : vector<256x128xf32>
      %cst_14 = arith.constant 0.000000e+00 : f32
      %16 = vector.broadcast %cst_14 : f32 to vector<256x128xf32>
      %17 = arith.maximumf %15, %16 : vector<256x128xf32>
      %c0_15 = arith.constant 0 : index
      %c0_16 = arith.constant 0 : index
      %18 = vector.load %arg6[%c0_15, %c0_16] : memref<256x128xf32, #tpu.memory_space<vmem>>, vector<256x128xf32>
      tpu.vector_store %arg6[%c0_15, %c0_16], %17 {strides = array<i32>} : memref<256x128xf32, #tpu.memory_space<vmem>>, vector<256x128xf32>,
    } else {
    }
    return
  }
  func.func @transform_0(%arg0: i32, %arg1: i32, %arg2: i32) -> (i32, i32) {
    %c0_i32 = arith.constant 0 : i32
    return %arg0, %arg2 : i32, i32
  }
  func.func @transform_1(%arg0: i32, %arg1: i32, %arg2: i32) -> (i32, i32) {
    %c0_i32 = arith.constant 0 : i32
    return %arg2, %arg1 : i32, i32
  }
  func.func @transform_2(%arg0: i32, %arg1: i32, %arg2: i32) -> (i32, i32) {
    %c0_i32 = arith.constant 0 : i32
    %c0_i32_0 = arith.constant 0 : i32
    return %c0_i32, %arg1 : i32, i32
  }
  func.func @transform_3(%arg0: i32, %arg1: i32, %arg2: i32) -> (i32, i32) {
    %c0_i32 = arith.constant 0 : i32
    return %arg0, %arg1 : i32, i32
  }
}

module attributes {stable_mosaic.version = 11 : i64} {
  func.func @_l1_sum_kernel(%arg0: i32, %arg1: memref<48x128xf32, #tpu.memory_space<vmem>>, %arg2: memref<48x128xf32, #tpu.memory_space<vmem>>, %arg3: memref<1x1xf32, #tpu.memory_space<vmem>>) attributes {dimension_semantics = [#tpu.dimension_semantics<arbitrary>], iteration_bounds = array<i64: 1>, scalar_prefetch = 0 : i64, scratch_operands = 0 : i64, tpu.core_type = #tpu.core_type<tc>, window_params = [{transform_indices = @transform_0, window_bounds = array<i64: 48, 128>}, {transform_indices = @transform_1, window_bounds = array<i64: 48, 128>}, {pipeline_mode = #tpu.pipeline_mode<synchronous>, transform_indices = @transform_2, window_bounds = array<i64: 1, 1>}]} {
    %c0_i32 = arith.constant 0 : i32
    %0 = arith.cmpi eq, %arg0, %c0_i32 : i32
    %1 = arith.extui %0 : i1 to i32
    %c0_i32_0 = arith.constant 0 : i32
    %2 = arith.cmpi ne, %1, %c0_i32_0 : i32
    scf.if %2 {
      %cst_8 = arith.constant 0.000000e+00 : f32
      %15 = vector.broadcast %cst_8 : f32 to vector<1x1xf32>
      %c0_9 = arith.constant 0 : index
      %c0_10 = arith.constant 0 : index
      %16 = vector.load %arg3[%c0_9, %c0_10] : memref<1x1xf32, #tpu.memory_space<vmem>>, vector<1x1xf32>
      tpu.vector_store %arg3[%c0_9, %c0_10], %15 {strides = array<i32>} : memref<1x1xf32, #tpu.memory_space<vmem>>, vector<1x1xf32>,
    } else {
    }
    %c0 = arith.constant 0 : index
    %c0_1 = arith.constant 0 : index
    %3 = vector.load %arg3[%c0, %c0_1] : memref<1x1xf32, #tpu.memory_space<vmem>>, vector<1x1xf32>
    %c0_2 = arith.constant 0 : index
    %c0_3 = arith.constant 0 : index
    %4 = vector.load %arg1[%c0_2, %c0_3] : memref<48x128xf32, #tpu.memory_space<vmem>>, vector<48x128xf32>
    %c0_4 = arith.constant 0 : index
    %c0_5 = arith.constant 0 : index
    %5 = vector.load %arg2[%c0_4, %c0_5] : memref<48x128xf32, #tpu.memory_space<vmem>>, vector<48x128xf32>
    %6 = arith.subf %4, %5 : vector<48x128xf32>
    %7 = math.absf %6 : vector<48x128xf32>
    %8 = vector.shape_cast %7 : vector<48x128xf32> to vector<1x48x128xf32>
    %cst = arith.constant dense<0.000000e+00> : vector<1xf32>
    %9 = vector.multi_reduction <add>, %8, %cst [1, 2] : vector<1x48x128xf32> to vector<1xf32>
    %10 = vector.shape_cast %9 : vector<1xf32> to vector<1x1x1xf32>
    %11 = vector.extract %10[0, 0, 0] : f32 from vector<1x1x1xf32>
    %12 = vector.broadcast %11 : f32 to vector<1x1xf32>
    %13 = arith.addf %3, %12 : vector<1x1xf32>
    %c0_6 = arith.constant 0 : index
    %c0_7 = arith.constant 0 : index
    %14 = vector.load %arg3[%c0_6, %c0_7] : memref<1x1xf32, #tpu.memory_space<vmem>>, vector<1x1xf32>
    tpu.vector_store %arg3[%c0_6, %c0_7], %13 {strides = array<i32>} : memref<1x1xf32, #tpu.memory_space<vmem>>, vector<1x1xf32>,
    return
  }
  func.func @transform_0(%arg0: i32) -> (i32, i32) {
    %c0_i32 = arith.constant 0 : i32
    %c0_i32_0 = arith.constant 0 : i32
    return %arg0, %c0_i32 : i32, i32
  }
  func.func @transform_1(%arg0: i32) -> (i32, i32) {
    %c0_i32 = arith.constant 0 : i32
    %c0_i32_0 = arith.constant 0 : i32
    return %arg0, %c0_i32 : i32, i32
  }
  func.func @transform_2(%arg0: i32) -> (i32, i32) {
    %c0_i32 = arith.constant 0 : i32
    %c0_i32_0 = arith.constant 0 : i32
    %c0_i32_1 = arith.constant 0 : i32
    return %c0_i32, %c0_i32_0 : i32, i32
  }
}

</mosaic_0001>

<bundles_post_ra>
// kernel: forward.11
= control target key start
LH: loop header
LB: loop body
LE: loop exit
PB: predicated region body
PF: predicated region fallthrough
CT: control target
= control target key end

     0   :  { %s1784_s1 = inlined_call_operand.vmem [shape: bf16[128,128], index: 1, kind: input, shape index: {}]   ;;  %s1785_s2 = inlined_call_operand.vmem [shape: f32[1,128], index: 2, kind: input, shape index: {}]   ;;  %s1786_s0 = inlined_call_operand.vmem [shape: bf16[512,128], index: 0, kind: input, shape index: {}]   ;;  %s1787_s3 = inlined_call_operand.vmem [shape: f32[512,128], index: 3, kind: output, shape index: {}]  }
   0x1   :  { %v1357_v0 = vld [vmem:[%s1784_s1 + $0x38] sm:$0xff]  ;;  %v1356_v1 = vld [vmem:[%s1784_s1 + $0x30] sm:$0xff]  ;;  %v1355_v2 = vld [vmem:[%s1784_s1 + $0x28] sm:$0xff] }
   0x2   :  { %466 = vmatpush.bf16.msra.mxu0 %v1357_v0  ;;  %1358 = vmatpush.bf16.msra.mxu1 %v1357_v0  ;;  %v1354_v3 = vld [vmem:[%s1784_s1 + $0x20] sm:$0xff]  ;;  %v1353_v4 = vld [vmem:[%s1784_s1 + $0x18] sm:$0xff]  ;;  %v1352_v5 = vld [vmem:[%s1784_s1 + $0x10] sm:$0xff] }
   0x3   :  { %1359 = vmatpush.bf16.msra.mxu2 %v1357_v0  ;;  %1360 = vmatpush.bf16.msra.mxu3 %v1357_v0  ;;  %v1351_v6 = vld [vmem:[%s1784_s1 + $0x8] sm:$0xff]  ;;  %v1350_v7 = vld [vmem:[%s1784_s1] sm:$0xff]  ;;  %v1320_v16 = vld [vmem:[%s1786_s0 + $0x10] sm:$0xff] }
   0x4   :  { %v1318_v8 = vld [vmem:[%s1786_s0] sm:$0xff]  ;;  %v1319_v12 = vld [vmem:[%s1786_s0 + $0x8] sm:$0xff]  ;;  %v1328_v17 = vld [vmem:[%s1786_s0 + $0x50] sm:$0xff] }
   0x5   :  { %v1326_v9 = vld [vmem:[%s1786_s0 + $0x40] sm:$0xff]  ;;  %v1327_v13 = vld [vmem:[%s1786_s0 + $0x48] sm:$0xff]  ;;  %v1336_v18 = vld [vmem:[%s1786_s0 + $0x90] sm:$0xff] }
   0x6   :  { %467 = vmatpush.bf16.msra.mxu0 %v1356_v1  ;;  %1361 = vmatpush.bf16.msra.mxu1 %v1356_v1  ;;  %v1334_v10 = vld [vmem:[%s1786_s0 + $0x80] sm:$0xff]  ;;  %v1335_v14 = vld [vmem:[%s1786_s0 + $0x88] sm:$0xff]  ;;  %v1344_v19 = vld [vmem:[%s1786_s0 + $0xd0] sm:$0xff] }
   0x7   :  { %1362 = vmatpush.bf16.msra.mxu2 %v1356_v1  ;;  %1363 = vmatpush.bf16.msra.mxu3 %v1356_v1  ;;  %v1342_v11 = vld [vmem:[%s1786_s0 + $0xc0] sm:$0xff]  ;;  %v1343_v15 = vld [vmem:[%s1786_s0 + $0xc8] sm:$0xff]  ;;  %v1321_v20 = vld [vmem:[%s1786_s0 + $0x18] sm:$0xff] }
   0x8   :  { %v1329_v21 = vld [vmem:[%s1786_s0 + $0x58] sm:$0xff]  ;;  %v1322_v24 = vld [vmem:[%s1786_s0 + $0x20] sm:$0xff]  ;;  %v1323_v28 = vld [vmem:[%s1786_s0 + $0x28] sm:$0xff] }
   0x9   :  { %v1337_v22 = vld [vmem:[%s1786_s0 + $0x98] sm:$0xff]  ;;  %v1330_v25 = vld [vmem:[%s1786_s0 + $0x60] sm:$0xff]  ;;  %v1331_v29 = vld [vmem:[%s1786_s0 + $0x68] sm:$0xff] }
   0xa   :  { %468 = vmatpush.bf16.msra.mxu0 %v1355_v2  ;;  %1364 = vmatpush.bf16.msra.mxu1 %v1355_v2  ;;  %v1345_v23 = vld [vmem:[%s1786_s0 + $0xd8] sm:$0xff]  ;;  %v1338_v26 = vld [vmem:[%s1786_s0 + $0xa0] sm:$0xff]  ;;  %v1339_v30 = vld [vmem:[%s1786_s0 + $0xa8] sm:$0xff] }
   0xb   :  { %1365 = vmatpush.bf16.msra.mxu2 %v1355_v2  ;;  %1366 = vmatpush.bf16.msra.mxu3 %v1355_v2  ;;  %v1346_v27 = vld [vmem:[%s1786_s0 + $0xe0] sm:$0xff]  ;;  %v1347_v31 = vld [vmem:[%s1786_s0 + $0xe8] sm:$0xff]  ;;  %v1324_v32 = vld [vmem:[%s1786_s0 + $0x30] sm:$0xff] }
   0xc   :  { %v1332_v33 = vld [vmem:[%s1786_s0 + $0x70] sm:$0xff]  ;;  %v1325_v36 = vld [vmem:[%s1786_s0 + $0x38] sm:$0xff]  ;;  %v1526_v40 = vld [vmem:[%s1785_s2] ss:$0 sm:$0xff] }
   0xd   :  { %v1340_v34 = vld [vmem:[%s1786_s0 + $0xb0] sm:$0xff]  ;;  %v1333_v37 = vld [vmem:[%s1786_s0 + $0x78] sm:$0xff] }
   0xe   :  { %469 = vmatpush.bf16.msra.mxu0 %v1354_v3  ;;  %1367 = vmatpush.bf16.msra.mxu1 %v1354_v3  ;;  %v1348_v35 = vld [vmem:[%s1786_s0 + $0xf0] sm:$0xff]  ;;  %v1341_v38 = vld [vmem:[%s1786_s0 + $0xb8] sm:$0xff] }
   0xf   :  { %1368 = vmatpush.bf16.msra.mxu2 %v1354_v3  ;;  %1369 = vmatpush.bf16.msra.mxu3 %v1354_v3  ;;  %v1349_v39 = vld [vmem:[%s1786_s0 + $0xf8] sm:$0xff] }
  0x12   :  { %470 = vmatpush.bf16.msra.mxu0 %v1353_v4  ;;  %1370 = vmatpush.bf16.msra.mxu1 %v1353_v4 }
  0x13   :  { %1371 = vmatpush.bf16.msra.mxu2 %v1353_v4  ;;  %1372 = vmatpush.bf16.msra.mxu3 %v1353_v4 }
  0x16   :  { %471 = vmatpush.bf16.msra.mxu0 %v1352_v5  ;;  %1373 = vmatpush.bf16.msra.mxu1 %v1352_v5 }
  0x17   :  { %1374 = vmatpush.bf16.msra.mxu2 %v1352_v5  ;;  %1375 = vmatpush.bf16.msra.mxu3 %v1352_v5 }
  0x1a   :  { %472 = vmatpush.bf16.msra.mxu0 %v1351_v6  ;;  %1376 = vmatpush.bf16.msra.mxu1 %v1351_v6 }
  0x1b   :  { %1377 = vmatpush.bf16.msra.mxu2 %v1351_v6  ;;  %1378 = vmatpush.bf16.msra.mxu3 %v1351_v6 }
  0x1e   :  { %473 = vmatpush.bf16.msra.mxu0 %v1350_v7  ;;  %1379 = vmatpush.bf16.msra.mxu1 %v1350_v7 }
  0x1f   :  { %1380 = vmatpush.bf16.msra.mxu2 %v1350_v7  ;;  %1381 = vmatpush.bf16.msra.mxu3 %v1350_v7 }
  0x21   :  { %474 = vmatmul.bf16.vlgmr.msra.gmra.mxu0 %v1318_v8  ;;  %514 = vmatmul.bf16.vlgmr.msra.gmra.mxu1 %v1326_v9 }
  0x22   :  { %554 = vmatmul.bf16.vlgmr.msra.gmra.mxu2 %v1334_v10  ;;  %594 = vmatmul.bf16.vlgmr.msra.gmra.mxu3 %v1342_v11 }
  0x31   :  { %479 = vmatmul.bf16.gmra.mxu0 %v1319_v12  ;;  %519 = vmatmul.bf16.gmra.mxu1 %v1327_v13 }
  0x32   :  { %559 = vmatmul.bf16.gmra.mxu2 %v1335_v14  ;;  %599 = vmatmul.bf16.gmra.mxu3 %v1343_v15 }
  0x41   :  { %484 = vmatmul.bf16.gmra.mxu0 %v1320_v16  ;;  %524 = vmatmul.bf16.gmra.mxu1 %v1328_v17 }
  0x42   :  { %564 = vmatmul.bf16.gmra.mxu2 %v1336_v18  ;;  %604 = vmatmul.bf16.gmra.mxu3 %v1344_v19 }
  0x51   :  { %489 = vmatmul.bf16.gmra.mxu0 %v1321_v20  ;;  %529 = vmatmul.bf16.gmra.mxu1 %v1329_v21 }
  0x52   :  { %569 = vmatmul.bf16.gmra.mxu2 %v1337_v22  ;;  %609 = vmatmul.bf16.gmra.mxu3 %v1345_v23 }
  0x61   :  { %494 = vmatmul.bf16.gmra.mxu0 %v1322_v24  ;;  %534 = vmatmul.bf16.gmra.mxu1 %v1330_v25 }
  0x62   :  { %574 = vmatmul.bf16.gmra.mxu2 %v1338_v26  ;;  %614 = vmatmul.bf16.gmra.mxu3 %v1346_v27 }
  0x71   :  { %499 = vmatmul.bf16.gmra.mxu0 %v1323_v28  ;;  %539 = vmatmul.bf16.gmra.mxu1 %v1331_v29 }
  0x72   :  { %579 = vmatmul.bf16.gmra.mxu2 %v1339_v30  ;;  %619 = vmatmul.bf16.gmra.mxu3 %v1347_v31 }
  0x81   :  { %504 = vmatmul.bf16.gmra.mxu0 %v1324_v32  ;;  %544 = vmatmul.bf16.gmra.mxu1 %v1332_v33 }
  0x82   :  { %584 = vmatmul.bf16.gmra.mxu2 %v1340_v34  ;;  %624 = vmatmul.bf16.gmra.mxu3 %v1348_v35 }
  0x91   :  { %509 = vmatmul.bf16.gmra.mxu0 %v1325_v36  ;;  %549 = vmatmul.bf16.gmra.mxu1 %v1333_v37 }
  0x92   :  { %589 = vmatmul.bf16.gmra.mxu2 %v1341_v38  ;;  %629 = vmatmul.bf16.gmra.mxu3 %v1349_v39 }
  0x9e   :  { %v475_v41 = vpop.f32.mrf.mxu0  ;;  %v515_v42 = vpop.f32.mrf.mxu1 }
  0x9f   :  { %v834_v43 = vadd.f32 %v1526_v40, %v475_v41  ;;  %v850_v44 = vadd.f32 %v1526_v40, %v515_v42 }
  0xa1   :  { %vm898_vm0 = vcmp.ge.f32.partialorder %v834_v43, 0.0  ;;  %v962_v45 = vmul.f32 0.2, %v834_v43  ;;  %vm914_vm1 = vcmp.ge.f32.partialorder %v850_v44, 0.0  ;;  %v978_v46 = vmul.f32 0.2, %v850_v44 }
  0xa3   :  { %v1026_v47 = vsel %vm898_vm0, %v834_v43, %v962_v45  ;;  %v1042_v48 = vsel %vm914_vm1, %v850_v44, %v978_v46 }
  0xa4   :  { %1090 = vst [vmem:[%s1787_s3] sm:$0xff] %v1026_v47 }
  0xa5   :  { %1106 = vst [vmem:[%s1787_s3 + $0x80] sm:$0xff] %v1042_v48  ;;  %v555_v49 = vpop.f32.mrf.mxu2  ;;  %v595_v50 = vpop.f32.mrf.mxu3 }
  0xa6   :  { %v866_v51 = vadd.f32 %v1526_v40, %v555_v49  ;;  %v882_v52 = vadd.f32 %v1526_v40, %v595_v50  ;;  %v477_v53 = vpop.f32.mrf.mxu0  ;;  %v517_v54 = vpop.f32.mrf.mxu1 }
  0xa7   :  { %v835_v55 = vadd.f32 %v1526_v40, %v477_v53  ;;  %v851_v56 = vadd.f32 %v1526_v40, %v517_v54 }
  0xa8   :  { %vm930_vm2 = vcmp.ge.f32.partialorder %v866_v51, 0.0  ;;  %v994_v57 = vmul.f32 0.2, %v866_v51  ;;  %vm946_vm3 = vcmp.ge.f32.partialorder %v882_v52, 0.0  ;;  %v1010_v58 = vmul.f32 0.2, %v882_v52 }
  0xa9   :  { %vm899_vm4 = vcmp.ge.f32.partialorder %v835_v55, 0.0  ;;  %v963_v59 = vmul.f32 0.2, %v835_v55  ;;  %vm915_vm5 = vcmp.ge.f32.partialorder %v851_v56, 0.0  ;;  %v979_v60 = vmul.f32 0.2, %v851_v56 }
  0xaa   :  { %v1058_v61 = vsel %vm930_vm2, %v866_v51, %v994_v57  ;;  %v1074_v62 = vsel %vm946_vm3, %v882_v52, %v1010_v58 }
  0xab   :  { %1122 = vst [vmem:[%s1787_s3 + $0x100] sm:$0xff] %v1058_v61  ;;  %v1027_v63 = vsel %vm899_vm4, %v835_v55, %v963_v59  ;;  %v1043_v0 = vsel %vm915_vm5, %v851_v56, %v979_v60 }
  0xac   :  { %1138 = vst [vmem:[%s1787_s3 + $0x180] sm:$0xff] %v1074_v62 }
  0xad   :  { %1091 = vst [vmem:[%s1787_s3 + $0x8] sm:$0xff] %v1027_v63  ;;  %v557_v1 = vpop.f32.mrf.mxu2  ;;  %v597_v2 = vpop.f32.mrf.mxu3 }
  0xae   :  { %1107 = vst [vmem:[%s1787_s3 + $0x88] sm:$0xff] %v1043_v0  ;;  %v867_v3 = vadd.f32 %v1526_v40, %v557_v1  ;;  %v883_v4 = vadd.f32 %v1526_v40, %v597_v2  ;;  %v480_v5 = vpop.f32.mrf.mxu0  ;;  %v520_v6 = vpop.f32.mrf.mxu1 }
  0xaf   :  { %v836_v7 = vadd.f32 %v1526_v40, %v480_v5  ;;  %v852_v8 = vadd.f32 %v1526_v40, %v520_v6 }
  0xb0   :  { %vm931_vm6 = vcmp.ge.f32.partialorder %v867_v3, 0.0  ;;  %v995_v9 = vmul.f32 0.2, %v867_v3  ;;  %vm947_vm7 = vcmp.ge.f32.partialorder %v883_v4, 0.0  ;;  %v1011_v10 = vmul.f32 0.2, %v883_v4 }
  0xb1   :  { %vm900_vm8 = vcmp.ge.f32.partialorder %v836_v7, 0.0  ;;  %v964_v11 = vmul.f32 0.2, %v836_v7  ;;  %vm916_vm9 = vcmp.ge.f32.partialorder %v852_v8, 0.0  ;;  %v980_v12 = vmul.f32 0.2, %v852_v8 }
  0xb2   :  { %v1059_v13 = vsel %vm931_vm6, %v867_v3, %v995_v9  ;;  %v1075_v14 = vsel %vm947_vm7, %v883_v4, %v1011_v10 }
  0xb3   :  { %1123 = vst [vmem:[%s1787_s3 + $0x108] sm:$0xff] %v1059_v13  ;;  %v1028_v15 = vsel %vm900_vm8, %v836_v7, %v964_v11  ;;  %v1044_v16 = vsel %vm916_vm9, %v852_v8, %v980_v12 }
  0xb4   :  { %1139 = vst [vmem:[%s1787_s3 + $0x188] sm:$0xff] %v1075_v14 }
  0xb5   :  { %1092 = vst [vmem:[%s1787_s3 + $0x10] sm:$0xff] %v1028_v15  ;;  %v560_v17 = vpop.f32.mrf.mxu2  ;;  %v600_v18 = vpop.f32.mrf.mxu3 }
  0xb6   :  { %1108 = vst [vmem:[%s1787_s3 + $0x90] sm:$0xff] %v1044_v16  ;;  %v868_v19 = vadd.f32 %v1526_v40, %v560_v17  ;;  %v884_v20 = vadd.f32 %v1526_v40, %v600_v18  ;;  %v482_v21 = vpop.f32.mrf.mxu0  ;;  %v522_v22 = vpop.f32.mrf.mxu1 }
  0xb7   :  { %v837_v23 = vadd.f32 %v1526_v40, %v482_v21  ;;  %v853_v24 = vadd.f32 %v1526_v40, %v522_v22 }
  0xb8   :  { %vm932_vm10 = vcmp.ge.f32.partialorder %v868_v19, 0.0  ;;  %v996_v25 = vmul.f32 0.2, %v868_v19  ;;  %vm948_vm11 = vcmp.ge.f32.partialorder %v884_v20, 0.0  ;;  %v1012_v26 = vmul.f32 0.2, %v884_v20 }
  0xb9   :  { %vm901_vm12 = vcmp.ge.f32.partialorder %v837_v23, 0.0  ;;  %v965_v27 = vmul.f32 0.2, %v837_v23  ;;  %vm917_vm13 = vcmp.ge.f32.partialorder %v853_v24, 0.0  ;;  %v981_v28 = vmul.f32 0.2, %v853_v24 }
  0xba   :  { %v1060_v29 = vsel %vm932_vm10, %v868_v19, %v996_v25  ;;  %v1076_v30 = vsel %vm948_vm11, %v884_v20, %v1012_v26 }
  0xbb   :  { %1124 = vst [vmem:[%s1787_s3 + $0x110] sm:$0xff] %v1060_v29  ;;  %v1029_v31 = vsel %vm901_vm12, %v837_v23, %v965_v27  ;;  %v1045_v32 = vsel %vm917_vm13, %v853_v24, %v981_v28 }
  0xbc   :  { %1140 = vst [vmem:[%s1787_s3 + $0x190] sm:$0xff] %v1076_v30 }
  0xbd   :  { %1093 = vst [vmem:[%s1787_s3 + $0x18] sm:$0xff] %v1029_v31  ;;  %v562_v33 = vpop.f32.mrf.mxu2  ;;  %v602_v34 = vpop.f32.mrf.mxu3 }
  0xbe   :  { %1109 = vst [vmem:[%s1787_s3 + $0x98] sm:$0xff] %v1045_v32  ;;  %v869_v35 = vadd.f32 %v1526_v40, %v562_v33  ;;  %v885_v36 = vadd.f32 %v1526_v40, %v602_v34  ;;  %v485_v37 = vpop.f32.mrf.mxu0  ;;  %v525_v38 = vpop.f32.mrf.mxu1 }
  0xbf   :  { %v838_v39 = vadd.f32 %v1526_v40, %v485_v37  ;;  %v854_v41 = vadd.f32 %v1526_v40, %v525_v38 }
  0xc0   :  { %vm933_vm14 = vcmp.ge.f32.partialorder %v869_v35, 0.0  ;;  %v997_v42 = vmul.f32 0.2, %v869_v35  ;;  %vm949_vm15 = vcmp.ge.f32.partialorder %v885_v36, 0.0  ;;  %v1013_v43 = vmul.f32 0.2, %v885_v36 }
  0xc1   :  { %vm902_vm0 = vcmp.ge.f32.partialorder %v838_v39, 0.0  ;;  %v966_v44 = vmul.f32 0.2, %v838_v39  ;;  %vm918_vm1 = vcmp.ge.f32.partialorder %v854_v41, 0.0  ;;  %v982_v45 = vmul.f32 0.2, %v854_v41 }
  0xc2   :  { %v1061_v46 = vsel %vm933_vm14, %v869_v35, %v997_v42  ;;  %v1077_v47 = vsel %vm949_vm15, %v885_v36, %v1013_v43 }
  0xc3   :  { %1125 = vst [vmem:[%s1787_s3 + $0x118] sm:$0xff] %v1061_v46  ;;  %v1030_v48 = vsel %vm902_vm0, %v838_v39, %v966_v44  ;;  %v1046_v49 = vsel %vm918_vm1, %v854_v41, %v982_v45 }
  0xc4   :  { %1141 = vst [vmem:[%s1787_s3 + $0x198] sm:$0xff] %v1077_v47 }
  0xc5   :  { %1094 = vst [vmem:[%s1787_s3 + $0x20] sm:$0xff] %v1030_v48  ;;  %v565_v50 = vpop.f32.mrf.mxu2  ;;  %v605_v51 = vpop.f32.mrf.mxu3 }
  0xc6   :  { %1110 = vst [vmem:[%s1787_s3 + $0xa0] sm:$0xff] %v1046_v49  ;;  %v870_v52 = vadd.f32 %v1526_v40, %v565_v50  ;;  %v886_v53 = vadd.f32 %v1526_v40, %v605_v51  ;;  %v487_v54 = vpop.f32.mrf.mxu0  ;;  %v527_v55 = vpop.f32.mrf.mxu1 }
  0xc7   :  { %v839_v56 = vadd.f32 %v1526_v40, %v487_v54  ;;  %v855_v57 = vadd.f32 %v1526_v40, %v527_v55 }
  0xc8   :  { %vm934_vm2 = vcmp.ge.f32.partialorder %v870_v52, 0.0  ;;  %v998_v58 = vmul.f32 0.2, %v870_v52  ;;  %vm950_vm3 = vcmp.ge.f32.partialorder %v886_v53, 0.0  ;;  %v1014_v59 = vmul.f32 0.2, %v886_v53 }
  0xc9   :  { %vm903_vm4 = vcmp.ge.f32.partialorder %v839_v56, 0.0  ;;  %v967_v60 = vmul.f32 0.2, %v839_v56  ;;  %vm919_vm5 = vcmp.ge.f32.partialorder %v855_v57, 0.0  ;;  %v983_v61 = vmul.f32 0.2, %v855_v57 }
  0xca   :  { %v1062_v62 = vsel %vm934_vm2, %v870_v52, %v998_v58  ;;  %v1078_v63 = vsel %vm950_vm3, %v886_v53, %v1014_v59 }
  0xcb   :  { %1126 = vst [vmem:[%s1787_s3 + $0x120] sm:$0xff] %v1062_v62  ;;  %v1031_v0 = vsel %vm903_vm4, %v839_v56, %v967_v60  ;;  %v1047_v1 = vsel %vm919_vm5, %v855_v57, %v983_v61 }
  0xcc   :  { %1142 = vst [vmem:[%s1787_s3 + $0x1a0] sm:$0xff] %v1078_v63 }
  0xcd   :  { %1095 = vst [vmem:[%s1787_s3 + $0x28] sm:$0xff] %v1031_v0  ;;  %v567_v2 = vpop.f32.mrf.mxu2  ;;  %v607_v3 = vpop.f32.mrf.mxu3 }
  0xce   :  { %1111 = vst [vmem:[%s1787_s3 + $0xa8] sm:$0xff] %v1047_v1  ;;  %v871_v4 = vadd.f32 %v1526_v40, %v567_v2  ;;  %v887_v5 = vadd.f32 %v1526_v40, %v607_v3  ;;  %v490_v6 = vpop.f32.mrf.mxu0  ;;  %v530_v7 = vpop.f32.mrf.mxu1 }
  0xcf   :  { %v840_v8 = vadd.f32 %v1526_v40, %v490_v6  ;;  %v856_v9 = vadd.f32 %v1526_v40, %v530_v7 }
  0xd0   :  { %vm935_vm6 = vcmp.ge.f32.partialorder %v871_v4, 0.0  ;;  %v999_v10 = vmul.f32 0.2, %v871_v4  ;;  %vm951_vm7 = vcmp.ge.f32.partialorder %v887_v5, 0.0  ;;  %v1015_v11 = vmul.f32 0.2, %v887_v5 }
  0xd1   :  { %vm904_vm8 = vcmp.ge.f32.partialorder %v840_v8, 0.0  ;;  %v968_v12 = vmul.f32 0.2, %v840_v8  ;;  %vm920_vm9 = vcmp.ge.f32.partialorder %v856_v9, 0.0  ;;  %v984_v13 = vmul.f32 0.2, %v856_v9 }
  0xd2   :  { %v1063_v14 = vsel %vm935_vm6, %v871_v4, %v999_v10  ;;  %v1079_v15 = vsel %vm951_vm7, %v887_v5, %v1015_v11 }
  0xd3   :  { %1127 = vst [vmem:[%s1787_s3 + $0x128] sm:$0xff] %v1063_v14  ;;  %v1032_v16 = vsel %vm904_vm8, %v840_v8, %v968_v12  ;;  %v1048_v17 = vsel %vm920_vm9, %v856_v9, %v984_v13 }
  0xd4   :  { %1143 = vst [vmem:[%s1787_s3 + $0x1a8] sm:$0xff] %v1079_v15 }
  0xd5   :  { %1096 = vst [vmem:[%s1787_s3 + $0x30] sm:$0xff] %v1032_v16  ;;  %v570_v18 = vpop.f32.mrf.mxu2  ;;  %v610_v19 = vpop.f32.mrf.mxu3 }
  0xd6   :  { %1112 = vst [vmem:[%s1787_s3 + $0xb0] sm:$0xff] %v1048_v17  ;;  %v872_v20 = vadd.f32 %v1526_v40, %v570_v18  ;;  %v888_v21 = vadd.f32 %v1526_v40, %v610_v19  ;;  %v492_v22 = vpop.f32.mrf.mxu0  ;;  %v532_v23 = vpop.f32.mrf.mxu1 }
  0xd7   :  { %v841_v24 = vadd.f32 %v1526_v40, %v492_v22  ;;  %v857_v25 = vadd.f32 %v1526_v40, %v532_v23 }
  0xd8   :  { %vm936_vm10 = vcmp.ge.f32.partialorder %v872_v20, 0.0  ;;  %v1000_v26 = vmul.f32 0.2, %v872_v20  ;;  %vm952_vm11 = vcmp.ge.f32.partialorder %v888_v21, 0.0  ;;  %v1016_v27 = vmul.f32 0.2, %v888_v21 }
  0xd9   :  { %vm905_vm12 = vcmp.ge.f32.partialorder %v841_v24, 0.0  ;;  %v969_v28 = vmul.f32 0.2, %v841_v24  ;;  %vm921_vm13 = vcmp.ge.f32.partialorder %v857_v25, 0.0  ;;  %v985_v29 = vmul.f32 0.2, %v857_v25 }
  0xda   :  { %v1064_v30 = vsel %vm936_vm10, %v872_v20, %v1000_v26  ;;  %v1080_v31 = vsel %vm952_vm11, %v888_v21, %v1016_v27 }
  0xdb   :  { %1128 = vst [vmem:[%s1787_s3 + $0x130] sm:$0xff] %v1064_v30  ;;  %v1033_v32 = vsel %vm905_vm12, %v841_v24, %v969_v28  ;;  %v1049_v33 = vsel %vm921_vm13, %v857_v25, %v985_v29 }
  0xdc   :  { %1144 = vst [vmem:[%s1787_s3 + $0x1b0] sm:$0xff] %v1080_v31 }
  0xdd   :  { %1097 = vst [vmem:[%s1787_s3 + $0x38] sm:$0xff] %v1033_v32  ;;  %v572_v34 = vpop.f32.mrf.mxu2  ;;  %v612_v35 = vpop.f32.mrf.mxu3 }
  0xde   :  { %1113 = vst [vmem:[%s1787_s3 + $0xb8] sm:$0xff] %v1049_v33  ;;  %v873_v36 = vadd.f32 %v1526_v40, %v572_v34  ;;  %v889_v37 = vadd.f32 %v1526_v40, %v612_v35  ;;  %v495_v38 = vpop.f32.mrf.mxu0  ;;  %v535_v39 = vpop.f32.mrf.mxu1 }
  0xdf   :  { %v842_v41 = vadd.f32 %v1526_v40, %v495_v38  ;;  %v858_v42 = vadd.f32 %v1526_v40, %v535_v39 }
  0xe0   :  { %vm937_vm14 = vcmp.ge.f32.partialorder %v873_v36, 0.0  ;;  %v1001_v43 = vmul.f32 0.2, %v873_v36  ;;  %vm953_vm15 = vcmp.ge.f32.partialorder %v889_v37, 0.0  ;;  %v1017_v44 = vmul.f32 0.2, %v889_v37 }
  0xe1   :  { %vm906_vm0 = vcmp.ge.f32.partialorder %v842_v41, 0.0  ;;  %v970_v45 = vmul.f32 0.2, %v842_v41  ;;  %vm922_vm1 = vcmp.ge.f32.partialorder %v858_v42, 0.0  ;;  %v986_v46 = vmul.f32 0.2, %v858_v42 }
  0xe2   :  { %v1065_v47 = vsel %vm937_vm14, %v873_v36, %v1001_v43  ;;  %v1081_v48 = vsel %vm953_vm15, %v889_v37, %v1017_v44 }
  0xe3   :  { %1129 = vst [vmem:[%s1787_s3 + $0x138] sm:$0xff] %v1065_v47  ;;  %v1034_v49 = vsel %vm906_vm0, %v842_v41, %v970_v45  ;;  %v1050_v50 = vsel %vm922_vm1, %v858_v42, %v986_v46 }
  0xe4   :  { %1145 = vst [vmem:[%s1787_s3 + $0x1b8] sm:$0xff] %v1081_v48 }
  0xe5   :  { %1098 = vst [vmem:[%s1787_s3 + $0x40] sm:$0xff] %v1034_v49  ;;  %v575_v51 = vpop.f32.mrf.mxu2  ;;  %v615_v52 = vpop.f32.mrf.mxu3 }
  0xe6   :  { %1114 = vst [vmem:[%s1787_s3 + $0xc0] sm:$0xff] %v1050_v50  ;;  %v874_v53 = vadd.f32 %v1526_v40, %v575_v51  ;;  %v890_v54 = vadd.f32 %v1526_v40, %v615_v52  ;;  %v497_v55 = vpop.f32.mrf.mxu0  ;;  %v537_v56 = vpop.f32.mrf.mxu1 }
  0xe7   :  { %v843_v57 = vadd.f32 %v1526_v40, %v497_v55  ;;  %v859_v58 = vadd.f32 %v1526_v40, %v537_v56 }
  0xe8   :  { %vm938_vm2 = vcmp.ge.f32.partialorder %v874_v53, 0.0  ;;  %v1002_v59 = vmul.f32 0.2, %v874_v53  ;;  %vm954_vm3 = vcmp.ge.f32.partialorder %v890_v54, 0.0  ;;  %v1018_v60 = vmul.f32 0.2, %v890_v54 }
  0xe9   :  { %vm907_vm4 = vcmp.ge.f32.partialorder %v843_v57, 0.0  ;;  %v971_v61 = vmul.f32 0.2, %v843_v57  ;;  %vm923_vm5 = vcmp.ge.f32.partialorder %v859_v58, 0.0  ;;  %v987_v62 = vmul.f32 0.2, %v859_v58 }
  0xea   :  { %v1066_v63 = vsel %vm938_vm2, %v874_v53, %v1002_v59  ;;  %v1082_v0 = vsel %vm954_vm3, %v890_v54, %v1018_v60 }
  0xeb   :  { %1130 = vst [vmem:[%s1787_s3 + $0x140] sm:$0xff] %v1066_v63  ;;  %v1035_v1 = vsel %vm907_vm4, %v843_v57, %v971_v61  ;;  %v1051_v2 = vsel %vm923_vm5, %v859_v58, %v987_v62 }
  0xec   :  { %1146 = vst [vmem:[%s1787_s3 + $0x1c0] sm:$0xff] %v1082_v0 }
  0xed   :  { %1099 = vst [vmem:[%s1787_s3 + $0x48] sm:$0xff] %v1035_v1  ;;  %v577_v3 = vpop.f32.mrf.mxu2  ;;  %v617_v4 = vpop.f32.mrf.mxu3 }
  0xee   :  { %1115 = vst [vmem:[%s1787_s3 + $0xc8] sm:$0xff] %v1051_v2  ;;  %v875_v5 = vadd.f32 %v1526_v40, %v577_v3  ;;  %v891_v6 = vadd.f32 %v1526_v40, %v617_v4  ;;  %v500_v7 = vpop.f32.mrf.mxu0  ;;  %v540_v8 = vpop.f32.mrf.mxu1 }
  0xef   :  { %v844_v9 = vadd.f32 %v1526_v40, %v500_v7  ;;  %v860_v10 = vadd.f32 %v1526_v40, %v540_v8 }
  0xf0   :  { %vm939_vm6 = vcmp.ge.f32.partialorder %v875_v5, 0.0  ;;  %v1003_v11 = vmul.f32 0.2, %v875_v5  ;;  %vm955_vm7 = vcmp.ge.f32.partialorder %v891_v6, 0.0  ;;  %v1019_v12 = vmul.f32 0.2, %v891_v6 }
  0xf1   :  { %vm908_vm8 = vcmp.ge.f32.partialorder %v844_v9, 0.0  ;;  %v972_v13 = vmul.f32 0.2, %v844_v9  ;;  %vm924_vm9 = vcmp.ge.f32.partialorder %v860_v10, 0.0  ;;  %v988_v14 = vmul.f32 0.2, %v860_v10 }
  0xf2   :  { %v1067_v15 = vsel %vm939_vm6, %v875_v5, %v1003_v11  ;;  %v1083_v16 = vsel %vm955_vm7, %v891_v6, %v1019_v12 }
  0xf3   :  { %1131 = vst [vmem:[%s1787_s3 + $0x148] sm:$0xff] %v1067_v15  ;;  %v1036_v17 = vsel %vm908_vm8, %v844_v9, %v972_v13  ;;  %v1052_v18 = vsel %vm924_vm9, %v860_v10, %v988_v14 }
  0xf4   :  { %1147 = vst [vmem:[%s1787_s3 + $0x1c8] sm:$0xff] %v1083_v16 }
  0xf5   :  { %1100 = vst [vmem:[%s1787_s3 + $0x50] sm:$0xff] %v1036_v17  ;;  %v580_v19 = vpop.f32.mrf.mxu2  ;;  %v620_v20 = vpop.f32.mrf.mxu3 }
  0xf6   :  { %1116 = vst [vmem:[%s1787_s3 + $0xd0] sm:$0xff] %v1052_v18  ;;  %v876_v21 = vadd.f32 %v1526_v40, %v580_v19  ;;  %v892_v22 = vadd.f32 %v1526_v40, %v620_v20  ;;  %v502_v23 = vpop.f32.mrf.mxu0  ;;  %v542_v24 = vpop.f32.mrf.mxu1 }
  0xf7   :  { %v845_v25 = vadd.f32 %v1526_v40, %v502_v23  ;;  %v861_v26 = vadd.f32 %v1526_v40, %v542_v24 }
  0xf8   :  { %vm940_vm10 = vcmp.ge.f32.partialorder %v876_v21, 0.0  ;;  %v1004_v27 = vmul.f32 0.2, %v876_v21  ;;  %vm956_vm11 = vcmp.ge.f32.partialorder %v892_v22, 0.0  ;;  %v1020_v28 = vmul.f32 0.2, %v892_v22 }
  0xf9   :  { %vm909_vm12 = vcmp.ge.f32.partialorder %v845_v25, 0.0  ;;  %v973_v29 = vmul.f32 0.2, %v845_v25  ;;  %vm925_vm13 = vcmp.ge.f32.partialorder %v861_v26, 0.0  ;;  %v989_v30 = vmul.f32 0.2, %v861_v26 }
  0xfa   :  { %v1068_v31 = vsel %vm940_vm10, %v876_v21, %v1004_v27  ;;  %v1084_v32 = vsel %vm956_vm11, %v892_v22, %v1020_v28 }
  0xfb   :  { %1132 = vst [vmem:[%s1787_s3 + $0x150] sm:$0xff] %v1068_v31  ;;  %v1037_v33 = vsel %vm909_vm12, %v845_v25, %v973_v29  ;;  %v1053_v34 = vsel %vm925_vm13, %v861_v26, %v989_v30 }
  0xfc   :  { %1148 = vst [vmem:[%s1787_s3 + $0x1d0] sm:$0xff] %v1084_v32 }
  0xfd   :  { %1101 = vst [vmem:[%s1787_s3 + $0x58] sm:$0xff] %v1037_v33  ;;  %v582_v35 = vpop.f32.mrf.mxu2  ;;  %v622_v36 = vpop.f32.mrf.mxu3 }
  0xfe   :  { %1117 = vst [vmem:[%s1787_s3 + $0xd8] sm:$0xff] %v1053_v34  ;;  %v877_v37 = vadd.f32 %v1526_v40, %v582_v35  ;;  %v893_v38 = vadd.f32 %v1526_v40, %v622_v36  ;;  %v505_v39 = vpop.f32.mrf.mxu0  ;;  %v545_v41 = vpop.f32.mrf.mxu1 }
  0xff   :  { %v846_v42 = vadd.f32 %v1526_v40, %v505_v39  ;;  %v862_v43 = vadd.f32 %v1526_v40, %v545_v41 }
 0x100   :  { %vm941_vm14 = vcmp.ge.f32.partialorder %v877_v37, 0.0  ;;  %v1005_v44 = vmul.f32 0.2, %v877_v37  ;;  %vm957_vm15 = vcmp.ge.f32.partialorder %v893_v38, 0.0  ;;  %v1021_v45 = vmul.f32 0.2, %v893_v38 }
 0x101   :  { %vm910_vm0 = vcmp.ge.f32.partialorder %v846_v42, 0.0  ;;  %v974_v46 = vmul.f32 0.2, %v846_v42  ;;  %vm926_vm1 = vcmp.ge.f32.partialorder %v862_v43, 0.0  ;;  %v990_v47 = vmul.f32 0.2, %v862_v43 }
 0x102   :  { %v1069_v48 = vsel %vm941_vm14, %v877_v37, %v1005_v44  ;;  %v1085_v49 = vsel %vm957_vm15, %v893_v38, %v1021_v45 }
 0x103   :  { %1133 = vst [vmem:[%s1787_s3 + $0x158] sm:$0xff] %v1069_v48  ;;  %v1038_v50 = vsel %vm910_vm0, %v846_v42, %v974_v46  ;;  %v1054_v51 = vsel %vm926_vm1, %v862_v43, %v990_v47 }
 0x104   :  { %1149 = vst [vmem:[%s1787_s3 + $0x1d8] sm:$0xff] %v1085_v49 }
 0x105   :  { %1102 = vst [vmem:[%s1787_s3 + $0x60] sm:$0xff] %v1038_v50  ;;  %v585_v52 = vpop.f32.mrf.mxu2  ;;  %v625_v53 = vpop.f32.mrf.mxu3 }
 0x106   :  { %1118 = vst [vmem:[%s1787_s3 + $0xe0] sm:$0xff] %v1054_v51  ;;  %v878_v54 = vadd.f32 %v1526_v40, %v585_v52  ;;  %v894_v55 = vadd.f32 %v1526_v40, %v625_v53  ;;  %v507_v56 = vpop.f32.mrf.mxu0  ;;  %v547_v57 = vpop.f32.mrf.mxu1 }
 0x107   :  { %v847_v58 = vadd.f32 %v1526_v40, %v507_v56  ;;  %v863_v59 = vadd.f32 %v1526_v40, %v547_v57 }
 0x108   :  { %vm942_vm2 = vcmp.ge.f32.partialorder %v878_v54, 0.0  ;;  %v1006_v60 = vmul.f32 0.2, %v878_v54  ;;  %vm958_vm3 = vcmp.ge.f32.partialorder %v894_v55, 0.0  ;;  %v1022_v61 = vmul.f32 0.2, %v894_v55 }
 0x109   :  { %vm911_vm4 = vcmp.ge.f32.partialorder %v847_v58, 0.0  ;;  %v975_v62 = vmul.f32 0.2, %v847_v58  ;;  %vm927_vm5 = vcmp.ge.f32.partialorder %v863_v59, 0.0  ;;  %v991_v63 = vmul.f32 0.2, %v863_v59 }
 0x10a   :  { %v1070_v0 = vsel %vm942_vm2, %v878_v54, %v1006_v60  ;;  %v1086_v1 = vsel %vm958_vm3, %v894_v55, %v1022_v61 }
 0x10b   :  { %1134 = vst [vmem:[%s1787_s3 + $0x160] sm:$0xff] %v1070_v0  ;;  %v1039_v2 = vsel %vm911_vm4, %v847_v58, %v975_v62  ;;  %v1055_v3 = vsel %vm927_vm5, %v863_v59, %v991_v63 }
 0x10c   :  { %1150 = vst [vmem:[%s1787_s3 + $0x1e0] sm:$0xff] %v1086_v1 }
 0x10d   :  { %1103 = vst [vmem:[%s1787_s3 + $0x68] sm:$0xff] %v1039_v2  ;;  %v587_v4 = vpop.f32.mrf.mxu2  ;;  %v627_v5 = vpop.f32.mrf.mxu3 }
 0x10e   :  { %1119 = vst [vmem:[%s1787_s3 + $0xe8] sm:$0xff] %v1055_v3  ;;  %v879_v6 = vadd.f32 %v1526_v40, %v587_v4  ;;  %v895_v7 = vadd.f32 %v1526_v40, %v627_v5  ;;  %v510_v8 = vpop.f32.mrf.mxu0  ;;  %v550_v9 = vpop.f32.mrf.mxu1 }
 0x10f   :  { %v848_v10 = vadd.f32 %v1526_v40, %v510_v8  ;;  %v864_v11 = vadd.f32 %v1526_v40, %v550_v9 }
 0x110   :  { %vm943_vm6 = vcmp.ge.f32.partialorder %v879_v6, 0.0  ;;  %v1007_v12 = vmul.f32 0.2, %v879_v6  ;;  %vm959_vm7 = vcmp.ge.f32.partialorder %v895_v7, 0.0  ;;  %v1023_v13 = vmul.f32 0.2, %v895_v7 }
 0x111   :  { %vm912_vm8 = vcmp.ge.f32.partialorder %v848_v10, 0.0  ;;  %v976_v14 = vmul.f32 0.2, %v848_v10  ;;  %vm928_vm9 = vcmp.ge.f32.partialorder %v864_v11, 0.0  ;;  %v992_v15 = vmul.f32 0.2, %v864_v11 }
 0x112   :  { %v1071_v16 = vsel %vm943_vm6, %v879_v6, %v1007_v12  ;;  %v1087_v17 = vsel %vm959_vm7, %v895_v7, %v1023_v13 }
 0x113   :  { %1135 = vst [vmem:[%s1787_s3 + $0x168] sm:$0xff] %v1071_v16  ;;  %v1040_v18 = vsel %vm912_vm8, %v848_v10, %v976_v14  ;;  %v1056_v19 = vsel %vm928_vm9, %v864_v11, %v992_v15 }
 0x114   :  { %1151 = vst [vmem:[%s1787_s3 + $0x1e8] sm:$0xff] %v1087_v17 }
 0x115   :  { %1104 = vst [vmem:[%s1787_s3 + $0x70] sm:$0xff] %v1040_v18  ;;  %v590_v20 = vpop.f32.mrf.mxu2  ;;  %v630_v21 = vpop.f32.mrf.mxu3 }
 0x116   :  { %1120 = vst [vmem:[%s1787_s3 + $0xf0] sm:$0xff] %v1056_v19  ;;  %v880_v22 = vadd.f32 %v1526_v40, %v590_v20  ;;  %v896_v23 = vadd.f32 %v1526_v40, %v630_v21  ;;  %v512_v24 = vpop.f32.mrf.mxu0  ;;  %v552_v25 = vpop.f32.mrf.mxu1 }
 0x117   :  { %v849_v26 = vadd.f32 %v1526_v40, %v512_v24  ;;  %v865_v27 = vadd.f32 %v1526_v40, %v552_v25 }
 0x118   :  { %vm944_vm10 = vcmp.ge.f32.partialorder %v880_v22, 0.0  ;;  %v1008_v28 = vmul.f32 0.2, %v880_v22  ;;  %vm960_vm11 = vcmp.ge.f32.partialorder %v896_v23, 0.0  ;;  %v1024_v29 = vmul.f32 0.2, %v896_v23 }
 0x119   :  { %vm913_vm12 = vcmp.ge.f32.partialorder %v849_v26, 0.0  ;;  %v977_v30 = vmul.f32 0.2, %v849_v26  ;;  %vm929_vm13 = vcmp.ge.f32.partialorder %v865_v27, 0.0  ;;  %v993_v31 = vmul.f32 0.2, %v865_v27 }
 0x11a   :  { %v1072_v32 = vsel %vm944_vm10, %v880_v22, %v1008_v28  ;;  %v1088_v33 = vsel %vm960_vm11, %v896_v23, %v1024_v29 }
 0x11b   :  { %1136 = vst [vmem:[%s1787_s3 + $0x170] sm:$0xff] %v1072_v32  ;;  %v1041_v34 = vsel %vm913_vm12, %v849_v26, %v977_v30  ;;  %v1057_v35 = vsel %vm929_vm13, %v865_v27, %v993_v31 }
 0x11c   :  { %1152 = vst [vmem:[%s1787_s3 + $0x1f0] sm:$0xff] %v1088_v33 }
 0x11d   :  { %1105 = vst [vmem:[%s1787_s3 + $0x78] sm:$0xff] %v1041_v34  ;;  %v592_v36 = vpop.f32.mrf.mxu2  ;;  %v632_v37 = vpop.f32.mrf.mxu3 }
 0x11e   :  { %1121 = vst [vmem:[%s1787_s3 + $0xf8] sm:$0xff] %v1057_v35  ;;  %v881_v38 = vadd.f32 %v1526_v40, %v592_v36  ;;  %v897_v39 = vadd.f32 %v1526_v40, %v632_v37 }
 0x120   :  { %vm945_vm14 = vcmp.ge.f32.partialorder %v881_v38, 0.0  ;;  %v1009_v41 = vmul.f32 0.2, %v881_v38  ;;  %vm961_vm15 = vcmp.ge.f32.partialorder %v897_v39, 0.0  ;;  %v1025_v42 = vmul.f32 0.2, %v897_v39 }
 0x122   :  { %v1073_v43 = vsel %vm945_vm14, %v881_v38, %v1009_v41  ;;  %v1089_v44 = vsel %vm961_vm15, %v897_v39, %v1025_v42 }
 0x123   :  { %1137 = vst [vmem:[%s1787_s3 + $0x178] sm:$0xff] %v1073_v43 }
 0x124   :  { %1153 = vst [vmem:[%s1787_s3 + $0x1f8] sm:$0xff] %v1089_v44 }

// kernel: forward.12
= control target key start
LH: loop header
LB: loop body
LE: loop exit
PB: predicated region body
PF: predicated region fallthrough
CT: control target
= control target key end

     0   :  { %s2783_s1 = inlined_call_operand.vmem [shape: bf16[1024,128], index: 1, kind: input, shape index: {}]   ;;  %s2784_s0 = inlined_call_operand.vmem [shape: bf16[128,1024], index: 0, kind: input, shape index: {}]   ;;  %s2785_s2 = inlined_call_operand.vmem [shape: f32[1,128], index: 2, kind: input, shape index: {}]   ;;  %s2786_s3 = inlined_call_operand.vmem [shape: f32[128,128], index: 3, kind: output, shape index: {}]  }
   0x1   :  { %v2012_v0 = vld [vmem:[%s2783_s1 + $0x38] sm:$0xff]  ;;  %v2011_v4 = vld [vmem:[%s2783_s1 + $0x30] sm:$0xff]  ;;  %v2010_v8 = vld [vmem:[%s2783_s1 + $0x28] sm:$0xff] }
   0x2   :  { %v2020_v1 = vld [vmem:[%s2783_s1 + $0x78] sm:$0xff]  ;;  %946 = vmatpush.bf16.msra.mxu0 %v2012_v0  ;;  %v2019_v5 = vld [vmem:[%s2783_s1 + $0x70] sm:$0xff]  ;;  %v2018_v9 = vld [vmem:[%s2783_s1 + $0x68] sm:$0xff] }
   0x3   :  { %v2028_v2 = vld [vmem:[%s2783_s1 + $0xb8] sm:$0xff]  ;;  %995 = vmatpush.bf16.msra.mxu1 %v2020_v1  ;;  %v2027_v6 = vld [vmem:[%s2783_s1 + $0xb0] sm:$0xff]  ;;  %v2026_v10 = vld [vmem:[%s2783_s1 + $0xa8] sm:$0xff] }
   0x4   :  { %v2036_v3 = vld [vmem:[%s2783_s1 + $0xf8] sm:$0xff]  ;;  %1044 = vmatpush.bf16.msra.mxu2 %v2028_v2  ;;  %v2035_v7 = vld [vmem:[%s2783_s1 + $0xf0] sm:$0xff]  ;;  %v2034_v11 = vld [vmem:[%s2783_s1 + $0xe8] sm:$0xff] }
   0x5   :  { %1093 = vmatpush.bf16.msra.mxu3 %v2036_v3  ;;  %v2009_v12 = vld [vmem:[%s2783_s1 + $0x20] sm:$0xff]  ;;  %v2008_v16 = vld [vmem:[%s2783_s1 + $0x18] sm:$0xff]  ;;  %v2007_v20 = vld [vmem:[%s2783_s1 + $0x10] sm:$0xff] }
   0x6   :  { %947 = vmatpush.bf16.msra.mxu0 %v2011_v4  ;;  %v2017_v13 = vld [vmem:[%s2783_s1 + $0x60] sm:$0xff]  ;;  %v2016_v17 = vld [vmem:[%s2783_s1 + $0x58] sm:$0xff]  ;;  %v2015_v21 = vld [vmem:[%s2783_s1 + $0x50] sm:$0xff] }
   0x7   :  { %996 = vmatpush.bf16.msra.mxu1 %v2019_v5  ;;  %v2025_v14 = vld [vmem:[%s2783_s1 + $0xa0] sm:$0xff]  ;;  %v2024_v18 = vld [vmem:[%s2783_s1 + $0x98] sm:$0xff]  ;;  %v2023_v22 = vld [vmem:[%s2783_s1 + $0x90] sm:$0xff] }
   0x8   :  { %1045 = vmatpush.bf16.msra.mxu2 %v2027_v6  ;;  %v2033_v15 = vld [vmem:[%s2783_s1 + $0xe0] sm:$0xff]  ;;  %v2032_v19 = vld [vmem:[%s2783_s1 + $0xd8] sm:$0xff]  ;;  %v2031_v23 = vld [vmem:[%s2783_s1 + $0xd0] sm:$0xff] }
   0x9   :  { %1094 = vmatpush.bf16.msra.mxu3 %v2035_v7  ;;  %v2006_v24 = vld [vmem:[%s2783_s1 + $0x8] sm:$0xff]  ;;  %v2005_v28 = vld [vmem:[%s2783_s1] sm:$0xff]  ;;  %v2060_v40 = vld [vmem:[%s2783_s1 + $0x1b8] sm:$0xff] }
   0xa   :  { %948 = vmatpush.bf16.msra.mxu0 %v2010_v8  ;;  %v2014_v25 = vld [vmem:[%s2783_s1 + $0x48] sm:$0xff]  ;;  %v2013_v29 = vld [vmem:[%s2783_s1 + $0x40] sm:$0xff]  ;;  %v2044_v41 = vld [vmem:[%s2783_s1 + $0x138] sm:$0xff] }
   0xb   :  { %997 = vmatpush.bf16.msra.mxu1 %v2018_v9  ;;  %v2022_v26 = vld [vmem:[%s2783_s1 + $0x88] sm:$0xff]  ;;  %v2021_v30 = vld [vmem:[%s2783_s1 + $0x80] sm:$0xff]  ;;  %v2068_v46 = vld [vmem:[%s2783_s1 + $0x1f8] sm:$0xff] }
   0xc   :  { %1046 = vmatpush.bf16.msra.mxu2 %v2026_v10  ;;  %v2030_v27 = vld [vmem:[%s2783_s1 + $0xc8] sm:$0xff]  ;;  %v2029_v31 = vld [vmem:[%s2783_s1 + $0xc0] sm:$0xff]  ;;  %v2052_v47 = vld [vmem:[%s2783_s1 + $0x178] sm:$0xff] }
   0xd   :  { %1095 = vmatpush.bf16.msra.mxu3 %v2034_v11  ;;  %v1431_v32 = vld [vmem:[%s2784_s0] sm:$0xf]  ;;  %v1941_v34 = vld [vmem:[%s2784_s0 + $0x4] sm:$0xf]  ;;  %v1439_v36 = vld [vmem:[%s2784_s0 + $0x8] sm:$0xf] }
   0xe   :  { %949 = vmatpush.bf16.msra.mxu0 %v2009_v12  ;;  %v1945_v33 = vld [vmem:[%s2784_s0 + $0x1c] sm:$0xf0]  ;;  %v1433_v35 = vld [vmem:[%s2784_s0 + $0x20] sm:$0xf0]  ;;  %v1946_v37 = vld [vmem:[%s2784_s0 + $0x24] sm:$0xf0] }
   0xf   :  { %998 = vmatpush.bf16.msra.mxu1 %v2017_v13  ;;  %v1942_v38 = vld [vmem:[%s2784_s0 + $0xc] sm:$0xf]  ;;  %v1432_v42 = vor.u32 %v1945_v33, %v1431_v32  ;;  %v1436_v43 = vor.u32 %v1941_v34, %v1433_v35  ;;  %v1440_v44 = vor.u32 %v1946_v37, %v1439_v36  ;;  %v2059_v48 = vld [vmem:[%s2783_s1 + $0x1b0] sm:$0xff]  ;;  %v1463_v56 = vld [vmem:[%s2784_s0 + $0x40] sm:$0xf] }
  0x10   :  { %1047 = vmatpush.bf16.msra.mxu2 %v2025_v14  ;;  %v1441_v39 = vld [vmem:[%s2784_s0 + $0x28] sm:$0xf0]  ;;  %v2043_v49 = vld [vmem:[%s2783_s1 + $0x130] sm:$0xff]  ;;  %v1953_v57 = vld [vmem:[%s2784_s0 + $0x5c] sm:$0xf0] }
  0x11   :  { %1096 = vmatpush.bf16.msra.mxu3 %v2033_v15  ;;  %v1444_v45 = vor.u32 %v1942_v38, %v1441_v39  ;;  %v2067_v50 = vld [vmem:[%s2783_s1 + $0x1f0] sm:$0xff]  ;;  %v2058_v52 = vld [vmem:[%s2783_s1 + $0x1a8] sm:$0xff]  ;;  %v1949_v58 = vld [vmem:[%s2784_s0 + $0x44] sm:$0xf]  ;;  %v1464_v0 = vor.u32 %v1953_v57, %v1463_v56 }
  0x12   :  { %950 = vmatpush.bf16.msra.mxu0 %v2008_v16  ;;  %v2051_v51 = vld [vmem:[%s2783_s1 + $0x170] sm:$0xff]  ;;  %v2042_v53 = vld [vmem:[%s2783_s1 + $0x128] sm:$0xff]  ;;  %v1465_v59 = vld [vmem:[%s2784_s0 + $0x60] sm:$0xf0] }
  0x13   :  { %999 = vmatpush.bf16.msra.mxu1 %v2016_v17  ;;  %v2066_v54 = vld [vmem:[%s2783_s1 + $0x1e8] sm:$0xff]  ;;  %v1468_v1 = vor.u32 %v1949_v58, %v1465_v59  ;;  %v2057_v4 = vld [vmem:[%s2783_s1 + $0x1a0] sm:$0xff]  ;;  %v2055_v36 = vld [vmem:[%s2783_s1 + $0x190] sm:$0xff] }
  0x14   :  { %1048 = vmatpush.bf16.msra.mxu2 %v2024_v18  ;;  %v2050_v55 = vld [vmem:[%s2783_s1 + $0x168] sm:$0xff]  ;;  %v2041_v5 = vld [vmem:[%s2783_s1 + $0x120] sm:$0xff]  ;;  %v2039_v37 = vld [vmem:[%s2783_s1 + $0x110] sm:$0xff] }
  0x15   :  { %1097 = vmatpush.bf16.msra.mxu3 %v2032_v19  ;;  %v1471_v60 = vld [vmem:[%s2784_s0 + $0x48] sm:$0xf]  ;;  %v1950_v62 = vld [vmem:[%s2784_s0 + $0x4c] sm:$0xf]  ;;  %v2065_v6 = vld [vmem:[%s2783_s1 + $0x1e0] sm:$0xff] }
  0x16   :  { %951 = vmatpush.bf16.msra.mxu0 %v2007_v20  ;;  %v1954_v61 = vld [vmem:[%s2784_s0 + $0x64] sm:$0xf0]  ;;  %v1473_v63 = vld [vmem:[%s2784_s0 + $0x68] sm:$0xf0]  ;;  %v2049_v7 = vld [vmem:[%s2783_s1 + $0x160] sm:$0xff] }
  0x17   :  { %1000 = vmatpush.bf16.msra.mxu1 %v2015_v21  ;;  %v1472_v2 = vor.u32 %v1954_v61, %v1471_v60  ;;  %v1476_v3 = vor.u32 %v1950_v62, %v1473_v63  ;;  %v1495_v8 = vld [vmem:[%s2784_s0 + $0x80] sm:$0xf]  ;;  %v1957_v10 = vld [vmem:[%s2784_s0 + $0x84] sm:$0xf]  ;;  %v1503_v12 = vld [vmem:[%s2784_s0 + $0x88] sm:$0xf] }
  0x18   :  { %1049 = vmatpush.bf16.msra.mxu2 %v2023_v22  ;;  %v1961_v9 = vld [vmem:[%s2784_s0 + $0x9c] sm:$0xf0]  ;;  %v1497_v11 = vld [vmem:[%s2784_s0 + $0xa0] sm:$0xf0]  ;;  %v1962_v13 = vld [vmem:[%s2784_s0 + $0xa4] sm:$0xf0] }
  0x19   :  { %1098 = vmatpush.bf16.msra.mxu3 %v2031_v23  ;;  %v1958_v14 = vld [vmem:[%s2784_s0 + $0x8c] sm:$0xf]  ;;  %v1496_v16 = vor.u32 %v1961_v9, %v1495_v8  ;;  %v1500_v17 = vor.u32 %v1957_v10, %v1497_v11  ;;  %v1504_v18 = vor.u32 %v1962_v13, %v1503_v12  ;;  %v2056_v20 = vld [vmem:[%s2783_s1 + $0x198] sm:$0xff]  ;;  %v2063_v38 = vld [vmem:[%s2783_s1 + $0x1d0] sm:$0xff] }
  0x1a   :  { %952 = vmatpush.bf16.msra.mxu0 %v2006_v24  ;;  %v1505_v15 = vld [vmem:[%s2784_s0 + $0xa8] sm:$0xf0]  ;;  %v2040_v21 = vld [vmem:[%s2783_s1 + $0x118] sm:$0xff]  ;;  %v1527_v24 = vld [vmem:[%s2784_s0 + $0xc0] sm:$0xf] }
  0x1b   :  { %1001 = vmatpush.bf16.msra.mxu1 %v2014_v25  ;;  %v1508_v19 = vor.u32 %v1958_v14, %v1505_v15  ;;  %v2064_v22 = vld [vmem:[%s2783_s1 + $0x1d8] sm:$0xff]  ;;  %v1969_v25 = vld [vmem:[%s2784_s0 + $0xdc] sm:$0xf0]  ;;  %v2047_v39 = vld [vmem:[%s2783_s1 + $0x150] sm:$0xff] }
  0x1c   :  { %1050 = vmatpush.bf16.msra.mxu2 %v2022_v26  ;;  %v2048_v23 = vld [vmem:[%s2783_s1 + $0x158] sm:$0xff]  ;;  %v1965_v26 = vld [vmem:[%s2784_s0 + $0xc4] sm:$0xf]  ;;  %v1528_v32 = vor.u32 %v1969_v25, %v1527_v24  ;;  %v1591_v56 = vld [vmem:[%s2784_s0 + $0x140] sm:$0xf] }
  0x1d   :  { %1099 = vmatpush.bf16.msra.mxu3 %v2030_v27  ;;  %v1529_v27 = vld [vmem:[%s2784_s0 + $0xe0] sm:$0xf0]  ;;  %v1985_v57 = vld [vmem:[%s2784_s0 + $0x15c] sm:$0xf0]  ;;  %v1599_v60 = vld [vmem:[%s2784_s0 + $0x148] sm:$0xf] }
  0x1e   :  { %953 = vmatpush.bf16.msra.mxu0 %v2005_v28  ;;  %v1535_v28 = vld [vmem:[%s2784_s0 + $0xc8] sm:$0xf]  ;;  %v1532_v33 = vor.u32 %v1965_v26, %v1529_v27  ;;  %v1981_v58 = vld [vmem:[%s2784_s0 + $0x144] sm:$0xf]  ;;  %v1982_v62 = vld [vmem:[%s2784_s0 + $0x14c] sm:$0xf] }
  0x1f   :  { %1002 = vmatpush.bf16.msra.mxu1 %v2013_v29  ;;  %v1970_v29 = vld [vmem:[%s2784_s0 + $0xe4] sm:$0xf0]  ;;  %v1593_v59 = vld [vmem:[%s2784_s0 + $0x160] sm:$0xf0]  ;;  %v1601_v63 = vld [vmem:[%s2784_s0 + $0x168] sm:$0xf0] }
  0x20   :  { %1051 = vmatpush.bf16.msra.mxu2 %v2021_v30  ;;  %v1966_v30 = vld [vmem:[%s2784_s0 + $0xcc] sm:$0xf]  ;;  %v1536_v34 = vor.u32 %v1970_v29, %v1535_v28  ;;  %v1986_v61 = vld [vmem:[%s2784_s0 + $0x164] sm:$0xf0]  ;;  %v1623_v8 = vld [vmem:[%s2784_s0 + $0x180] sm:$0xf] }
  0x21   :  { %1100 = vmatpush.bf16.msra.mxu3 %v2029_v31  ;;  %954 = vmatmul.bf16.vlgmr.msra.gmra.mxu0 %v1432_v42  ;;  %v1537_v31 = vld [vmem:[%s2784_s0 + $0xe8] sm:$0xf0]  ;;  %v1973_v42 = vld [vmem:[%s2784_s0 + $0x104] sm:$0xf]  ;;  %v1993_v9 = vld [vmem:[%s2784_s0 + $0x19c] sm:$0xf0] }
  0x22   :  { %1142 = vmatpush.bf16.msrb.mxu0 %v2044_v41  ;;  %1003 = vmatmul.bf16.vlgmr.msra.gmra.mxu1 %v1436_v43  ;;  %v1540_v35 = vor.u32 %v1966_v30, %v1537_v31  ;;  %v1977_v41 = vld [vmem:[%s2784_s0 + $0x11c] sm:$0xf0]  ;;  %v1561_v43 = vld [vmem:[%s2784_s0 + $0x120] sm:$0xf0]  ;;  %v1631_v12 = vld [vmem:[%s2784_s0 + $0x188] sm:$0xf] }
  0x23   :  { %1052 = vmatmul.bf16.vlgmr.msra.gmra.mxu2 %v1440_v44  ;;  %1191 = vmatpush.bf16.msrb.mxu1 %v2052_v47  ;;  %v1567_v44 = vld [vmem:[%s2784_s0 + $0x108] sm:$0xf]  ;;  %v1569_v47 = vld [vmem:[%s2784_s0 + $0x128] sm:$0xf0]  ;;  %v1989_v10 = vld [vmem:[%s2784_s0 + $0x184] sm:$0xf] }
  0x24   :  { %1240 = vmatpush.bf16.msrb.mxu2 %v2060_v40  ;;  %1101 = vmatmul.bf16.vlgmr.msra.gmra.mxu3 %v1444_v45  ;;  %v1559_v40 = vld [vmem:[%s2784_s0 + $0x100] sm:$0xf]  ;;  %v1978_v45 = vld [vmem:[%s2784_s0 + $0x124] sm:$0xf0]  ;;  %v1625_v11 = vld [vmem:[%s2784_s0 + $0x1a0] sm:$0xf0] }
  0x25   :  { %1289 = vmatpush.bf16.msrb.mxu3 %v2068_v46  ;;  %v1974_v46 = vld [vmem:[%s2784_s0 + $0x10c] sm:$0xf]  ;;  %v1994_v13 = vld [vmem:[%s2784_s0 + $0x1a4] sm:$0xf0] }
  0x26   :  { %1143 = vmatpush.bf16.msrb.mxu0 %v2043_v49  ;;  %v1564_v49 = vor.u32 %v1973_v42, %v1561_v43  ;;  %v1990_v14 = vld [vmem:[%s2784_s0 + $0x18c] sm:$0xf]  ;;  %v1663_v24 = vld [vmem:[%s2784_s0 + $0x1c8] sm:$0xf] }
  0x27   :  { %1192 = vmatpush.bf16.msrb.mxu1 %v2051_v51  ;;  %v1572_v51 = vor.u32 %v1974_v46, %v1569_v47  ;;  %v1633_v15 = vld [vmem:[%s2784_s0 + $0x1a8] sm:$0xf0]  ;;  %v2002_v25 = vld [vmem:[%s2784_s0 + $0x1e4] sm:$0xf0] }
  0x28   :  { %1241 = vmatpush.bf16.msrb.mxu2 %v2059_v48  ;;  %v1560_v48 = vor.u32 %v1977_v41, %v1559_v40  ;;  %v1998_v26 = vld [vmem:[%s2784_s0 + $0x1cc] sm:$0xf]  ;;  %v1664_v30 = vor.u32 %v2002_v25, %v1663_v24 }
  0x29   :  { %1290 = vmatpush.bf16.msrb.mxu3 %v2067_v50  ;;  %v1568_v50 = vor.u32 %v1978_v45, %v1567_v44  ;;  %v1665_v27 = vld [vmem:[%s2784_s0 + $0x1e8] sm:$0xf0] }
  0x2a   :  { %1144 = vmatpush.bf16.msrb.mxu0 %v2042_v53  ;;  %v2038_v53 = vld [vmem:[%s2783_s1 + $0x108] sm:$0xff]  ;;  %v1668_v31 = vor.u32 %v1998_v26, %v1665_v27 }
  0x2b   :  { %1193 = vmatpush.bf16.msrb.mxu1 %v2050_v55  ;;  %v2046_v55 = vld [vmem:[%s2783_s1 + $0x148] sm:$0xff] }
  0x2c   :  { %1242 = vmatpush.bf16.msrb.mxu2 %v2058_v52  ;;  %v2054_v52 = vld [vmem:[%s2783_s1 + $0x188] sm:$0xff] }
  0x2d   :  { %1291 = vmatpush.bf16.msrb.mxu3 %v2066_v54  ;;  %v2062_v54 = vld [vmem:[%s2783_s1 + $0x1c8] sm:$0xff] }
  0x2e   :  { %1145 = vmatpush.bf16.msrb.mxu0 %v2041_v5  ;;  %v2037_v5 = vld [vmem:[%s2783_s1 + $0x100] sm:$0xff] }
  0x2f   :  { %1194 = vmatpush.bf16.msrb.mxu1 %v2049_v7  ;;  %v2045_v7 = vld [vmem:[%s2783_s1 + $0x140] sm:$0xff] }
  0x30   :  { %1243 = vmatpush.bf16.msrb.mxu2 %v2057_v4  ;;  %v2053_v4 = vld [vmem:[%s2783_s1 + $0x180] sm:$0xff] }
  0x31   :  { %959 = vmatmul.bf16.gmra.mxu0 %v1464_v0  ;;  %1292 = vmatpush.bf16.msrb.mxu3 %v2065_v6  ;;  %v1592_v0 = vor.u32 %v1985_v57, %v1591_v56  ;;  %v2061_v6 = vld [vmem:[%s2783_s1 + $0x1c0] sm:$0xff]  ;;  %v1951_v56 = vld [vmem:[%s2784_s0 + $0x54] sm:$0xf] }
  0x32   :  { %1008 = vmatmul.bf16.gmra.mxu1 %v1468_v1  ;;  %1146 = vmatpush.bf16.msrb.mxu0 %v2040_v21  ;;  %v1596_v1 = vor.u32 %v1981_v58, %v1593_v59  ;;  %v2001_v21 = vld [vmem:[%s2784_s0 + $0x1dc] sm:$0xf0]  ;;  %v1481_v57 = vld [vmem:[%s2784_s0 + $0x70] sm:$0xf0]  ;;  %v1487_v58 = vld [vmem:[%s2784_s0 + $0x58] sm:$0xf] }
  0x33   :  { %1057 = vmatmul.bf16.gmra.mxu2 %v1472_v2  ;;  %1195 = vmatpush.bf16.msrb.mxu1 %v2048_v23  ;;  %v1600_v2 = vor.u32 %v1986_v61, %v1599_v60  ;;  %v1657_v23 = vld [vmem:[%s2784_s0 + $0x1e0] sm:$0xf0]  ;;  %v1956_v59 = vld [vmem:[%s2784_s0 + $0x74] sm:$0xf0]  ;;  %v1952_v60 = vld [vmem:[%s2784_s0 + $0x5c] sm:$0xf] }
  0x34   :  { %1106 = vmatmul.bf16.gmra.mxu3 %v1476_v3  ;;  %1244 = vmatpush.bf16.msrb.mxu2 %v2056_v20  ;;  %v1604_v3 = vor.u32 %v1982_v62, %v1601_v63  ;;  %v1655_v20 = vld [vmem:[%s2784_s0 + $0x1c0] sm:$0xf]  ;;  %v1489_v61 = vld [vmem:[%s2784_s0 + $0x78] sm:$0xf0] }
  0x35   :  { %1293 = vmatpush.bf16.msrb.mxu3 %v2064_v22  ;;  %v1997_v22 = vld [vmem:[%s2784_s0 + $0x1c4] sm:$0xf]  ;;  %v1656_v28 = vor.u32 %v2001_v21, %v1655_v20  ;;  %v1519_v20 = vld [vmem:[%s2784_s0 + $0x98] sm:$0xf] }
  0x36   :  { %1147 = vmatpush.bf16.msrb.mxu0 %v2039_v37  ;;  %v1660_v29 = vor.u32 %v1997_v22, %v1657_v23  ;;  %v1948_v37 = vld [vmem:[%s2784_s0 + $0x34] sm:$0xf0]  ;;  %v1960_v22 = vld [vmem:[%s2784_s0 + $0x9c] sm:$0xf] }
  0x37   :  { %1196 = vmatpush.bf16.msrb.mxu1 %v2047_v39  ;;  %v1457_v39 = vld [vmem:[%s2784_s0 + $0x38] sm:$0xf0]  ;;  %v1964_v21 = vld [vmem:[%s2784_s0 + $0xb4] sm:$0xf0] }
  0x38   :  { %1245 = vmatpush.bf16.msrb.mxu2 %v2055_v36  ;;  %v1455_v36 = vld [vmem:[%s2784_s0 + $0x18] sm:$0xf]  ;;  %v1521_v23 = vld [vmem:[%s2784_s0 + $0xb8] sm:$0xf0] }
  0x39   :  { %1294 = vmatpush.bf16.msrb.mxu3 %v2063_v38  ;;  %v1944_v38 = vld [vmem:[%s2784_s0 + $0x1c] sm:$0xf]  ;;  %v1456_v44 = vor.u32 %v1948_v37, %v1455_v36 }
  0x3a   :  { %1148 = vmatpush.bf16.msrb.mxu0 %v2038_v53  ;;  %v1460_v45 = vor.u32 %v1944_v38, %v1457_v39 }
  0x3b   :  { %1197 = vmatpush.bf16.msrb.mxu1 %v2046_v55  ;;  %v1955_v55 = vld [vmem:[%s2784_s0 + $0x6c] sm:$0xf0] }
  0x3c   :  { %1246 = vmatpush.bf16.msrb.mxu2 %v2054_v52 }
  0x3d   :  { %1295 = vmatpush.bf16.msrb.mxu3 %v2062_v54  ;;  %v1479_v54 = vld [vmem:[%s2784_s0 + $0x50] sm:$0xf] }
  0x3e   :  { %1149 = vmatpush.bf16.msrb.mxu0 %v2037_v5  ;;  %v1488_v5 = vor.u32 %v1956_v59, %v1487_v58 }
  0x3f   :  { %1198 = vmatpush.bf16.msrb.mxu1 %v2045_v7 }
  0x40   :  { %1247 = vmatpush.bf16.msrb.mxu2 %v2053_v4 }
  0x41   :  { %964 = vmatmul.bf16.gmra.mxu0 %v1496_v16  ;;  %1296 = vmatpush.bf16.msrb.mxu3 %v2061_v6  ;;  %v1624_v16 = vor.u32 %v1993_v9, %v1623_v8  ;;  %v1492_v6 = vor.u32 %v1952_v60, %v1489_v61 }
  0x42   :  { %1013 = vmatmul.bf16.gmra.mxu1 %v1500_v17  ;;  %v1628_v17 = vor.u32 %v1989_v10, %v1625_v11 }
  0x43   :  { %1062 = vmatmul.bf16.gmra.mxu2 %v1504_v18  ;;  %v1632_v18 = vor.u32 %v1994_v13, %v1631_v12 }
  0x44   :  { %1111 = vmatmul.bf16.gmra.mxu3 %v1508_v19  ;;  %v1636_v19 = vor.u32 %v1990_v14, %v1633_v15 }
  0x51   :  { %969 = vmatmul.bf16.gmra.mxu0 %v1528_v32  ;;  %v1447_v32 = vld [vmem:[%s2784_s0 + $0x10] sm:$0xf] }
  0x52   :  { %1018 = vmatmul.bf16.gmra.mxu1 %v1532_v33  ;;  %v1947_v33 = vld [vmem:[%s2784_s0 + $0x2c] sm:$0xf0] }
  0x53   :  { %1067 = vmatmul.bf16.gmra.mxu2 %v1536_v34  ;;  %v1943_v34 = vld [vmem:[%s2784_s0 + $0x14] sm:$0xf]  ;;  %v1448_v40 = vor.u32 %v1947_v33, %v1447_v32  ;;  %v1524_v32 = vor.u32 %v1960_v22, %v1521_v23 }
  0x54   :  { %1116 = vmatmul.bf16.gmra.mxu3 %v1540_v35  ;;  %v1449_v35 = vld [vmem:[%s2784_s0 + $0x30] sm:$0xf0] }
  0x55   :  { %v1452_v41 = vor.u32 %v1943_v34, %v1449_v35 }
  0x61   :  { %974 = vmatmul.bf16.gmra.mxu0 %v1560_v48 }
  0x62   :  { %1023 = vmatmul.bf16.gmra.mxu1 %v1564_v49 }
  0x63   :  { %1072 = vmatmul.bf16.gmra.mxu2 %v1568_v50 }
  0x64   :  { %1121 = vmatmul.bf16.gmra.mxu3 %v1572_v51 }
  0x71   :  { %979 = vmatmul.bf16.gmra.mxu0 %v1592_v0  ;;  %v1480_v0 = vor.u32 %v1955_v55, %v1479_v54 }
  0x72   :  { %1028 = vmatmul.bf16.gmra.mxu1 %v1596_v1  ;;  %v1484_v1 = vor.u32 %v1951_v56, %v1481_v57 }
  0x73   :  { %1077 = vmatmul.bf16.gmra.mxu2 %v1600_v2 }
  0x74   :  { %1126 = vmatmul.bf16.gmra.mxu3 %v1604_v3 }
  0x81   :  { %984 = vmatmul.bf16.gmra.mxu0 %v1624_v16  ;;  %v1511_v16 = vld [vmem:[%s2784_s0 + $0x90] sm:$0xf] }
  0x82   :  { %1033 = vmatmul.bf16.gmra.mxu1 %v1628_v17  ;;  %v1963_v17 = vld [vmem:[%s2784_s0 + $0xac] sm:$0xf0] }
  0x83   :  { %1082 = vmatmul.bf16.gmra.mxu2 %v1632_v18  ;;  %v1959_v18 = vld [vmem:[%s2784_s0 + $0x94] sm:$0xf]  ;;  %v1512_v26 = vor.u32 %v1963_v17, %v1511_v16 }
  0x84   :  { %1131 = vmatmul.bf16.gmra.mxu3 %v1636_v19  ;;  %v1513_v19 = vld [vmem:[%s2784_s0 + $0xb0] sm:$0xf0] }
  0x85   :  { %v1516_v27 = vor.u32 %v1959_v18, %v1513_v19 }
  0x91   :  { %989 = vmatmul.bf16.gmra.mxu0 %v1656_v28 }
  0x92   :  { %1038 = vmatmul.bf16.gmra.mxu1 %v1660_v29 }
  0x93   :  { %1087 = vmatmul.bf16.gmra.mxu2 %v1664_v30 }
  0x94   :  { %1136 = vmatmul.bf16.gmra.mxu3 %v1668_v31  ;;  %v1520_v31 = vor.u32 %v1964_v21, %v1519_v20 }
  0x9e   :  { %v955_v42 = vpop.f32.mrf.mxu0 }
  0x9f   :  { %v1004_v43 = vpop.f32.mrf.mxu1 }
  0xa0   :  { %v1005_v46 = vadd.f32 %v1004_v43, %v955_v42  ;;  %v1543_v42 = vld [vmem:[%s2784_s0 + $0xd0] sm:$0xf] }
  0xa1   :  { %1150 = vmatmul.bf16.vlgmr.msrb.gmra.mxu0 %v1448_v40  ;;  %v1971_v43 = vld [vmem:[%s2784_s0 + $0xec] sm:$0xf0] }
  0xa2   :  { %1199 = vmatmul.bf16.vlgmr.msrb.gmra.mxu1 %v1452_v41 }
  0xa3   :  { %1248 = vmatmul.bf16.vlgmr.msrb.gmra.mxu2 %v1456_v44  ;;  %v1967_v44 = vld [vmem:[%s2784_s0 + $0xd4] sm:$0xf] }
  0xa4   :  { %1297 = vmatmul.bf16.vlgmr.msrb.gmra.mxu3 %v1460_v45  ;;  %v1545_v45 = vld [vmem:[%s2784_s0 + $0xf0] sm:$0xf0] }
  0xa5   :  { %v1548_v54 = vor.u32 %v1967_v44, %v1545_v45 }
  0xa6   :  { %v1053_v47 = vpop.f32.mrf.mxu2  ;;  %v957_v50 = vpop.f32.mrf.mxu0 }
  0xa7   :  { %v1102_v48 = vpop.f32.mrf.mxu3  ;;  %v1054_v49 = vadd.f32 %v1053_v47, %v1005_v46  ;;  %v1006_v51 = vpop.f32.mrf.mxu1  ;;  %v1551_v46 = vld [vmem:[%s2784_s0 + $0xd8] sm:$0xf] }
  0xa8   :  { %v1007_v52 = vadd.f32 %v1006_v51, %v957_v50  ;;  %v1972_v47 = vld [vmem:[%s2784_s0 + $0xf4] sm:$0xf0] }
  0xa9   :  { %v2498_v53 = vadd.f32 %v1102_v48, %v1054_v49  ;;  %v1968_v48 = vld [vmem:[%s2784_s0 + $0xdc] sm:$0xf]  ;;  %v1552_v58 = vor.u32 %v1972_v47, %v1551_v46 }
  0xaa   :  { %v1553_v49 = vld [vmem:[%s2784_s0 + $0xf8] sm:$0xf0] }
  0xab   :  { %v1556_v59 = vor.u32 %v1968_v48, %v1553_v49 }
  0xae   :  { %v1055_v62 = vpop.f32.mrf.mxu2  ;;  %v960_v3 = vpop.f32.mrf.mxu0 }
  0xaf   :  { %v1104_v63 = vpop.f32.mrf.mxu3  ;;  %v1056_v2 = vadd.f32 %v1055_v62, %v1007_v52  ;;  %v1009_v4 = vpop.f32.mrf.mxu1  ;;  %v1544_v52 = vor.u32 %v1971_v43, %v1543_v42  ;;  %v1617_v42 = vld [vmem:[%s2784_s0 + $0x178] sm:$0xf0] }
  0xb0   :  { %v1010_v7 = vadd.f32 %v1009_v4, %v960_v3 }
  0xb1   :  { %v2524_v8 = vadd.f32 %v1104_v63, %v1056_v2  ;;  %1155 = vmatmul.bf16.gmra.mxu0 %v1480_v0 }
  0xb2   :  { %1204 = vmatmul.bf16.gmra.mxu1 %v1484_v1 }
  0xb3   :  { %1253 = vmatmul.bf16.gmra.mxu2 %v1488_v5  ;;  %v1575_v5 = vld [vmem:[%s2784_s0 + $0x110] sm:$0xf] }
  0xb4   :  { %1302 = vmatmul.bf16.gmra.mxu3 %v1492_v6  ;;  %v1979_v6 = vld [vmem:[%s2784_s0 + $0x12c] sm:$0xf0] }
  0xb5   :  { %v1576_v17 = vor.u32 %v1979_v6, %v1575_v5  ;;  %v1996_v5 = vld [vmem:[%s2784_s0 + $0x1b4] sm:$0xf0]  ;;  %v1992_v6 = vld [vmem:[%s2784_s0 + $0x19c] sm:$0xf] }
  0xb6   :  { %v1058_v9 = vpop.f32.mrf.mxu2  ;;  %v962_v12 = vpop.f32.mrf.mxu0 }
  0xb7   :  { %v1107_v10 = vpop.f32.mrf.mxu3  ;;  %v1059_v11 = vadd.f32 %v1058_v9, %v1010_v7  ;;  %v1011_v13 = vpop.f32.mrf.mxu1  ;;  %v1975_v7 = vld [vmem:[%s2784_s0 + $0x114] sm:$0xf] }
  0xb8   :  { %v1012_v14 = vadd.f32 %v1011_v13, %v962_v12  ;;  %v1577_v9 = vld [vmem:[%s2784_s0 + $0x130] sm:$0xf0]  ;;  %v1976_v12 = vld [vmem:[%s2784_s0 + $0x11c] sm:$0xf] }
  0xb9   :  { %v2526_v15 = vadd.f32 %v1107_v10, %v1059_v11  ;;  %v1583_v10 = vld [vmem:[%s2784_s0 + $0x118] sm:$0xf]  ;;  %v1585_v13 = vld [vmem:[%s2784_s0 + $0x138] sm:$0xf0]  ;;  %v1580_v18 = vor.u32 %v1975_v7, %v1577_v9 }
  0xba   :  { %v1980_v11 = vld [vmem:[%s2784_s0 + $0x134] sm:$0xf0]  ;;  %v1588_v23 = vor.u32 %v1976_v12, %v1585_v13  ;;  %v1649_v7 = vld [vmem:[%s2784_s0 + $0x1b8] sm:$0xf0] }
  0xbb   :  { %v1584_v22 = vor.u32 %v1980_v11, %v1583_v10 }
  0xbe   :  { %v1060_v24 = vpop.f32.mrf.mxu2  ;;  %v965_v29 = vpop.f32.mrf.mxu0 }
  0xbf   :  { %v1109_v25 = vpop.f32.mrf.mxu3  ;;  %v1061_v28 = vadd.f32 %v1060_v24, %v1012_v14  ;;  %v1014_v30 = vpop.f32.mrf.mxu1 }
  0xc0   :  { %v1015_v33 = vadd.f32 %v1014_v30, %v965_v29 }
  0xc1   :  { %v2552_v34 = vadd.f32 %v1109_v25, %v1061_v28  ;;  %1160 = vmatmul.bf16.gmra.mxu0 %v1512_v26 }
  0xc2   :  { %1209 = vmatmul.bf16.gmra.mxu1 %v1516_v27 }
  0xc3   :  { %1258 = vmatmul.bf16.gmra.mxu2 %v1520_v31 }
  0xc4   :  { %1307 = vmatmul.bf16.gmra.mxu3 %v1524_v32 }
  0xc6   :  { %v1063_v35 = vpop.f32.mrf.mxu2  ;;  %v967_v38 = vpop.f32.mrf.mxu0 }
  0xc7   :  { %v1112_v36 = vpop.f32.mrf.mxu3  ;;  %v1064_v37 = vadd.f32 %v1063_v35, %v1015_v33  ;;  %v1016_v39 = vpop.f32.mrf.mxu1  ;;  %v1607_v33 = vld [vmem:[%s2784_s0 + $0x150] sm:$0xf] }
  0xc8   :  { %v1017_v40 = vadd.f32 %v1016_v39, %v967_v38  ;;  %v1987_v35 = vld [vmem:[%s2784_s0 + $0x16c] sm:$0xf0]  ;;  %v1615_v38 = vld [vmem:[%s2784_s0 + $0x158] sm:$0xf] }
  0xc9   :  { %v2554_v41 = vadd.f32 %v1112_v36, %v1064_v37  ;;  %v1983_v36 = vld [vmem:[%s2784_s0 + $0x154] sm:$0xf]  ;;  %v1988_v39 = vld [vmem:[%s2784_s0 + $0x174] sm:$0xf0]  ;;  %v1608_v45 = vor.u32 %v1987_v35, %v1607_v33 }
  0xca   :  { %v1609_v37 = vld [vmem:[%s2784_s0 + $0x170] sm:$0xf0]  ;;  %v1679_v35 = vld [vmem:[%s2784_s0 + $0x1d8] sm:$0xf] }
  0xcb   :  { %v1612_v46 = vor.u32 %v1983_v36, %v1609_v37  ;;  %v1673_v33 = vld [vmem:[%s2784_s0 + $0x1f0] sm:$0xf0]  ;;  %v2004_v36 = vld [vmem:[%s2784_s0 + $0x1f4] sm:$0xf0]  ;;  %v2000_v37 = vld [vmem:[%s2784_s0 + $0x1dc] sm:$0xf] }
  0xce   :  { %v1065_v50 = vpop.f32.mrf.mxu2  ;;  %v970_v56 = vpop.f32.mrf.mxu0 }
  0xcf   :  { %v1114_v51 = vpop.f32.mrf.mxu3  ;;  %v1066_v55 = vadd.f32 %v1065_v50, %v1017_v40  ;;  %v1019_v57 = vpop.f32.mrf.mxu1  ;;  %v1984_v40 = vld [vmem:[%s2784_s0 + $0x15c] sm:$0xf]  ;;  %v1616_v50 = vor.u32 %v1988_v39, %v1615_v38 }
  0xd0   :  { %v1020_v60 = vadd.f32 %v1019_v57, %v970_v56  ;;  %v1681_v38 = vld [vmem:[%s2784_s0 + $0x1f8] sm:$0xf0] }
  0xd1   :  { %v2580_v61 = vadd.f32 %v1114_v51, %v1066_v55  ;;  %1165 = vmatmul.bf16.gmra.mxu0 %v1544_v52  ;;  %v1620_v51 = vor.u32 %v1984_v40, %v1617_v42 }
  0xd2   :  { %1214 = vmatmul.bf16.gmra.mxu1 %v1548_v54 }
  0xd3   :  { %1263 = vmatmul.bf16.gmra.mxu2 %v1552_v58 }
  0xd4   :  { %1312 = vmatmul.bf16.gmra.mxu3 %v1556_v59 }
  0xd6   :  { %v1068_v62 = vpop.f32.mrf.mxu2  ;;  %v972_v1 = vpop.f32.mrf.mxu0 }
  0xd7   :  { %v1117_v63 = vpop.f32.mrf.mxu3  ;;  %v1069_v0 = vadd.f32 %v1068_v62, %v1020_v60  ;;  %v1021_v2 = vpop.f32.mrf.mxu1 }
  0xd8   :  { %v1022_v3 = vadd.f32 %v1021_v2, %v972_v1  ;;  %v1991_v1 = vld [vmem:[%s2784_s0 + $0x194] sm:$0xf] }
  0xd9   :  { %v2582_v4 = vadd.f32 %v1117_v63, %v1069_v0  ;;  %v1639_v63 = vld [vmem:[%s2784_s0 + $0x190] sm:$0xf]  ;;  %v1641_v2 = vld [vmem:[%s2784_s0 + $0x1b0] sm:$0xf0] }
  0xda   :  { %v1995_v0 = vld [vmem:[%s2784_s0 + $0x1ac] sm:$0xf0]  ;;  %v1644_v12 = vor.u32 %v1991_v1, %v1641_v2 }
  0xdb   :  { %v1640_v11 = vor.u32 %v1995_v0, %v1639_v63 }
  0xde   :  { %v1070_v14 = vpop.f32.mrf.mxu2  ;;  %v975_v20 = vpop.f32.mrf.mxu0 }
  0xdf   :  { %v1119_v16 = vpop.f32.mrf.mxu3  ;;  %v1071_v19 = vadd.f32 %v1070_v14, %v1022_v3  ;;  %v1024_v21 = vpop.f32.mrf.mxu1  ;;  %v1647_v3 = vld [vmem:[%s2784_s0 + $0x198] sm:$0xf] }
  0xe0   :  { %v1025_v24 = vadd.f32 %v1024_v21, %v975_v20 }
  0xe1   :  { %v2608_v25 = vadd.f32 %v1119_v16, %v1071_v19  ;;  %1170 = vmatmul.bf16.gmra.mxu0 %v1576_v17  ;;  %v1648_v17 = vor.u32 %v1996_v5, %v1647_v3 }
  0xe2   :  { %1219 = vmatmul.bf16.gmra.mxu1 %v1580_v18  ;;  %v1652_v18 = vor.u32 %v1992_v6, %v1649_v7 }
  0xe3   :  { %1268 = vmatmul.bf16.gmra.mxu2 %v1584_v22 }
  0xe4   :  { %1317 = vmatmul.bf16.gmra.mxu3 %v1588_v23 }
  0xe6   :  { %v1073_v26 = vpop.f32.mrf.mxu2  ;;  %v977_v29 = vpop.f32.mrf.mxu0 }
  0xe7   :  { %v1122_v27 = vpop.f32.mrf.mxu3  ;;  %v1074_v28 = vadd.f32 %v1073_v26, %v1025_v24  ;;  %v1026_v30 = vpop.f32.mrf.mxu1 }
  0xe8   :  { %v1027_v31 = vadd.f32 %v1026_v30, %v977_v29  ;;  %v1671_v29 = vld [vmem:[%s2784_s0 + $0x1d0] sm:$0xf] }
  0xe9   :  { %v2610_v32 = vadd.f32 %v1122_v27, %v1074_v28  ;;  %v2003_v30 = vld [vmem:[%s2784_s0 + $0x1ec] sm:$0xf0] }
  0xea   :  { %v1672_v42 = vor.u32 %v2003_v30, %v1671_v29 }
  0xee   :  { %v1075_v43 = vpop.f32.mrf.mxu2  ;;  %v980_v48 = vpop.f32.mrf.mxu0 }
  0xef   :  { %v1124_v44 = vpop.f32.mrf.mxu3  ;;  %v1076_v47 = vadd.f32 %v1075_v43, %v1027_v31  ;;  %v1029_v49 = vpop.f32.mrf.mxu1  ;;  %v1999_v31 = vld [vmem:[%s2784_s0 + $0x1d4] sm:$0xf] }
  0xf0   :  { %v1030_v52 = vadd.f32 %v1029_v49, %v980_v48  ;;  %v1676_v43 = vor.u32 %v1999_v31, %v1673_v33  ;;  %v1684_v48 = vor.u32 %v2000_v37, %v1681_v38 }
  0xf1   :  { %v2636_v54 = vadd.f32 %v1124_v44, %v1076_v47  ;;  %1175 = vmatmul.bf16.gmra.mxu0 %v1608_v45  ;;  %v1680_v47 = vor.u32 %v2004_v36, %v1679_v35 }
  0xf2   :  { %1224 = vmatmul.bf16.gmra.mxu1 %v1612_v46 }
  0xf3   :  { %1273 = vmatmul.bf16.gmra.mxu2 %v1616_v50 }
  0xf4   :  { %1322 = vmatmul.bf16.gmra.mxu3 %v1620_v51 }
  0xf6   :  { %v1078_v55 = vpop.f32.mrf.mxu2  ;;  %v982_v58 = vpop.f32.mrf.mxu0 }
  0xf7   :  { %v1127_v56 = vpop.f32.mrf.mxu3  ;;  %v1079_v57 = vadd.f32 %v1078_v55, %v1030_v52  ;;  %v1031_v59 = vpop.f32.mrf.mxu1 }
  0xf8   :  { %v1032_v60 = vadd.f32 %v1031_v59, %v982_v58 }
  0xf9   :  { %v2638_v62 = vadd.f32 %v1127_v56, %v1079_v57 }
  0xfe   :  { %v1080_v9 = vpop.f32.mrf.mxu2  ;;  %v985_v14 = vpop.f32.mrf.mxu0 }
  0xff   :  { %v1129_v10 = vpop.f32.mrf.mxu3  ;;  %v1081_v13 = vadd.f32 %v1080_v9, %v1032_v60  ;;  %v1034_v16 = vpop.f32.mrf.mxu1 }
 0x100   :  { %v1035_v19 = vadd.f32 %v1034_v16, %v985_v14 }
 0x101   :  { %v2664_v20 = vadd.f32 %v1129_v10, %v1081_v13  ;;  %1180 = vmatmul.bf16.gmra.mxu0 %v1640_v11  ;;  %v2702_v11 = vld [vmem:[%s2785_s2] ss:$0 sm:$0xff] }
 0x102   :  { %1229 = vmatmul.bf16.gmra.mxu1 %v1644_v12 }
 0x103   :  { %1278 = vmatmul.bf16.gmra.mxu2 %v1648_v17 }
 0x104   :  { %1327 = vmatmul.bf16.gmra.mxu3 %v1652_v18 }
 0x106   :  { %v1083_v21 = vpop.f32.mrf.mxu2  ;;  %v987_v24 = vpop.f32.mrf.mxu0 }
 0x107   :  { %v1132_v22 = vpop.f32.mrf.mxu3  ;;  %v1084_v23 = vadd.f32 %v1083_v21, %v1035_v19  ;;  %v1036_v26 = vpop.f32.mrf.mxu1 }
 0x108   :  { %v1037_v27 = vadd.f32 %v1036_v26, %v987_v24 }
 0x109   :  { %v2666_v28 = vadd.f32 %v1132_v22, %v1084_v23 }
 0x10e   :  { %v1085_v39 = vpop.f32.mrf.mxu2  ;;  %v990_v45 = vpop.f32.mrf.mxu0 }
 0x10f   :  { %v1134_v40 = vpop.f32.mrf.mxu3  ;;  %v1086_v44 = vadd.f32 %v1085_v39, %v1037_v27  ;;  %v1039_v46 = vpop.f32.mrf.mxu1 }
 0x110   :  { %v1040_v49 = vadd.f32 %v1039_v46, %v990_v45 }
 0x111   :  { %v2692_v50 = vadd.f32 %v1134_v40, %v1086_v44  ;;  %1185 = vmatmul.bf16.gmra.mxu0 %v1672_v42 }
 0x112   :  { %1234 = vmatmul.bf16.gmra.mxu1 %v1676_v43 }
 0x113   :  { %1283 = vmatmul.bf16.gmra.mxu2 %v1680_v47 }
 0x114   :  { %1332 = vmatmul.bf16.gmra.mxu3 %v1684_v48 }
 0x116   :  { %v1088_v51 = vpop.f32.mrf.mxu2  ;;  %v992_v56 = vpop.f32.mrf.mxu0 }
 0x117   :  { %v1137_v52 = vpop.f32.mrf.mxu3  ;;  %v1089_v55 = vadd.f32 %v1088_v51, %v1040_v49  ;;  %v1041_v57 = vpop.f32.mrf.mxu1 }
 0x118   :  { %v1042_v58 = vadd.f32 %v1041_v57, %v992_v56 }
 0x119   :  { %v2694_v59 = vadd.f32 %v1137_v52, %v1089_v55 }
 0x11e   :  { %v1090_v60 = vpop.f32.mrf.mxu2  ;;  %v1151_v1 = vpop.f32.mrf.mxu0 }
 0x11f   :  { %v1139_v63 = vpop.f32.mrf.mxu3  ;;  %v1091_v0 = vadd.f32 %v1090_v60, %v1042_v58  ;;  %v1200_v2 = vpop.f32.mrf.mxu1  ;;  %v1152_v5 = vadd.f32 %v1151_v1, %v2498_v53 }
 0x121   :  { %v2696_v3 = vadd.f32 %v1139_v63, %v1091_v0  ;;  %v1201_v6 = vadd.f32 %v1200_v2, %v1152_v5 }
 0x126   :  { %v1249_v7 = vpop.f32.mrf.mxu2  ;;  %v1153_v12 = vpop.f32.mrf.mxu0 }
 0x127   :  { %v1298_v9 = vpop.f32.mrf.mxu3  ;;  %v1250_v10 = vadd.f32 %v1249_v7, %v1201_v6  ;;  %v1202_v13 = vpop.f32.mrf.mxu1  ;;  %v1154_v16 = vadd.f32 %v1153_v12, %v2524_v8 }
 0x129   :  { %v1299_v14 = vadd.f32 %v1298_v9, %v1250_v10  ;;  %v1203_v53 = vadd.f32 %v1202_v13, %v1154_v16 }
 0x12b   :  { %v1393_v17 = vadd.f32 %v2702_v11, %v1299_v14 }
 0x12d   :  { %1409 = vst [vmem:[%s2786_s3] sm:$0xff] %v1393_v17 }
 0x12e   :  { %v1251_v18 = vpop.f32.mrf.mxu2  ;;  %v1156_v22 = vpop.f32.mrf.mxu0 }
 0x12f   :  { %v1300_v19 = vpop.f32.mrf.mxu3  ;;  %v1252_v21 = vadd.f32 %v1251_v18, %v1203_v53  ;;  %v1205_v23 = vpop.f32.mrf.mxu1  ;;  %v1157_v26 = vadd.f32 %v1156_v22, %v2526_v15 }
 0x131   :  { %v1301_v24 = vadd.f32 %v1300_v19, %v1252_v21  ;;  %v1206_v8 = vadd.f32 %v1205_v23, %v1157_v26 }
 0x133   :  { %v1394_v27 = vadd.f32 %v2702_v11, %v1301_v24 }
 0x135   :  { %1410 = vst [vmem:[%s2786_s3 + $0x8] sm:$0xff] %v1394_v27 }
 0x136   :  { %v1254_v29 = vpop.f32.mrf.mxu2  ;;  %v1158_v33 = vpop.f32.mrf.mxu0 }
 0x137   :  { %v1303_v30 = vpop.f32.mrf.mxu3  ;;  %v1255_v31 = vadd.f32 %v1254_v29, %v1206_v8  ;;  %v1207_v35 = vpop.f32.mrf.mxu1  ;;  %v1159_v37 = vadd.f32 %v1158_v33, %v2552_v34 }
 0x139   :  { %v1304_v36 = vadd.f32 %v1303_v30, %v1255_v31  ;;  %v1208_v15 = vadd.f32 %v1207_v35, %v1159_v37 }
 0x13b   :  { %v1395_v38 = vadd.f32 %v2702_v11, %v1304_v36 }
 0x13d   :  { %1411 = vst [vmem:[%s2786_s3 + $0x10] sm:$0xff] %v1395_v38 }
 0x13e   :  { %v1256_v39 = vpop.f32.mrf.mxu2  ;;  %v1161_v43 = vpop.f32.mrf.mxu0 }
 0x13f   :  { %v1305_v40 = vpop.f32.mrf.mxu3  ;;  %v1257_v42 = vadd.f32 %v1256_v39, %v1208_v15  ;;  %v1210_v44 = vpop.f32.mrf.mxu1  ;;  %v1162_v46 = vadd.f32 %v1161_v43, %v2554_v41 }
 0x141   :  { %v1306_v45 = vadd.f32 %v1305_v40, %v1257_v42  ;;  %v1211_v34 = vadd.f32 %v1210_v44, %v1162_v46 }
 0x143   :  { %v1396_v47 = vadd.f32 %v2702_v11, %v1306_v45 }
 0x145   :  { %1412 = vst [vmem:[%s2786_s3 + $0x18] sm:$0xff] %v1396_v47 }
 0x146   :  { %v1259_v48 = vpop.f32.mrf.mxu2  ;;  %v1163_v52 = vpop.f32.mrf.mxu0 }
 0x147   :  { %v1308_v49 = vpop.f32.mrf.mxu3  ;;  %v1260_v51 = vadd.f32 %v1259_v48, %v1211_v34  ;;  %v1212_v55 = vpop.f32.mrf.mxu1  ;;  %v1164_v57 = vadd.f32 %v1163_v52, %v2580_v61 }
 0x149   :  { %v1309_v56 = vadd.f32 %v1308_v49, %v1260_v51  ;;  %v1213_v41 = vadd.f32 %v1212_v55, %v1164_v57 }
 0x14b   :  { %v1397_v58 = vadd.f32 %v2702_v11, %v1309_v56 }
 0x14d   :  { %1413 = vst [vmem:[%s2786_s3 + $0x20] sm:$0xff] %v1397_v58 }
 0x14e   :  { %v1261_v60 = vpop.f32.mrf.mxu2  ;;  %v1166_v1 = vpop.f32.mrf.mxu0 }
 0x14f   :  { %v1310_v63 = vpop.f32.mrf.mxu3  ;;  %v1262_v0 = vadd.f32 %v1261_v60, %v1213_v41  ;;  %v1215_v2 = vpop.f32.mrf.mxu1  ;;  %v1167_v6 = vadd.f32 %v1166_v1, %v2582_v4 }
 0x151   :  { %v1311_v5 = vadd.f32 %v1310_v63, %v1262_v0  ;;  %v1216_v61 = vadd.f32 %v1215_v2, %v1167_v6 }
 0x153   :  { %v1398_v7 = vadd.f32 %v2702_v11, %v1311_v5 }
 0x155   :  { %1414 = vst [vmem:[%s2786_s3 + $0x28] sm:$0xff] %v1398_v7 }
 0x156   :  { %v1264_v9 = vpop.f32.mrf.mxu2  ;;  %v1168_v13 = vpop.f32.mrf.mxu0 }
 0x157   :  { %v1313_v10 = vpop.f32.mrf.mxu3  ;;  %v1265_v12 = vadd.f32 %v1264_v9, %v1216_v61  ;;  %v1217_v14 = vpop.f32.mrf.mxu1  ;;  %v1169_v17 = vadd.f32 %v1168_v13, %v2608_v25 }
 0x159   :  { %v1314_v16 = vadd.f32 %v1313_v10, %v1265_v12  ;;  %v1218_v4 = vadd.f32 %v1217_v14, %v1169_v17 }
 0x15b   :  { %v1399_v53 = vadd.f32 %v2702_v11, %v1314_v16 }
 0x15d   :  { %1415 = vst [vmem:[%s2786_s3 + $0x30] sm:$0xff] %v1399_v53 }
 0x15e   :  { %v1266_v18 = vpop.f32.mrf.mxu2  ;;  %v1171_v22 = vpop.f32.mrf.mxu0 }
 0x15f   :  { %v1315_v19 = vpop.f32.mrf.mxu3  ;;  %v1267_v21 = vadd.f32 %v1266_v18, %v1218_v4  ;;  %v1220_v23 = vpop.f32.mrf.mxu1  ;;  %v1172_v26 = vadd.f32 %v1171_v22, %v2610_v32 }
 0x161   :  { %v1316_v24 = vadd.f32 %v1315_v19, %v1267_v21  ;;  %v1221_v25 = vadd.f32 %v1220_v23, %v1172_v26 }
 0x163   :  { %v1400_v27 = vadd.f32 %v2702_v11, %v1316_v24 }
 0x165   :  { %1416 = vst [vmem:[%s2786_s3 + $0x38] sm:$0xff] %v1400_v27 }
 0x166   :  { %v1269_v8 = vpop.f32.mrf.mxu2  ;;  %v1173_v31 = vpop.f32.mrf.mxu0 }
 0x167   :  { %v1318_v29 = vpop.f32.mrf.mxu3  ;;  %v1270_v30 = vadd.f32 %v1269_v8, %v1221_v25  ;;  %v1222_v33 = vpop.f32.mrf.mxu1  ;;  %v1174_v36 = vadd.f32 %v1173_v31, %v2636_v54 }
 0x169   :  { %v1319_v35 = vadd.f32 %v1318_v29, %v1270_v30  ;;  %v1223_v32 = vadd.f32 %v1222_v33, %v1174_v36 }
 0x16b   :  { %v1401_v37 = vadd.f32 %v2702_v11, %v1319_v35 }
 0x16d   :  { %1417 = vst [vmem:[%s2786_s3 + $0x40] sm:$0xff] %v1401_v37 }
 0x16e   :  { %v1271_v38 = vpop.f32.mrf.mxu2  ;;  %v1176_v40 = vpop.f32.mrf.mxu0 }
 0x16f   :  { %v1320_v15 = vpop.f32.mrf.mxu3  ;;  %v1272_v39 = vadd.f32 %v1271_v38, %v1223_v32  ;;  %v1225_v42 = vpop.f32.mrf.mxu1  ;;  %v1177_v44 = vadd.f32 %v1176_v40, %v2638_v62 }
 0x171   :  { %v1321_v43 = vadd.f32 %v1320_v15, %v1272_v39  ;;  %v1226_v54 = vadd.f32 %v1225_v42, %v1177_v44 }
 0x173   :  { %v1402_v45 = vadd.f32 %v2702_v11, %v1321_v43 }
 0x175   :  { %1418 = vst [vmem:[%s2786_s3 + $0x48] sm:$0xff] %v1402_v45 }
 0x176   :  { %v1274_v46 = vpop.f32.mrf.mxu2  ;;  %v1178_v48 = vpop.f32.mrf.mxu0 }
 0x177   :  { %v1323_v47 = vpop.f32.mrf.mxu3  ;;  %v1275_v34 = vadd.f32 %v1274_v46, %v1226_v54  ;;  %v1227_v49 = vpop.f32.mrf.mxu1  ;;  %v1179_v52 = vadd.f32 %v1178_v48, %v2664_v20 }
 0x179   :  { %v1324_v51 = vadd.f32 %v1323_v47, %v1275_v34  ;;  %v1228_v62 = vadd.f32 %v1227_v49, %v1179_v52 }
 0x17b   :  { %v1403_v55 = vadd.f32 %v2702_v11, %v1324_v51 }
 0x17d   :  { %1419 = vst [vmem:[%s2786_s3 + $0x50] sm:$0xff] %v1403_v55 }
 0x17e   :  { %v1276_v56 = vpop.f32.mrf.mxu2  ;;  %v1181_v41 = vpop.f32.mrf.mxu0 }
 0x17f   :  { %v1325_v57 = vpop.f32.mrf.mxu3  ;;  %v1277_v58 = vadd.f32 %v1276_v56, %v1228_v62  ;;  %v1230_v60 = vpop.f32.mrf.mxu1  ;;  %v1182_v0 = vadd.f32 %v1181_v41, %v2666_v28 }
 0x181   :  { %v1326_v63 = vadd.f32 %v1325_v57, %v1277_v58  ;;  %v1231_v20 = vadd.f32 %v1230_v60, %v1182_v0 }
 0x183   :  { %v1404_v1 = vadd.f32 %v2702_v11, %v1326_v63 }
 0x185   :  { %1420 = vst [vmem:[%s2786_s3 + $0x58] sm:$0xff] %v1404_v1 }
 0x186   :  { %v1279_v2 = vpop.f32.mrf.mxu2  ;;  %v1183_v7 = vpop.f32.mrf.mxu0 }
 0x187   :  { %v1328_v5 = vpop.f32.mrf.mxu3  ;;  %v1280_v6 = vadd.f32 %v1279_v2, %v1231_v20  ;;  %v1232_v61 = vpop.f32.mrf.mxu1  ;;  %v1184_v10 = vadd.f32 %v1183_v7, %v2692_v50 }
 0x189   :  { %v1329_v9 = vadd.f32 %v1328_v5, %v1280_v6  ;;  %v1233_v28 = vadd.f32 %v1232_v61, %v1184_v10 }
 0x18b   :  { %v1405_v12 = vadd.f32 %v2702_v11, %v1329_v9 }
 0x18d   :  { %1421 = vst [vmem:[%s2786_s3 + $0x60] sm:$0xff] %v1405_v12 }
 0x18e   :  { %v1281_v13 = vpop.f32.mrf.mxu2  ;;  %v1186_v17 = vpop.f32.mrf.mxu0 }
 0x18f   :  { %v1330_v14 = vpop.f32.mrf.mxu3  ;;  %v1282_v16 = vadd.f32 %v1281_v13, %v1233_v28  ;;  %v1187_v4 = vadd.f32 %v1186_v17, %v2694_v59  ;;  %v1235_v18 = vpop.f32.mrf.mxu1 }
 0x191   :  { %v1331_v53 = vadd.f32 %v1330_v14, %v1282_v16  ;;  %v1236_v50 = vadd.f32 %v1235_v18, %v1187_v4 }
 0x193   :  { %v1406_v19 = vadd.f32 %v2702_v11, %v1331_v53 }
 0x195   :  { %1422 = vst [vmem:[%s2786_s3 + $0x68] sm:$0xff] %v1406_v19 }
 0x196   :  { %v1284_v21 = vpop.f32.mrf.mxu2  ;;  %v1188_v24 = vpop.f32.mrf.mxu0 }
 0x197   :  { %v1333_v22 = vpop.f32.mrf.mxu3  ;;  %v1285_v23 = vadd.f32 %v1284_v21, %v1236_v50  ;;  %v1189_v27 = vadd.f32 %v1188_v24, %v2696_v3  ;;  %v1237_v8 = vpop.f32.mrf.mxu1 }
 0x199   :  { %v1334_v26 = vadd.f32 %v1333_v22, %v1285_v23  ;;  %v1238_v59 = vadd.f32 %v1237_v8, %v1189_v27 }
 0x19b   :  { %v1407_v25 = vadd.f32 %v2702_v11, %v1334_v26 }
 0x19d   :  { %1423 = vst [vmem:[%s2786_s3 + $0x70] sm:$0xff] %v1407_v25 }
 0x19e   :  { %v1286_v29 = vpop.f32.mrf.mxu2 }
 0x19f   :  { %v1287_v30 = vadd.f32 %v1286_v29, %v1238_v59  ;;  %v1335_v31 = vpop.f32.mrf.mxu3 }
 0x1a1   :  { %v1336_v33 = vadd.f32 %v1335_v31, %v1287_v30 }
 0x1a3   :  { %v1408_v35 = vadd.f32 %v2702_v11, %v1336_v33 }
 0x1a5   :  { %1424 = vst [vmem:[%s2786_s3 + $0x78] sm:$0xff] %v1408_v35 }

// kernel: forward.13
= control target key start
LH: loop header
LB: loop body
LE: loop exit
PB: predicated region body
PF: predicated region fallthrough
CT: control target
= control target key end

     0   :  { %s1564_s12 = smov 0   ;;  %s1566_s13 = smov 0   ;;  %s1834_s0 = inlined_call_operand.vmem [shape: bf16[32,2048], index: 0, kind: input, shape index: {}]   ;;  %s1835_s1 = inlined_call_operand.vmem [shape: bf16[2048,256], index: 1, kind: input, shape index: {}]   ;;  %s1836_s2 = inlined_call_operand.vmem [shape: f32[1,256], index: 2, kind: input, shape index: {}]   ;;  %s1837_s3 = inlined_call_operand.vmem [shape: f32[32,256], index: 3, kind: output, shape index: {}]  }
   0x1   :  { %s1568_s14 = smov 0   ;;  %s1570_s15 = smov 0  }
   0x2   :  { %s1572_s16 = smov 0  }
   0x3 LB: > { %s25_s17 = sadd.s32 1, %s1537_s15  ;;  %p48_p1 = scmp.ne.s32.totalorder %s1529_s13, %s1525_s12  ;;  %s1541_s16 = sphi %s1572_s16, %s13_s16   ;;  %s1537_s15 = sphi %s1570_s15, %s1841_s15   ;;  %s1533_s14 = sphi %s1568_s14, %s1840_s14   ;;  %s1529_s13 = sphi %s1566_s13, %s1839_s13   ;;  %s1525_s12 = sphi %s1564_s12, %s1838_s12  }
   0x4   : > { %p26_p0 = scmp.ge.s32.totalorder %s25_s17, 4  ;;  %p49_p2 = scmp.eq.s32.totalorder %s1541_s16, 0 }
   0x5   : > { %s41_s19 = sadd.s32 1, %s1529_s13  ;;  %p1085_p5 = scmp.ge.s32.totalorder %s1541_s16, 4 }
   0x6   : > { %s1843_s17 = smov (%p26_p0, %s25_s17), 0  ;;  %p50_p3 = por %p49_p2, %p48_p1 }
   0x7   : > { %s37_s18 = ssub.s32 %s1537_s15, %s1843_s17  ;;  %164 = sbr.rel (%p1085_p5) target bundleno = 24 (0x18), region = 20 }
   0x8   : > { %p39_p4 = scmp.eq.s32.totalorder %s37_s18, 0 }
   0xa   : > { %s1599_s20 = scalar_select %p39_p4, %s1529_s13, %s41_s19  }
   0xc   : > { %167 = sbr.rel (!%p50_p3) target bundleno = 24 (0x18), region = 24  ;;  %s169_s21 = sand.u32 (%p50_p3), 1, %s1529_s13  }
   0xd   : > { %s1388_s22 = sshll.u32 (%p50_p3), %s1537_s15, 4  ;;  %s1086_s23 = sshll.u32 (%p50_p3), %s169_s21, 6 }
   0xe   : > { %s177_s26 = scalar_lea.vmem (%p50_p3), %s1834_s0, %s1388_s22  ;;  %s171_s27 = scalar_lea.vmem (%p50_p3), [#allocation3], %s1086_s23 }
   0xf   : > { %v190_v0 = vld [vmem:[%s177_s26] sm:$0xff] (%p50_p3)  ;;  %v192_v1 = vld [vmem:[%s177_s26 + $0x8] sm:$0xff] (%p50_p3) }
  0x10   : > { %v194_v2 = vld [vmem:[%s177_s26 + $0x40] sm:$0xff] (%p50_p3)  ;;  %191 = vst [vmem:[%s171_s27] sm:$0xff] (%p50_p3), %v190_v0  ;;  %v196_v3 = vld [vmem:[%s177_s26 + $0x48] sm:$0xff] (%p50_p3) }
  0x11   : > { %193 = vst [vmem:[%s171_s27 + $0x8] sm:$0xff] %v192_v1  ;;  %v198_v4 = vld [vmem:[%s177_s26 + $0x80] sm:$0xff]  ;;  %v200_v5 = vld [vmem:[%s177_s26 + $0x88] sm:$0xff] }
  0x12   : > { %195 = vst [vmem:[%s171_s27 + $0x10] sm:$0xff] %v194_v2  ;;  %v202_v6 = vld [vmem:[%s177_s26 + $0xc0] sm:$0xff]  ;;  %v204_v7 = vld [vmem:[%s177_s26 + $0xc8] sm:$0xff] }
  0x13   : > { %197 = vst [vmem:[%s171_s27 + $0x18] sm:$0xff] %v196_v3 }
  0x14   : > { %199 = vst [vmem:[%s171_s27 + $0x20] sm:$0xff] %v198_v4 }
  0x15   : > { %201 = vst [vmem:[%s171_s27 + $0x28] sm:$0xff] %v200_v5 }
  0x16   : > { %203 = vst [vmem:[%s171_s27 + $0x30] sm:$0xff] %v202_v6 }
  0x17   : > { %205 = vst [vmem:[%s171_s27 + $0x38] sm:$0xff] %v204_v7 }
  0x18 PF: > { %p1089_p6 = scmp.ge.s32.totalorder %s1541_s16, 1  ;;  %p225_p7 = scmp.lt.s32.totalorder %s1541_s16, 5 }
  0x1a   : > { %p226_p8 = pnand %p1089_p6, %p225_p7 }
  0x1b   : > { %s232_s28 = sand.u32 (!%p226_p8), 1, %s1525_s12   ;;  %s1091_s29 = sshll.u32 (!%p226_p8), %s1533_s14, 6 }
  0x1c   : > { %229 = sbr.rel (%p226_p8) target bundleno = 291 (0x123), region = 51  ;;  %s1090_s30 = sshll.u32 (!%p226_p8), %s232_s28, 6 }
  0x1d   : > { %p278_p9 = scmp.lt.s32.totalorder (!%p226_p8), %s1091_s29, 255  ;;  %s1616_s8 = scalar_lea.vmem (!%p226_p8), [#allocation3], %s1090_s30 }
  0x1e   : > { %p1094_p10 = scmp.ne.s32.totalorder (!%p226_p8), %s1533_s14, 0 }
  0x21   : > { %s1845_s29 = smov (!%p278_p9, %s1091_s29), 255  ;;  %308 = sbr.rel (%p1094_p10) target bundleno = 47 (0x2f), region = 59 }
  0x22   : > { %s1389_s4 = sshll.u32 %s1845_s29, 3 }
  0x23   : > { %s1614_s7 = scalar_lea.vmem %s1835_s1, %s1389_s4 }
  0x26   : > { %v1543_v8 = vmov 0.0  }
  0x27   : > { %309 = vst [vmem:[#allocation2 + $0x30] sm:$0xff] %v1543_v8 }
  0x28   : > { %310 = vst [vmem:[#allocation2] sm:$0xff] %v1543_v8 }
  0x29   : > { %311 = vst [vmem:[#allocation2 + $0x18] sm:$0xff] %v1543_v8 }
  0x2a   : > { %312 = vst [vmem:[#allocation2 + $0x10] sm:$0xff] %v1543_v8 }
  0x2b   : > { %313 = vst [vmem:[#allocation2 + $0x8] sm:$0xff] %v1543_v8 }
  0x2c   : > { %314 = vst [vmem:[#allocation2 + $0x20] sm:$0xff] %v1543_v8 }
  0x2d   : > { %315 = vst [vmem:[#allocation2 + $0x28] sm:$0xff] %v1543_v8 }
  0x2e   : > { %316 = vst [vmem:[#allocation2 + $0x38] sm:$0xff] %v1543_v8 }
  0x2f PF: > { %v1185_v9 = vld [vmem:[%s1614_s7 + $0x70] sm:$0xf]  ;;  %v1413_v10 = vld [vmem:[%s1614_s7 + $0x74] sm:$0xf0]  ;;  %v1177_v20 = vld [vmem:[%s1614_s7 + $0x60] sm:$0xf] }
  0x30   : > { %v1249_v11 = vld [vmem:[%s1614_s7 + $0xf0] sm:$0xf]  ;;  %v1186_v12 = vor.u32 %v1413_v10, %v1185_v9  ;;  %v1429_v13 = vld [vmem:[%s1614_s7 + $0xf4] sm:$0xf0]  ;;  %v1411_v22 = vld [vmem:[%s1614_s7 + $0x64] sm:$0xf0] }
  0x31   : > { %v1313_v14 = vld [vmem:[%s1614_s7 + $0x170] sm:$0xf]  ;;  %v1445_v15 = vld [vmem:[%s1614_s7 + $0x174] sm:$0xf0]  ;;  %v1250_v16 = vor.u32 %v1429_v13, %v1249_v11  ;;  %v1241_v23 = vld [vmem:[%s1614_s7 + $0xe0] sm:$0xf]  ;;  %v1178_v25 = vor.u32 %v1411_v22, %v1177_v20 }
  0x32   : > { %v1314_v17 = vor.u32 %v1445_v15, %v1313_v14  ;;  %v1377_v18 = vld [vmem:[%s1614_s7 + $0x1f0] sm:$0xf]  ;;  %v1461_v19 = vld [vmem:[%s1614_s7 + $0x1f4] sm:$0xf0]  ;;  %757 = vmatpush.bf16.msra.mxu0 %v1186_v12  ;;  %v1427_v24 = vld [vmem:[%s1614_s7 + $0xe4] sm:$0xf0] }
  0x33   : > { %v1378_v21 = vor.u32 %v1461_v19, %v1377_v18  ;;  %776 = vmatpush.bf16.msra.mxu1 %v1250_v16  ;;  %v1242_v26 = vor.u32 %v1427_v24, %v1241_v23  ;;  %v1305_v27 = vld [vmem:[%s1614_s7 + $0x160] sm:$0xf]  ;;  %v1443_v28 = vld [vmem:[%s1614_s7 + $0x164] sm:$0xf0]  ;;  %v1169_v32 = vld [vmem:[%s1614_s7 + $0x50] sm:$0xf] }
  0x34   : > { %795 = vmatpush.bf16.msra.mxu2 %v1314_v17  ;;  %v1369_v29 = vld [vmem:[%s1614_s7 + $0x1e0] sm:$0xf]  ;;  %v1306_v30 = vor.u32 %v1443_v28, %v1305_v27  ;;  %v1459_v31 = vld [vmem:[%s1614_s7 + $0x1e4] sm:$0xf0]  ;;  %v1409_v33 = vld [vmem:[%s1614_s7 + $0x54] sm:$0xf0] }
  0x35   : > { %814 = vmatpush.bf16.msra.mxu3 %v1378_v21  ;;  %v1370_v34 = vor.u32 %v1459_v31, %v1369_v29  ;;  %v1233_v35 = vld [vmem:[%s1614_s7 + $0xd0] sm:$0xf]  ;;  %v1425_v36 = vld [vmem:[%s1614_s7 + $0xd4] sm:$0xf0]  ;;  %v1170_v38 = vor.u32 %v1409_v33, %v1169_v32  ;;  %v1161_v44 = vld [vmem:[%s1614_s7 + $0x40] sm:$0xf] }
  0x36   : > { %v1297_v37 = vld [vmem:[%s1614_s7 + $0x150] sm:$0xf]  ;;  %758 = vmatpush.bf16.msra.mxu0 %v1178_v25  ;;  %v1441_v39 = vld [vmem:[%s1614_s7 + $0x154] sm:$0xf0]  ;;  %v1234_v42 = vor.u32 %v1425_v36, %v1233_v35  ;;  %v1407_v45 = vld [vmem:[%s1614_s7 + $0x44] sm:$0xf0] }
  0x37   : > { %v1361_v40 = vld [vmem:[%s1614_s7 + $0x1d0] sm:$0xf]  ;;  %v1457_v41 = vld [vmem:[%s1614_s7 + $0x1d4] sm:$0xf0]  ;;  %777 = vmatpush.bf16.msra.mxu1 %v1242_v26  ;;  %v1298_v43 = vor.u32 %v1441_v39, %v1297_v37  ;;  %v1225_v46 = vld [vmem:[%s1614_s7 + $0xc0] sm:$0xf]  ;;  %v1162_v53 = vor.u32 %v1407_v45, %v1161_v44 }
  0x38   : > { %796 = vmatpush.bf16.msra.mxu2 %v1306_v30  ;;  %v1362_v47 = vor.u32 %v1457_v41, %v1361_v40  ;;  %v1423_v48 = vld [vmem:[%s1614_s7 + $0xc4] sm:$0xf0]  ;;  %v1289_v49 = vld [vmem:[%s1614_s7 + $0x140] sm:$0xf]  ;;  %v1153_v56 = vld [vmem:[%s1614_s7 + $0x30] sm:$0xf] }
  0x39   : > { %815 = vmatpush.bf16.msra.mxu3 %v1370_v34  ;;  %v1439_v50 = vld [vmem:[%s1614_s7 + $0x144] sm:$0xf0]  ;;  %v1353_v51 = vld [vmem:[%s1614_s7 + $0x1c0] sm:$0xf]  ;;  %v1226_v54 = vor.u32 %v1423_v48, %v1225_v46  ;;  %v1405_v57 = vld [vmem:[%s1614_s7 + $0x34] sm:$0xf0] }
  0x3a   : > { %v1455_v52 = vld [vmem:[%s1614_s7 + $0x1c4] sm:$0xf0]  ;;  %759 = vmatpush.bf16.msra.mxu0 %v1170_v38  ;;  %v1290_v55 = vor.u32 %v1439_v50, %v1289_v49  ;;  %v1217_v58 = vld [vmem:[%s1614_s7 + $0xb0] sm:$0xf]  ;;  %v1421_v60 = vld [vmem:[%s1614_s7 + $0xb4] sm:$0xf0]  ;;  %v1154_v1 = vor.u32 %v1405_v57, %v1153_v56 }
  0x3b   : > { %778 = vmatpush.bf16.msra.mxu1 %v1234_v42  ;;  %v1354_v59 = vor.u32 %v1455_v52, %v1353_v51  ;;  %v1281_v61 = vld [vmem:[%s1614_s7 + $0x130] sm:$0xf]  ;;  %v1437_v62 = vld [vmem:[%s1614_s7 + $0x134] sm:$0xf0]  ;;  %v1218_v2 = vor.u32 %v1421_v60, %v1217_v58  ;;  %v1145_v4 = vld [vmem:[%s1614_s7 + $0x20] sm:$0xf] }
  0x3c   : > { %797 = vmatpush.bf16.msra.mxu2 %v1298_v43  ;;  %v1345_v63 = vld [vmem:[%s1614_s7 + $0x1b0] sm:$0xf]  ;;  %v1453_v0 = vld [vmem:[%s1614_s7 + $0x1b4] sm:$0xf0]  ;;  %v1282_v3 = vor.u32 %v1437_v62, %v1281_v61  ;;  %v1403_v5 = vld [vmem:[%s1614_s7 + $0x24] sm:$0xf0] }
  0x3d   : > { %816 = vmatpush.bf16.msra.mxu3 %v1362_v47  ;;  %v1209_v6 = vld [vmem:[%s1614_s7 + $0xa0] sm:$0xf]  ;;  %v1346_v7 = vor.u32 %v1453_v0, %v1345_v63  ;;  %v1419_v8 = vld [vmem:[%s1614_s7 + $0xa4] sm:$0xf0]  ;;  %v1146_v13 = vor.u32 %v1403_v5, %v1145_v4  ;;  %v1137_v16 = vld [vmem:[%s1614_s7 + $0x10] sm:$0xf] }
  0x3e   : > { %760 = vmatpush.bf16.msra.mxu0 %v1162_v53  ;;  %v1273_v9 = vld [vmem:[%s1614_s7 + $0x120] sm:$0xf]  ;;  %v1435_v10 = vld [vmem:[%s1614_s7 + $0x124] sm:$0xf0]  ;;  %v1210_v14 = vor.u32 %v1419_v8, %v1209_v6  ;;  %v1401_v17 = vld [vmem:[%s1614_s7 + $0x14] sm:$0xf0] }
  0x3f   : > { %779 = vmatpush.bf16.msra.mxu1 %v1226_v54  ;;  %v1337_v11 = vld [vmem:[%s1614_s7 + $0x1a0] sm:$0xf]  ;;  %v1451_v12 = vld [vmem:[%s1614_s7 + $0x1a4] sm:$0xf0]  ;;  %v1274_v15 = vor.u32 %v1435_v10, %v1273_v9  ;;  %v1201_v18 = vld [vmem:[%s1614_s7 + $0x90] sm:$0xf]  ;;  %v1138_v26 = vor.u32 %v1401_v17, %v1137_v16 }
  0x40   : > { %798 = vmatpush.bf16.msra.mxu2 %v1290_v55  ;;  %v1338_v19 = vor.u32 %v1451_v12, %v1337_v11  ;;  %v1417_v20 = vld [vmem:[%s1614_s7 + $0x94] sm:$0xf0]  ;;  %v1265_v21 = vld [vmem:[%s1614_s7 + $0x110] sm:$0xf]  ;;  %v1129_v25 = vld [vmem:[%s1614_s7] sm:$0xf] }
  0x41   : > { %817 = vmatpush.bf16.msra.mxu3 %v1354_v59  ;;  %v1433_v22 = vld [vmem:[%s1614_s7 + $0x114] sm:$0xf0]  ;;  %v1329_v23 = vld [vmem:[%s1614_s7 + $0x190] sm:$0xf]  ;;  %v1399_v27 = vld [vmem:[%s1614_s7 + $0x4] sm:$0xf0]  ;;  %v1202_v30 = vor.u32 %v1417_v20, %v1201_v18 }
  0x42   : > { %761 = vmatpush.bf16.msra.mxu0 %v1154_v1  ;;  %v1449_v24 = vld [vmem:[%s1614_s7 + $0x194] sm:$0xf0]  ;;  %v1193_v28 = vld [vmem:[%s1614_s7 + $0x80] sm:$0xf]  ;;  %v1415_v29 = vld [vmem:[%s1614_s7 + $0x84] sm:$0xf0]  ;;  %v1266_v31 = vor.u32 %v1433_v22, %v1265_v21  ;;  %v1130_v43 = vor.u32 %v1399_v27, %v1129_v25 }
  0x43   : > { %780 = vmatpush.bf16.msra.mxu1 %v1218_v2  ;;  %v1257_v32 = vld [vmem:[%s1614_s7 + $0x100] sm:$0xf]  ;;  %v1431_v33 = vld [vmem:[%s1614_s7 + $0x104] sm:$0xf0]  ;;  %v1330_v35 = vor.u32 %v1449_v24, %v1329_v23  ;;  %v1392_v38 = vld [vmem:[%s1616_s8 + $0xc] sm:$0xf0]  ;;  %v1194_v47 = vor.u32 %v1415_v29, %v1193_v28 }
  0x44   : > { %799 = vmatpush.bf16.msra.mxu2 %v1282_v3  ;;  %v1321_v34 = vld [vmem:[%s1614_s7 + $0x180] sm:$0xf]  ;;  %v1447_v36 = vld [vmem:[%s1614_s7 + $0x184] sm:$0xf0]  ;;  %v1390_v39 = vld [vmem:[%s1616_s8 + $0x4] sm:$0xf]  ;;  %v1258_v48 = vor.u32 %v1431_v33, %v1257_v32 }
  0x45   : > { %818 = vmatpush.bf16.msra.mxu3 %v1346_v7  ;;  %v1097_v37 = vld [vmem:[%s1616_s8] sm:$0xf]  ;;  %v1099_v40 = vld [vmem:[%s1616_s8 + $0x10] sm:$0xf0]  ;;  %v1315_v42 = vld [vmem:[%s1614_s7 + $0x178] sm:$0xf0]  ;;  %v1322_v52 = vor.u32 %v1447_v36, %v1321_v34 }
  0x46   : > { %762 = vmatpush.bf16.msra.mxu0 %v1146_v13  ;;  %v1444_v41 = vld [vmem:[%s1614_s7 + $0x174] sm:$0xf]  ;;  %v1105_v44 = vld [vmem:[%s1616_s8 + $0x8] sm:$0xf]  ;;  %v1251_v46 = vld [vmem:[%s1614_s7 + $0xf8] sm:$0xf0]  ;;  %v1698_v57 = vor.u32 %v1392_v38, %v1097_v37  ;;  %v1703_v62 = vor.u32 %v1390_v39, %v1099_v40 }
  0x47   : > { %781 = vmatpush.bf16.msra.mxu1 %v1210_v14  ;;  %v1428_v45 = vld [vmem:[%s1614_s7 + $0xf4] sm:$0xf]  ;;  %v1393_v49 = vld [vmem:[%s1616_s8 + $0x14] sm:$0xf0]  ;;  %v1391_v50 = vld [vmem:[%s1616_s8 + $0xc] sm:$0xf]  ;;  %v1318_v53 = vor.u32 %v1444_v41, %v1315_v42 }
  0x48   : > { %800 = vmatpush.bf16.msra.mxu2 %v1274_v15  ;;  %v1107_v51 = vld [vmem:[%s1616_s8 + $0x18] sm:$0xf0]  ;;  %v1412_v54 = vld [vmem:[%s1614_s7 + $0x74] sm:$0xf]  ;;  %v1254_v58 = vor.u32 %v1428_v45, %v1251_v46  ;;  %v1442_v60 = vld [vmem:[%s1614_s7 + $0x164] sm:$0xf]  ;;  %v1705_v63 = vor.u32 %v1393_v49, %v1105_v44 }
  0x49   : > { %819 = vmatpush.bf16.msra.mxu3 %v1338_v19  ;;  %v1187_v55 = vld [vmem:[%s1614_s7 + $0x78] sm:$0xf0]  ;;  %v1460_v56 = vld [vmem:[%s1614_s7 + $0x1f4] sm:$0xf]  ;;  %v1307_v61 = vld [vmem:[%s1614_s7 + $0x168] sm:$0xf0]  ;;  %v1709_v2 = vor.u32 %v1391_v50, %v1107_v51 }
  0x4a   : > { %763 = vmatpush.bf16.msra.mxu0 %v1138_v26  ;;  %v1379_v59 = vld [vmem:[%s1614_s7 + $0x1f8] sm:$0xf0]  ;;  %v1426_v0 = vld [vmem:[%s1614_s7 + $0xe4] sm:$0xf]  ;;  %v1243_v1 = vld [vmem:[%s1614_s7 + $0xe8] sm:$0xf0]  ;;  %v1190_v3 = vor.u32 %v1412_v54, %v1187_v55  ;;  %v1310_v5 = vor.u32 %v1442_v60, %v1307_v61 }
  0x4b   : > { %782 = vmatpush.bf16.msra.mxu1 %v1202_v30  ;;  %v1382_v4 = vor.u32 %v1460_v56, %v1379_v59  ;;  %v1410_v6 = vld [vmem:[%s1614_s7 + $0x64] sm:$0xf]  ;;  %v1179_v7 = vld [vmem:[%s1614_s7 + $0x68] sm:$0xf0]  ;;  %v1246_v9 = vor.u32 %v1426_v0, %v1243_v1  ;;  %v1440_v11 = vld [vmem:[%s1614_s7 + $0x154] sm:$0xf] }
  0x4c   : > { %801 = vmatpush.bf16.msra.mxu2 %v1266_v31  ;;  %v1458_v8 = vld [vmem:[%s1614_s7 + $0x1e4] sm:$0xf]  ;;  %v1371_v10 = vld [vmem:[%s1614_s7 + $0x1e8] sm:$0xf0]  ;;  %v1299_v12 = vld [vmem:[%s1614_s7 + $0x158] sm:$0xf0]  ;;  %v1182_v15 = vor.u32 %v1410_v6, %v1179_v7 }
  0x4d   : > { %820 = vmatpush.bf16.msra.mxu3 %v1330_v35  ;;  %v1424_v13 = vld [vmem:[%s1614_s7 + $0xd4] sm:$0xf]  ;;  %v1235_v14 = vld [vmem:[%s1614_s7 + $0xd8] sm:$0xf0]  ;;  %v1374_v16 = vor.u32 %v1458_v8, %v1371_v10  ;;  %v1302_v17 = vor.u32 %v1440_v11, %v1299_v12  ;;  %v1438_v23 = vld [vmem:[%s1614_s7 + $0x144] sm:$0xf] }
  0x4e   : > { %764 = vmatpush.bf16.msra.mxu0 %v1130_v43  ;;  %v1408_v18 = vld [vmem:[%s1614_s7 + $0x54] sm:$0xf]  ;;  %v1171_v19 = vld [vmem:[%s1614_s7 + $0x58] sm:$0xf0]  ;;  %v1238_v21 = vor.u32 %v1424_v13, %v1235_v14  ;;  %v1291_v24 = vld [vmem:[%s1614_s7 + $0x148] sm:$0xf0] }
  0x4f   : > { %783 = vmatpush.bf16.msra.mxu1 %v1194_v47  ;;  %v1456_v20 = vld [vmem:[%s1614_s7 + $0x1d4] sm:$0xf]  ;;  %v1363_v22 = vld [vmem:[%s1614_s7 + $0x1d8] sm:$0xf0]  ;;  %v1422_v25 = vld [vmem:[%s1614_s7 + $0xc4] sm:$0xf]  ;;  %v1174_v27 = vor.u32 %v1408_v18, %v1171_v19  ;;  %v1294_v32 = vor.u32 %v1438_v23, %v1291_v24 }
  0x50   : > { %802 = vmatpush.bf16.msra.mxu2 %v1258_v48  ;;  %v1227_v26 = vld [vmem:[%s1614_s7 + $0xc8] sm:$0xf0]  ;;  %v1406_v28 = vld [vmem:[%s1614_s7 + $0x44] sm:$0xf]  ;;  %v1366_v31 = vor.u32 %v1456_v20, %v1363_v22  ;;  %v1113_v34 = vld [vmem:[%s1616_s8 + $0x20] sm:$0xf] }
  0x51   : > { %821 = vmatpush.bf16.msra.mxu3 %v1322_v52  ;;  %765 = vmatmul.bf16.vlgmr.msra.gmra.mxu0 %v1698_v57  ;;  %v1163_v29 = vld [vmem:[%s1614_s7 + $0x48] sm:$0xf0]  ;;  %v1454_v30 = vld [vmem:[%s1614_s7 + $0x1c4] sm:$0xf]  ;;  %v1396_v35 = vld [vmem:[%s1616_s8 + $0x2c] sm:$0xf0]  ;;  %v1230_v36 = vor.u32 %v1422_v25, %v1227_v26 }
  0x52   : > { %784 = vmatmul.bf16.vlgmr.msra.gmra.mxu1 %v1703_v62  ;;  %833 = vmatpush.bf16.msrb.mxu0 %v1190_v3  ;;  %v1355_v33 = vld [vmem:[%s1614_s7 + $0x1c8] sm:$0xf0]  ;;  %v1394_v37 = vld [vmem:[%s1616_s8 + $0x24] sm:$0xf]  ;;  %v1115_v38 = vld [vmem:[%s1616_s8 + $0x30] sm:$0xf0]  ;;  %v1166_v44 = vor.u32 %v1406_v28, %v1163_v29 }
  0x53   : > { %852 = vmatpush.bf16.msrb.mxu1 %v1254_v58  ;;  %803 = vmatmul.bf16.vlgmr.msra.gmra.mxu2 %v1705_v63  ;;  %v1436_v39 = vld [vmem:[%s1614_s7 + $0x134] sm:$0xf]  ;;  %v1283_v40 = vld [vmem:[%s1614_s7 + $0x138] sm:$0xf0]  ;;  %v1121_v41 = vld [vmem:[%s1616_s8 + $0x28] sm:$0xf]  ;;  %v1358_v48 = vor.u32 %v1454_v30, %v1355_v33  ;;  %v1755_v59 = vor.u32 %v1394_v37, %v1115_v38 }
  0x54   : > { %871 = vmatpush.bf16.msrb.mxu2 %v1318_v53  ;;  %822 = vmatmul.bf16.vlgmr.msra.gmra.mxu3 %v1709_v2  ;;  %v1420_v42 = vld [vmem:[%s1614_s7 + $0xb4] sm:$0xf]  ;;  %v1219_v43 = vld [vmem:[%s1614_s7 + $0xb8] sm:$0xf0]  ;;  %v1397_v45 = vld [vmem:[%s1616_s8 + $0x34] sm:$0xf0]  ;;  %v1286_v49 = vor.u32 %v1436_v39, %v1283_v40  ;;  %v1750_v53 = vor.u32 %v1396_v35, %v1113_v34 }
  0x55   : > { %890 = vmatpush.bf16.msrb.mxu3 %v1382_v4  ;;  %v1395_v46 = vld [vmem:[%s1616_s8 + $0x2c] sm:$0xf]  ;;  %v1123_v47 = vld [vmem:[%s1616_s8 + $0x38] sm:$0xf0]  ;;  %v1404_v50 = vld [vmem:[%s1614_s7 + $0x34] sm:$0xf]  ;;  %v1222_v54 = vor.u32 %v1420_v42, %v1219_v43  ;;  %v1757_v60 = vor.u32 %v1397_v45, %v1121_v41 }
  0x56   : > { %834 = vmatpush.bf16.msrb.mxu0 %v1182_v15  ;;  %v1155_v51 = vld [vmem:[%s1614_s7 + $0x38] sm:$0xf0]  ;;  %v1452_v52 = vld [vmem:[%s1614_s7 + $0x1b4] sm:$0xf]  ;;  %v1434_v56 = vld [vmem:[%s1614_s7 + $0x124] sm:$0xf]  ;;  %v1126_v1 = vor.u32 %v1395_v46, %v1123_v47 }
  0x57   : > { %853 = vmatpush.bf16.msrb.mxu1 %v1246_v9  ;;  %v1347_v55 = vld [vmem:[%s1614_s7 + $0x1b8] sm:$0xf0]  ;;  %v1275_v58 = vld [vmem:[%s1614_s7 + $0x128] sm:$0xf0]  ;;  %v1418_v61 = vld [vmem:[%s1614_s7 + $0xa4] sm:$0xf]  ;;  %v1158_v3 = vor.u32 %v1404_v50, %v1155_v51 }
  0x58   : > { %872 = vmatpush.bf16.msrb.mxu2 %v1310_v5  ;;  %v1211_v0 = vld [vmem:[%s1614_s7 + $0xa8] sm:$0xf0]  ;;  %v1350_v4 = vor.u32 %v1452_v52, %v1347_v55  ;;  %v1278_v5 = vor.u32 %v1434_v56, %v1275_v58  ;;  %v1402_v6 = vld [vmem:[%s1614_s7 + $0x24] sm:$0xf]  ;;  %v1432_v11 = vld [vmem:[%s1614_s7 + $0x114] sm:$0xf] }
  0x59   : > { %891 = vmatpush.bf16.msrb.mxu3 %v1374_v16  ;;  %v1147_v7 = vld [vmem:[%s1614_s7 + $0x28] sm:$0xf0]  ;;  %v1450_v8 = vld [vmem:[%s1614_s7 + $0x1a4] sm:$0xf]  ;;  %v1214_v9 = vor.u32 %v1418_v61, %v1211_v0  ;;  %v1267_v12 = vld [vmem:[%s1614_s7 + $0x118] sm:$0xf0] }
  0x5a   : > { %835 = vmatpush.bf16.msrb.mxu0 %v1174_v27  ;;  %v1339_v10 = vld [vmem:[%s1614_s7 + $0x1a8] sm:$0xf0]  ;;  %v1416_v13 = vld [vmem:[%s1614_s7 + $0x94] sm:$0xf]  ;;  %v1203_v14 = vld [vmem:[%s1614_s7 + $0x98] sm:$0xf0]  ;;  %v1150_v15 = vor.u32 %v1402_v6, %v1147_v7 }
  0x5b   : > { %854 = vmatpush.bf16.msrb.mxu1 %v1238_v21  ;;  %v1342_v16 = vor.u32 %v1450_v8, %v1339_v10  ;;  %v1400_v18 = vld [vmem:[%s1614_s7 + $0x14] sm:$0xf]  ;;  %v1139_v19 = vld [vmem:[%s1614_s7 + $0x18] sm:$0xf0]  ;;  %v1206_v21 = vor.u32 %v1416_v13, %v1203_v14  ;;  %v1430_v23 = vld [vmem:[%s1614_s7 + $0x104] sm:$0xf] }
  0x5c   : > { %873 = vmatpush.bf16.msrb.mxu2 %v1302_v17  ;;  %v1270_v17 = vor.u32 %v1432_v11, %v1267_v12  ;;  %v1448_v20 = vld [vmem:[%s1614_s7 + $0x194] sm:$0xf]  ;;  %v1331_v22 = vld [vmem:[%s1614_s7 + $0x198] sm:$0xf0]  ;;  %v1259_v24 = vld [vmem:[%s1614_s7 + $0x108] sm:$0xf0]  ;;  %v1142_v27 = vor.u32 %v1400_v18, %v1139_v19 }
  0x5d   : > { %892 = vmatpush.bf16.msrb.mxu3 %v1366_v31  ;;  %v1414_v25 = vld [vmem:[%s1614_s7 + $0x84] sm:$0xf]  ;;  %v1195_v26 = vld [vmem:[%s1614_s7 + $0x88] sm:$0xf0]  ;;  %v1334_v28 = vor.u32 %v1448_v20, %v1331_v22  ;;  %v1262_v29 = vor.u32 %v1430_v23, %v1259_v24  ;;  %v317_v43 = vld [vmem:[#allocation2 + $0x30] sm:$0xff]  ;;  %p1383_p11 = scmp.ne.s32.totalorder %s1533_s14, 3 }
  0x5e   : > { %836 = vmatpush.bf16.msrb.mxu0 %v1166_v44  ;;  %v1398_v30 = vld [vmem:[%s1614_s7 + $0x4] sm:$0xf]  ;;  %v1131_v31 = vld [vmem:[%s1614_s7 + $0x8] sm:$0xf0]  ;;  %v320_v24 = vld [vmem:[#allocation2 + $0x10] sm:$0xff] }
  0x5f   : > { %855 = vmatpush.bf16.msrb.mxu1 %v1230_v36  ;;  %v1446_v33 = vld [vmem:[%s1614_s7 + $0x184] sm:$0xf]  ;;  %v1323_v34 = vld [vmem:[%s1614_s7 + $0x188] sm:$0xf0]  ;;  %v1134_v35 = vor.u32 %v1398_v30, %v1131_v31 }
  0x60   : > { %874 = vmatpush.bf16.msrb.mxu2 %v1294_v32  ;;  %v1198_v32 = vor.u32 %v1414_v25, %v1195_v26  ;;  %v1326_v36 = vor.u32 %v1446_v33, %v1323_v34  ;;  %v323_v6 = vld [vmem:[#allocation2 + $0x28] sm:$0xff]  ;;  %v322_v33 = vld [vmem:[#allocation2 + $0x20] sm:$0xff] }
  0x61   : > { %893 = vmatpush.bf16.msrb.mxu3 %v1358_v48  ;;  %770 = vmatmul.bf16.gmra.mxu0 %v1750_v53 }
  0x62   : > { %789 = vmatmul.bf16.gmra.mxu1 %v1755_v59  ;;  %837 = vmatpush.bf16.msrb.mxu0 %v1158_v3 }
  0x63   : > { %856 = vmatpush.bf16.msrb.mxu1 %v1222_v54  ;;  %808 = vmatmul.bf16.gmra.mxu2 %v1757_v60 }
  0x64   : > { %875 = vmatpush.bf16.msrb.mxu2 %v1286_v49  ;;  %827 = vmatmul.bf16.gmra.mxu3 %v1126_v1  ;;  %v319_v49 = vld [vmem:[#allocation2 + $0x18] sm:$0xff] }
  0x65   : > { %894 = vmatpush.bf16.msrb.mxu3 %v1350_v4 }
  0x66   : > { %838 = vmatpush.bf16.msrb.mxu0 %v1150_v15 }
  0x67   : > { %857 = vmatpush.bf16.msrb.mxu1 %v1214_v9 }
  0x68   : > { %876 = vmatpush.bf16.msrb.mxu2 %v1278_v5 }
  0x69   : > { %895 = vmatpush.bf16.msrb.mxu3 %v1342_v16 }
  0x6a   : > { %839 = vmatpush.bf16.msrb.mxu0 %v1142_v27 }
  0x6b   : > { %858 = vmatpush.bf16.msrb.mxu1 %v1206_v21 }
  0x6c   : > { %877 = vmatpush.bf16.msrb.mxu2 %v1270_v17  ;;  %v318_v17 = vld [vmem:[#allocation2] sm:$0xff] }
  0x6d   : > { %896 = vmatpush.bf16.msrb.mxu3 %v1334_v28 }
  0x6e   : > { %840 = vmatpush.bf16.msrb.mxu0 %v1134_v35 }
  0x6f   : > { %859 = vmatpush.bf16.msrb.mxu1 %v1198_v32 }
  0x70   : > { %878 = vmatpush.bf16.msrb.mxu2 %v1262_v29 }
  0x71   : > { %897 = vmatpush.bf16.msrb.mxu3 %v1326_v36  ;;  %841 = vmatmul.bf16.vlgmr.msrb.gmra.mxu0 %v1698_v57 }
  0x72   : > { %860 = vmatmul.bf16.vlgmr.msrb.gmra.mxu1 %v1703_v62 }
  0x73   : > { %879 = vmatmul.bf16.vlgmr.msrb.gmra.mxu2 %v1705_v63 }
  0x74   : > { %898 = vmatmul.bf16.vlgmr.msrb.gmra.mxu3 %v1709_v2 }
  0x81   : > { %846 = vmatmul.bf16.gmra.mxu0 %v1750_v53 }
  0x82   : > { %865 = vmatmul.bf16.gmra.mxu1 %v1755_v59  ;;  %v321_v59 = vld [vmem:[#allocation2 + $0x8] sm:$0xff] }
  0x83   : > { %884 = vmatmul.bf16.gmra.mxu2 %v1757_v60 }
  0x84   : > { %903 = vmatmul.bf16.gmra.mxu3 %v1126_v1 }
  0xce   : > { %v766_v37 = vpop.f32.mrf.mxu0 }
  0xcf   : > { %v785_v38 = vpop.f32.mrf.mxu1 }
  0xd0   : > { %v786_v39 = vadd.f32 %v785_v38, %v766_v37 }
  0xd6   : > { %v804_v40 = vpop.f32.mrf.mxu2  ;;  %v768_v57 = vpop.f32.mrf.mxu0 }
  0xd7   : > { %v805_v41 = vadd.f32 %v804_v40, %v786_v39  ;;  %v823_v42 = vpop.f32.mrf.mxu3  ;;  %v787_v62 = vpop.f32.mrf.mxu1 }
  0xd8   : > { %v788_v2 = vadd.f32 %v787_v62, %v768_v57 }
  0xd9   : > { %v824_v44 = vadd.f32 %v823_v42, %v805_v41  ;;  %v324_v41 = vld [vmem:[#allocation2 + $0x38] sm:$0xff] }
  0xdb   : > { %v909_v63 = vadd.f32 %v824_v44, %v317_v43 }
  0xdd   : > { %917 = vst [vmem:[#allocation2 + $0x30] sm:$0xff] %v909_v63 }
  0xde   : > { %v806_v45 = vpop.f32.mrf.mxu2  ;;  %v771_v48 = vpop.f32.mrf.mxu0 }
  0xdf   : > { %v807_v46 = vadd.f32 %v806_v45, %v788_v2  ;;  %v825_v47 = vpop.f32.mrf.mxu3  ;;  %v790_v50 = vpop.f32.mrf.mxu1 }
  0xe0   : > { %v791_v53 = vadd.f32 %v790_v50, %v771_v48 }
  0xe1   : > { %v826_v51 = vadd.f32 %v825_v47, %v807_v46 }
  0xe3   : > { %v911_v52 = vadd.f32 %v826_v51, %v319_v49 }
  0xe5   : > { %919 = vst [vmem:[#allocation2 + $0x18] sm:$0xff] %v911_v52 }
  0xe6   : > { %v809_v54 = vpop.f32.mrf.mxu2  ;;  %v773_v58 = vpop.f32.mrf.mxu0 }
  0xe7   : > { %v810_v55 = vadd.f32 %v809_v54, %v791_v53  ;;  %v828_v56 = vpop.f32.mrf.mxu3  ;;  %v792_v60 = vpop.f32.mrf.mxu1 }
  0xe8   : > { %v793_v1 = vadd.f32 %v792_v60, %v773_v58 }
  0xe9   : > { %v829_v61 = vadd.f32 %v828_v56, %v810_v55 }
  0xeb   : > { %v913_v0 = vadd.f32 %v829_v61, %v321_v59 }
  0xed   : > { %921 = vst [vmem:[#allocation2 + $0x8] sm:$0xff] %v913_v0 }
  0xee   : > { %v811_v3 = vpop.f32.mrf.mxu2  ;;  %v842_v7 = vpop.f32.mrf.mxu0 }
  0xef   : > { %v812_v4 = vadd.f32 %v811_v3, %v793_v1  ;;  %v830_v5 = vpop.f32.mrf.mxu3  ;;  %v861_v8 = vpop.f32.mrf.mxu1 }
  0xf0   : > { %v862_v11 = vadd.f32 %v861_v8, %v842_v7 }
  0xf1   : > { %v831_v9 = vadd.f32 %v830_v5, %v812_v4 }
  0xf3   : > { %v915_v10 = vadd.f32 %v831_v9, %v323_v6 }
  0xf5   : > { %923 = vst [vmem:[#allocation2 + $0x28] sm:$0xff] %v915_v10 }
  0xf6   : > { %v880_v12 = vpop.f32.mrf.mxu2  ;;  %v844_v15 = vpop.f32.mrf.mxu0 }
  0xf7   : > { %v899_v13 = vpop.f32.mrf.mxu3  ;;  %v881_v14 = vadd.f32 %v880_v12, %v862_v11  ;;  %v863_v16 = vpop.f32.mrf.mxu1 }
  0xf8   : > { %v864_v20 = vadd.f32 %v863_v16, %v844_v15 }
  0xf9   : > { %v900_v18 = vadd.f32 %v899_v13, %v881_v14 }
  0xfb   : > { %v910_v19 = vadd.f32 %v900_v18, %v318_v17 }
  0xfd   : > { %918 = vst [vmem:[#allocation2] sm:$0xff] %v910_v19 }
  0xfe   : > { %v882_v21 = vpop.f32.mrf.mxu2  ;;  %v847_v25 = vpop.f32.mrf.mxu0 }
  0xff   : > { %v901_v22 = vpop.f32.mrf.mxu3  ;;  %v883_v23 = vadd.f32 %v882_v21, %v864_v20  ;;  %v866_v26 = vpop.f32.mrf.mxu1 }
 0x100   : > { %v867_v29 = vadd.f32 %v866_v26, %v847_v25 }
 0x101   : > { %v902_v27 = vadd.f32 %v901_v22, %v883_v23 }
 0x103   : > { %v912_v28 = vadd.f32 %v902_v27, %v320_v24 }
 0x105   : > { %920 = vst [vmem:[#allocation2 + $0x10] sm:$0xff] %v912_v28 }
 0x106   : > { %v885_v30 = vpop.f32.mrf.mxu2  ;;  %v849_v35 = vpop.f32.mrf.mxu0 }
 0x107   : > { %v904_v31 = vpop.f32.mrf.mxu3  ;;  %v886_v32 = vadd.f32 %v885_v30, %v867_v29  ;;  %v868_v36 = vpop.f32.mrf.mxu1 }
 0x108   : > { %v869_v38 = vadd.f32 %v868_v36, %v849_v35 }
 0x109   : > { %v905_v34 = vadd.f32 %v904_v31, %v886_v32 }
 0x10b   : > { %v914_v37 = vadd.f32 %v905_v34, %v322_v33 }
 0x10d   : > { %922 = vst [vmem:[#allocation2 + $0x20] sm:$0xff] %v914_v37 }
 0x10e   : > { %v887_v39 = vpop.f32.mrf.mxu2 }
 0x10f   : > { %v888_v40 = vadd.f32 %v887_v39, %v869_v38  ;;  %v906_v42 = vpop.f32.mrf.mxu3 }
 0x111   : > { %v907_v57 = vadd.f32 %v906_v42, %v888_v40  ;;  %928 = sbr.rel (%p1383_p11) target bundleno = 291 (0x123), region = 63 }
 0x113   : > { %v916_v43 = vadd.f32 %v907_v57, %v324_v41 }
 0x115   : > { %924 = vst [vmem:[#allocation2 + $0x38] sm:$0xff] %v916_v43 }
 0x116   : > { %v929_v62 = vld [vmem:[#allocation2 + $0x30] sm:$0xff]  ;;  %v937_v44 = vld [vmem:[%s1836_s2] sm:$0x3]  ;;  %v931_v46 = vld [vmem:[#allocation2 + $0x18] sm:$0xff] }
 0x117   : > { %v930_v63 = vld [vmem:[#allocation2] sm:$0xff]  ;;  %v939_v2 = vperm.slane %v937_v44, 0  ;;  %v940_v45 = vperm.slane %v937_v44, 1  ;;  %v932_v47 = vld [vmem:[#allocation2 + $0x10] sm:$0xff]  ;;  %v933_v48 = vld [vmem:[#allocation2 + $0x8] sm:$0xff] }
 0x118   : > { %v934_v52 = vld [vmem:[#allocation2 + $0x20] sm:$0xff]  ;;  %v935_v54 = vld [vmem:[#allocation2 + $0x28] sm:$0xff] }
 0x119   : > { %v943_v49 = vadd.f32 %v939_v2, %v929_v62  ;;  %v944_v50 = vadd.f32 %v940_v45, %v930_v63  ;;  %v945_v51 = vadd.f32 %v939_v2, %v931_v46  ;;  %v946_v53 = vadd.f32 %v940_v45, %v932_v47 }
 0x11a   : > { %v947_v55 = vadd.f32 %v939_v2, %v933_v48  ;;  %v948_v58 = vadd.f32 %v940_v45, %v934_v52  ;;  %v949_v59 = vadd.f32 %v939_v2, %v935_v54 }
 0x11b   : > { %951 = vst [vmem:[%s1837_s3] sm:$0xff] %v943_v49 }
 0x11c   : > { %v936_v56 = vld [vmem:[#allocation2 + $0x38] sm:$0xff]  ;;  %952 = vst [vmem:[%s1837_s3 + $0x8] sm:$0xff] %v944_v50 }
 0x11d   : > { %953 = vst [vmem:[%s1837_s3 + $0x10] sm:$0xff] %v945_v51  ;;  %v950_v60 = vadd.f32 %v940_v45, %v936_v56 }
 0x11e   : > { %954 = vst [vmem:[%s1837_s3 + $0x18] sm:$0xff] %v946_v53 }
 0x11f   : > { %955 = vst [vmem:[%s1837_s3 + $0x20] sm:$0xff] %v947_v55 }
 0x120   : > { %956 = vst [vmem:[%s1837_s3 + $0x28] sm:$0xff] %v948_v58 }
 0x121   : > { %957 = vst [vmem:[%s1837_s3 + $0x30] sm:$0xff] %v949_v59 }
 0x122   : > { %958 = vst [vmem:[%s1837_s3 + $0x38] sm:$0xff] %v950_v60 }
 0x123 PF: > { %s13_s16 = sadd.s32 1, %s1541_s16   ;;  %s1838_s12 = smov %s1529_s13 }
 0x124   : > { %p10_p12 = scmp.ge.s32.totalorder %s13_s16, 6   ;;  %s1839_s13 = smov %s1599_s20 }
 0x125   : > { %s1840_s14 = smov %s1537_s15  ;;  %s1841_s15 = smov %s1843_s17 }
 0x126   :  { %12 = sbr.rel (!%p10_p12) target bundleno = 3 (0x3), region = 104 }

// kernel: forward.14
= control target key start
LH: loop header
LB: loop body
LE: loop exit
PB: predicated region body
PF: predicated region fallthrough
CT: control target
= control target key end

     0   :  { %s2480_s12 = smov 0   ;;  %s2482_s13 = smov 0   ;;  %s2922_s0 = inlined_call_operand.vmem [shape: bf16[32,4096], index: 0, kind: input, shape index: {}]   ;;  %s2923_s1 = inlined_call_operand.vmem [shape: bf16[4096,512], index: 1, kind: input, shape index: {}]   ;;  %s2924_s2 = inlined_call_operand.vmem [shape: f32[1,512], index: 2, kind: input, shape index: {}]   ;;  %s2925_s3 = inlined_call_operand.vmem [shape: f32[32,512], index: 3, kind: output, shape index: {}]  }
   0x1   :  { %s2484_s14 = smov 0   ;;  %s2486_s15 = smov 0  }
   0x2   :  { %s2488_s16 = smov 0  }
   0x3 LB: > { %s25_s17 = sadd.s32 1, %s2453_s15  ;;  %p48_p1 = scmp.ne.s32.totalorder %s2445_s13, %s2441_s12  ;;  %s2457_s16 = sphi %s2488_s16, %s13_s16   ;;  %s2453_s15 = sphi %s2486_s15, %s2929_s15   ;;  %s2449_s14 = sphi %s2484_s14, %s2928_s14   ;;  %s2445_s13 = sphi %s2482_s13, %s2927_s13   ;;  %s2441_s12 = sphi %s2480_s12, %s2926_s12  }
   0x4   : > { %p26_p0 = scmp.ge.s32.totalorder %s25_s17, 8  ;;  %p49_p2 = scmp.eq.s32.totalorder %s2457_s16, 0 }
   0x5   : > { %s41_s19 = sadd.s32 1, %s2445_s13  ;;  %p1681_p5 = scmp.ge.s32.totalorder %s2457_s16, 8 }
   0x6   : > { %s2931_s17 = smov (%p26_p0, %s25_s17), 0  ;;  %p50_p3 = por %p49_p2, %p48_p1 }
   0x7   : > { %s37_s18 = ssub.s32 %s2453_s15, %s2931_s17  ;;  %164 = sbr.rel (%p1681_p5) target bundleno = 24 (0x18), region = 20 }
   0x8   : > { %p39_p4 = scmp.eq.s32.totalorder %s37_s18, 0 }
   0xa   : > { %s2515_s20 = scalar_select %p39_p4, %s2445_s13, %s41_s19  }
   0xc   : > { %167 = sbr.rel (!%p50_p3) target bundleno = 24 (0x18), region = 24  ;;  %s169_s21 = sand.u32 (%p50_p3), 1, %s2445_s13  }
   0xd   : > { %s2240_s22 = sshll.u32 (%p50_p3), %s2453_s15, 4  ;;  %s1682_s23 = sshll.u32 (%p50_p3), %s169_s21, 6 }
   0xe   : > { %s177_s26 = scalar_lea.vmem (%p50_p3), %s2922_s0, %s2240_s22  ;;  %s171_s27 = scalar_lea.vmem (%p50_p3), [#allocation3], %s1682_s23 }
   0xf   : > { %v190_v0 = vld [vmem:[%s177_s26] sm:$0xff] (%p50_p3)  ;;  %v192_v1 = vld [vmem:[%s177_s26 + $0x8] sm:$0xff] (%p50_p3) }
  0x10   : > { %v194_v2 = vld [vmem:[%s177_s26 + $0x80] sm:$0xff] (%p50_p3)  ;;  %191 = vst [vmem:[%s171_s27] sm:$0xff] (%p50_p3), %v190_v0  ;;  %v196_v3 = vld [vmem:[%s177_s26 + $0x88] sm:$0xff] (%p50_p3) }
  0x11   : > { %193 = vst [vmem:[%s171_s27 + $0x8] sm:$0xff] %v192_v1  ;;  %v198_v4 = vld [vmem:[%s177_s26 + $0x100] sm:$0xff]  ;;  %v200_v5 = vld [vmem:[%s177_s26 + $0x108] sm:$0xff] }
  0x12   : > { %195 = vst [vmem:[%s171_s27 + $0x10] sm:$0xff] %v194_v2  ;;  %v202_v6 = vld [vmem:[%s177_s26 + $0x180] sm:$0xff]  ;;  %v204_v7 = vld [vmem:[%s177_s26 + $0x188] sm:$0xff] }
  0x13   : > { %197 = vst [vmem:[%s171_s27 + $0x18] sm:$0xff] %v196_v3 }
  0x14   : > { %199 = vst [vmem:[%s171_s27 + $0x20] sm:$0xff] %v198_v4 }
  0x15   : > { %201 = vst [vmem:[%s171_s27 + $0x28] sm:$0xff] %v200_v5 }
  0x16   : > { %203 = vst [vmem:[%s171_s27 + $0x30] sm:$0xff] %v202_v6 }
  0x17   : > { %205 = vst [vmem:[%s171_s27 + $0x38] sm:$0xff] %v204_v7 }
  0x18 PF: > { %p1685_p6 = scmp.ge.s32.totalorder %s2457_s16, 1  ;;  %p225_p7 = scmp.lt.s32.totalorder %s2457_s16, 9 }
  0x1a   : > { %p226_p8 = pnand %p1685_p6, %p225_p7 }
  0x1b   : > { %s232_s28 = sand.u32 (!%p226_p8), 1, %s2441_s12   ;;  %s1687_s29 = sshll.u32 (!%p226_p8), %s2449_s14, 6 }
  0x1c   : > { %229 = sbr.rel (%p226_p8) target bundleno = 372 (0x174), region = 51  ;;  %s1686_s30 = sshll.u32 (!%p226_p8), %s232_s28, 6 }
  0x1d   : > { %p278_p9 = scmp.lt.s32.totalorder (!%p226_p8), %s1687_s29, 511  ;;  %s2532_s8 = scalar_lea.vmem (!%p226_p8), [#allocation3], %s1686_s30 }
  0x1e   : > { %p1690_p10 = scmp.ne.s32.totalorder (!%p226_p8), %s2449_s14, 0 }
  0x21   : > { %s2933_s29 = smov (!%p278_p9, %s1687_s29), 511  ;;  %308 = sbr.rel (%p1690_p10) target bundleno = 55 (0x37), region = 59 }
  0x22   : > { %s2241_s4 = sshll.u32 %s2933_s29, 4 }
  0x23   : > { %s2530_s7 = scalar_lea.vmem %s2923_s1, %s2241_s4 }
  0x26   : > { %v2459_v8 = vmov 0.0  }
  0x27   : > { %309 = vst [vmem:[#allocation2 + $0x30] sm:$0xff] %v2459_v8 }
  0x28   : > { %310 = vst [vmem:[#allocation2] sm:$0xff] %v2459_v8 }
  0x29   : > { %311 = vst [vmem:[#allocation2 + $0x58] sm:$0xff] %v2459_v8 }
  0x2a   : > { %312 = vst [vmem:[#allocation2 + $0x18] sm:$0xff] %v2459_v8 }
  0x2b   : > { %313 = vst [vmem:[#allocation2 + $0x50] sm:$0xff] %v2459_v8 }
  0x2c   : > { %314 = vst [vmem:[#allocation2 + $0x68] sm:$0xff] %v2459_v8 }
  0x2d   : > { %315 = vst [vmem:[#allocation2 + $0x8] sm:$0xff] %v2459_v8 }
  0x2e   : > { %316 = vst [vmem:[#allocation2 + $0x48] sm:$0xff] %v2459_v8 }
  0x2f   : > { %317 = vst [vmem:[#allocation2 + $0x40] sm:$0xff] %v2459_v8 }
  0x30   : > { %318 = vst [vmem:[#allocation2 + $0x20] sm:$0xff] %v2459_v8 }
  0x31   : > { %319 = vst [vmem:[#allocation2 + $0x10] sm:$0xff] %v2459_v8 }
  0x32   : > { %320 = vst [vmem:[#allocation2 + $0x38] sm:$0xff] %v2459_v8 }
  0x33   : > { %321 = vst [vmem:[#allocation2 + $0x60] sm:$0xff] %v2459_v8 }
  0x34   : > { %322 = vst [vmem:[#allocation2 + $0x70] sm:$0xff] %v2459_v8 }
  0x35   : > { %323 = vst [vmem:[#allocation2 + $0x78] sm:$0xff] %v2459_v8 }
  0x36   : > { %324 = vst [vmem:[#allocation2 + $0x28] sm:$0xff] %v2459_v8 }
  0x37 PF: > { %v1837_v9 = vld [vmem:[%s2530_s7 + $0xe0] sm:$0xf]  ;;  %v2280_v10 = vld [vmem:[%s2530_s7 + $0xec] sm:$0xf0]  ;;  %p2235_p11 = scmp.ne.s32.totalorder %s2449_s14, 7 }
  0x38   : > { %v1965_v11 = vld [vmem:[%s2530_s7 + $0x1e0] sm:$0xf]  ;;  %v1838_v12 = vor.u32 %v2280_v10, %v1837_v9  ;;  %v2312_v13 = vld [vmem:[%s2530_s7 + $0x1ec] sm:$0xf0] }
  0x39   : > { %v2093_v14 = vld [vmem:[%s2530_s7 + $0x2e0] sm:$0xf]  ;;  %v2344_v15 = vld [vmem:[%s2530_s7 + $0x2ec] sm:$0xf0]  ;;  %v1966_v16 = vor.u32 %v2312_v13, %v1965_v11 }
  0x3a   : > { %v2094_v17 = vor.u32 %v2344_v15, %v2093_v14  ;;  %v2221_v18 = vld [vmem:[%s2530_s7 + $0x3e0] sm:$0xf]  ;;  %v2376_v19 = vld [vmem:[%s2530_s7 + $0x3ec] sm:$0xf0]  ;;  %1157 = vmatpush.bf16.msra.mxu0 %v1838_v12 }
  0x3b   : > { %v1821_v20 = vld [vmem:[%s2530_s7 + $0xc0] sm:$0xf]  ;;  %v2222_v21 = vor.u32 %v2376_v19, %v2221_v18  ;;  %v2276_v22 = vld [vmem:[%s2530_s7 + $0xcc] sm:$0xf0]  ;;  %1176 = vmatpush.bf16.msra.mxu1 %v1966_v16 }
  0x3c   : > { %v1949_v23 = vld [vmem:[%s2530_s7 + $0x1c0] sm:$0xf]  ;;  %v2308_v24 = vld [vmem:[%s2530_s7 + $0x1cc] sm:$0xf0]  ;;  %1195 = vmatpush.bf16.msra.mxu2 %v2094_v17  ;;  %v1822_v25 = vor.u32 %v2276_v22, %v1821_v20 }
  0x3d   : > { %v1950_v26 = vor.u32 %v2308_v24, %v1949_v23  ;;  %v2077_v27 = vld [vmem:[%s2530_s7 + $0x2c0] sm:$0xf]  ;;  %v2340_v28 = vld [vmem:[%s2530_s7 + $0x2cc] sm:$0xf0]  ;;  %1214 = vmatpush.bf16.msra.mxu3 %v2222_v21 }
  0x3e   : > { %v2205_v29 = vld [vmem:[%s2530_s7 + $0x3c0] sm:$0xf]  ;;  %v2078_v30 = vor.u32 %v2340_v28, %v2077_v27  ;;  %v2372_v31 = vld [vmem:[%s2530_s7 + $0x3cc] sm:$0xf0]  ;;  %1158 = vmatpush.bf16.msra.mxu0 %v1822_v25 }
  0x3f   : > { %v1805_v32 = vld [vmem:[%s2530_s7 + $0xa0] sm:$0xf]  ;;  %v2272_v33 = vld [vmem:[%s2530_s7 + $0xac] sm:$0xf0]  ;;  %v2206_v34 = vor.u32 %v2372_v31, %v2205_v29  ;;  %1177 = vmatpush.bf16.msra.mxu1 %v1950_v26 }
  0x40   : > { %v1933_v35 = vld [vmem:[%s2530_s7 + $0x1a0] sm:$0xf]  ;;  %v2304_v36 = vld [vmem:[%s2530_s7 + $0x1ac] sm:$0xf0]  ;;  %v1806_v38 = vor.u32 %v2272_v33, %v1805_v32  ;;  %1196 = vmatpush.bf16.msra.mxu2 %v2078_v30 }
  0x41   : > { %v2061_v37 = vld [vmem:[%s2530_s7 + $0x2a0] sm:$0xf]  ;;  %v2336_v39 = vld [vmem:[%s2530_s7 + $0x2ac] sm:$0xf0]  ;;  %v1934_v42 = vor.u32 %v2304_v36, %v1933_v35  ;;  %1215 = vmatpush.bf16.msra.mxu3 %v2206_v34 }
  0x42   : > { %v2189_v40 = vld [vmem:[%s2530_s7 + $0x3a0] sm:$0xf]  ;;  %v2368_v41 = vld [vmem:[%s2530_s7 + $0x3ac] sm:$0xf0]  ;;  %v2062_v43 = vor.u32 %v2336_v39, %v2061_v37  ;;  %1159 = vmatpush.bf16.msra.mxu0 %v1806_v38  ;;  %v2242_v39 = vld [vmem:[%s2532_s8 + $0x4] sm:$0xf] }
  0x43   : > { %v1789_v44 = vld [vmem:[%s2530_s7 + $0x80] sm:$0xf]  ;;  %v2268_v45 = vld [vmem:[%s2530_s7 + $0x8c] sm:$0xf0]  ;;  %v2190_v47 = vor.u32 %v2368_v41, %v2189_v40  ;;  %1178 = vmatpush.bf16.msra.mxu1 %v1934_v42  ;;  %v1695_v40 = vld [vmem:[%s2532_s8 + $0x10] sm:$0xf0] }
  0x44   : > { %v1917_v46 = vld [vmem:[%s2530_s7 + $0x180] sm:$0xf]  ;;  %v2300_v48 = vld [vmem:[%s2530_s7 + $0x18c] sm:$0xf0]  ;;  %v1790_v53 = vor.u32 %v2268_v45, %v1789_v44  ;;  %1197 = vmatpush.bf16.msra.mxu2 %v2062_v43  ;;  %v2342_v41 = vld [vmem:[%s2530_s7 + $0x2e4] sm:$0xf] }
  0x45   : > { %v2045_v49 = vld [vmem:[%s2530_s7 + $0x280] sm:$0xf]  ;;  %v2332_v50 = vld [vmem:[%s2530_s7 + $0x28c] sm:$0xf0]  ;;  %v1918_v54 = vor.u32 %v2300_v48, %v1917_v46  ;;  %1216 = vmatpush.bf16.msra.mxu3 %v2190_v47  ;;  %v2095_v42 = vld [vmem:[%s2530_s7 + $0x2f0] sm:$0xf0] }
  0x46   : > { %v2173_v51 = vld [vmem:[%s2530_s7 + $0x380] sm:$0xf]  ;;  %v2364_v52 = vld [vmem:[%s2530_s7 + $0x38c] sm:$0xf0]  ;;  %v2046_v55 = vor.u32 %v2332_v50, %v2045_v49  ;;  %1160 = vmatpush.bf16.msra.mxu0 %v1790_v53  ;;  %v1701_v44 = vld [vmem:[%s2532_s8 + $0x8] sm:$0xf]  ;;  %v2098_v53 = vor.u32 %v2342_v41, %v2095_v42 }
  0x47   : > { %v1773_v56 = vld [vmem:[%s2530_s7 + $0x60] sm:$0xf]  ;;  %v2264_v57 = vld [vmem:[%s2530_s7 + $0x6c] sm:$0xf0]  ;;  %v2174_v59 = vor.u32 %v2364_v52, %v2173_v51  ;;  %1179 = vmatpush.bf16.msra.mxu1 %v1918_v54  ;;  %v2310_v45 = vld [vmem:[%s2530_s7 + $0x1e4] sm:$0xf] }
  0x48   : > { %v1901_v58 = vld [vmem:[%s2530_s7 + $0x160] sm:$0xf]  ;;  %v2296_v60 = vld [vmem:[%s2530_s7 + $0x16c] sm:$0xf0]  ;;  %v1774_v1 = vor.u32 %v2264_v57, %v1773_v56  ;;  %1198 = vmatpush.bf16.msra.mxu2 %v2046_v55  ;;  %v1967_v46 = vld [vmem:[%s2530_s7 + $0x1f0] sm:$0xf0] }
  0x49   : > { %v2029_v61 = vld [vmem:[%s2530_s7 + $0x260] sm:$0xf]  ;;  %v2328_v62 = vld [vmem:[%s2530_s7 + $0x26c] sm:$0xf0]  ;;  %v1902_v2 = vor.u32 %v2296_v60, %v1901_v58  ;;  %1217 = vmatpush.bf16.msra.mxu3 %v2174_v59  ;;  %v2245_v49 = vld [vmem:[%s2532_s8 + $0x14] sm:$0xf0]  ;;  %v1970_v58 = vor.u32 %v2310_v45, %v1967_v46 }
  0x4a   : > { %v2157_v63 = vld [vmem:[%s2530_s7 + $0x360] sm:$0xf]  ;;  %v2360_v0 = vld [vmem:[%s2530_s7 + $0x36c] sm:$0xf0]  ;;  %v2030_v3 = vor.u32 %v2328_v62, %v2029_v61  ;;  %1161 = vmatpush.bf16.msra.mxu0 %v1774_v1  ;;  %v2243_v50 = vld [vmem:[%s2532_s8 + $0xc] sm:$0xf]  ;;  %v2619_v62 = vor.u32 %v2242_v39, %v1695_v40 }
  0x4b   : > { %v1757_v4 = vld [vmem:[%s2530_s7 + $0x40] sm:$0xf]  ;;  %v2260_v5 = vld [vmem:[%s2530_s7 + $0x4c] sm:$0xf0]  ;;  %v2158_v7 = vor.u32 %v2360_v0, %v2157_v63  ;;  %1180 = vmatpush.bf16.msra.mxu1 %v1902_v2  ;;  %v1703_v51 = vld [vmem:[%s2532_s8 + $0x18] sm:$0xf0]  ;;  %v2621_v63 = vor.u32 %v2245_v49, %v1701_v44 }
  0x4c   : > { %v1885_v6 = vld [vmem:[%s2530_s7 + $0x140] sm:$0xf]  ;;  %v2292_v8 = vld [vmem:[%s2530_s7 + $0x14c] sm:$0xf0]  ;;  %v1758_v13 = vor.u32 %v2260_v5, %v1757_v4  ;;  %1199 = vmatpush.bf16.msra.mxu2 %v2030_v3  ;;  %v2278_v54 = vld [vmem:[%s2530_s7 + $0xe4] sm:$0xf]  ;;  %v2625_v2 = vor.u32 %v2243_v50, %v1703_v51 }
  0x4d   : > { %v2013_v9 = vld [vmem:[%s2530_s7 + $0x240] sm:$0xf]  ;;  %v2324_v10 = vld [vmem:[%s2530_s7 + $0x24c] sm:$0xf0]  ;;  %v1886_v14 = vor.u32 %v2292_v8, %v1885_v6  ;;  %1218 = vmatpush.bf16.msra.mxu3 %v2158_v7  ;;  %v1839_v55 = vld [vmem:[%s2530_s7 + $0xf0] sm:$0xf0] }
  0x4e   : > { %v2141_v11 = vld [vmem:[%s2530_s7 + $0x340] sm:$0xf]  ;;  %v2356_v12 = vld [vmem:[%s2530_s7 + $0x34c] sm:$0xf0]  ;;  %v2014_v15 = vor.u32 %v2324_v10, %v2013_v9  ;;  %1162 = vmatpush.bf16.msra.mxu0 %v1758_v13  ;;  %v2374_v56 = vld [vmem:[%s2530_s7 + $0x3e4] sm:$0xf]  ;;  %v1842_v3 = vor.u32 %v2278_v54, %v1839_v55 }
  0x4f   : > { %v1741_v16 = vld [vmem:[%s2530_s7 + $0x20] sm:$0xf]  ;;  %v2256_v17 = vld [vmem:[%s2530_s7 + $0x2c] sm:$0xf0]  ;;  %v2142_v19 = vor.u32 %v2356_v12, %v2141_v11  ;;  %1181 = vmatpush.bf16.msra.mxu1 %v1886_v14  ;;  %v2223_v59 = vld [vmem:[%s2530_s7 + $0x3f0] sm:$0xf0] }
  0x50   : > { %v1869_v18 = vld [vmem:[%s2530_s7 + $0x120] sm:$0xf]  ;;  %v2288_v20 = vld [vmem:[%s2530_s7 + $0x12c] sm:$0xf0]  ;;  %v1742_v26 = vor.u32 %v2256_v17, %v1741_v16  ;;  %1200 = vmatpush.bf16.msra.mxu2 %v2014_v15  ;;  %v2338_v60 = vld [vmem:[%s2530_s7 + $0x2c4] sm:$0xf]  ;;  %v2226_v4 = vor.u32 %v2374_v56, %v2223_v59 }
  0x51   : > { %v1997_v21 = vld [vmem:[%s2530_s7 + $0x220] sm:$0xf]  ;;  %v2320_v22 = vld [vmem:[%s2530_s7 + $0x22c] sm:$0xf0]  ;;  %v1870_v30 = vor.u32 %v2288_v20, %v1869_v18  ;;  %1219 = vmatpush.bf16.msra.mxu3 %v2142_v19  ;;  %v2079_v61 = vld [vmem:[%s2530_s7 + $0x2d0] sm:$0xf0] }
  0x52   : > { %v2125_v23 = vld [vmem:[%s2530_s7 + $0x320] sm:$0xf]  ;;  %v2352_v24 = vld [vmem:[%s2530_s7 + $0x32c] sm:$0xf0]  ;;  %v1998_v31 = vor.u32 %v2320_v22, %v1997_v21  ;;  %1163 = vmatpush.bf16.msra.mxu0 %v1742_v26  ;;  %v2306_v0 = vld [vmem:[%s2530_s7 + $0x1c4] sm:$0xf]  ;;  %v2082_v5 = vor.u32 %v2338_v60, %v2079_v61 }
  0x53   : > { %v1725_v25 = vld [vmem:[%s2530_s7] sm:$0xf]  ;;  %v2252_v27 = vld [vmem:[%s2530_s7 + $0xc] sm:$0xf0]  ;;  %v2126_v35 = vor.u32 %v2352_v24, %v2125_v23  ;;  %1182 = vmatpush.bf16.msra.mxu1 %v1870_v30  ;;  %v1951_v1 = vld [vmem:[%s2530_s7 + $0x1d0] sm:$0xf0] }
  0x54   : > { %v1853_v28 = vld [vmem:[%s2530_s7 + $0x100] sm:$0xf]  ;;  %v2284_v29 = vld [vmem:[%s2530_s7 + $0x10c] sm:$0xf0]  ;;  %v1726_v43 = vor.u32 %v2252_v27, %v1725_v25  ;;  %1201 = vmatpush.bf16.msra.mxu2 %v1998_v31  ;;  %v2274_v6 = vld [vmem:[%s2530_s7 + $0xc4] sm:$0xf]  ;;  %v1954_v9 = vor.u32 %v2306_v0, %v1951_v1 }
  0x55   : > { %v1981_v32 = vld [vmem:[%s2530_s7 + $0x200] sm:$0xf]  ;;  %v2316_v33 = vld [vmem:[%s2530_s7 + $0x20c] sm:$0xf0]  ;;  %v1854_v47 = vor.u32 %v2284_v29, %v1853_v28  ;;  %1220 = vmatpush.bf16.msra.mxu3 %v2126_v35  ;;  %v1823_v7 = vld [vmem:[%s2530_s7 + $0xd0] sm:$0xf0] }
  0x56   : > { %v2109_v34 = vld [vmem:[%s2530_s7 + $0x300] sm:$0xf]  ;;  %v2348_v36 = vld [vmem:[%s2530_s7 + $0x30c] sm:$0xf0]  ;;  %v1982_v48 = vor.u32 %v2316_v33, %v1981_v32  ;;  %1164 = vmatpush.bf16.msra.mxu0 %v1726_v43  ;;  %v2370_v8 = vld [vmem:[%s2530_s7 + $0x3c4] sm:$0xf]  ;;  %v1826_v15 = vor.u32 %v2274_v6, %v1823_v7 }
  0x57   : > { %v1693_v37 = vld [vmem:[%s2532_s8] sm:$0xf]  ;;  %v2244_v38 = vld [vmem:[%s2532_s8 + $0xc] sm:$0xf0]  ;;  %v2110_v52 = vor.u32 %v2348_v36, %v2109_v34  ;;  %1183 = vmatpush.bf16.msra.mxu1 %v1854_v47  ;;  %v2207_v10 = vld [vmem:[%s2530_s7 + $0x3d0] sm:$0xf0] }
  0x58   : > { %v2614_v57 = vor.u32 %v2244_v38, %v1693_v37  ;;  %1202 = vmatpush.bf16.msra.mxu2 %v1982_v48  ;;  %v2334_v11 = vld [vmem:[%s2530_s7 + $0x2a4] sm:$0xf]  ;;  %v2063_v12 = vld [vmem:[%s2530_s7 + $0x2b0] sm:$0xf0]  ;;  %v2210_v16 = vor.u32 %v2370_v8, %v2207_v10  ;;  %v1709_v34 = vld [vmem:[%s2532_s8 + $0x20] sm:$0xf] }
  0x59   : > { %1221 = vmatpush.bf16.msra.mxu3 %v2110_v52  ;;  %v2302_v13 = vld [vmem:[%s2530_s7 + $0x1a4] sm:$0xf]  ;;  %v1935_v14 = vld [vmem:[%s2530_s7 + $0x1b0] sm:$0xf0]  ;;  %v2066_v17 = vor.u32 %v2334_v11, %v2063_v12  ;;  %v2248_v35 = vld [vmem:[%s2532_s8 + $0x2c] sm:$0xf0] }
  0x5a   : > { %1165 = vmatmul.bf16.vlgmr.msra.gmra.mxu0 %v2614_v57  ;;  %1184 = vmatmul.bf16.vlgmr.msra.gmra.mxu1 %v2619_v62  ;;  %v2270_v18 = vld [vmem:[%s2530_s7 + $0xa4] sm:$0xf]  ;;  %v1807_v19 = vld [vmem:[%s2530_s7 + $0xb0] sm:$0xf0]  ;;  %v1938_v21 = vor.u32 %v2302_v13, %v1935_v14  ;;  %v1717_v41 = vld [vmem:[%s2532_s8 + $0x28] sm:$0xf] }
  0x5b   : > { %1252 = vmatpush.bf16.msrb.mxu1 %v1970_v58  ;;  %1203 = vmatmul.bf16.vlgmr.msra.gmra.mxu2 %v2621_v63  ;;  %v2366_v20 = vld [vmem:[%s2530_s7 + $0x3a4] sm:$0xf]  ;;  %v2191_v22 = vld [vmem:[%s2530_s7 + $0x3b0] sm:$0xf0]  ;;  %v1810_v27 = vor.u32 %v2270_v18, %v1807_v19  ;;  %v2249_v45 = vld [vmem:[%s2532_s8 + $0x34] sm:$0xf0] }
  0x5c   : > { %1271 = vmatpush.bf16.msrb.mxu2 %v2098_v53  ;;  %1222 = vmatmul.bf16.vlgmr.msra.gmra.mxu3 %v2625_v2  ;;  %v2330_v23 = vld [vmem:[%s2530_s7 + $0x284] sm:$0xf]  ;;  %v2047_v24 = vld [vmem:[%s2530_s7 + $0x290] sm:$0xf0]  ;;  %v2194_v31 = vor.u32 %v2366_v20, %v2191_v22  ;;  %v2247_v46 = vld [vmem:[%s2532_s8 + $0x2c] sm:$0xf]  ;;  %v2666_v53 = vor.u32 %v2248_v35, %v1709_v34  ;;  %v2673_v60 = vor.u32 %v2249_v45, %v1717_v41 }
  0x5d   : > { %1233 = vmatpush.bf16.msrb.mxu0 %v1842_v3  ;;  %1290 = vmatpush.bf16.msrb.mxu3 %v2226_v4  ;;  %v2298_v25 = vld [vmem:[%s2530_s7 + $0x184] sm:$0xf]  ;;  %v1919_v26 = vld [vmem:[%s2530_s7 + $0x190] sm:$0xf0]  ;;  %v2050_v32 = vor.u32 %v2330_v23, %v2047_v24  ;;  %v1719_v47 = vld [vmem:[%s2532_s8 + $0x38] sm:$0xf0] }
  0x5e   : > { %v2266_v28 = vld [vmem:[%s2530_s7 + $0x84] sm:$0xf]  ;;  %v1791_v29 = vld [vmem:[%s2530_s7 + $0x90] sm:$0xf0]  ;;  %v1922_v36 = vor.u32 %v2298_v25, %v1919_v26  ;;  %v2677_v1 = vor.u32 %v2247_v46, %v1719_v47  ;;  %v2281_v41 = vld [vmem:[%s2530_s7 + $0xf4] sm:$0xf0] }
  0x5f   : > { %1253 = vmatpush.bf16.msrb.mxu1 %v1954_v9  ;;  %v2362_v30 = vld [vmem:[%s2530_s7 + $0x384] sm:$0xf]  ;;  %v2175_v33 = vld [vmem:[%s2530_s7 + $0x390] sm:$0xf0]  ;;  %v1794_v44 = vor.u32 %v2266_v28, %v1791_v29  ;;  %v2345_v28 = vld [vmem:[%s2530_s7 + $0x2f4] sm:$0xf0] }
  0x60   : > { %1272 = vmatpush.bf16.msrb.mxu2 %v2082_v5  ;;  %v2246_v37 = vld [vmem:[%s2532_s8 + $0x24] sm:$0xf]  ;;  %v1711_v38 = vld [vmem:[%s2532_s8 + $0x30] sm:$0xf0]  ;;  %v2178_v48 = vor.u32 %v2362_v30, %v2175_v33  ;;  %v2085_v45 = vld [vmem:[%s2530_s7 + $0x2c8] sm:$0xf] }
  0x61   : > { %1234 = vmatpush.bf16.msrb.mxu0 %v1826_v15  ;;  %1291 = vmatpush.bf16.msrb.mxu3 %v2210_v16  ;;  %v2326_v39 = vld [vmem:[%s2530_s7 + $0x264] sm:$0xf]  ;;  %v2031_v40 = vld [vmem:[%s2530_s7 + $0x270] sm:$0xf0]  ;;  %v2671_v59 = vor.u32 %v2246_v37, %v1711_v38  ;;  %v2341_v46 = vld [vmem:[%s2530_s7 + $0x2d4] sm:$0xf0] }
  0x62   : > { %v2294_v42 = vld [vmem:[%s2530_s7 + $0x164] sm:$0xf]  ;;  %v1903_v43 = vld [vmem:[%s2530_s7 + $0x170] sm:$0xf0]  ;;  %v2034_v49 = vor.u32 %v2326_v39, %v2031_v40  ;;  %v1845_v40 = vld [vmem:[%s2530_s7 + $0xe8] sm:$0xf] }
  0x63   : > { %1254 = vmatpush.bf16.msrb.mxu1 %v1938_v21  ;;  %v2262_v50 = vld [vmem:[%s2530_s7 + $0x64] sm:$0xf]  ;;  %v1775_v51 = vld [vmem:[%s2530_s7 + $0x70] sm:$0xf0]  ;;  %v1906_v54 = vor.u32 %v2294_v42, %v1903_v43  ;;  %v2229_v42 = vld [vmem:[%s2530_s7 + $0x3e8] sm:$0xf] }
  0x64   : > { %1273 = vmatpush.bf16.msrb.mxu2 %v2066_v17  ;;  %v2358_v52 = vld [vmem:[%s2530_s7 + $0x364] sm:$0xf]  ;;  %v2159_v55 = vld [vmem:[%s2530_s7 + $0x370] sm:$0xf0]  ;;  %v1778_v3 = vor.u32 %v2262_v50, %v1775_v51  ;;  %v1829_v50 = vld [vmem:[%s2530_s7 + $0xc8] sm:$0xf] }
  0x65   : > { %1235 = vmatpush.bf16.msrb.mxu0 %v1810_v27  ;;  %1292 = vmatpush.bf16.msrb.mxu3 %v2194_v31  ;;  %v2322_v56 = vld [vmem:[%s2530_s7 + $0x244] sm:$0xf]  ;;  %v2015_v58 = vld [vmem:[%s2530_s7 + $0x250] sm:$0xf0]  ;;  %v2162_v4 = vor.u32 %v2358_v52, %v2159_v55  ;;  %v2101_v27 = vld [vmem:[%s2530_s7 + $0x2e8] sm:$0xf] }
  0x66   : > { %v2290_v61 = vld [vmem:[%s2530_s7 + $0x144] sm:$0xf]  ;;  %v1887_v0 = vld [vmem:[%s2530_s7 + $0x150] sm:$0xf0]  ;;  %v2018_v5 = vor.u32 %v2322_v56, %v2015_v58  ;;  %v1973_v31 = vld [vmem:[%s2530_s7 + $0x1e8] sm:$0xf]  ;;  %v2102_v39 = vor.u32 %v2345_v28, %v2101_v27 }
  0x67   : > { %1255 = vmatpush.bf16.msrb.mxu1 %v1922_v36  ;;  %v2258_v6 = vld [vmem:[%s2530_s7 + $0x44] sm:$0xf]  ;;  %v1759_v7 = vld [vmem:[%s2530_s7 + $0x50] sm:$0xf0]  ;;  %v1890_v9 = vor.u32 %v2290_v61, %v1887_v0  ;;  %v2277_v51 = vld [vmem:[%s2530_s7 + $0xd4] sm:$0xf0] }
  0x68   : > { %1274 = vmatpush.bf16.msrb.mxu2 %v2050_v32  ;;  %v2354_v8 = vld [vmem:[%s2530_s7 + $0x344] sm:$0xf]  ;;  %v2143_v10 = vld [vmem:[%s2530_s7 + $0x350] sm:$0xf0]  ;;  %v1762_v15 = vor.u32 %v2258_v6, %v1759_v7  ;;  %v2313_v32 = vld [vmem:[%s2530_s7 + $0x1f4] sm:$0xf0] }
  0x69   : > { %1236 = vmatpush.bf16.msrb.mxu0 %v1794_v44  ;;  %1293 = vmatpush.bf16.msrb.mxu3 %v2178_v48  ;;  %v2318_v11 = vld [vmem:[%s2530_s7 + $0x224] sm:$0xf]  ;;  %v1999_v12 = vld [vmem:[%s2530_s7 + $0x230] sm:$0xf0]  ;;  %v2146_v17 = vor.u32 %v2354_v8, %v2143_v10  ;;  %v1974_v43 = vor.u32 %v2313_v32, %v1973_v31  ;;  %v2377_v44 = vld [vmem:[%s2530_s7 + $0x3f4] sm:$0xf0] }
  0x6a   : > { %1170 = vmatmul.bf16.gmra.mxu0 %v2666_v53  ;;  %1189 = vmatmul.bf16.gmra.mxu1 %v2671_v59  ;;  %v2286_v13 = vld [vmem:[%s2530_s7 + $0x124] sm:$0xf]  ;;  %v1871_v14 = vld [vmem:[%s2530_s7 + $0x130] sm:$0xf0]  ;;  %v2002_v18 = vor.u32 %v2318_v11, %v1999_v12  ;;  %v2230_v52 = vor.u32 %v2377_v44, %v2229_v42  ;;  %v1957_v55 = vld [vmem:[%s2530_s7 + $0x1c8] sm:$0xf] }
  0x6b   : > { %1256 = vmatpush.bf16.msrb.mxu1 %v1906_v54  ;;  %1208 = vmatmul.bf16.gmra.mxu2 %v2673_v60  ;;  %v2254_v16 = vld [vmem:[%s2530_s7 + $0x24] sm:$0xf]  ;;  %v1743_v19 = vld [vmem:[%s2530_s7 + $0x30] sm:$0xf0]  ;;  %v1874_v22 = vor.u32 %v2286_v13, %v1871_v14  ;;  %v2086_v54 = vor.u32 %v2341_v46, %v2085_v45  ;;  %v2309_v56 = vld [vmem:[%s2530_s7 + $0x1d4] sm:$0xf0] }
  0x6c   : > { %1275 = vmatpush.bf16.msrb.mxu2 %v2034_v49  ;;  %1227 = vmatmul.bf16.gmra.mxu3 %v2677_v1  ;;  %v2350_v20 = vld [vmem:[%s2530_s7 + $0x324] sm:$0xf]  ;;  %v2127_v21 = vld [vmem:[%s2530_s7 + $0x330] sm:$0xf0]  ;;  %v1746_v29 = vor.u32 %v2254_v16, %v1743_v19  ;;  %v1846_v49 = vor.u32 %v2281_v41, %v1845_v40  ;;  %v2213_v58 = vld [vmem:[%s2530_s7 + $0x3c8] sm:$0xf] }
  0x6d   : > { %1237 = vmatpush.bf16.msrb.mxu0 %v1778_v3  ;;  %1294 = vmatpush.bf16.msrb.mxu3 %v2162_v4  ;;  %v2314_v23 = vld [vmem:[%s2530_s7 + $0x204] sm:$0xf]  ;;  %v1983_v24 = vld [vmem:[%s2530_s7 + $0x210] sm:$0xf0]  ;;  %v2130_v33 = vor.u32 %v2350_v20, %v2127_v21  ;;  %v2373_v61 = vld [vmem:[%s2530_s7 + $0x3d4] sm:$0xf0]  ;;  %v1830_v4 = vor.u32 %v2277_v51, %v1829_v50 }
  0x6e   : > { %v2282_v25 = vld [vmem:[%s2530_s7 + $0x104] sm:$0xf]  ;;  %v1855_v26 = vld [vmem:[%s2530_s7 + $0x110] sm:$0xf0]  ;;  %v1986_v34 = vor.u32 %v2314_v23, %v1983_v24  ;;  %v2069_v0 = vld [vmem:[%s2530_s7 + $0x2a8] sm:$0xf]  ;;  %v2214_v8 = vor.u32 %v2373_v61, %v2213_v58 }
  0x6f   : > { %1257 = vmatpush.bf16.msrb.mxu1 %v1890_v9  ;;  %v2250_v30 = vld [vmem:[%s2530_s7 + $0x4] sm:$0xf]  ;;  %v1727_v35 = vld [vmem:[%s2530_s7 + $0x10] sm:$0xf0]  ;;  %v1858_v38 = vor.u32 %v2282_v25, %v1855_v26  ;;  %v2337_v3 = vld [vmem:[%s2530_s7 + $0x2b4] sm:$0xf0] }
  0x70   : > { %1276 = vmatpush.bf16.msrb.mxu2 %v2018_v5  ;;  %v2346_v36 = vld [vmem:[%s2530_s7 + $0x304] sm:$0xf]  ;;  %v2111_v37 = vld [vmem:[%s2530_s7 + $0x310] sm:$0xf0]  ;;  %v1730_v47 = vor.u32 %v2250_v30, %v1727_v35  ;;  %v1958_v5 = vor.u32 %v2309_v56, %v1957_v55  ;;  %v1813_v6 = vld [vmem:[%s2530_s7 + $0xa8] sm:$0xf]  ;;  %v2070_v9 = vor.u32 %v2337_v3, %v2069_v0 }
  0x71   : > { %1238 = vmatpush.bf16.msrb.mxu0 %v1762_v15  ;;  %1295 = vmatpush.bf16.msrb.mxu3 %v2146_v17  ;;  %v2114_v48 = vor.u32 %v2346_v36, %v2111_v37  ;;  %v2273_v7 = vld [vmem:[%s2530_s7 + $0xb4] sm:$0xf0]  ;;  %v1941_v10 = vld [vmem:[%s2530_s7 + $0x1a8] sm:$0xf] }
  0x72   : > { %v2305_v11 = vld [vmem:[%s2530_s7 + $0x1b4] sm:$0xf0]  ;;  %v2197_v12 = vld [vmem:[%s2530_s7 + $0x3a8] sm:$0xf]  ;;  %v1814_v16 = vor.u32 %v2273_v7, %v1813_v6 }
  0x73   : > { %1258 = vmatpush.bf16.msrb.mxu1 %v1874_v22  ;;  %v2369_v13 = vld [vmem:[%s2530_s7 + $0x3b4] sm:$0xf0]  ;;  %v2053_v14 = vld [vmem:[%s2530_s7 + $0x288] sm:$0xf]  ;;  %v1942_v17 = vor.u32 %v2305_v11, %v1941_v10 }
  0x74   : > { %1277 = vmatpush.bf16.msrb.mxu2 %v2002_v18  ;;  %v2333_v15 = vld [vmem:[%s2530_s7 + $0x294] sm:$0xf0]  ;;  %v1797_v18 = vld [vmem:[%s2530_s7 + $0x88] sm:$0xf]  ;;  %v2198_v20 = vor.u32 %v2369_v13, %v2197_v12 }
  0x75   : > { %1239 = vmatpush.bf16.msrb.mxu0 %v1746_v29  ;;  %1296 = vmatpush.bf16.msrb.mxu3 %v2130_v33  ;;  %v2269_v19 = vld [vmem:[%s2530_s7 + $0x94] sm:$0xf0]  ;;  %v2054_v21 = vor.u32 %v2333_v15, %v2053_v14  ;;  %v1925_v22 = vld [vmem:[%s2530_s7 + $0x188] sm:$0xf] }
  0x76   : > { %v2301_v23 = vld [vmem:[%s2530_s7 + $0x194] sm:$0xf0]  ;;  %v2181_v24 = vld [vmem:[%s2530_s7 + $0x388] sm:$0xf]  ;;  %v1798_v28 = vor.u32 %v2269_v19, %v1797_v18 }
  0x77   : > { %1259 = vmatpush.bf16.msrb.mxu1 %v1858_v38  ;;  %v2365_v25 = vld [vmem:[%s2530_s7 + $0x394] sm:$0xf0]  ;;  %v2037_v26 = vld [vmem:[%s2530_s7 + $0x268] sm:$0xf]  ;;  %v1926_v29 = vor.u32 %v2301_v23, %v1925_v22  ;;  %v1847_v22 = vld [vmem:[%s2530_s7 + $0xf8] sm:$0xf0] }
  0x78   : > { %1278 = vmatpush.bf16.msrb.mxu2 %v1986_v34  ;;  %v2329_v27 = vld [vmem:[%s2530_s7 + $0x274] sm:$0xf0]  ;;  %v1781_v30 = vld [vmem:[%s2530_s7 + $0x68] sm:$0xf]  ;;  %v2182_v32 = vor.u32 %v2365_v25, %v2181_v24  ;;  %v2311_v23 = vld [vmem:[%s2530_s7 + $0x1ec] sm:$0xf] }
  0x79   : > { %1240 = vmatpush.bf16.msrb.mxu0 %v1730_v47  ;;  %1297 = vmatpush.bf16.msrb.mxu3 %v2114_v48  ;;  %v2265_v31 = vld [vmem:[%s2530_s7 + $0x74] sm:$0xf0]  ;;  %v2038_v33 = vor.u32 %v2329_v27, %v2037_v26  ;;  %v1909_v34 = vld [vmem:[%s2530_s7 + $0x168] sm:$0xf]  ;;  %v1975_v24 = vld [vmem:[%s2530_s7 + $0x1f8] sm:$0xf0] }
  0x7a   : > { %1260 = vmatmul.bf16.vlgmr.msrb.gmra.mxu1 %v2619_v62  ;;  %v2297_v35 = vld [vmem:[%s2530_s7 + $0x174] sm:$0xf0]  ;;  %v2165_v36 = vld [vmem:[%s2530_s7 + $0x368] sm:$0xf]  ;;  %v1782_v40 = vor.u32 %v2265_v31, %v1781_v30  ;;  %v2375_v25 = vld [vmem:[%s2530_s7 + $0x3ec] sm:$0xf] }
  0x7b   : > { %1328 = vmatpush.bf16.msra.mxu1 %v1974_v43  ;;  %1279 = vmatmul.bf16.vlgmr.msrb.gmra.mxu2 %v2621_v63  ;;  %v2361_v37 = vld [vmem:[%s2530_s7 + $0x374] sm:$0xf0]  ;;  %v2021_v38 = vld [vmem:[%s2530_s7 + $0x248] sm:$0xf]  ;;  %v1910_v41 = vor.u32 %v2297_v35, %v1909_v34  ;;  %v2231_v26 = vld [vmem:[%s2530_s7 + $0x3f8] sm:$0xf0] }
  0x7c   : > { %1347 = vmatpush.bf16.msra.mxu2 %v2102_v39  ;;  %1241 = vmatmul.bf16.vlgmr.msrb.gmra.mxu0 %v2614_v57  ;;  %v2325_v39 = vld [vmem:[%s2530_s7 + $0x254] sm:$0xf0]  ;;  %v1765_v42 = vld [vmem:[%s2530_s7 + $0x48] sm:$0xf]  ;;  %v2166_v44 = vor.u32 %v2361_v37, %v2165_v36  ;;  %v2087_v30 = vld [vmem:[%s2530_s7 + $0x2d8] sm:$0xf0]  ;;  %v2234_v34 = vor.u32 %v2375_v25, %v2231_v26 }
  0x7d   : > { %1309 = vmatpush.bf16.msra.mxu0 %v1846_v49  ;;  %1366 = vmatpush.bf16.msra.mxu3 %v2230_v52  ;;  %v2261_v43 = vld [vmem:[%s2530_s7 + $0x54] sm:$0xf0]  ;;  %v2022_v45 = vor.u32 %v2325_v39, %v2021_v38  ;;  %v1893_v46 = vld [vmem:[%s2530_s7 + $0x148] sm:$0xf]  ;;  %v2275_v35 = vld [vmem:[%s2530_s7 + $0xcc] sm:$0xf] }
  0x7e   : > { %1298 = vmatmul.bf16.vlgmr.msrb.gmra.mxu3 %v2625_v2  ;;  %v2293_v47 = vld [vmem:[%s2530_s7 + $0x154] sm:$0xf0]  ;;  %v2149_v48 = vld [vmem:[%s2530_s7 + $0x348] sm:$0xf]  ;;  %v1766_v52 = vor.u32 %v2261_v43, %v1765_v42  ;;  %v1831_v36 = vld [vmem:[%s2530_s7 + $0xd8] sm:$0xf0] }
  0x7f   : > { %1329 = vmatpush.bf16.msra.mxu1 %v1958_v5  ;;  %v2357_v49 = vld [vmem:[%s2530_s7 + $0x354] sm:$0xf0]  ;;  %v2005_v50 = vld [vmem:[%s2530_s7 + $0x228] sm:$0xf]  ;;  %v2307_v38 = vld [vmem:[%s2530_s7 + $0x1cc] sm:$0xf] }
  0x80   : > { %1348 = vmatpush.bf16.msra.mxu2 %v2086_v54  ;;  %v2321_v51 = vld [vmem:[%s2530_s7 + $0x234] sm:$0xf0]  ;;  %v1894_v54 = vor.u32 %v2293_v47, %v1893_v46  ;;  %v1749_v55 = vld [vmem:[%s2530_s7 + $0x28] sm:$0xf]  ;;  %v2150_v58 = vor.u32 %v2357_v49, %v2149_v48  ;;  %v1959_v39 = vld [vmem:[%s2530_s7 + $0x1d8] sm:$0xf0] }
  0x81   : > { %1310 = vmatpush.bf16.msra.mxu0 %v1830_v4  ;;  %1367 = vmatpush.bf16.msra.mxu3 %v2214_v8  ;;  %v2257_v56 = vld [vmem:[%s2530_s7 + $0x34] sm:$0xf0]  ;;  %v2006_v61 = vor.u32 %v2321_v51, %v2005_v50  ;;  %v1877_v0 = vld [vmem:[%s2530_s7 + $0x128] sm:$0xf]  ;;  %v2343_v8 = vld [vmem:[%s2530_s7 + $0x2ec] sm:$0xf]  ;;  %v1962_v47 = vor.u32 %v2307_v38, %v1959_v39 }
  0x82   : > { %v2289_v3 = vld [vmem:[%s2530_s7 + $0x134] sm:$0xf0]  ;;  %v2133_v4 = vld [vmem:[%s2530_s7 + $0x328] sm:$0xf]  ;;  %v1750_v10 = vor.u32 %v2257_v56, %v1749_v55  ;;  %v2215_v42 = vld [vmem:[%s2530_s7 + $0x3d8] sm:$0xf0] }
  0x83   : > { %1330 = vmatpush.bf16.msra.mxu1 %v1942_v17  ;;  %v2353_v5 = vld [vmem:[%s2530_s7 + $0x334] sm:$0xf0]  ;;  %v1989_v6 = vld [vmem:[%s2530_s7 + $0x208] sm:$0xf]  ;;  %v1878_v11 = vor.u32 %v2289_v3, %v1877_v0  ;;  %v2335_v43 = vld [vmem:[%s2530_s7 + $0x2ac] sm:$0xf] }
  0x84   : > { %1349 = vmatpush.bf16.msra.mxu2 %v2070_v9  ;;  %v2317_v7 = vld [vmem:[%s2530_s7 + $0x214] sm:$0xf0]  ;;  %v2103_v9 = vld [vmem:[%s2530_s7 + $0x2f8] sm:$0xf0]  ;;  %v1733_v12 = vld [vmem:[%s2530_s7 + $0x8] sm:$0xf]  ;;  %v2134_v15 = vor.u32 %v2353_v5, %v2133_v4 }
  0x85   : > { %1311 = vmatpush.bf16.msra.mxu0 %v1814_v16  ;;  %1368 = vmatpush.bf16.msra.mxu3 %v2198_v20  ;;  %v2253_v13 = vld [vmem:[%s2530_s7 + $0x14] sm:$0xf0]  ;;  %v1861_v14 = vld [vmem:[%s2530_s7 + $0x108] sm:$0xf]  ;;  %v1990_v16 = vor.u32 %v2317_v7, %v1989_v6  ;;  %v2106_v20 = vor.u32 %v2343_v8, %v2103_v9  ;;  %v1815_v46 = vld [vmem:[%s2530_s7 + $0xb8] sm:$0xf0] }
  0x86   : > { %v2285_v17 = vld [vmem:[%s2530_s7 + $0x114] sm:$0xf0]  ;;  %v2117_v18 = vld [vmem:[%s2530_s7 + $0x308] sm:$0xf]  ;;  %v1734_v27 = vor.u32 %v2253_v13, %v1733_v12  ;;  %v2303_v49 = vld [vmem:[%s2530_s7 + $0x1ac] sm:$0xf] }
  0x87   : > { %1331 = vmatpush.bf16.msra.mxu1 %v1926_v29  ;;  %v2349_v19 = vld [vmem:[%s2530_s7 + $0x314] sm:$0xf0]  ;;  %v2339_v29 = vld [vmem:[%s2530_s7 + $0x2cc] sm:$0xf]  ;;  %v1943_v50 = vld [vmem:[%s2530_s7 + $0x1b8] sm:$0xf0] }
  0x88   : > { %1350 = vmatpush.bf16.msra.mxu2 %v2054_v21  ;;  %v2279_v21 = vld [vmem:[%s2530_s7 + $0xec] sm:$0xf]  ;;  %v2118_v31 = vor.u32 %v2349_v19, %v2117_v18  ;;  %v2090_v37 = vor.u32 %v2339_v29, %v2087_v30  ;;  %v2199_v55 = vld [vmem:[%s2530_s7 + $0x3b8] sm:$0xf0]  ;;  %v1946_v3 = vor.u32 %v2303_v49, %v1943_v50 }
  0x89   : > { %1312 = vmatpush.bf16.msra.mxu0 %v1798_v28  ;;  %1369 = vmatpush.bf16.msra.mxu3 %v2182_v32  ;;  %v1862_v28 = vor.u32 %v2285_v17, %v1861_v14  ;;  %v1850_v32 = vor.u32 %v2279_v21, %v1847_v22  ;;  %v2331_v56 = vld [vmem:[%s2530_s7 + $0x28c] sm:$0xf]  ;;  %v1799_v0 = vld [vmem:[%s2530_s7 + $0x98] sm:$0xf0] }
  0x8a   : > { %1265 = vmatmul.bf16.gmra.mxu1 %v2671_v59  ;;  %v2299_v5 = vld [vmem:[%s2530_s7 + $0x18c] sm:$0xf]  ;;  %v1927_v6 = vld [vmem:[%s2530_s7 + $0x198] sm:$0xf0] }
  0x8b   : > { %1332 = vmatpush.bf16.msra.mxu1 %v1910_v41  ;;  %1284 = vmatmul.bf16.gmra.mxu2 %v2673_v60  ;;  %v2371_v41 = vld [vmem:[%s2530_s7 + $0x3cc] sm:$0xf]  ;;  %v2039_v12 = vld [vmem:[%s2530_s7 + $0x278] sm:$0xf0] }
  0x8c   : > { %1351 = vmatpush.bf16.msra.mxu2 %v2038_v33  ;;  %1246 = vmatmul.bf16.gmra.mxu0 %v2666_v53  ;;  %v1978_v33 = vor.u32 %v2311_v23, %v1975_v24  ;;  %v2218_v48 = vor.u32 %v2371_v41, %v2215_v42  ;;  %v2363_v9 = vld [vmem:[%s2530_s7 + $0x38c] sm:$0xf]  ;;  %v1783_v14 = vld [vmem:[%s2530_s7 + $0x78] sm:$0xf0] }
  0x8d   : > { %1313 = vmatpush.bf16.msra.mxu0 %v1782_v40  ;;  %1370 = vmatpush.bf16.msra.mxu3 %v2166_v44  ;;  %v1834_v40 = vor.u32 %v2275_v35, %v1831_v36  ;;  %v2071_v44 = vld [vmem:[%s2530_s7 + $0x2b8] sm:$0xf0]  ;;  %v2263_v13 = vld [vmem:[%s2530_s7 + $0x6c] sm:$0xf] }
  0x8e   : > { %1303 = vmatmul.bf16.gmra.mxu3 %v2677_v1  ;;  %v2074_v51 = vor.u32 %v2335_v43, %v2071_v44  ;;  %v2295_v17 = vld [vmem:[%s2530_s7 + $0x16c] sm:$0xf]  ;;  %v1911_v18 = vld [vmem:[%s2530_s7 + $0x178] sm:$0xf0] }
  0x8f   : > { %1333 = vmatpush.bf16.msra.mxu1 %v1894_v54  ;;  %v2367_v54 = vld [vmem:[%s2530_s7 + $0x3ac] sm:$0xf]  ;;  %v2167_v22 = vld [vmem:[%s2530_s7 + $0x378] sm:$0xf0] }
  0x90   : > { %1352 = vmatpush.bf16.msra.mxu2 %v2022_v45  ;;  %v2271_v45 = vld [vmem:[%s2530_s7 + $0xac] sm:$0xf]  ;;  %v2202_v4 = vor.u32 %v2367_v54, %v2199_v55  ;;  %v2023_v24 = vld [vmem:[%s2530_s7 + $0x258] sm:$0xf0] }
  0x91   : > { %1314 = vmatpush.bf16.msra.mxu0 %v1766_v52  ;;  %1371 = vmatpush.bf16.msra.mxu3 %v2150_v58  ;;  %v1818_v52 = vor.u32 %v2271_v45, %v1815_v46  ;;  %v2055_v58 = vld [vmem:[%s2530_s7 + $0x298] sm:$0xf0]  ;;  %v2359_v21 = vld [vmem:[%s2530_s7 + $0x36c] sm:$0xf] }
  0x92   : > { %v2058_v7 = vor.u32 %v2331_v56, %v2055_v58  ;;  %v2323_v23 = vld [vmem:[%s2530_s7 + $0x24c] sm:$0xf]  ;;  %v1767_v26 = vld [vmem:[%s2530_s7 + $0x58] sm:$0xf0] }
  0x93   : > { %1334 = vmatpush.bf16.msra.mxu1 %v1878_v11  ;;  %v2327_v11 = vld [vmem:[%s2530_s7 + $0x26c] sm:$0xf]  ;;  %v1895_v30 = vld [vmem:[%s2530_s7 + $0x158] sm:$0xf0] }
  0x94   : > { %1353 = vmatpush.bf16.msra.mxu2 %v2006_v61  ;;  %v2267_v61 = vld [vmem:[%s2530_s7 + $0x8c] sm:$0xf]  ;;  %v2042_v19 = vor.u32 %v2327_v11, %v2039_v12  ;;  %v2007_v36 = vld [vmem:[%s2530_s7 + $0x238] sm:$0xf0] }
  0x95   : > { %1315 = vmatpush.bf16.msra.mxu0 %v1750_v10  ;;  %1372 = vmatpush.bf16.msra.mxu3 %v2134_v15  ;;  %v1802_v8 = vor.u32 %v2267_v61, %v1799_v0  ;;  %v2183_v10 = vld [vmem:[%s2530_s7 + $0x398] sm:$0xf0]  ;;  %v1930_v15 = vor.u32 %v2299_v5, %v1927_v6  ;;  %v2259_v25 = vld [vmem:[%s2530_s7 + $0x4c] sm:$0xf] }
  0x96   : > { %v2291_v29 = vld [vmem:[%s2530_s7 + $0x14c] sm:$0xf]  ;;  %v1751_v38 = vld [vmem:[%s2530_s7 + $0x38] sm:$0xf0] }
  0x97   : > { %1335 = vmatpush.bf16.msra.mxu1 %v1862_v28  ;;  %v2170_v28 = vor.u32 %v2359_v21, %v2167_v22  ;;  %v2319_v35 = vld [vmem:[%s2530_s7 + $0x22c] sm:$0xf]  ;;  %v1898_v39 = vor.u32 %v2291_v29, %v1895_v30  ;;  %v1879_v42 = vld [vmem:[%s2530_s7 + $0x138] sm:$0xf0]  ;;  %v333_v22 = vld [vmem:[#allocation2 + $0x40] sm:$0xff] }
  0x98   : > { %1354 = vmatpush.bf16.msra.mxu2 %v1990_v16  ;;  %v2186_v16 = vor.u32 %v2363_v9, %v2183_v10  ;;  %v2287_v41 = vld [vmem:[%s2530_s7 + $0x12c] sm:$0xf]  ;;  %v2010_v43 = vor.u32 %v2319_v35, %v2007_v36  ;;  %v2135_v46 = vld [vmem:[%s2530_s7 + $0x338] sm:$0xf0]  ;;  %v337_v30 = vld [vmem:[#allocation2 + $0x60] sm:$0xff] }
  0x99   : > { %1316 = vmatpush.bf16.msra.mxu0 %v1734_v27  ;;  %1373 = vmatpush.bf16.msra.mxu3 %v2118_v31  ;;  %v1914_v27 = vor.u32 %v2295_v17, %v1911_v18  ;;  %v2026_v31 = vor.u32 %v2323_v23, %v2023_v24  ;;  %v2351_v45 = vld [vmem:[%s2530_s7 + $0x32c] sm:$0xf]  ;;  %v1735_v50 = vld [vmem:[%s2530_s7 + $0x18] sm:$0xf0] }
  0x9a   : > { %1336 = vmatmul.bf16.vlgmr.msra.gmra.mxu1 %v2619_v62  ;;  %v2251_v49 = vld [vmem:[%s2530_s7 + $0xc] sm:$0xf]  ;;  %v1863_v58 = vld [vmem:[%s2530_s7 + $0x118] sm:$0xf0] }
  0x9b   : > { %1404 = vmatpush.bf16.msrb.mxu1 %v1978_v33  ;;  %1355 = vmatmul.bf16.vlgmr.msra.gmra.mxu2 %v2621_v63  ;;  %v2355_v33 = vld [vmem:[%s2530_s7 + $0x34c] sm:$0xf]  ;;  %v1738_v56 = vor.u32 %v2251_v49, %v1735_v50  ;;  %v2119_v0 = vld [vmem:[%s2530_s7 + $0x318] sm:$0xf0] }
  0x9c   : > { %1423 = vmatpush.bf16.msrb.mxu2 %v2106_v20  ;;  %1317 = vmatmul.bf16.vlgmr.msra.gmra.mxu0 %v2614_v57  ;;  %v1786_v20 = vor.u32 %v2263_v13, %v1783_v14  ;;  %v2283_v54 = vld [vmem:[%s2530_s7 + $0x10c] sm:$0xf] }
  0x9d   : > { %1385 = vmatpush.bf16.msrb.mxu0 %v1850_v32  ;;  %1442 = vmatpush.bf16.msrb.mxu3 %v2234_v34  ;;  %v1770_v32 = vor.u32 %v2259_v25, %v1767_v26  ;;  %v2151_v34 = vld [vmem:[%s2530_s7 + $0x358] sm:$0xf0]  ;;  %v2347_v61 = vld [vmem:[%s2530_s7 + $0x30c] sm:$0xf] }
  0x9e   : > { %1374 = vmatmul.bf16.vlgmr.msra.gmra.mxu3 %v2625_v2  ;;  %v330_v50 = vld [vmem:[#allocation2 + $0x68] sm:$0xff] }
  0x9f   : > { %1405 = vmatpush.bf16.msrb.mxu1 %v1962_v47  ;;  %v2315_v47 = vld [vmem:[%s2530_s7 + $0x20c] sm:$0xf] }
  0xa0   : > { %1424 = vmatpush.bf16.msrb.mxu2 %v2090_v37  ;;  %v2255_v37 = vld [vmem:[%s2530_s7 + $0x2c] sm:$0xf] }
  0xa1   : > { %1386 = vmatpush.bf16.msrb.mxu0 %v1834_v40  ;;  %1443 = vmatpush.bf16.msrb.mxu3 %v2218_v48  ;;  %v2154_v40 = vor.u32 %v2355_v33, %v2151_v34  ;;  %v1754_v44 = vor.u32 %v2255_v37, %v1751_v38  ;;  %v1991_v48 = vld [vmem:[%s2530_s7 + $0x218] sm:$0xf0] }
  0xa2   : > { %v1994_v55 = vor.u32 %v2315_v47, %v1991_v48 }
  0xa3   : > { %1406 = vmatpush.bf16.msrb.mxu1 %v1946_v3  ;;  %v1866_v3 = vor.u32 %v2283_v54, %v1863_v58 }
  0xa4   : > { %1425 = vmatpush.bf16.msrb.mxu2 %v2074_v51  ;;  %v1882_v51 = vor.u32 %v2287_v41, %v1879_v42  ;;  %v326_v41 = vld [vmem:[#allocation2] sm:$0xff] }
  0xa5   : > { %1387 = vmatpush.bf16.msrb.mxu0 %v1818_v52  ;;  %1444 = vmatpush.bf16.msrb.mxu3 %v2202_v4  ;;  %v2138_v52 = vor.u32 %v2351_v45, %v2135_v46  ;;  %v2122_v4 = vor.u32 %v2347_v61, %v2119_v0 }
  0xa7   : > { %1407 = vmatpush.bf16.msrb.mxu1 %v1930_v15 }
  0xa8   : > { %1426 = vmatpush.bf16.msrb.mxu2 %v2058_v7 }
  0xa9   : > { %1388 = vmatpush.bf16.msrb.mxu0 %v1802_v8  ;;  %1445 = vmatpush.bf16.msrb.mxu3 %v2186_v16 }
  0xaa   : > { %1341 = vmatmul.bf16.gmra.mxu1 %v2671_v59 }
  0xab   : > { %1408 = vmatpush.bf16.msrb.mxu1 %v1914_v27  ;;  %1360 = vmatmul.bf16.gmra.mxu2 %v2673_v60 }
  0xac   : > { %1427 = vmatpush.bf16.msrb.mxu2 %v2042_v19  ;;  %1322 = vmatmul.bf16.gmra.mxu0 %v2666_v53 }
  0xad   : > { %1389 = vmatpush.bf16.msrb.mxu0 %v1786_v20  ;;  %1446 = vmatpush.bf16.msrb.mxu3 %v2170_v28 }
  0xae   : > { %1379 = vmatmul.bf16.gmra.mxu3 %v2677_v1 }
  0xaf   : > { %1409 = vmatpush.bf16.msrb.mxu1 %v1898_v39 }
  0xb0   : > { %1428 = vmatpush.bf16.msrb.mxu2 %v2026_v31 }
  0xb1   : > { %1390 = vmatpush.bf16.msrb.mxu0 %v1770_v32  ;;  %1447 = vmatpush.bf16.msrb.mxu3 %v2154_v40 }
  0xb3   : > { %1410 = vmatpush.bf16.msrb.mxu1 %v1882_v51 }
  0xb4   : > { %1429 = vmatpush.bf16.msrb.mxu2 %v2010_v43 }
  0xb5   : > { %1391 = vmatpush.bf16.msrb.mxu0 %v1754_v44  ;;  %1448 = vmatpush.bf16.msrb.mxu3 %v2138_v52 }
  0xb7   : > { %1411 = vmatpush.bf16.msrb.mxu1 %v1866_v3  ;;  %v334_v3 = vld [vmem:[#allocation2 + $0x20] sm:$0xff] }
  0xb8   : > { %1430 = vmatpush.bf16.msrb.mxu2 %v1994_v55 }
  0xb9   : > { %1392 = vmatpush.bf16.msrb.mxu0 %v1738_v56  ;;  %1449 = vmatpush.bf16.msrb.mxu3 %v2122_v4 }
  0xba   : > { %1412 = vmatmul.bf16.vlgmr.msrb.gmra.mxu1 %v2619_v62  ;;  %v325_v62 = vld [vmem:[#allocation2 + $0x30] sm:$0xff] }
  0xbb   : > { %1431 = vmatmul.bf16.vlgmr.msrb.gmra.mxu2 %v2621_v63 }
  0xbc   : > { %1393 = vmatmul.bf16.vlgmr.msrb.gmra.mxu0 %v2614_v57 }
  0xbe   : > { %1450 = vmatmul.bf16.vlgmr.msrb.gmra.mxu3 %v2625_v2 }
  0xca   : > { %1417 = vmatmul.bf16.gmra.mxu1 %v2671_v59 }
  0xcb   : > { %1436 = vmatmul.bf16.gmra.mxu2 %v2673_v60  ;;  %v329_v60 = vld [vmem:[#allocation2 + $0x50] sm:$0xff] }
  0xcc   : > { %1398 = vmatmul.bf16.gmra.mxu0 %v2666_v53 }
  0xce   : > { %1455 = vmatmul.bf16.gmra.mxu3 %v2677_v1 }
  0xd7   : > { %v1166_v5 = vpop.f32.mrf.mxu0  ;;  %v1185_v6 = vpop.f32.mrf.mxu1 }
  0xd8   : > { %v1186_v7 = vadd.f32 %v1185_v6, %v1166_v5 }
  0xde   : > { %v1204_v8 = vpop.f32.mrf.mxu2 }
  0xdf   : > { %v1205_v9 = vadd.f32 %v1204_v8, %v1186_v7  ;;  %v1223_v57 = vpop.f32.mrf.mxu3  ;;  %v1168_v10 = vpop.f32.mrf.mxu0 }
  0xe0   : > { %v1187_v11 = vpop.f32.mrf.mxu1 }
  0xe1   : > { %v1224_v63 = vadd.f32 %v1223_v57, %v1205_v9  ;;  %v1188_v2 = vadd.f32 %v1187_v11, %v1168_v10 }
  0xe3   : > { %v1461_v12 = vadd.f32 %v1224_v63, %v325_v62  ;;  %v338_v62 = vld [vmem:[#allocation2 + $0x70] sm:$0xff] }
  0xe5   : > { %1477 = vst [vmem:[#allocation2 + $0x30] sm:$0xff] %v1461_v12 }
  0xe6   : > { %v1206_v53 = vpop.f32.mrf.mxu2 }
  0xe7   : > { %v1207_v13 = vadd.f32 %v1206_v53, %v1188_v2  ;;  %v1225_v59 = vpop.f32.mrf.mxu3  ;;  %v1171_v14 = vpop.f32.mrf.mxu0 }
  0xe8   : > { %v1190_v15 = vpop.f32.mrf.mxu1 }
  0xe9   : > { %v1226_v1 = vadd.f32 %v1225_v59, %v1207_v13  ;;  %v1191_v17 = vadd.f32 %v1190_v15, %v1171_v14 }
  0xeb   : > { %v1465_v16 = vadd.f32 %v1226_v1, %v329_v60  ;;  %v327_v60 = vld [vmem:[#allocation2 + $0x58] sm:$0xff] }
  0xed   : > { %1481 = vst [vmem:[#allocation2 + $0x50] sm:$0xff] %v1465_v16 }
  0xee   : > { %v1209_v18 = vpop.f32.mrf.mxu2 }
  0xef   : > { %v1210_v19 = vadd.f32 %v1209_v18, %v1191_v17  ;;  %v1228_v20 = vpop.f32.mrf.mxu3  ;;  %v1173_v21 = vpop.f32.mrf.mxu0 }
  0xf0   : > { %v1192_v23 = vpop.f32.mrf.mxu1 }
  0xf1   : > { %v1229_v24 = vadd.f32 %v1228_v20, %v1210_v19  ;;  %v1193_v26 = vadd.f32 %v1192_v23, %v1173_v21 }
  0xf3   : > { %v1469_v25 = vadd.f32 %v1229_v24, %v333_v22  ;;  %v331_v22 = vld [vmem:[#allocation2 + $0x8] sm:$0xff] }
  0xf5   : > { %1485 = vst [vmem:[#allocation2 + $0x40] sm:$0xff] %v1469_v25 }
  0xf6   : > { %v1211_v27 = vpop.f32.mrf.mxu2 }
  0xf7   : > { %v1212_v28 = vadd.f32 %v1211_v27, %v1193_v26  ;;  %v1230_v29 = vpop.f32.mrf.mxu3 }
  0xf8   : > { %v1261_v32 = vpop.f32.mrf.mxu1 }
  0xf9   : > { %v1242_v31 = vpop.f32.mrf.mxu0  ;;  %v1231_v33 = vadd.f32 %v1230_v29, %v1212_v28 }
  0xfa   : > { %v1262_v35 = vadd.f32 %v1261_v32, %v1242_v31  ;;  %v335_v31 = vld [vmem:[#allocation2 + $0x10] sm:$0xff] }
  0xfb   : > { %v1473_v34 = vadd.f32 %v1231_v33, %v337_v30 }
  0xfd   : > { %1489 = vst [vmem:[#allocation2 + $0x60] sm:$0xff] %v1473_v34 }
  0xfe   : > { %v1280_v36 = vpop.f32.mrf.mxu2 }
  0xff   : > { %v1281_v38 = vadd.f32 %v1280_v36, %v1262_v35 }
 0x100   : > { %v1263_v40 = vpop.f32.mrf.mxu1 }
 0x101   : > { %v1299_v37 = vpop.f32.mrf.mxu3  ;;  %v1244_v39 = vpop.f32.mrf.mxu0 }
 0x102   : > { %v1300_v42 = vadd.f32 %v1299_v37, %v1281_v38  ;;  %v1264_v44 = vadd.f32 %v1263_v40, %v1244_v39  ;;  %v339_v40 = vld [vmem:[#allocation2 + $0x78] sm:$0xff] }
 0x104   : > { %v1462_v43 = vadd.f32 %v1300_v42, %v326_v41 }
 0x106   : > { %1478 = vst [vmem:[#allocation2] sm:$0xff] %v1462_v43  ;;  %v1282_v45 = vpop.f32.mrf.mxu2 }
 0x107   : > { %v1283_v47 = vadd.f32 %v1282_v45, %v1264_v44 }
 0x108   : > { %v1266_v49 = vpop.f32.mrf.mxu1 }
 0x109   : > { %v1301_v46 = vpop.f32.mrf.mxu3  ;;  %v1247_v48 = vpop.f32.mrf.mxu0 }
 0x10a   : > { %v1302_v51 = vadd.f32 %v1301_v46, %v1283_v47  ;;  %v1267_v54 = vadd.f32 %v1266_v49, %v1247_v48  ;;  %v328_v49 = vld [vmem:[#allocation2 + $0x18] sm:$0xff] }
 0x10c   : > { %v1466_v52 = vadd.f32 %v1302_v51, %v330_v50 }
 0x10e   : > { %1482 = vst [vmem:[#allocation2 + $0x68] sm:$0xff] %v1466_v52  ;;  %v1285_v55 = vpop.f32.mrf.mxu2 }
 0x10f   : > { %v1286_v58 = vadd.f32 %v1285_v55, %v1267_v54 }
 0x110   : > { %v1268_v0 = vpop.f32.mrf.mxu1 }
 0x111   : > { %v1304_v56 = vpop.f32.mrf.mxu3  ;;  %v1249_v61 = vpop.f32.mrf.mxu0 }
 0x112   : > { %v1305_v4 = vadd.f32 %v1304_v56, %v1286_v58  ;;  %v1269_v6 = vadd.f32 %v1268_v0, %v1249_v61  ;;  %v332_v58 = vld [vmem:[#allocation2 + $0x48] sm:$0xff] }
 0x114   : > { %v1470_v5 = vadd.f32 %v1305_v4, %v334_v3 }
 0x116   : > { %1486 = vst [vmem:[#allocation2 + $0x20] sm:$0xff] %v1470_v5  ;;  %v1287_v7 = vpop.f32.mrf.mxu2 }
 0x117   : > { %v1288_v9 = vadd.f32 %v1287_v7, %v1269_v6 }
 0x118   : > { %v1337_v10 = vpop.f32.mrf.mxu1 }
 0x119   : > { %v1306_v8 = vpop.f32.mrf.mxu3  ;;  %v1318_v57 = vpop.f32.mrf.mxu0 }
 0x11a   : > { %v1307_v11 = vadd.f32 %v1306_v8, %v1288_v9  ;;  %v1338_v12 = vadd.f32 %v1337_v10, %v1318_v57  ;;  %v336_v9 = vld [vmem:[#allocation2 + $0x38] sm:$0xff] }
 0x11c   : > { %v1474_v63 = vadd.f32 %v1307_v11, %v338_v62 }
 0x11e   : > { %1490 = vst [vmem:[#allocation2 + $0x70] sm:$0xff] %v1474_v63  ;;  %v1356_v2 = vpop.f32.mrf.mxu2 }
 0x11f   : > { %v1357_v13 = vadd.f32 %v1356_v2, %v1338_v12 }
 0x120   : > { %v1339_v14 = vpop.f32.mrf.mxu1 }
 0x121   : > { %v1375_v53 = vpop.f32.mrf.mxu3  ;;  %v1320_v59 = vpop.f32.mrf.mxu0 }
 0x122   : > { %v1376_v15 = vadd.f32 %v1375_v53, %v1357_v13  ;;  %v1340_v16 = vadd.f32 %v1339_v14, %v1320_v59  ;;  %v340_v53 = vld [vmem:[#allocation2 + $0x28] sm:$0xff] }
 0x124   : > { %v1463_v1 = vadd.f32 %v1376_v15, %v327_v60 }
 0x126   : > { %1479 = vst [vmem:[#allocation2 + $0x58] sm:$0xff] %v1463_v1  ;;  %v1358_v17 = vpop.f32.mrf.mxu2 }
 0x127   : > { %v1359_v19 = vadd.f32 %v1358_v17, %v1340_v16 }
 0x128   : > { %v1342_v21 = vpop.f32.mrf.mxu1 }
 0x129   : > { %v1377_v18 = vpop.f32.mrf.mxu3  ;;  %v1323_v20 = vpop.f32.mrf.mxu0 }
 0x12a   : > { %v1378_v23 = vadd.f32 %v1377_v18, %v1359_v19  ;;  %v1343_v25 = vadd.f32 %v1342_v21, %v1323_v20 }
 0x12c   : > { %v1467_v24 = vadd.f32 %v1378_v23, %v331_v22 }
 0x12e   : > { %1483 = vst [vmem:[#allocation2 + $0x8] sm:$0xff] %v1467_v24  ;;  %v1361_v26 = vpop.f32.mrf.mxu2 }
 0x12f   : > { %v1362_v28 = vadd.f32 %v1361_v26, %v1343_v25 }
 0x130   : > { %v1344_v30 = vpop.f32.mrf.mxu1 }
 0x131   : > { %v1380_v27 = vpop.f32.mrf.mxu3  ;;  %v1325_v29 = vpop.f32.mrf.mxu0 }
 0x132   : > { %v1381_v32 = vadd.f32 %v1380_v27, %v1362_v28  ;;  %v1345_v34 = vadd.f32 %v1344_v30, %v1325_v29 }
 0x134   : > { %v1471_v33 = vadd.f32 %v1381_v32, %v335_v31 }
 0x136   : > { %1487 = vst [vmem:[#allocation2 + $0x10] sm:$0xff] %v1471_v33  ;;  %v1363_v35 = vpop.f32.mrf.mxu2 }
 0x137   : > { %v1364_v37 = vadd.f32 %v1363_v35, %v1345_v34 }
 0x138   : > { %v1413_v39 = vpop.f32.mrf.mxu1 }
 0x139   : > { %v1382_v36 = vpop.f32.mrf.mxu3  ;;  %v1394_v38 = vpop.f32.mrf.mxu0 }
 0x13a   : > { %v1383_v41 = vadd.f32 %v1382_v36, %v1364_v37  ;;  %v1414_v43 = vadd.f32 %v1413_v39, %v1394_v38 }
 0x13c   : > { %v1475_v42 = vadd.f32 %v1383_v41, %v339_v40 }
 0x13e   : > { %1491 = vst [vmem:[#allocation2 + $0x78] sm:$0xff] %v1475_v42  ;;  %v1432_v44 = vpop.f32.mrf.mxu2 }
 0x13f   : > { %v1433_v46 = vadd.f32 %v1432_v44, %v1414_v43 }
 0x140   : > { %v1415_v48 = vpop.f32.mrf.mxu1 }
 0x141   : > { %v1451_v45 = vpop.f32.mrf.mxu3  ;;  %v1396_v47 = vpop.f32.mrf.mxu0 }
 0x142   : > { %v1452_v50 = vadd.f32 %v1451_v45, %v1433_v46  ;;  %v1416_v52 = vadd.f32 %v1415_v48, %v1396_v47 }
 0x144   : > { %v1464_v51 = vadd.f32 %v1452_v50, %v328_v49 }
 0x146   : > { %1480 = vst [vmem:[#allocation2 + $0x18] sm:$0xff] %v1464_v51  ;;  %v1434_v54 = vpop.f32.mrf.mxu2 }
 0x147   : > { %v1435_v56 = vadd.f32 %v1434_v54, %v1416_v52 }
 0x148   : > { %v1418_v0 = vpop.f32.mrf.mxu1 }
 0x149   : > { %v1453_v55 = vpop.f32.mrf.mxu3  ;;  %v1399_v61 = vpop.f32.mrf.mxu0 }
 0x14a   : > { %v1454_v3 = vadd.f32 %v1453_v55, %v1435_v56  ;;  %v1419_v5 = vadd.f32 %v1418_v0, %v1399_v61 }
 0x14c   : > { %v1468_v4 = vadd.f32 %v1454_v3, %v332_v58 }
 0x14e   : > { %1484 = vst [vmem:[#allocation2 + $0x48] sm:$0xff] %v1468_v4  ;;  %v1437_v6 = vpop.f32.mrf.mxu2 }
 0x14f   : > { %v1438_v8 = vadd.f32 %v1437_v6, %v1419_v5 }
 0x150   : > { %v1420_v62 = vpop.f32.mrf.mxu1 }
 0x151   : > { %v1456_v7 = vpop.f32.mrf.mxu3  ;;  %v1401_v10 = vpop.f32.mrf.mxu0 }
 0x152   : > { %v1457_v57 = vadd.f32 %v1456_v7, %v1438_v8  ;;  %v1421_v63 = vadd.f32 %v1420_v62, %v1401_v10 }
 0x154   : > { %v1472_v11 = vadd.f32 %v1457_v57, %v336_v9 }
 0x156   : > { %1488 = vst [vmem:[#allocation2 + $0x38] sm:$0xff] %v1472_v11  ;;  %v1439_v12 = vpop.f32.mrf.mxu2 }
 0x157   : > { %v1440_v2 = vadd.f32 %v1439_v12, %v1421_v63 }
 0x159   : > { %v1458_v13 = vpop.f32.mrf.mxu3 }
 0x15a   : > { %v1459_v59 = vadd.f32 %v1458_v13, %v1440_v2  ;;  %1496 = sbr.rel (%p2235_p11) target bundleno = 372 (0x174), region = 63 }
 0x15c   : > { %v1476_v14 = vadd.f32 %v1459_v59, %v340_v53 }
 0x15e   : > { %1492 = vst [vmem:[#allocation2 + $0x28] sm:$0xff] %v1476_v14 }
 0x15f   : > { %v1497_v60 = vld [vmem:[#allocation2 + $0x30] sm:$0xff]  ;;  %v1513_v15 = vld [vmem:[%s2924_s2] sm:$0xf]  ;;  %v1499_v18 = vld [vmem:[#allocation2 + $0x58] sm:$0xff] }
 0x160   : > { %v1498_v1 = vld [vmem:[#allocation2] sm:$0xff]  ;;  %v1515_v16 = vperm.slane %v1513_v15, 0  ;;  %v1516_v17 = vperm.slane %v1513_v15, 1  ;;  %v1517_v19 = vperm.slane %v1513_v15, 2  ;;  %v1500_v20 = vld [vmem:[#allocation2 + $0x18] sm:$0xff]  ;;  %v1518_v21 = vperm.slane %v1513_v15, 3 }
 0x161   : > { %v1501_v22 = vld [vmem:[#allocation2 + $0x50] sm:$0xff]  ;;  %v1502_v26 = vld [vmem:[#allocation2 + $0x68] sm:$0xff]  ;;  %v1505_v32 = vld [vmem:[#allocation2 + $0x40] sm:$0xff] }
 0x162   : > { %v1523_v23 = vadd.f32 %v1515_v16, %v1497_v60  ;;  %v1524_v24 = vadd.f32 %v1516_v17, %v1498_v1  ;;  %v1525_v25 = vadd.f32 %v1517_v19, %v1499_v18  ;;  %v1526_v27 = vadd.f32 %v1518_v21, %v1500_v20  ;;  %v1503_v28 = vld [vmem:[#allocation2 + $0x8] sm:$0xff]  ;;  %v1506_v34 = vld [vmem:[#allocation2 + $0x20] sm:$0xff]  ;;  %v1507_v36 = vld [vmem:[#allocation2 + $0x10] sm:$0xff] }
 0x163   : > { %v1527_v29 = vadd.f32 %v1515_v16, %v1501_v22  ;;  %v1504_v30 = vld [vmem:[#allocation2 + $0x48] sm:$0xff]  ;;  %v1528_v31 = vadd.f32 %v1516_v17, %v1502_v26  ;;  %v1529_v33 = vadd.f32 %v1517_v19, %v1503_v28  ;;  %v1531_v37 = vadd.f32 %v1515_v16, %v1505_v32  ;;  %v1508_v38 = vld [vmem:[#allocation2 + $0x38] sm:$0xff]  ;;  %v1509_v40 = vld [vmem:[#allocation2 + $0x60] sm:$0xff] }
 0x164   : > { %1539 = vst [vmem:[%s2925_s3] sm:$0xff] %v1523_v23  ;;  %v1530_v35 = vadd.f32 %v1518_v21, %v1504_v30  ;;  %v1532_v39 = vadd.f32 %v1516_v17, %v1506_v34  ;;  %v1533_v41 = vadd.f32 %v1517_v19, %v1507_v36  ;;  %v1510_v42 = vld [vmem:[#allocation2 + $0x70] sm:$0xff]  ;;  %v1534_v43 = vadd.f32 %v1518_v21, %v1508_v38  ;;  %v1511_v44 = vld [vmem:[#allocation2 + $0x78] sm:$0xff] }
 0x165   : > { %1540 = vst [vmem:[%s2925_s3 + $0x8] sm:$0xff] %v1524_v24  ;;  %v1535_v45 = vadd.f32 %v1515_v16, %v1509_v40  ;;  %v1512_v46 = vld [vmem:[#allocation2 + $0x28] sm:$0xff]  ;;  %v1536_v47 = vadd.f32 %v1516_v17, %v1510_v42  ;;  %v1537_v48 = vadd.f32 %v1517_v19, %v1511_v44 }
 0x166   : > { %1541 = vst [vmem:[%s2925_s3 + $0x10] sm:$0xff] %v1525_v25  ;;  %v1538_v49 = vadd.f32 %v1518_v21, %v1512_v46 }
 0x167   : > { %1542 = vst [vmem:[%s2925_s3 + $0x18] sm:$0xff] %v1526_v27 }
 0x168   : > { %1543 = vst [vmem:[%s2925_s3 + $0x20] sm:$0xff] %v1527_v29 }
 0x169   : > { %1544 = vst [vmem:[%s2925_s3 + $0x28] sm:$0xff] %v1528_v31 }
 0x16a   : > { %1545 = vst [vmem:[%s2925_s3 + $0x30] sm:$0xff] %v1529_v33 }
 0x16b   : > { %1546 = vst [vmem:[%s2925_s3 + $0x38] sm:$0xff] %v1530_v35 }
 0x16c   : > { %1547 = vst [vmem:[%s2925_s3 + $0x40] sm:$0xff] %v1531_v37 }
 0x16d   : > { %1548 = vst [vmem:[%s2925_s3 + $0x48] sm:$0xff] %v1532_v39 }
 0x16e   : > { %1549 = vst [vmem:[%s2925_s3 + $0x50] sm:$0xff] %v1533_v41 }
 0x16f   : > { %1550 = vst [vmem:[%s2925_s3 + $0x58] sm:$0xff] %v1534_v43 }
 0x170   : > { %1551 = vst [vmem:[%s2925_s3 + $0x60] sm:$0xff] %v1535_v45 }
 0x171   : > { %1552 = vst [vmem:[%s2925_s3 + $0x68] sm:$0xff] %v1536_v47 }
 0x172   : > { %1553 = vst [vmem:[%s2925_s3 + $0x70] sm:$0xff] %v1537_v48 }
 0x173   : > { %1554 = vst [vmem:[%s2925_s3 + $0x78] sm:$0xff] %v1538_v49 }
 0x174 PF: > { %s13_s16 = sadd.s32 1, %s2457_s16   ;;  %s2926_s12 = smov %s2445_s13 }
 0x175   : > { %p10_p12 = scmp.ge.s32.totalorder %s13_s16, 10   ;;  %s2927_s13 = smov %s2515_s20 }
 0x176   : > { %s2928_s14 = smov %s2453_s15  ;;  %s2929_s15 = smov %s2931_s17 }
 0x177   :  { %12 = sbr.rel (!%p10_p12) target bundleno = 3 (0x3), region = 104 }

// kernel: forward.15
= control target key start
LH: loop header
LB: loop body
LE: loop exit
PB: predicated region body
PF: predicated region fallthrough
CT: control target
= control target key end

     0   :  { %s1053_s12 = smov 0   ;;  %s1055_s13 = smov 0   ;;  %s1173_s0 = inlined_call_operand.vmem [shape: bf16[16,8192], index: 0, kind: input, shape index: {}]   ;;  %s1174_s1 = inlined_call_operand.vmem [shape: bf16[8192,128], index: 1, kind: input, shape index: {}]   ;;  %s1175_s2 = inlined_call_operand.vmem [shape: f32[1,128], index: 2, kind: input, shape index: {}]   ;;  %s1176_s3 = inlined_call_operand.vmem [shape: f32[16,128], index: 3, kind: output, shape index: {}]  }
   0x1   :  { %s1057_s14 = smov 0   ;;  %s1059_s15 = smov 0  }
   0x2   :  { %s1061_s16 = smov 0  }
   0x3 LB: > { %s25_s17 = sadd.s32 1, %s1026_s15  ;;  %p48_p1 = scmp.ne.s32.totalorder %s1018_s13, %s1014_s12  ;;  %s1030_s16 = sphi %s1061_s16, %s13_s16   ;;  %s1026_s15 = sphi %s1059_s15, %s1180_s15   ;;  %s1022_s14 = sphi %s1057_s14, %s1179_s14   ;;  %s1018_s13 = sphi %s1055_s13, %s1178_s13   ;;  %s1014_s12 = sphi %s1053_s12, %s1177_s12  }
   0x4   : > { %p26_p0 = scmp.ge.s32.totalorder %s25_s17, 16  ;;  %p49_p2 = scmp.eq.s32.totalorder %s1030_s16, 0 }
   0x5   : > { %s41_s19 = sadd.s32 1, %s1018_s13  ;;  %p755_p5 = scmp.ge.s32.totalorder %s1030_s16, 16 }
   0x6   : > { %s1182_s17 = smov (%p26_p0, %s25_s17), 0  ;;  %p50_p3 = por %p49_p2, %p48_p1 }
   0x7   : > { %s37_s18 = ssub.s32 %s1026_s15, %s1182_s17  ;;  %162 = sbr.rel (%p755_p5) target bundleno = 20 (0x14), region = 20 }
   0x8   : > { %p39_p4 = scmp.eq.s32.totalorder %s37_s18, 0 }
   0xa   : > { %s1088_s20 = scalar_select %p39_p4, %s1018_s13, %s41_s19  }
   0xc   : > { %165 = sbr.rel (!%p50_p3) target bundleno = 20 (0x14), region = 24  ;;  %s167_s21 = sand.u32 (%p50_p3), 1, %s1018_s13  }
   0xd   : > { %s913_s22 = sshll.u32 (%p50_p3), %s1026_s15, 4  ;;  %s756_s23 = sshll.u32 (%p50_p3), %s167_s21, 5 }
   0xe   : > { %s175_s26 = scalar_lea.vmem (%p50_p3), %s1173_s0, %s913_s22  ;;  %s169_s27 = scalar_lea.vmem (%p50_p3), [#allocation3], %s756_s23 }
   0xf   : > { %v188_v0 = vld [vmem:[%s175_s26] sm:$0xff] (%p50_p3)  ;;  %v190_v1 = vld [vmem:[%s175_s26 + $0x8] sm:$0xff] (%p50_p3) }
  0x10   : > { %v192_v2 = vld [vmem:[%s175_s26 + $0x100] sm:$0xff] (%p50_p3)  ;;  %189 = vst [vmem:[%s169_s27] sm:$0xff] (%p50_p3), %v188_v0  ;;  %v194_v3 = vld [vmem:[%s175_s26 + $0x108] sm:$0xff] (%p50_p3) }
  0x11   : > { %191 = vst [vmem:[%s169_s27 + $0x8] sm:$0xff] %v190_v1 }
  0x12   : > { %193 = vst [vmem:[%s169_s27 + $0x10] sm:$0xff] %v192_v2 }
  0x13   : > { %195 = vst [vmem:[%s169_s27 + $0x18] sm:$0xff] %v194_v3 }
  0x14 PF: > { %p759_p6 = scmp.ge.s32.totalorder %s1030_s16, 1  ;;  %p212_p7 = scmp.lt.s32.totalorder %s1030_s16, 17 }
  0x16   : > { %p213_p8 = pnand %p759_p6, %p212_p7 }
  0x17   : > { %s219_s28 = sand.u32 (!%p213_p8), 1, %s1014_s12   ;;  %s761_s29 = sshll.u32 (!%p213_p8), %s1022_s14, 6 }
  0x18   : > { %216 = sbr.rel (%p213_p8) target bundleno = 228 (0xe4), region = 51  ;;  %s760_s30 = sshll.u32 (!%p213_p8), %s219_s28, 5 }
  0x19   : > { %p259_p9 = scmp.lt.s32.totalorder (!%p213_p8), %s761_s29, 1023  ;;  %s1105_s8 = scalar_lea.vmem (!%p213_p8), [#allocation3], %s760_s30 }
  0x1a   : > { %p763_p10 = scmp.ne.s32.totalorder (!%p213_p8), %s1022_s14, 0 }
  0x1d   : > { %s1184_s29 = smov (!%p259_p9, %s761_s29), 1023  ;;  %282 = sbr.rel (%p763_p10) target bundleno = 37 (0x25), region = 59 }
  0x1e   : > { %s762_s4 = sshll.u32 %s1184_s29, 2 }
  0x1f   : > { %s1103_s7 = scalar_lea.vmem %s1174_s1, %s762_s4 }
  0x22   : > { %v1032_v4 = vmov 0.0  }
  0x23   : > { %283 = vst [vmem:[#allocation2] sm:$0xff] %v1032_v4 }
  0x24   : > { %284 = vst [vmem:[#allocation2 + $0x8] sm:$0xff] %v1032_v4 }
  0x25 PF: > { %v925_v5 = vld [vmem:[%s1103_s7 + $0x38] sm:$0xff]  ;;  %v924_v9 = vld [vmem:[%s1103_s7 + $0x30] sm:$0xff]  ;;  %v923_v13 = vld [vmem:[%s1103_s7 + $0x28] sm:$0xff]  ;;  %p908_p11 = scmp.ne.s32.totalorder %s1022_s14, 15 }
  0x26   : > { %v933_v6 = vld [vmem:[%s1103_s7 + $0x78] sm:$0xff]  ;;  %567 = vmatpush.bf16.msra.mxu0 %v925_v5  ;;  %v932_v10 = vld [vmem:[%s1103_s7 + $0x70] sm:$0xff]  ;;  %v931_v14 = vld [vmem:[%s1103_s7 + $0x68] sm:$0xff] }
  0x27   : > { %v941_v7 = vld [vmem:[%s1103_s7 + $0xb8] sm:$0xff]  ;;  %581 = vmatpush.bf16.msra.mxu1 %v933_v6  ;;  %v940_v11 = vld [vmem:[%s1103_s7 + $0xb0] sm:$0xff]  ;;  %v939_v15 = vld [vmem:[%s1103_s7 + $0xa8] sm:$0xff] }
  0x28   : > { %v949_v8 = vld [vmem:[%s1103_s7 + $0xf8] sm:$0xff]  ;;  %595 = vmatpush.bf16.msra.mxu2 %v941_v7  ;;  %v948_v12 = vld [vmem:[%s1103_s7 + $0xf0] sm:$0xff]  ;;  %v947_v16 = vld [vmem:[%s1103_s7 + $0xe8] sm:$0xff] }
  0x29   : > { %609 = vmatpush.bf16.msra.mxu3 %v949_v8  ;;  %v922_v17 = vld [vmem:[%s1103_s7 + $0x20] sm:$0xff]  ;;  %v921_v21 = vld [vmem:[%s1103_s7 + $0x18] sm:$0xff]  ;;  %v920_v25 = vld [vmem:[%s1103_s7 + $0x10] sm:$0xff] }
  0x2a   : > { %568 = vmatpush.bf16.msra.mxu0 %v924_v9  ;;  %v930_v18 = vld [vmem:[%s1103_s7 + $0x60] sm:$0xff]  ;;  %v929_v22 = vld [vmem:[%s1103_s7 + $0x58] sm:$0xff]  ;;  %v928_v26 = vld [vmem:[%s1103_s7 + $0x50] sm:$0xff] }
  0x2b   : > { %582 = vmatpush.bf16.msra.mxu1 %v932_v10  ;;  %v938_v19 = vld [vmem:[%s1103_s7 + $0xa0] sm:$0xff]  ;;  %v937_v23 = vld [vmem:[%s1103_s7 + $0x98] sm:$0xff]  ;;  %v936_v27 = vld [vmem:[%s1103_s7 + $0x90] sm:$0xff] }
  0x2c   : > { %596 = vmatpush.bf16.msra.mxu2 %v940_v11  ;;  %v946_v20 = vld [vmem:[%s1103_s7 + $0xe0] sm:$0xff]  ;;  %v945_v24 = vld [vmem:[%s1103_s7 + $0xd8] sm:$0xff]  ;;  %v944_v28 = vld [vmem:[%s1103_s7 + $0xd0] sm:$0xff] }
  0x2d   : > { %610 = vmatpush.bf16.msra.mxu3 %v948_v12  ;;  %v919_v29 = vld [vmem:[%s1103_s7 + $0x8] sm:$0xff]  ;;  %v918_v33 = vld [vmem:[%s1103_s7] sm:$0xff]  ;;  %v766_v37 = vld [vmem:[%s1105_s8] sm:$0xf] }
  0x2e   : > { %569 = vmatpush.bf16.msra.mxu0 %v923_v13  ;;  %v927_v30 = vld [vmem:[%s1103_s7 + $0x48] sm:$0xff]  ;;  %v926_v34 = vld [vmem:[%s1103_s7 + $0x40] sm:$0xff]  ;;  %v914_v39 = vld [vmem:[%s1105_s8 + $0x4] sm:$0xf] }
  0x2f   : > { %583 = vmatpush.bf16.msra.mxu1 %v931_v14  ;;  %v935_v31 = vld [vmem:[%s1103_s7 + $0x88] sm:$0xff]  ;;  %v934_v35 = vld [vmem:[%s1103_s7 + $0x80] sm:$0xff]  ;;  %v774_v41 = vld [vmem:[%s1105_s8 + $0x8] sm:$0xf] }
  0x30   : > { %597 = vmatpush.bf16.msra.mxu2 %v939_v15  ;;  %v943_v32 = vld [vmem:[%s1103_s7 + $0xc8] sm:$0xff]  ;;  %v942_v36 = vld [vmem:[%s1103_s7 + $0xc0] sm:$0xff]  ;;  %v915_v43 = vld [vmem:[%s1105_s8 + $0xc] sm:$0xf] }
  0x31   : > { %611 = vmatpush.bf16.msra.mxu3 %v947_v16  ;;  %v916_v38 = vld [vmem:[%s1105_s8 + $0xc] sm:$0xf0]  ;;  %v768_v40 = vld [vmem:[%s1105_s8 + $0x10] sm:$0xf0]  ;;  %v917_v42 = vld [vmem:[%s1105_s8 + $0x14] sm:$0xf0] }
  0x32   : > { %570 = vmatpush.bf16.msra.mxu0 %v922_v17  ;;  %v776_v44 = vld [vmem:[%s1105_s8 + $0x18] sm:$0xf0]  ;;  %v767_v45 = vor.u32 %v916_v38, %v766_v37  ;;  %v771_v46 = vor.u32 %v914_v39, %v768_v40  ;;  %v775_v47 = vor.u32 %v917_v42, %v774_v41  ;;  %v285_v55 = vld [vmem:[#allocation2] sm:$0xff] }
  0x33   : > { %584 = vmatpush.bf16.msra.mxu1 %v930_v18  ;;  %v779_v48 = vor.u32 %v915_v43, %v776_v44  ;;  %v286_v63 = vld [vmem:[#allocation2 + $0x8] sm:$0xff] }
  0x34   : > { %598 = vmatpush.bf16.msra.mxu2 %v938_v19 }
  0x35   : > { %612 = vmatpush.bf16.msra.mxu3 %v946_v20 }
  0x36   : > { %571 = vmatpush.bf16.msra.mxu0 %v921_v21 }
  0x37   : > { %585 = vmatpush.bf16.msra.mxu1 %v929_v22 }
  0x38   : > { %599 = vmatpush.bf16.msra.mxu2 %v937_v23 }
  0x39   : > { %613 = vmatpush.bf16.msra.mxu3 %v945_v24 }
  0x3a   : > { %572 = vmatpush.bf16.msra.mxu0 %v920_v25 }
  0x3b   : > { %586 = vmatpush.bf16.msra.mxu1 %v928_v26 }
  0x3c   : > { %600 = vmatpush.bf16.msra.mxu2 %v936_v27 }
  0x3d   : > { %614 = vmatpush.bf16.msra.mxu3 %v944_v28 }
  0x3e   : > { %573 = vmatpush.bf16.msra.mxu0 %v919_v29 }
  0x3f   : > { %587 = vmatpush.bf16.msra.mxu1 %v927_v30 }
  0x40   : > { %601 = vmatpush.bf16.msra.mxu2 %v935_v31 }
  0x41   : > { %615 = vmatpush.bf16.msra.mxu3 %v943_v32 }
  0x42   : > { %574 = vmatpush.bf16.msra.mxu0 %v918_v33 }
  0x43   : > { %588 = vmatpush.bf16.msra.mxu1 %v926_v34 }
  0x44   : > { %602 = vmatpush.bf16.msra.mxu2 %v934_v35 }
  0x45   : > { %616 = vmatpush.bf16.msra.mxu3 %v942_v36  ;;  %575 = vmatmul.bf16.vlgmr.msra.gmra.mxu0 %v767_v45 }
  0x46   : > { %589 = vmatmul.bf16.vlgmr.msra.gmra.mxu1 %v771_v46 }
  0x47   : > { %603 = vmatmul.bf16.vlgmr.msra.gmra.mxu2 %v775_v47 }
  0x48   : > { %617 = vmatmul.bf16.vlgmr.msra.gmra.mxu3 %v779_v48 }
  0xc2   : > { %v576_v49 = vpop.f32.mrf.mxu0 }
  0xc3   : > { %v590_v50 = vpop.f32.mrf.mxu1 }
  0xc4   : > { %v591_v51 = vadd.f32 %v590_v50, %v576_v49 }
  0xca   : > { %v604_v52 = vpop.f32.mrf.mxu2  ;;  %v578_v57 = vpop.f32.mrf.mxu0 }
  0xcb   : > { %v618_v53 = vpop.f32.mrf.mxu3  ;;  %v605_v54 = vadd.f32 %v604_v52, %v591_v51  ;;  %v592_v58 = vpop.f32.mrf.mxu1 }
  0xcc   : > { %v593_v60 = vadd.f32 %v592_v58, %v578_v57 }
  0xcd   : > { %v619_v56 = vadd.f32 %v618_v53, %v605_v54 }
  0xcf   : > { %v623_v59 = vadd.f32 %v619_v56, %v285_v55 }
  0xd1   : > { %625 = vst [vmem:[#allocation2] sm:$0xff] %v623_v59 }
  0xd2   : > { %v606_v61 = vpop.f32.mrf.mxu2 }
  0xd3   : > { %v607_v62 = vadd.f32 %v606_v61, %v593_v60  ;;  %v620_v0 = vpop.f32.mrf.mxu3 }
  0xd5   : > { %v621_v1 = vadd.f32 %v620_v0, %v607_v62  ;;  %630 = sbr.rel (%p908_p11) target bundleno = 228 (0xe4), region = 63 }
  0xd7   : > { %v624_v2 = vadd.f32 %v621_v1, %v286_v63 }
  0xd9   : > { %626 = vst [vmem:[#allocation2 + $0x8] sm:$0xff] %v624_v2 }
  0xda   : > { %v631_v3 = vld [vmem:[#allocation2] sm:$0xff] }
  0xdb   : > { %v991_v4 = vld [vmem:[%s1175_s2] ss:$0 sm:$0xff] }
  0xdc   : > { %v637_v6 = vadd.f32 %v991_v4, %v631_v3 }
  0xde   : > { %639 = vst [vmem:[%s1176_s3] sm:$0xff] %v637_v6 }
  0xe0   : > { %v632_v5 = vld [vmem:[#allocation2 + $0x8] sm:$0xff] }
  0xe1   : > { %v638_v7 = vadd.f32 %v991_v4, %v632_v5 }
  0xe3   : > { %640 = vst [vmem:[%s1176_s3 + $0x8] sm:$0xff] %v638_v7 }
  0xe4 PF: > { %s13_s16 = sadd.s32 1, %s1030_s16   ;;  %s1177_s12 = smov %s1018_s13 }
  0xe5   : > { %p10_p12 = scmp.ge.s32.totalorder %s13_s16, 18   ;;  %s1178_s13 = smov %s1088_s20 }
  0xe6   : > { %s1179_s14 = smov %s1026_s15  ;;  %s1180_s15 = smov %s1182_s17 }
  0xe7   :  { %12 = sbr.rel (!%p10_p12) target bundleno = 3 (0x3), region = 104 }

// kernel: forward.8
= control target key start
LH: loop header
LB: loop body
LE: loop exit
PB: predicated region body
PF: predicated region fallthrough
CT: control target
= control target key end

     0   :  { %s1688_s12 = smov 0   ;;  %s1690_s13 = smov 0   ;;  %s1921_s0 = inlined_call_operand.vmem [shape: bf16[4096,128], index: 0, kind: input, shape index: {}]   ;;  %s1922_s1 = inlined_call_operand.vmem [shape: bf16[128,128], index: 1, kind: input, shape index: {}]   ;;  %s1923_s2 = inlined_call_operand.vmem [shape: f32[1,128], index: 2, kind: input, shape index: {}]   ;;  %s1924_s3 = inlined_call_operand.vmem [shape: f32[4096,128], index: 3, kind: output, shape index: {}]  }
   0x1   :  { %s1692_s14 = smov 0  }
   0x2 LB: > { %s32_s15 = sadd.s32 1, %s1662_s13  ;;  %p1388_p0 = scmp.ge.s32.totalorder %s1666_s14, 1  ;;  %s1666_s14 = sphi %s1692_s14, %s13_s14   ;;  %s1662_s13 = sphi %s1690_s13, %s1926_s13   ;;  %s1658_s12 = sphi %s1688_s12, %s1925_s12  }
   0x3   : > { %p34_p1 = scmp.ge.s32.totalorder %s32_s15, 8  ;;  %p188_p2 = scmp.lt.s32.totalorder %s1666_s14, 9 }
   0x5   : > { %s1928_s15 = smov (%p34_p1, %s32_s15), 0  ;;  %p189_p3 = pnand %p1388_p0, %p188_p2 }
   0x6   : > { %s1389_s24 = sshll.u32 (!%p189_p3), %s1658_s12, 6 }
   0x7   : > { %192 = sbr.rel (%p189_p3) target bundleno = 303 (0x12f), region = 32  ;;  %p230_p4 = scmp.lt.s32.totalorder (!%p189_p3), %s1389_s24, 511 }
   0xc   : > { %v1594_v0 = vld [vmem:[%s1922_s1 + $0x38] sm:$0xff]  ;;  %v1593_v1 = vld [vmem:[%s1922_s1 + $0x30] sm:$0xff]  ;;  %v1592_v2 = vld [vmem:[%s1922_s1 + $0x28] sm:$0xff]  ;;  %s1930_s24 = smov (!%p230_p4, %s1389_s24), 511 }
   0xd   : > { %711 = vmatpush.bf16.msra.mxu0 %v1594_v0  ;;  %1595 = vmatpush.bf16.msra.mxu1 %v1594_v0  ;;  %v1591_v3 = vld [vmem:[%s1922_s1 + $0x20] sm:$0xff]  ;;  %v1590_v4 = vld [vmem:[%s1922_s1 + $0x18] sm:$0xff]  ;;  %v1589_v5 = vld [vmem:[%s1922_s1 + $0x10] sm:$0xff]  ;;  %s1390_s4 = sshll.u32 %s1930_s24, 2  ;;  %s1392_s12 = sshll.u32 %s1930_s24, 3 }
   0xe   : > { %1596 = vmatpush.bf16.msra.mxu2 %v1594_v0  ;;  %1597 = vmatpush.bf16.msra.mxu3 %v1594_v0  ;;  %v1588_v6 = vld [vmem:[%s1922_s1 + $0x8] sm:$0xff]  ;;  %v1587_v7 = vld [vmem:[%s1922_s1] sm:$0xff]  ;;  %s1739_s9 = scalar_lea.vmem %s1921_s0, %s1390_s4  ;;  %s1784_s18 = scalar_lea.vmem %s1924_s3, %s1392_s12 }
   0xf   : > { %v1555_v8 = vld [vmem:[%s1739_s9] sm:$0xff]  ;;  %v1556_v12 = vld [vmem:[%s1739_s9 + $0x8] sm:$0xff]  ;;  %v1557_v16 = vld [vmem:[%s1739_s9 + $0x10] sm:$0xff] }
  0x10   : > { %v1563_v9 = vld [vmem:[%s1739_s9 + $0x40] sm:$0xff]  ;;  %v1564_v13 = vld [vmem:[%s1739_s9 + $0x48] sm:$0xff]  ;;  %v1565_v17 = vld [vmem:[%s1739_s9 + $0x50] sm:$0xff] }
  0x11   : > { %712 = vmatpush.bf16.msra.mxu0 %v1593_v1  ;;  %1598 = vmatpush.bf16.msra.mxu1 %v1593_v1  ;;  %v1571_v10 = vld [vmem:[%s1739_s9 + $0x80] sm:$0xff]  ;;  %v1572_v14 = vld [vmem:[%s1739_s9 + $0x88] sm:$0xff]  ;;  %v1573_v18 = vld [vmem:[%s1739_s9 + $0x90] sm:$0xff] }
  0x12   : > { %1599 = vmatpush.bf16.msra.mxu2 %v1593_v1  ;;  %1600 = vmatpush.bf16.msra.mxu3 %v1593_v1  ;;  %v1579_v11 = vld [vmem:[%s1739_s9 + $0xc0] sm:$0xff]  ;;  %v1580_v15 = vld [vmem:[%s1739_s9 + $0xc8] sm:$0xff]  ;;  %v1581_v19 = vld [vmem:[%s1739_s9 + $0xd0] sm:$0xff] }
  0x13   : > { %v1558_v20 = vld [vmem:[%s1739_s9 + $0x18] sm:$0xff]  ;;  %v1559_v24 = vld [vmem:[%s1739_s9 + $0x20] sm:$0xff]  ;;  %v1560_v28 = vld [vmem:[%s1739_s9 + $0x28] sm:$0xff] }
  0x14   : > { %v1566_v21 = vld [vmem:[%s1739_s9 + $0x58] sm:$0xff]  ;;  %v1567_v25 = vld [vmem:[%s1739_s9 + $0x60] sm:$0xff]  ;;  %v1568_v29 = vld [vmem:[%s1739_s9 + $0x68] sm:$0xff] }
  0x15   : > { %713 = vmatpush.bf16.msra.mxu0 %v1592_v2  ;;  %1601 = vmatpush.bf16.msra.mxu1 %v1592_v2  ;;  %v1574_v22 = vld [vmem:[%s1739_s9 + $0x98] sm:$0xff]  ;;  %v1575_v26 = vld [vmem:[%s1739_s9 + $0xa0] sm:$0xff]  ;;  %v1576_v30 = vld [vmem:[%s1739_s9 + $0xa8] sm:$0xff] }
  0x16   : > { %1602 = vmatpush.bf16.msra.mxu2 %v1592_v2  ;;  %1603 = vmatpush.bf16.msra.mxu3 %v1592_v2  ;;  %v1582_v23 = vld [vmem:[%s1739_s9 + $0xd8] sm:$0xff]  ;;  %v1583_v27 = vld [vmem:[%s1739_s9 + $0xe0] sm:$0xff]  ;;  %v1584_v31 = vld [vmem:[%s1739_s9 + $0xe8] sm:$0xff] }
  0x17   : > { %v1561_v32 = vld [vmem:[%s1739_s9 + $0x30] sm:$0xff]  ;;  %v1562_v36 = vld [vmem:[%s1739_s9 + $0x38] sm:$0xff]  ;;  %v1776_v40 = vld [vmem:[%s1923_s2] ss:$0 sm:$0xff] }
  0x18   : > { %v1569_v33 = vld [vmem:[%s1739_s9 + $0x70] sm:$0xff]  ;;  %v1570_v37 = vld [vmem:[%s1739_s9 + $0x78] sm:$0xff] }
  0x19   : > { %714 = vmatpush.bf16.msra.mxu0 %v1591_v3  ;;  %1604 = vmatpush.bf16.msra.mxu1 %v1591_v3  ;;  %v1577_v34 = vld [vmem:[%s1739_s9 + $0xb0] sm:$0xff]  ;;  %v1578_v38 = vld [vmem:[%s1739_s9 + $0xb8] sm:$0xff] }
  0x1a   : > { %1605 = vmatpush.bf16.msra.mxu2 %v1591_v3  ;;  %1606 = vmatpush.bf16.msra.mxu3 %v1591_v3  ;;  %v1585_v35 = vld [vmem:[%s1739_s9 + $0xf0] sm:$0xff]  ;;  %v1586_v39 = vld [vmem:[%s1739_s9 + $0xf8] sm:$0xff] }
  0x1d   : > { %715 = vmatpush.bf16.msra.mxu0 %v1590_v4  ;;  %1607 = vmatpush.bf16.msra.mxu1 %v1590_v4 }
  0x1e   : > { %1608 = vmatpush.bf16.msra.mxu2 %v1590_v4  ;;  %1609 = vmatpush.bf16.msra.mxu3 %v1590_v4 }
  0x21   : > { %716 = vmatpush.bf16.msra.mxu0 %v1589_v5  ;;  %1610 = vmatpush.bf16.msra.mxu1 %v1589_v5 }
  0x22   : > { %1611 = vmatpush.bf16.msra.mxu2 %v1589_v5  ;;  %1612 = vmatpush.bf16.msra.mxu3 %v1589_v5 }
  0x25   : > { %717 = vmatpush.bf16.msra.mxu0 %v1588_v6  ;;  %1613 = vmatpush.bf16.msra.mxu1 %v1588_v6 }
  0x26   : > { %1614 = vmatpush.bf16.msra.mxu2 %v1588_v6  ;;  %1615 = vmatpush.bf16.msra.mxu3 %v1588_v6 }
  0x29   : > { %718 = vmatpush.bf16.msra.mxu0 %v1587_v7  ;;  %1616 = vmatpush.bf16.msra.mxu1 %v1587_v7 }
  0x2a   : > { %1617 = vmatpush.bf16.msra.mxu2 %v1587_v7  ;;  %1618 = vmatpush.bf16.msra.mxu3 %v1587_v7 }
  0x2c   : > { %719 = vmatmul.bf16.vlgmr.msra.gmra.mxu0 %v1555_v8  ;;  %759 = vmatmul.bf16.vlgmr.msra.gmra.mxu1 %v1563_v9 }
  0x2d   : > { %799 = vmatmul.bf16.vlgmr.msra.gmra.mxu2 %v1571_v10  ;;  %839 = vmatmul.bf16.vlgmr.msra.gmra.mxu3 %v1579_v11 }
  0x3c   : > { %724 = vmatmul.bf16.gmra.mxu0 %v1556_v12  ;;  %764 = vmatmul.bf16.gmra.mxu1 %v1564_v13 }
  0x3d   : > { %804 = vmatmul.bf16.gmra.mxu2 %v1572_v14  ;;  %844 = vmatmul.bf16.gmra.mxu3 %v1580_v15 }
  0x4c   : > { %729 = vmatmul.bf16.gmra.mxu0 %v1557_v16  ;;  %769 = vmatmul.bf16.gmra.mxu1 %v1565_v17 }
  0x4d   : > { %809 = vmatmul.bf16.gmra.mxu2 %v1573_v18  ;;  %849 = vmatmul.bf16.gmra.mxu3 %v1581_v19 }
  0x5c   : > { %734 = vmatmul.bf16.gmra.mxu0 %v1558_v20  ;;  %774 = vmatmul.bf16.gmra.mxu1 %v1566_v21 }
  0x5d   : > { %814 = vmatmul.bf16.gmra.mxu2 %v1574_v22  ;;  %854 = vmatmul.bf16.gmra.mxu3 %v1582_v23 }
  0x6c   : > { %739 = vmatmul.bf16.gmra.mxu0 %v1559_v24  ;;  %779 = vmatmul.bf16.gmra.mxu1 %v1567_v25 }
  0x6d   : > { %819 = vmatmul.bf16.gmra.mxu2 %v1575_v26  ;;  %859 = vmatmul.bf16.gmra.mxu3 %v1583_v27 }
  0x7c   : > { %744 = vmatmul.bf16.gmra.mxu0 %v1560_v28  ;;  %784 = vmatmul.bf16.gmra.mxu1 %v1568_v29 }
  0x7d   : > { %824 = vmatmul.bf16.gmra.mxu2 %v1576_v30  ;;  %864 = vmatmul.bf16.gmra.mxu3 %v1584_v31 }
  0x8c   : > { %749 = vmatmul.bf16.gmra.mxu0 %v1561_v32  ;;  %789 = vmatmul.bf16.gmra.mxu1 %v1569_v33 }
  0x8d   : > { %829 = vmatmul.bf16.gmra.mxu2 %v1577_v34  ;;  %869 = vmatmul.bf16.gmra.mxu3 %v1585_v35 }
  0x9c   : > { %754 = vmatmul.bf16.gmra.mxu0 %v1562_v36  ;;  %794 = vmatmul.bf16.gmra.mxu1 %v1570_v37 }
  0x9d   : > { %834 = vmatmul.bf16.gmra.mxu2 %v1578_v38  ;;  %874 = vmatmul.bf16.gmra.mxu3 %v1586_v39 }
  0xa9   : > { %v720_v41 = vpop.f32.mrf.mxu0  ;;  %v760_v42 = vpop.f32.mrf.mxu1 }
  0xaa   : > { %v1079_v43 = vadd.f32 %v1776_v40, %v720_v41  ;;  %v1095_v44 = vadd.f32 %v1776_v40, %v760_v42 }
  0xac   : > { %v1143_v45 = vmax.f32 %v1079_v43, 0.0  ;;  %v1159_v46 = vmax.f32 %v1095_v44, 0.0 }
  0xae   : > { %1207 = vst [vmem:[%s1784_s18] sm:$0xff] %v1143_v45 }
  0xaf   : > { %1223 = vst [vmem:[%s1784_s18 + $0x80] sm:$0xff] %v1159_v46 }
  0xb0   : > { %v800_v47 = vpop.f32.mrf.mxu2  ;;  %v840_v48 = vpop.f32.mrf.mxu3 }
  0xb1   : > { %v1111_v49 = vadd.f32 %v1776_v40, %v800_v47  ;;  %v1127_v50 = vadd.f32 %v1776_v40, %v840_v48  ;;  %v722_v51 = vpop.f32.mrf.mxu0  ;;  %v762_v52 = vpop.f32.mrf.mxu1 }
  0xb2   : > { %v1080_v53 = vadd.f32 %v1776_v40, %v722_v51  ;;  %v1096_v54 = vadd.f32 %v1776_v40, %v762_v52 }
  0xb3   : > { %v1175_v55 = vmax.f32 %v1111_v49, 0.0  ;;  %v1191_v56 = vmax.f32 %v1127_v50, 0.0 }
  0xb4   : > { %v1144_v57 = vmax.f32 %v1080_v53, 0.0  ;;  %v1160_v58 = vmax.f32 %v1096_v54, 0.0 }
  0xb5   : > { %1239 = vst [vmem:[%s1784_s18 + $0x100] sm:$0xff] %v1175_v55 }
  0xb6   : > { %1255 = vst [vmem:[%s1784_s18 + $0x180] sm:$0xff] %v1191_v56 }
  0xb7   : > { %1208 = vst [vmem:[%s1784_s18 + $0x8] sm:$0xff] %v1144_v57 }
  0xb8   : > { %1224 = vst [vmem:[%s1784_s18 + $0x88] sm:$0xff] %v1160_v58  ;;  %v802_v59 = vpop.f32.mrf.mxu2  ;;  %v842_v60 = vpop.f32.mrf.mxu3 }
  0xb9   : > { %v1112_v61 = vadd.f32 %v1776_v40, %v802_v59  ;;  %v1128_v62 = vadd.f32 %v1776_v40, %v842_v60  ;;  %v725_v63 = vpop.f32.mrf.mxu0  ;;  %v765_v0 = vpop.f32.mrf.mxu1 }
  0xba   : > { %v1081_v1 = vadd.f32 %v1776_v40, %v725_v63  ;;  %v1097_v2 = vadd.f32 %v1776_v40, %v765_v0 }
  0xbb   : > { %v1176_v3 = vmax.f32 %v1112_v61, 0.0  ;;  %v1192_v4 = vmax.f32 %v1128_v62, 0.0 }
  0xbc   : > { %v1145_v5 = vmax.f32 %v1081_v1, 0.0  ;;  %v1161_v6 = vmax.f32 %v1097_v2, 0.0 }
  0xbd   : > { %1240 = vst [vmem:[%s1784_s18 + $0x108] sm:$0xff] %v1176_v3 }
  0xbe   : > { %1256 = vst [vmem:[%s1784_s18 + $0x188] sm:$0xff] %v1192_v4 }
  0xbf   : > { %1209 = vst [vmem:[%s1784_s18 + $0x10] sm:$0xff] %v1145_v5 }
  0xc0   : > { %1225 = vst [vmem:[%s1784_s18 + $0x90] sm:$0xff] %v1161_v6  ;;  %v805_v7 = vpop.f32.mrf.mxu2  ;;  %v845_v8 = vpop.f32.mrf.mxu3 }
  0xc1   : > { %v1113_v9 = vadd.f32 %v1776_v40, %v805_v7  ;;  %v1129_v10 = vadd.f32 %v1776_v40, %v845_v8  ;;  %v727_v11 = vpop.f32.mrf.mxu0  ;;  %v767_v12 = vpop.f32.mrf.mxu1 }
  0xc2   : > { %v1082_v13 = vadd.f32 %v1776_v40, %v727_v11  ;;  %v1098_v14 = vadd.f32 %v1776_v40, %v767_v12 }
  0xc3   : > { %v1177_v15 = vmax.f32 %v1113_v9, 0.0  ;;  %v1193_v16 = vmax.f32 %v1129_v10, 0.0 }
  0xc4   : > { %v1146_v17 = vmax.f32 %v1082_v13, 0.0  ;;  %v1162_v18 = vmax.f32 %v1098_v14, 0.0 }
  0xc5   : > { %1241 = vst [vmem:[%s1784_s18 + $0x110] sm:$0xff] %v1177_v15 }
  0xc6   : > { %1257 = vst [vmem:[%s1784_s18 + $0x190] sm:$0xff] %v1193_v16 }
  0xc7   : > { %1210 = vst [vmem:[%s1784_s18 + $0x18] sm:$0xff] %v1146_v17 }
  0xc8   : > { %1226 = vst [vmem:[%s1784_s18 + $0x98] sm:$0xff] %v1162_v18  ;;  %v807_v19 = vpop.f32.mrf.mxu2  ;;  %v847_v20 = vpop.f32.mrf.mxu3 }
  0xc9   : > { %v1114_v21 = vadd.f32 %v1776_v40, %v807_v19  ;;  %v1130_v22 = vadd.f32 %v1776_v40, %v847_v20  ;;  %v730_v23 = vpop.f32.mrf.mxu0  ;;  %v770_v24 = vpop.f32.mrf.mxu1 }
  0xca   : > { %v1083_v25 = vadd.f32 %v1776_v40, %v730_v23  ;;  %v1099_v26 = vadd.f32 %v1776_v40, %v770_v24 }
  0xcb   : > { %v1178_v27 = vmax.f32 %v1114_v21, 0.0  ;;  %v1194_v28 = vmax.f32 %v1130_v22, 0.0 }
  0xcc   : > { %v1147_v29 = vmax.f32 %v1083_v25, 0.0  ;;  %v1163_v30 = vmax.f32 %v1099_v26, 0.0 }
  0xcd   : > { %1242 = vst [vmem:[%s1784_s18 + $0x118] sm:$0xff] %v1178_v27 }
  0xce   : > { %1258 = vst [vmem:[%s1784_s18 + $0x198] sm:$0xff] %v1194_v28 }
  0xcf   : > { %1211 = vst [vmem:[%s1784_s18 + $0x20] sm:$0xff] %v1147_v29 }
  0xd0   : > { %1227 = vst [vmem:[%s1784_s18 + $0xa0] sm:$0xff] %v1163_v30  ;;  %v810_v31 = vpop.f32.mrf.mxu2  ;;  %v850_v32 = vpop.f32.mrf.mxu3 }
  0xd1   : > { %v1115_v33 = vadd.f32 %v1776_v40, %v810_v31  ;;  %v1131_v34 = vadd.f32 %v1776_v40, %v850_v32  ;;  %v732_v35 = vpop.f32.mrf.mxu0  ;;  %v772_v36 = vpop.f32.mrf.mxu1 }
  0xd2   : > { %v1084_v37 = vadd.f32 %v1776_v40, %v732_v35  ;;  %v1100_v38 = vadd.f32 %v1776_v40, %v772_v36 }
  0xd3   : > { %v1179_v39 = vmax.f32 %v1115_v33, 0.0  ;;  %v1195_v41 = vmax.f32 %v1131_v34, 0.0 }
  0xd4   : > { %v1148_v42 = vmax.f32 %v1084_v37, 0.0  ;;  %v1164_v43 = vmax.f32 %v1100_v38, 0.0 }
  0xd5   : > { %1243 = vst [vmem:[%s1784_s18 + $0x120] sm:$0xff] %v1179_v39 }
  0xd6   : > { %1259 = vst [vmem:[%s1784_s18 + $0x1a0] sm:$0xff] %v1195_v41 }
  0xd7   : > { %1212 = vst [vmem:[%s1784_s18 + $0x28] sm:$0xff] %v1148_v42 }
  0xd8   : > { %1228 = vst [vmem:[%s1784_s18 + $0xa8] sm:$0xff] %v1164_v43  ;;  %v812_v44 = vpop.f32.mrf.mxu2  ;;  %v852_v45 = vpop.f32.mrf.mxu3 }
  0xd9   : > { %v1116_v46 = vadd.f32 %v1776_v40, %v812_v44  ;;  %v1132_v47 = vadd.f32 %v1776_v40, %v852_v45  ;;  %v735_v48 = vpop.f32.mrf.mxu0  ;;  %v775_v49 = vpop.f32.mrf.mxu1 }
  0xda   : > { %v1085_v50 = vadd.f32 %v1776_v40, %v735_v48  ;;  %v1101_v51 = vadd.f32 %v1776_v40, %v775_v49 }
  0xdb   : > { %v1180_v52 = vmax.f32 %v1116_v46, 0.0  ;;  %v1196_v53 = vmax.f32 %v1132_v47, 0.0 }
  0xdc   : > { %v1149_v54 = vmax.f32 %v1085_v50, 0.0  ;;  %v1165_v55 = vmax.f32 %v1101_v51, 0.0 }
  0xdd   : > { %1244 = vst [vmem:[%s1784_s18 + $0x128] sm:$0xff] %v1180_v52 }
  0xde   : > { %1260 = vst [vmem:[%s1784_s18 + $0x1a8] sm:$0xff] %v1196_v53 }
  0xdf   : > { %1213 = vst [vmem:[%s1784_s18 + $0x30] sm:$0xff] %v1149_v54 }
  0xe0   : > { %1229 = vst [vmem:[%s1784_s18 + $0xb0] sm:$0xff] %v1165_v55  ;;  %v815_v56 = vpop.f32.mrf.mxu2  ;;  %v855_v57 = vpop.f32.mrf.mxu3 }
  0xe1   : > { %v1117_v58 = vadd.f32 %v1776_v40, %v815_v56  ;;  %v1133_v59 = vadd.f32 %v1776_v40, %v855_v57  ;;  %v737_v60 = vpop.f32.mrf.mxu0  ;;  %v777_v61 = vpop.f32.mrf.mxu1 }
  0xe2   : > { %v1086_v62 = vadd.f32 %v1776_v40, %v737_v60  ;;  %v1102_v63 = vadd.f32 %v1776_v40, %v777_v61 }
  0xe3   : > { %v1181_v0 = vmax.f32 %v1117_v58, 0.0  ;;  %v1197_v1 = vmax.f32 %v1133_v59, 0.0 }
  0xe4   : > { %v1150_v2 = vmax.f32 %v1086_v62, 0.0  ;;  %v1166_v3 = vmax.f32 %v1102_v63, 0.0 }
  0xe5   : > { %1245 = vst [vmem:[%s1784_s18 + $0x130] sm:$0xff] %v1181_v0 }
  0xe6   : > { %1261 = vst [vmem:[%s1784_s18 + $0x1b0] sm:$0xff] %v1197_v1 }
  0xe7   : > { %1214 = vst [vmem:[%s1784_s18 + $0x38] sm:$0xff] %v1150_v2 }
  0xe8   : > { %1230 = vst [vmem:[%s1784_s18 + $0xb8] sm:$0xff] %v1166_v3  ;;  %v817_v4 = vpop.f32.mrf.mxu2  ;;  %v857_v5 = vpop.f32.mrf.mxu3 }
  0xe9   : > { %v1118_v6 = vadd.f32 %v1776_v40, %v817_v4  ;;  %v1134_v7 = vadd.f32 %v1776_v40, %v857_v5  ;;  %v740_v8 = vpop.f32.mrf.mxu0  ;;  %v780_v9 = vpop.f32.mrf.mxu1 }
  0xea   : > { %v1087_v10 = vadd.f32 %v1776_v40, %v740_v8  ;;  %v1103_v11 = vadd.f32 %v1776_v40, %v780_v9 }
  0xeb   : > { %v1182_v12 = vmax.f32 %v1118_v6, 0.0  ;;  %v1198_v13 = vmax.f32 %v1134_v7, 0.0 }
  0xec   : > { %v1151_v14 = vmax.f32 %v1087_v10, 0.0  ;;  %v1167_v15 = vmax.f32 %v1103_v11, 0.0 }
  0xed   : > { %1246 = vst [vmem:[%s1784_s18 + $0x138] sm:$0xff] %v1182_v12 }
  0xee   : > { %1262 = vst [vmem:[%s1784_s18 + $0x1b8] sm:$0xff] %v1198_v13 }
  0xef   : > { %1215 = vst [vmem:[%s1784_s18 + $0x40] sm:$0xff] %v1151_v14 }
  0xf0   : > { %1231 = vst [vmem:[%s1784_s18 + $0xc0] sm:$0xff] %v1167_v15  ;;  %v820_v16 = vpop.f32.mrf.mxu2  ;;  %v860_v17 = vpop.f32.mrf.mxu3 }
  0xf1   : > { %v1119_v18 = vadd.f32 %v1776_v40, %v820_v16  ;;  %v1135_v19 = vadd.f32 %v1776_v40, %v860_v17  ;;  %v742_v20 = vpop.f32.mrf.mxu0  ;;  %v782_v21 = vpop.f32.mrf.mxu1 }
  0xf2   : > { %v1088_v22 = vadd.f32 %v1776_v40, %v742_v20  ;;  %v1104_v23 = vadd.f32 %v1776_v40, %v782_v21 }
  0xf3   : > { %v1183_v24 = vmax.f32 %v1119_v18, 0.0  ;;  %v1199_v25 = vmax.f32 %v1135_v19, 0.0 }
  0xf4   : > { %v1152_v26 = vmax.f32 %v1088_v22, 0.0  ;;  %v1168_v27 = vmax.f32 %v1104_v23, 0.0 }
  0xf5   : > { %1247 = vst [vmem:[%s1784_s18 + $0x140] sm:$0xff] %v1183_v24 }
  0xf6   : > { %1263 = vst [vmem:[%s1784_s18 + $0x1c0] sm:$0xff] %v1199_v25 }
  0xf7   : > { %1216 = vst [vmem:[%s1784_s18 + $0x48] sm:$0xff] %v1152_v26 }
  0xf8   : > { %1232 = vst [vmem:[%s1784_s18 + $0xc8] sm:$0xff] %v1168_v27  ;;  %v822_v28 = vpop.f32.mrf.mxu2  ;;  %v862_v29 = vpop.f32.mrf.mxu3 }
  0xf9   : > { %v1120_v30 = vadd.f32 %v1776_v40, %v822_v28  ;;  %v1136_v31 = vadd.f32 %v1776_v40, %v862_v29  ;;  %v745_v32 = vpop.f32.mrf.mxu0  ;;  %v785_v33 = vpop.f32.mrf.mxu1 }
  0xfa   : > { %v1089_v34 = vadd.f32 %v1776_v40, %v745_v32  ;;  %v1105_v35 = vadd.f32 %v1776_v40, %v785_v33 }
  0xfb   : > { %v1184_v36 = vmax.f32 %v1120_v30, 0.0  ;;  %v1200_v37 = vmax.f32 %v1136_v31, 0.0 }
  0xfc   : > { %v1153_v38 = vmax.f32 %v1089_v34, 0.0  ;;  %v1169_v39 = vmax.f32 %v1105_v35, 0.0 }
  0xfd   : > { %1248 = vst [vmem:[%s1784_s18 + $0x148] sm:$0xff] %v1184_v36 }
  0xfe   : > { %1264 = vst [vmem:[%s1784_s18 + $0x1c8] sm:$0xff] %v1200_v37 }
  0xff   : > { %1217 = vst [vmem:[%s1784_s18 + $0x50] sm:$0xff] %v1153_v38 }
 0x100   : > { %1233 = vst [vmem:[%s1784_s18 + $0xd0] sm:$0xff] %v1169_v39  ;;  %v825_v41 = vpop.f32.mrf.mxu2  ;;  %v865_v42 = vpop.f32.mrf.mxu3 }
 0x101   : > { %v1121_v43 = vadd.f32 %v1776_v40, %v825_v41  ;;  %v1137_v44 = vadd.f32 %v1776_v40, %v865_v42  ;;  %v747_v45 = vpop.f32.mrf.mxu0  ;;  %v787_v46 = vpop.f32.mrf.mxu1 }
 0x102   : > { %v1090_v47 = vadd.f32 %v1776_v40, %v747_v45  ;;  %v1106_v48 = vadd.f32 %v1776_v40, %v787_v46 }
 0x103   : > { %v1185_v49 = vmax.f32 %v1121_v43, 0.0  ;;  %v1201_v50 = vmax.f32 %v1137_v44, 0.0 }
 0x104   : > { %v1154_v51 = vmax.f32 %v1090_v47, 0.0  ;;  %v1170_v52 = vmax.f32 %v1106_v48, 0.0 }
 0x105   : > { %1249 = vst [vmem:[%s1784_s18 + $0x150] sm:$0xff] %v1185_v49 }
 0x106   : > { %1265 = vst [vmem:[%s1784_s18 + $0x1d0] sm:$0xff] %v1201_v50 }
 0x107   : > { %1218 = vst [vmem:[%s1784_s18 + $0x58] sm:$0xff] %v1154_v51 }
 0x108   : > { %1234 = vst [vmem:[%s1784_s18 + $0xd8] sm:$0xff] %v1170_v52  ;;  %v827_v53 = vpop.f32.mrf.mxu2  ;;  %v867_v54 = vpop.f32.mrf.mxu3 }
 0x109   : > { %v1122_v55 = vadd.f32 %v1776_v40, %v827_v53  ;;  %v1138_v56 = vadd.f32 %v1776_v40, %v867_v54  ;;  %v750_v57 = vpop.f32.mrf.mxu0  ;;  %v790_v58 = vpop.f32.mrf.mxu1 }
 0x10a   : > { %v1091_v59 = vadd.f32 %v1776_v40, %v750_v57  ;;  %v1107_v60 = vadd.f32 %v1776_v40, %v790_v58 }
 0x10b   : > { %v1186_v61 = vmax.f32 %v1122_v55, 0.0  ;;  %v1202_v62 = vmax.f32 %v1138_v56, 0.0 }
 0x10c   : > { %v1155_v63 = vmax.f32 %v1091_v59, 0.0  ;;  %v1171_v0 = vmax.f32 %v1107_v60, 0.0 }
 0x10d   : > { %1250 = vst [vmem:[%s1784_s18 + $0x158] sm:$0xff] %v1186_v61 }
 0x10e   : > { %1266 = vst [vmem:[%s1784_s18 + $0x1d8] sm:$0xff] %v1202_v62 }
 0x10f   : > { %1219 = vst [vmem:[%s1784_s18 + $0x60] sm:$0xff] %v1155_v63 }
 0x110   : > { %1235 = vst [vmem:[%s1784_s18 + $0xe0] sm:$0xff] %v1171_v0  ;;  %v830_v1 = vpop.f32.mrf.mxu2  ;;  %v870_v2 = vpop.f32.mrf.mxu3 }
 0x111   : > { %v1123_v3 = vadd.f32 %v1776_v40, %v830_v1  ;;  %v1139_v4 = vadd.f32 %v1776_v40, %v870_v2  ;;  %v752_v5 = vpop.f32.mrf.mxu0  ;;  %v792_v6 = vpop.f32.mrf.mxu1 }
 0x112   : > { %v1092_v7 = vadd.f32 %v1776_v40, %v752_v5  ;;  %v1108_v8 = vadd.f32 %v1776_v40, %v792_v6 }
 0x113   : > { %v1187_v9 = vmax.f32 %v1123_v3, 0.0  ;;  %v1203_v10 = vmax.f32 %v1139_v4, 0.0 }
 0x114   : > { %v1156_v11 = vmax.f32 %v1092_v7, 0.0  ;;  %v1172_v12 = vmax.f32 %v1108_v8, 0.0 }
 0x115   : > { %1251 = vst [vmem:[%s1784_s18 + $0x160] sm:$0xff] %v1187_v9 }
 0x116   : > { %1267 = vst [vmem:[%s1784_s18 + $0x1e0] sm:$0xff] %v1203_v10 }
 0x117   : > { %1220 = vst [vmem:[%s1784_s18 + $0x68] sm:$0xff] %v1156_v11 }
 0x118   : > { %1236 = vst [vmem:[%s1784_s18 + $0xe8] sm:$0xff] %v1172_v12  ;;  %v832_v13 = vpop.f32.mrf.mxu2  ;;  %v872_v14 = vpop.f32.mrf.mxu3 }
 0x119   : > { %v1124_v15 = vadd.f32 %v1776_v40, %v832_v13  ;;  %v1140_v16 = vadd.f32 %v1776_v40, %v872_v14  ;;  %v755_v17 = vpop.f32.mrf.mxu0  ;;  %v795_v18 = vpop.f32.mrf.mxu1 }
 0x11a   : > { %v1093_v19 = vadd.f32 %v1776_v40, %v755_v17  ;;  %v1109_v20 = vadd.f32 %v1776_v40, %v795_v18 }
 0x11b   : > { %v1188_v21 = vmax.f32 %v1124_v15, 0.0  ;;  %v1204_v22 = vmax.f32 %v1140_v16, 0.0 }
 0x11c   : > { %v1157_v23 = vmax.f32 %v1093_v19, 0.0  ;;  %v1173_v24 = vmax.f32 %v1109_v20, 0.0 }
 0x11d   : > { %1252 = vst [vmem:[%s1784_s18 + $0x168] sm:$0xff] %v1188_v21 }
 0x11e   : > { %1268 = vst [vmem:[%s1784_s18 + $0x1e8] sm:$0xff] %v1204_v22 }
 0x11f   : > { %1221 = vst [vmem:[%s1784_s18 + $0x70] sm:$0xff] %v1157_v23 }
 0x120   : > { %1237 = vst [vmem:[%s1784_s18 + $0xf0] sm:$0xff] %v1173_v24  ;;  %v835_v25 = vpop.f32.mrf.mxu2  ;;  %v875_v26 = vpop.f32.mrf.mxu3 }
 0x121   : > { %v1125_v27 = vadd.f32 %v1776_v40, %v835_v25  ;;  %v1141_v28 = vadd.f32 %v1776_v40, %v875_v26  ;;  %v757_v29 = vpop.f32.mrf.mxu0  ;;  %v797_v30 = vpop.f32.mrf.mxu1 }
 0x122   : > { %v1094_v31 = vadd.f32 %v1776_v40, %v757_v29  ;;  %v1110_v32 = vadd.f32 %v1776_v40, %v797_v30 }
 0x123   : > { %v1189_v33 = vmax.f32 %v1125_v27, 0.0  ;;  %v1205_v34 = vmax.f32 %v1141_v28, 0.0 }
 0x124   : > { %v1158_v35 = vmax.f32 %v1094_v31, 0.0  ;;  %v1174_v36 = vmax.f32 %v1110_v32, 0.0 }
 0x125   : > { %1253 = vst [vmem:[%s1784_s18 + $0x170] sm:$0xff] %v1189_v33 }
 0x126   : > { %1269 = vst [vmem:[%s1784_s18 + $0x1f0] sm:$0xff] %v1205_v34 }
 0x127   : > { %1222 = vst [vmem:[%s1784_s18 + $0x78] sm:$0xff] %v1158_v35 }
 0x128   : > { %1238 = vst [vmem:[%s1784_s18 + $0xf8] sm:$0xff] %v1174_v36  ;;  %v837_v37 = vpop.f32.mrf.mxu2  ;;  %v877_v38 = vpop.f32.mrf.mxu3 }
 0x129   : > { %v1126_v39 = vadd.f32 %v1776_v40, %v837_v37  ;;  %v1142_v41 = vadd.f32 %v1776_v40, %v877_v38 }
 0x12b   : > { %v1190_v42 = vmax.f32 %v1126_v39, 0.0  ;;  %v1206_v43 = vmax.f32 %v1142_v41, 0.0 }
 0x12d   : > { %1254 = vst [vmem:[%s1784_s18 + $0x178] sm:$0xff] %v1190_v42 }
 0x12e   : > { %1270 = vst [vmem:[%s1784_s18 + $0x1f8] sm:$0xff] %v1206_v43 }
 0x12f PF: > { %s13_s14 = sadd.s32 1, %s1666_s14   ;;  %s1925_s12 = smov %s1662_s13 }
 0x130   : > { %p10_p5 = scmp.ge.s32.totalorder %s13_s14, 10   ;;  %s1926_s13 = smov %s1928_s15 }
 0x132   :  { %12 = sbr.rel (!%p10_p5) target bundleno = 2 (0x2), region = 76 }

// kernel: forward.9
= control target key start
LH: loop header
LB: loop body
LE: loop exit
PB: predicated region body
PF: predicated region fallthrough
CT: control target
= control target key end

     0   :  { %s1486_s12 = smov 0   ;;  %s1488_s13 = smov 0   ;;  %s1714_s0 = inlined_call_operand.vmem [shape: bf16[1024,256], index: 0, kind: input, shape index: {}]   ;;  %s1715_s1 = inlined_call_operand.vmem [shape: bf16[256,128], index: 1, kind: input, shape index: {}]   ;;  %s1716_s2 = inlined_call_operand.vmem [shape: f32[1,128], index: 2, kind: input, shape index: {}]   ;;  %s1717_s3 = inlined_call_operand.vmem [shape: f32[1024,128], index: 3, kind: output, shape index: {}]  }
   0x1   :  { %s1490_s14 = smov 0  }
   0x2 LB: > { %s32_s15 = sadd.s32 1, %s1460_s13  ;;  %p1152_p0 = scmp.ge.s32.totalorder %s1464_s14, 1  ;;  %s1464_s14 = sphi %s1490_s14, %s13_s14   ;;  %s1460_s13 = sphi %s1488_s13, %s1719_s13   ;;  %s1456_s12 = sphi %s1486_s12, %s1718_s12  }
   0x3   : > { %p34_p1 = scmp.ge.s32.totalorder %s32_s15, 4  ;;  %p191_p2 = scmp.lt.s32.totalorder %s1464_s14, 5 }
   0x5   : > { %s1721_s15 = smov (%p34_p1, %s32_s15), 0  ;;  %p192_p3 = pnand %p1152_p0, %p191_p2 }
   0x6   : > { %s1153_s28 = sshll.u32 (!%p192_p3), %s1456_s12, 5 }
   0x7   : > { %195 = sbr.rel (%p192_p3) target bundleno = 304 (0x130), region = 32  ;;  %p236_p4 = scmp.lt.s32.totalorder (!%p192_p3), %s1153_s28, 127 }
   0xc   : > { %v1392_v0 = vld [vmem:[%s1715_s1 + $0x38] sm:$0xff]  ;;  %v1391_v2 = vld [vmem:[%s1715_s1 + $0x30] sm:$0xff]  ;;  %v1390_v4 = vld [vmem:[%s1715_s1 + $0x28] sm:$0xff]  ;;  %s1723_s28 = smov (!%p236_p4, %s1153_s28), 127 }
   0xd   : > { %v1400_v1 = vld [vmem:[%s1715_s1 + $0x78] sm:$0xff]  ;;  %655 = vmatpush.bf16.msra.mxu0 %v1392_v0  ;;  %1401 = vmatpush.bf16.msra.mxu2 %v1392_v0  ;;  %v1399_v3 = vld [vmem:[%s1715_s1 + $0x70] sm:$0xff]  ;;  %v1398_v5 = vld [vmem:[%s1715_s1 + $0x68] sm:$0xff]  ;;  %s1352_s17 = sshll.u32 %s1723_s28, 3 }
   0xe   : > { %744 = vmatpush.bf16.msra.mxu1 %v1400_v1  ;;  %1409 = vmatpush.bf16.msra.mxu3 %v1400_v1  ;;  %v1389_v6 = vld [vmem:[%s1715_s1 + $0x20] sm:$0xff]  ;;  %v1388_v8 = vld [vmem:[%s1715_s1 + $0x18] sm:$0xff]  ;;  %v1387_v10 = vld [vmem:[%s1715_s1 + $0x10] sm:$0xff]  ;;  %s1554_s22 = scalar_lea.vmem %s1714_s0, %s1352_s17  ;;  %s1640_s7 = scalar_lea.vmem %s1717_s3, %s1352_s17 }
   0xf   : > { %v1397_v7 = vld [vmem:[%s1715_s1 + $0x60] sm:$0xff]  ;;  %v1396_v9 = vld [vmem:[%s1715_s1 + $0x58] sm:$0xff]  ;;  %v1395_v11 = vld [vmem:[%s1715_s1 + $0x50] sm:$0xff] }
  0x10   : > { %v1386_v12 = vld [vmem:[%s1715_s1 + $0x8] sm:$0xff]  ;;  %v1385_v14 = vld [vmem:[%s1715_s1] sm:$0xff]  ;;  %v1168_v28 = vld [vmem:[%s1554_s22 + $0x10] sm:$0xf] }
  0x11   : > { %656 = vmatpush.bf16.msra.mxu0 %v1391_v2  ;;  %1402 = vmatpush.bf16.msra.mxu2 %v1391_v2  ;;  %v1394_v13 = vld [vmem:[%s1715_s1 + $0x48] sm:$0xff]  ;;  %v1393_v15 = vld [vmem:[%s1715_s1 + $0x40] sm:$0xff]  ;;  %v1356_v29 = vld [vmem:[%s1554_s22 + $0x14] sm:$0xf0] }
  0x12   : > { %745 = vmatpush.bf16.msra.mxu1 %v1399_v3  ;;  %1410 = vmatpush.bf16.msra.mxu3 %v1399_v3  ;;  %v1160_v16 = vld [vmem:[%s1554_s22] sm:$0xf]  ;;  %v1354_v17 = vld [vmem:[%s1554_s22 + $0x4] sm:$0xf0]  ;;  %v1353_v20 = vld [vmem:[%s1554_s22 + $0x4] sm:$0xf]  ;;  %v1169_v36 = vor.u32 %v1356_v29, %v1168_v28 }
  0x13   : > { %v1224_v18 = vld [vmem:[%s1554_s22 + $0x80] sm:$0xf]  ;;  %v1370_v19 = vld [vmem:[%s1554_s22 + $0x84] sm:$0xf0]  ;;  %v1162_v21 = vld [vmem:[%s1554_s22 + $0x8] sm:$0xf0]  ;;  %v1161_v24 = vor.u32 %v1354_v17, %v1160_v16 }
  0x14   : > { %v1369_v22 = vld [vmem:[%s1554_s22 + $0x84] sm:$0xf]  ;;  %v1226_v23 = vld [vmem:[%s1554_s22 + $0x88] sm:$0xf0]  ;;  %v1225_v25 = vor.u32 %v1370_v19, %v1224_v18  ;;  %v1165_v26 = vor.u32 %v1353_v20, %v1162_v21  ;;  %v1232_v30 = vld [vmem:[%s1554_s22 + $0x90] sm:$0xf] }
  0x15   : > { %657 = vmatpush.bf16.msra.mxu0 %v1390_v4  ;;  %1403 = vmatpush.bf16.msra.mxu2 %v1390_v4  ;;  %v1229_v27 = vor.u32 %v1369_v22, %v1226_v23  ;;  %v1372_v31 = vld [vmem:[%s1554_s22 + $0x94] sm:$0xf0]  ;;  %v1355_v32 = vld [vmem:[%s1554_s22 + $0x14] sm:$0xf]  ;;  %v1170_v33 = vld [vmem:[%s1554_s22 + $0x18] sm:$0xf0] }
  0x16   : > { %746 = vmatpush.bf16.msra.mxu1 %v1398_v5  ;;  %1411 = vmatpush.bf16.msra.mxu3 %v1398_v5  ;;  %v1371_v34 = vld [vmem:[%s1554_s22 + $0x94] sm:$0xf]  ;;  %v1234_v35 = vld [vmem:[%s1554_s22 + $0x98] sm:$0xf0]  ;;  %v1233_v37 = vor.u32 %v1372_v31, %v1232_v30  ;;  %v1173_v38 = vor.u32 %v1355_v32, %v1170_v33  ;;  %v1176_v40 = vld [vmem:[%s1554_s22 + $0x20] sm:$0xf] }
  0x17   : > { %v1237_v39 = vor.u32 %v1371_v34, %v1234_v35  ;;  %v1358_v41 = vld [vmem:[%s1554_s22 + $0x24] sm:$0xf0]  ;;  %v1240_v42 = vld [vmem:[%s1554_s22 + $0xa0] sm:$0xf]  ;;  %v1357_v44 = vld [vmem:[%s1554_s22 + $0x24] sm:$0xf] }
  0x18   : > { %v1374_v43 = vld [vmem:[%s1554_s22 + $0xa4] sm:$0xf0]  ;;  %v1178_v45 = vld [vmem:[%s1554_s22 + $0x28] sm:$0xf0]  ;;  %v1373_v46 = vld [vmem:[%s1554_s22 + $0xa4] sm:$0xf]  ;;  %v1177_v48 = vor.u32 %v1358_v41, %v1176_v40 }
  0x19   : > { %658 = vmatpush.bf16.msra.mxu0 %v1389_v6  ;;  %1404 = vmatpush.bf16.msra.mxu2 %v1389_v6  ;;  %v1242_v47 = vld [vmem:[%s1554_s22 + $0xa8] sm:$0xf0]  ;;  %v1241_v49 = vor.u32 %v1374_v43, %v1240_v42  ;;  %v1181_v50 = vor.u32 %v1357_v44, %v1178_v45  ;;  %v1184_v52 = vld [vmem:[%s1554_s22 + $0x30] sm:$0xf]  ;;  %v1360_v53 = vld [vmem:[%s1554_s22 + $0x34] sm:$0xf0] }
  0x1a   : > { %747 = vmatpush.bf16.msra.mxu1 %v1397_v7  ;;  %1412 = vmatpush.bf16.msra.mxu3 %v1397_v7  ;;  %v1245_v51 = vor.u32 %v1373_v46, %v1242_v47  ;;  %v1248_v54 = vld [vmem:[%s1554_s22 + $0xb0] sm:$0xf]  ;;  %v1376_v55 = vld [vmem:[%s1554_s22 + $0xb4] sm:$0xf0]  ;;  %v1359_v56 = vld [vmem:[%s1554_s22 + $0x34] sm:$0xf]  ;;  %v1185_v60 = vor.u32 %v1360_v53, %v1184_v52 }
  0x1b   : > { %v1186_v57 = vld [vmem:[%s1554_s22 + $0x38] sm:$0xf0]  ;;  %v1375_v58 = vld [vmem:[%s1554_s22 + $0xb4] sm:$0xf]  ;;  %v1249_v61 = vor.u32 %v1376_v55, %v1248_v54  ;;  %v1192_v0 = vld [vmem:[%s1554_s22 + $0x40] sm:$0xf] }
  0x1c   : > { %v1250_v59 = vld [vmem:[%s1554_s22 + $0xb8] sm:$0xf0]  ;;  %v1189_v62 = vor.u32 %v1359_v56, %v1186_v57  ;;  %v1362_v1 = vld [vmem:[%s1554_s22 + $0x44] sm:$0xf0]  ;;  %v1256_v2 = vld [vmem:[%s1554_s22 + $0xc0] sm:$0xf] }
  0x1d   : > { %659 = vmatpush.bf16.msra.mxu0 %v1388_v8  ;;  %1405 = vmatpush.bf16.msra.mxu2 %v1388_v8  ;;  %v1253_v63 = vor.u32 %v1375_v58, %v1250_v59  ;;  %v1378_v3 = vld [vmem:[%s1554_s22 + $0xc4] sm:$0xf0]  ;;  %v1361_v4 = vld [vmem:[%s1554_s22 + $0x44] sm:$0xf]  ;;  %v1194_v5 = vld [vmem:[%s1554_s22 + $0x48] sm:$0xf0]  ;;  %v1193_v8 = vor.u32 %v1362_v1, %v1192_v0 }
  0x1e   : > { %748 = vmatpush.bf16.msra.mxu1 %v1396_v9  ;;  %1413 = vmatpush.bf16.msra.mxu3 %v1396_v9  ;;  %v1377_v6 = vld [vmem:[%s1554_s22 + $0xc4] sm:$0xf]  ;;  %v1258_v7 = vld [vmem:[%s1554_s22 + $0xc8] sm:$0xf0]  ;;  %v1257_v9 = vor.u32 %v1378_v3, %v1256_v2  ;;  %v1363_v16 = vld [vmem:[%s1554_s22 + $0x54] sm:$0xf] }
  0x1f   : > { %v1202_v17 = vld [vmem:[%s1554_s22 + $0x58] sm:$0xf0]  ;;  %v1379_v18 = vld [vmem:[%s1554_s22 + $0xd4] sm:$0xf]  ;;  %v1365_v28 = vld [vmem:[%s1554_s22 + $0x64] sm:$0xf] }
  0x20   : > { %v1266_v19 = vld [vmem:[%s1554_s22 + $0xd8] sm:$0xf0]  ;;  %v1205_v22 = vor.u32 %v1363_v16, %v1202_v17  ;;  %v1210_v29 = vld [vmem:[%s1554_s22 + $0x68] sm:$0xf0]  ;;  %v1381_v30 = vld [vmem:[%s1554_s22 + $0xe4] sm:$0xf] }
  0x21   : > { %660 = vmatpush.bf16.msra.mxu0 %v1387_v10  ;;  %1406 = vmatpush.bf16.msra.mxu2 %v1387_v10  ;;  %v1197_v10 = vor.u32 %v1361_v4, %v1194_v5  ;;  %v1269_v23 = vor.u32 %v1379_v18, %v1266_v19  ;;  %v1274_v31 = vld [vmem:[%s1554_s22 + $0xe8] sm:$0xf0]  ;;  %v1213_v34 = vor.u32 %v1365_v28, %v1210_v29  ;;  %v1367_v40 = vld [vmem:[%s1554_s22 + $0x74] sm:$0xf]  ;;  %v1218_v41 = vld [vmem:[%s1554_s22 + $0x78] sm:$0xf0] }
  0x22   : > { %749 = vmatpush.bf16.msra.mxu1 %v1395_v11  ;;  %1414 = vmatpush.bf16.msra.mxu3 %v1395_v11  ;;  %v1261_v11 = vor.u32 %v1377_v6, %v1258_v7  ;;  %v1277_v35 = vor.u32 %v1381_v30, %v1274_v31  ;;  %v1383_v42 = vld [vmem:[%s1554_s22 + $0xf4] sm:$0xf]  ;;  %v1282_v43 = vld [vmem:[%s1554_s22 + $0xf8] sm:$0xf0]  ;;  %v1221_v46 = vor.u32 %v1367_v40, %v1218_v41 }
  0x23   : > { %v1285_v47 = vor.u32 %v1383_v42, %v1282_v43 }
  0x25   : > { %661 = vmatpush.bf16.msra.mxu0 %v1386_v12  ;;  %1407 = vmatpush.bf16.msra.mxu2 %v1386_v12  ;;  %v1200_v12 = vld [vmem:[%s1554_s22 + $0x50] sm:$0xf] }
  0x26   : > { %750 = vmatpush.bf16.msra.mxu1 %v1394_v13  ;;  %1415 = vmatpush.bf16.msra.mxu3 %v1394_v13  ;;  %v1364_v13 = vld [vmem:[%s1554_s22 + $0x54] sm:$0xf0] }
  0x27   : > { %v1201_v20 = vor.u32 %v1364_v13, %v1200_v12 }
  0x29   : > { %662 = vmatpush.bf16.msra.mxu0 %v1385_v14  ;;  %1408 = vmatpush.bf16.msra.mxu2 %v1385_v14  ;;  %v1264_v14 = vld [vmem:[%s1554_s22 + $0xd0] sm:$0xf] }
  0x2a   : > { %751 = vmatpush.bf16.msra.mxu1 %v1393_v15  ;;  %1416 = vmatpush.bf16.msra.mxu3 %v1393_v15  ;;  %v1380_v15 = vld [vmem:[%s1554_s22 + $0xd4] sm:$0xf0] }
  0x2b   : > { %v1265_v21 = vor.u32 %v1380_v15, %v1264_v14 }
  0x2c   : > { %663 = vmatmul.bf16.vlgmr.msra.gmra.mxu0 %v1161_v24  ;;  %703 = vmatmul.bf16.vlgmr.msra.gmra.mxu2 %v1225_v25  ;;  %v1208_v24 = vld [vmem:[%s1554_s22 + $0x60] sm:$0xf]  ;;  %v1366_v25 = vld [vmem:[%s1554_s22 + $0x64] sm:$0xf0] }
  0x2d   : > { %752 = vmatmul.bf16.vlgmr.msra.gmra.mxu1 %v1165_v26  ;;  %792 = vmatmul.bf16.vlgmr.msra.gmra.mxu3 %v1229_v27  ;;  %v1272_v26 = vld [vmem:[%s1554_s22 + $0xe0] sm:$0xf]  ;;  %v1382_v27 = vld [vmem:[%s1554_s22 + $0xe4] sm:$0xf0]  ;;  %v1209_v32 = vor.u32 %v1366_v25, %v1208_v24 }
  0x2e   : > { %v1273_v33 = vor.u32 %v1382_v27, %v1272_v26 }
  0x3c   : > { %668 = vmatmul.bf16.gmra.mxu0 %v1169_v36  ;;  %708 = vmatmul.bf16.gmra.mxu2 %v1233_v37  ;;  %v1216_v36 = vld [vmem:[%s1554_s22 + $0x70] sm:$0xf]  ;;  %v1368_v37 = vld [vmem:[%s1554_s22 + $0x74] sm:$0xf0] }
  0x3d   : > { %757 = vmatmul.bf16.gmra.mxu1 %v1173_v38  ;;  %797 = vmatmul.bf16.gmra.mxu3 %v1237_v39  ;;  %v1280_v38 = vld [vmem:[%s1554_s22 + $0xf0] sm:$0xf]  ;;  %v1384_v39 = vld [vmem:[%s1554_s22 + $0xf4] sm:$0xf0]  ;;  %v1217_v44 = vor.u32 %v1368_v37, %v1216_v36 }
  0x3e   : > { %v1281_v45 = vor.u32 %v1384_v39, %v1280_v38 }
  0x4c   : > { %673 = vmatmul.bf16.gmra.mxu0 %v1177_v48  ;;  %713 = vmatmul.bf16.gmra.mxu2 %v1241_v49  ;;  %v1632_v49 = vld [vmem:[%s1716_s2] ss:$0 sm:$0xff] }
  0x4d   : > { %762 = vmatmul.bf16.gmra.mxu1 %v1181_v50  ;;  %802 = vmatmul.bf16.gmra.mxu3 %v1245_v51 }
  0x5c   : > { %678 = vmatmul.bf16.gmra.mxu0 %v1185_v60  ;;  %718 = vmatmul.bf16.gmra.mxu2 %v1249_v61 }
  0x5d   : > { %767 = vmatmul.bf16.gmra.mxu1 %v1189_v62  ;;  %807 = vmatmul.bf16.gmra.mxu3 %v1253_v63 }
  0x6c   : > { %683 = vmatmul.bf16.gmra.mxu0 %v1193_v8  ;;  %723 = vmatmul.bf16.gmra.mxu2 %v1257_v9 }
  0x6d   : > { %772 = vmatmul.bf16.gmra.mxu1 %v1197_v10  ;;  %812 = vmatmul.bf16.gmra.mxu3 %v1261_v11 }
  0x7c   : > { %688 = vmatmul.bf16.gmra.mxu0 %v1201_v20  ;;  %728 = vmatmul.bf16.gmra.mxu2 %v1265_v21 }
  0x7d   : > { %777 = vmatmul.bf16.gmra.mxu1 %v1205_v22  ;;  %817 = vmatmul.bf16.gmra.mxu3 %v1269_v23 }
  0x8c   : > { %693 = vmatmul.bf16.gmra.mxu0 %v1209_v32  ;;  %733 = vmatmul.bf16.gmra.mxu2 %v1273_v33 }
  0x8d   : > { %782 = vmatmul.bf16.gmra.mxu1 %v1213_v34  ;;  %822 = vmatmul.bf16.gmra.mxu3 %v1277_v35 }
  0x9c   : > { %698 = vmatmul.bf16.gmra.mxu0 %v1217_v44  ;;  %738 = vmatmul.bf16.gmra.mxu2 %v1281_v45 }
  0x9d   : > { %787 = vmatmul.bf16.gmra.mxu1 %v1221_v46  ;;  %827 = vmatmul.bf16.gmra.mxu3 %v1285_v47 }
  0xa9   : > { %v664_v48 = vpop.f32.mrf.mxu0 }
  0xaa   : > { %v753_v50 = vpop.f32.mrf.mxu1 }
  0xab   : > { %v754_v51 = vadd.f32 %v753_v50, %v664_v48 }
  0xad   : > { %v936_v52 = vadd.f32 %v1632_v49, %v754_v51 }
  0xaf   : > { %v968_v53 = vmax.f32 %v936_v52, 0.0  ;;  %v704_v54 = vpop.f32.mrf.mxu2 }
  0xb0   : > { %v793_v55 = vpop.f32.mrf.mxu3 }
  0xb1   : > { %1000 = vst [vmem:[%s1640_s7] sm:$0xff] %v968_v53  ;;  %v794_v56 = vadd.f32 %v793_v55, %v704_v54  ;;  %v666_v57 = vpop.f32.mrf.mxu0 }
  0xb2   : > { %v755_v58 = vpop.f32.mrf.mxu1 }
  0xb3   : > { %v952_v59 = vadd.f32 %v1632_v49, %v794_v56  ;;  %v756_v60 = vadd.f32 %v755_v58, %v666_v57 }
  0xb5   : > { %v984_v61 = vmax.f32 %v952_v59, 0.0  ;;  %v937_v62 = vadd.f32 %v1632_v49, %v756_v60 }
  0xb7   : > { %1016 = vst [vmem:[%s1640_s7 + $0x80] sm:$0xff] %v984_v61  ;;  %v969_v63 = vmax.f32 %v937_v62, 0.0  ;;  %v706_v0 = vpop.f32.mrf.mxu2 }
  0xb8   : > { %v795_v1 = vpop.f32.mrf.mxu3 }
  0xb9   : > { %1001 = vst [vmem:[%s1640_s7 + $0x8] sm:$0xff] %v969_v63  ;;  %v796_v2 = vadd.f32 %v795_v1, %v706_v0  ;;  %v669_v3 = vpop.f32.mrf.mxu0 }
  0xba   : > { %v758_v4 = vpop.f32.mrf.mxu1 }
  0xbb   : > { %v953_v5 = vadd.f32 %v1632_v49, %v796_v2  ;;  %v759_v6 = vadd.f32 %v758_v4, %v669_v3 }
  0xbd   : > { %v985_v7 = vmax.f32 %v953_v5, 0.0  ;;  %v938_v8 = vadd.f32 %v1632_v49, %v759_v6 }
  0xbf   : > { %1017 = vst [vmem:[%s1640_s7 + $0x88] sm:$0xff] %v985_v7  ;;  %v970_v9 = vmax.f32 %v938_v8, 0.0  ;;  %v709_v10 = vpop.f32.mrf.mxu2 }
  0xc0   : > { %v798_v11 = vpop.f32.mrf.mxu3 }
  0xc1   : > { %1002 = vst [vmem:[%s1640_s7 + $0x10] sm:$0xff] %v970_v9  ;;  %v799_v12 = vadd.f32 %v798_v11, %v709_v10  ;;  %v671_v13 = vpop.f32.mrf.mxu0 }
  0xc2   : > { %v760_v14 = vpop.f32.mrf.mxu1 }
  0xc3   : > { %v954_v15 = vadd.f32 %v1632_v49, %v799_v12  ;;  %v761_v16 = vadd.f32 %v760_v14, %v671_v13 }
  0xc5   : > { %v986_v17 = vmax.f32 %v954_v15, 0.0  ;;  %v939_v18 = vadd.f32 %v1632_v49, %v761_v16 }
  0xc7   : > { %1018 = vst [vmem:[%s1640_s7 + $0x90] sm:$0xff] %v986_v17  ;;  %v971_v19 = vmax.f32 %v939_v18, 0.0  ;;  %v711_v20 = vpop.f32.mrf.mxu2 }
  0xc8   : > { %v800_v21 = vpop.f32.mrf.mxu3 }
  0xc9   : > { %1003 = vst [vmem:[%s1640_s7 + $0x18] sm:$0xff] %v971_v19  ;;  %v801_v22 = vadd.f32 %v800_v21, %v711_v20  ;;  %v674_v23 = vpop.f32.mrf.mxu0 }
  0xca   : > { %v763_v24 = vpop.f32.mrf.mxu1 }
  0xcb   : > { %v955_v25 = vadd.f32 %v1632_v49, %v801_v22  ;;  %v764_v26 = vadd.f32 %v763_v24, %v674_v23 }
  0xcd   : > { %v987_v27 = vmax.f32 %v955_v25, 0.0  ;;  %v940_v28 = vadd.f32 %v1632_v49, %v764_v26 }
  0xcf   : > { %1019 = vst [vmem:[%s1640_s7 + $0x98] sm:$0xff] %v987_v27  ;;  %v972_v29 = vmax.f32 %v940_v28, 0.0  ;;  %v714_v30 = vpop.f32.mrf.mxu2 }
  0xd0   : > { %v803_v31 = vpop.f32.mrf.mxu3 }
  0xd1   : > { %1004 = vst [vmem:[%s1640_s7 + $0x20] sm:$0xff] %v972_v29  ;;  %v804_v32 = vadd.f32 %v803_v31, %v714_v30  ;;  %v676_v33 = vpop.f32.mrf.mxu0 }
  0xd2   : > { %v765_v34 = vpop.f32.mrf.mxu1 }
  0xd3   : > { %v956_v35 = vadd.f32 %v1632_v49, %v804_v32  ;;  %v766_v36 = vadd.f32 %v765_v34, %v676_v33 }
  0xd5   : > { %v988_v37 = vmax.f32 %v956_v35, 0.0  ;;  %v941_v38 = vadd.f32 %v1632_v49, %v766_v36 }
  0xd7   : > { %1020 = vst [vmem:[%s1640_s7 + $0xa0] sm:$0xff] %v988_v37  ;;  %v973_v39 = vmax.f32 %v941_v38, 0.0  ;;  %v716_v40 = vpop.f32.mrf.mxu2 }
  0xd8   : > { %v805_v41 = vpop.f32.mrf.mxu3 }
  0xd9   : > { %1005 = vst [vmem:[%s1640_s7 + $0x28] sm:$0xff] %v973_v39  ;;  %v806_v42 = vadd.f32 %v805_v41, %v716_v40  ;;  %v679_v43 = vpop.f32.mrf.mxu0 }
  0xda   : > { %v768_v44 = vpop.f32.mrf.mxu1 }
  0xdb   : > { %v957_v45 = vadd.f32 %v1632_v49, %v806_v42  ;;  %v769_v46 = vadd.f32 %v768_v44, %v679_v43 }
  0xdd   : > { %v989_v47 = vmax.f32 %v957_v45, 0.0  ;;  %v942_v48 = vadd.f32 %v1632_v49, %v769_v46 }
  0xdf   : > { %1021 = vst [vmem:[%s1640_s7 + $0xa8] sm:$0xff] %v989_v47  ;;  %v974_v50 = vmax.f32 %v942_v48, 0.0  ;;  %v719_v51 = vpop.f32.mrf.mxu2 }
  0xe0   : > { %v808_v52 = vpop.f32.mrf.mxu3 }
  0xe1   : > { %1006 = vst [vmem:[%s1640_s7 + $0x30] sm:$0xff] %v974_v50  ;;  %v809_v53 = vadd.f32 %v808_v52, %v719_v51  ;;  %v681_v54 = vpop.f32.mrf.mxu0 }
  0xe2   : > { %v770_v55 = vpop.f32.mrf.mxu1 }
  0xe3   : > { %v958_v56 = vadd.f32 %v1632_v49, %v809_v53  ;;  %v771_v57 = vadd.f32 %v770_v55, %v681_v54 }
  0xe5   : > { %v990_v58 = vmax.f32 %v958_v56, 0.0  ;;  %v943_v59 = vadd.f32 %v1632_v49, %v771_v57 }
  0xe7   : > { %1022 = vst [vmem:[%s1640_s7 + $0xb0] sm:$0xff] %v990_v58  ;;  %v975_v60 = vmax.f32 %v943_v59, 0.0  ;;  %v721_v61 = vpop.f32.mrf.mxu2 }
  0xe8   : > { %v810_v62 = vpop.f32.mrf.mxu3 }
  0xe9   : > { %1007 = vst [vmem:[%s1640_s7 + $0x38] sm:$0xff] %v975_v60  ;;  %v811_v63 = vadd.f32 %v810_v62, %v721_v61  ;;  %v684_v0 = vpop.f32.mrf.mxu0 }
  0xea   : > { %v773_v1 = vpop.f32.mrf.mxu1 }
  0xeb   : > { %v959_v2 = vadd.f32 %v1632_v49, %v811_v63  ;;  %v774_v3 = vadd.f32 %v773_v1, %v684_v0 }
  0xed   : > { %v991_v4 = vmax.f32 %v959_v2, 0.0  ;;  %v944_v5 = vadd.f32 %v1632_v49, %v774_v3 }
  0xef   : > { %1023 = vst [vmem:[%s1640_s7 + $0xb8] sm:$0xff] %v991_v4  ;;  %v976_v6 = vmax.f32 %v944_v5, 0.0  ;;  %v724_v7 = vpop.f32.mrf.mxu2 }
  0xf0   : > { %v813_v8 = vpop.f32.mrf.mxu3 }
  0xf1   : > { %1008 = vst [vmem:[%s1640_s7 + $0x40] sm:$0xff] %v976_v6  ;;  %v814_v9 = vadd.f32 %v813_v8, %v724_v7  ;;  %v686_v10 = vpop.f32.mrf.mxu0 }
  0xf2   : > { %v775_v11 = vpop.f32.mrf.mxu1 }
  0xf3   : > { %v960_v12 = vadd.f32 %v1632_v49, %v814_v9  ;;  %v776_v13 = vadd.f32 %v775_v11, %v686_v10 }
  0xf5   : > { %v992_v14 = vmax.f32 %v960_v12, 0.0  ;;  %v945_v15 = vadd.f32 %v1632_v49, %v776_v13 }
  0xf7   : > { %1024 = vst [vmem:[%s1640_s7 + $0xc0] sm:$0xff] %v992_v14  ;;  %v977_v16 = vmax.f32 %v945_v15, 0.0  ;;  %v726_v17 = vpop.f32.mrf.mxu2 }
  0xf8   : > { %v815_v18 = vpop.f32.mrf.mxu3 }
  0xf9   : > { %1009 = vst [vmem:[%s1640_s7 + $0x48] sm:$0xff] %v977_v16  ;;  %v816_v19 = vadd.f32 %v815_v18, %v726_v17  ;;  %v689_v20 = vpop.f32.mrf.mxu0 }
  0xfa   : > { %v778_v21 = vpop.f32.mrf.mxu1 }
  0xfb   : > { %v961_v22 = vadd.f32 %v1632_v49, %v816_v19  ;;  %v779_v23 = vadd.f32 %v778_v21, %v689_v20 }
  0xfd   : > { %v993_v24 = vmax.f32 %v961_v22, 0.0  ;;  %v946_v25 = vadd.f32 %v1632_v49, %v779_v23 }
  0xff   : > { %1025 = vst [vmem:[%s1640_s7 + $0xc8] sm:$0xff] %v993_v24  ;;  %v978_v26 = vmax.f32 %v946_v25, 0.0  ;;  %v729_v27 = vpop.f32.mrf.mxu2 }
 0x100   : > { %v818_v28 = vpop.f32.mrf.mxu3 }
 0x101   : > { %1010 = vst [vmem:[%s1640_s7 + $0x50] sm:$0xff] %v978_v26  ;;  %v819_v29 = vadd.f32 %v818_v28, %v729_v27  ;;  %v691_v30 = vpop.f32.mrf.mxu0 }
 0x102   : > { %v780_v31 = vpop.f32.mrf.mxu1 }
 0x103   : > { %v962_v32 = vadd.f32 %v1632_v49, %v819_v29  ;;  %v781_v33 = vadd.f32 %v780_v31, %v691_v30 }
 0x105   : > { %v994_v34 = vmax.f32 %v962_v32, 0.0  ;;  %v947_v35 = vadd.f32 %v1632_v49, %v781_v33 }
 0x107   : > { %1026 = vst [vmem:[%s1640_s7 + $0xd0] sm:$0xff] %v994_v34  ;;  %v979_v36 = vmax.f32 %v947_v35, 0.0  ;;  %v731_v37 = vpop.f32.mrf.mxu2 }
 0x108   : > { %v820_v38 = vpop.f32.mrf.mxu3 }
 0x109   : > { %1011 = vst [vmem:[%s1640_s7 + $0x58] sm:$0xff] %v979_v36  ;;  %v821_v39 = vadd.f32 %v820_v38, %v731_v37  ;;  %v694_v40 = vpop.f32.mrf.mxu0 }
 0x10a   : > { %v783_v41 = vpop.f32.mrf.mxu1 }
 0x10b   : > { %v963_v42 = vadd.f32 %v1632_v49, %v821_v39  ;;  %v784_v43 = vadd.f32 %v783_v41, %v694_v40 }
 0x10d   : > { %v995_v44 = vmax.f32 %v963_v42, 0.0  ;;  %v948_v45 = vadd.f32 %v1632_v49, %v784_v43 }
 0x10f   : > { %1027 = vst [vmem:[%s1640_s7 + $0xd8] sm:$0xff] %v995_v44  ;;  %v980_v46 = vmax.f32 %v948_v45, 0.0  ;;  %v734_v47 = vpop.f32.mrf.mxu2 }
 0x110   : > { %v823_v48 = vpop.f32.mrf.mxu3 }
 0x111   : > { %1012 = vst [vmem:[%s1640_s7 + $0x60] sm:$0xff] %v980_v46  ;;  %v824_v50 = vadd.f32 %v823_v48, %v734_v47  ;;  %v696_v51 = vpop.f32.mrf.mxu0 }
 0x112   : > { %v785_v52 = vpop.f32.mrf.mxu1 }
 0x113   : > { %v964_v53 = vadd.f32 %v1632_v49, %v824_v50  ;;  %v786_v54 = vadd.f32 %v785_v52, %v696_v51 }
 0x115   : > { %v996_v55 = vmax.f32 %v964_v53, 0.0  ;;  %v949_v56 = vadd.f32 %v1632_v49, %v786_v54 }
 0x117   : > { %1028 = vst [vmem:[%s1640_s7 + $0xe0] sm:$0xff] %v996_v55  ;;  %v981_v57 = vmax.f32 %v949_v56, 0.0  ;;  %v736_v58 = vpop.f32.mrf.mxu2 }
 0x118   : > { %v825_v59 = vpop.f32.mrf.mxu3 }
 0x119   : > { %1013 = vst [vmem:[%s1640_s7 + $0x68] sm:$0xff] %v981_v57  ;;  %v826_v60 = vadd.f32 %v825_v59, %v736_v58  ;;  %v699_v61 = vpop.f32.mrf.mxu0 }
 0x11a   : > { %v788_v62 = vpop.f32.mrf.mxu1 }
 0x11b   : > { %v965_v63 = vadd.f32 %v1632_v49, %v826_v60  ;;  %v789_v0 = vadd.f32 %v788_v62, %v699_v61 }
 0x11d   : > { %v997_v1 = vmax.f32 %v965_v63, 0.0  ;;  %v950_v2 = vadd.f32 %v1632_v49, %v789_v0 }
 0x11f   : > { %1029 = vst [vmem:[%s1640_s7 + $0xe8] sm:$0xff] %v997_v1  ;;  %v982_v3 = vmax.f32 %v950_v2, 0.0  ;;  %v739_v4 = vpop.f32.mrf.mxu2 }
 0x120   : > { %v828_v5 = vpop.f32.mrf.mxu3 }
 0x121   : > { %1014 = vst [vmem:[%s1640_s7 + $0x70] sm:$0xff] %v982_v3  ;;  %v829_v6 = vadd.f32 %v828_v5, %v739_v4  ;;  %v701_v7 = vpop.f32.mrf.mxu0 }
 0x122   : > { %v790_v8 = vpop.f32.mrf.mxu1 }
 0x123   : > { %v966_v9 = vadd.f32 %v1632_v49, %v829_v6  ;;  %v791_v10 = vadd.f32 %v790_v8, %v701_v7 }
 0x125   : > { %v998_v11 = vmax.f32 %v966_v9, 0.0  ;;  %v951_v12 = vadd.f32 %v1632_v49, %v791_v10 }
 0x127   : > { %1030 = vst [vmem:[%s1640_s7 + $0xf0] sm:$0xff] %v998_v11  ;;  %v983_v13 = vmax.f32 %v951_v12, 0.0  ;;  %v741_v14 = vpop.f32.mrf.mxu2 }
 0x128   : > { %v830_v15 = vpop.f32.mrf.mxu3 }
 0x129   : > { %1015 = vst [vmem:[%s1640_s7 + $0x78] sm:$0xff] %v983_v13  ;;  %v831_v16 = vadd.f32 %v830_v15, %v741_v14 }
 0x12b   : > { %v967_v17 = vadd.f32 %v1632_v49, %v831_v16 }
 0x12d   : > { %v999_v18 = vmax.f32 %v967_v17, 0.0 }
 0x12f   : > { %1031 = vst [vmem:[%s1640_s7 + $0xf8] sm:$0xff] %v999_v18 }
 0x130 PF: > { %s13_s14 = sadd.s32 1, %s1464_s14   ;;  %s1718_s12 = smov %s1460_s13 }
 0x131   : > { %p10_p5 = scmp.ge.s32.totalorder %s13_s14, 6   ;;  %s1719_s13 = smov %s1721_s15 }
 0x133   :  { %12 = sbr.rel (!%p10_p5) target bundleno = 2 (0x2), region = 76 }

// kernel: forward.10
= control target key start
LH: loop header
LB: loop body
LE: loop exit
PB: predicated region body
PF: predicated region fallthrough
CT: control target
= control target key end

     0   :  { %s165_s0 = inlined_call_operand.vmem [shape: f32[48,128], index: 0, kind: input, shape index: {}]   ;;  %s166_s1 = inlined_call_operand.vmem [shape: f32[48,128], index: 1, kind: input, shape index: {}]   ;;  %s167_s2 = inlined_call_operand.hbm [shape: f32[1,1], index: 2, kind: output, shape index: {}]  }
   0x1   :  { %v19_v0 = vld [vmem:[%s165_s0] sm:$0xff]  ;;  %v20_v1 = vld [vmem:[%s165_s0 + $0x8] sm:$0xff]  ;;  %v21_v2 = vld [vmem:[%s165_s0 + $0x10] sm:$0xff] }
   0x2   :  { %v22_v3 = vld [vmem:[%s165_s0 + $0x18] sm:$0xff]  ;;  %v23_v4 = vld [vmem:[%s165_s0 + $0x20] sm:$0xff]  ;;  %v26_v6 = vld [vmem:[%s166_s1 + $0x8] sm:$0xff] }
   0x3   :  { %v25_v5 = vld [vmem:[%s166_s1] sm:$0xff]  ;;  %v27_v7 = vld [vmem:[%s166_s1 + $0x10] sm:$0xff]  ;;  %v28_v8 = vld [vmem:[%s166_s1 + $0x18] sm:$0xff]  ;;  %v32_v11 = vsub.f32 %v20_v1, %v26_v6 }
   0x4   :  { %v29_v9 = vld [vmem:[%s166_s1 + $0x20] sm:$0xff]  ;;  %v31_v10 = vsub.f32 %v19_v0, %v25_v5  ;;  %v33_v12 = vsub.f32 %v21_v2, %v27_v7  ;;  %v24_v13 = vld [vmem:[%s165_s0 + $0x28] sm:$0xff]  ;;  %v34_v15 = vsub.f32 %v22_v3, %v28_v8 }
   0x5   :  { %v30_v14 = vld [vmem:[%s166_s1 + $0x28] sm:$0xff] }
   0x6   :  { %7 = vsyncpa [#allocation3], 0  ;;  %v35_v16 = vsub.f32 %v23_v4, %v29_v9  ;;  %v37_v17 = vand.u32 2147483647, %v31_v10  ;;  %v38_v18 = vand.u32 2147483647, %v32_v11  ;;  %v36_v20 = vsub.f32 %v24_v13, %v30_v14 }
   0x7   :  { %v39_v19 = vand.u32 2147483647, %v33_v12  ;;  %v40_v21 = vand.u32 2147483647, %v34_v15  ;;  %vm16_vm0 = vcmask 0   ;;  %v107_v29 = vmov 0.0  }
   0x8   :  { %v43_v22 = vadd.f32 %v38_v18, %v37_v17  ;;  %v41_v23 = vand.u32 2147483647, %v35_v16  ;;  %v42_v25 = vand.u32 2147483647, %v36_v20  ;;  %17 = vst.msk [vmem:[#allocation2] sm:$0x1] %vm16_vm0, %v107_v29 }
   0x9   :  { %s108_s0 = smov [#allocation2]   ;;  %s68_s7 = sshll.u32 %s167_s2, 4  ;;  %s69_s7 = int_to_ptr.hbm [resolvable:$true] %s68_s7 }
   0xa   :  { %v44_v24 = vadd.f32 %v43_v22, %v39_v19  ;;  %s66_s1 = sshll.u32 %s108_s0, 4  ;;  %s67_s1 = int_to_ptr.vmem [resolvable:$true] %s66_s1 }
   0xc   :  { %v45_v26 = vadd.f32 %v44_v24, %v40_v21 }
   0xe   :  { %v46_v27 = vadd.f32 %v45_v26, %v41_v23 }
   0xf   :  { %v18_v37 = vld [vmem:[#allocation2] sm:$0x1] }
  0x10   :  { %v47_v28 = vadd.f32 %v46_v27, %v42_v25 }
  0x12   :  { %48 = vadd.xlane.f32.xlu0 %v47_v28 }
  0x85   :  { %v49_v30 = vpop.xlane.xlu0 %48 }
  0x86   :  { %v50_v31 = vrot.slane %v49_v30, 4 }
  0x88   :  { %v51_v32 = vadd.f32 %v50_v31, %v49_v30 }
  0x8a   :  { %v52_v33 = vrot.slane %v51_v32, 2 }
  0x8c   :  { %v53_v34 = vadd.f32 %v52_v33, %v51_v32 }
  0x8e   :  { %v54_v35 = vrot.slane %v53_v34, 1 }
  0x90   :  { %v55_v36 = vadd.f32 %v54_v35, %v53_v34 }
  0x92   :  { %77 = vpush %v55_v36 }
  0xc3   :  { %s78_s8 = spop %77 }
  0xc4   :  { %v57_v38 = vstv %s78_s8 }
  0xc5   :  { %v58_v39 = vadd.f32 %v57_v38, %v18_v37 }
  0xc7   :  { %60 = vst.msk [vmem:[#allocation2] sm:$0x1] %vm16_vm0, %v58_v39 }
  0xc8   :  { %71 = dma.vmem_to_hbm [thread:$0]  %s67_s1, 16, %s69_s7, [#allocation3]  }
  0xc9   :  { %105 = dma.done.wait [#allocation3], 16  }
  0xca   :  { %106 = vsyncadd [#allocation3], 4294967280 }
  0xcb   :  { %76 = vsyncpa [#allocation3], 1 }

</bundles_post_ra>
